<compile_context>
chip_gen: v6e
topology: v6e:2x2x1
jax: 0.10.0
libtpu: 0.0.40
codegen_flags: <defaults>
</compile_context>

<pallas_src>
import math

import jax
import jax.numpy as jnp
from jax.experimental import pallas as pl
from jax.experimental.pallas import tpu as pltpu


# ----------------------- fused Conv(5,1,2)+bias+MaxPool(2) -----------------------

def conv_pool_block(x_nchw, w_fold, bias_col, *, samples_per_step=16):
    """Fused Conv2d(k=5, s=1, p=2) + bias + MaxPool2d(2).

    x_nchw:   (N, Cin, H, W)   float32, H and W even.
    w_fold:   (Cout, 25*Cin)   float32 -- column (i*5+j)*Cin + c = torch_w[:, c, i, j].
    bias_col: (Cout, 1)        float32.
    returns   (N, Cout, H//2, W//2) float32 (NCHW).
    """
    N, Cin, H, W = x_nchw.shape
    Cout = w_fold.shape[0]
    Hp, Wp = H + 4, W + 4

    # Flat per-sample geometry (row-major over the padded (Hp, Wp) image).
    V = H * Wp                 # pooled-candidate length written by the kernel
    A = V + Wp + 1             # conv output length (covers both pool shifts)
    S = Hp * Wp + Wp + 5       # padded flat input length (covers all 25 tap shifts)
    K = 25 * Cin               # folded MXU contraction depth
    offs = tuple(i * Wp + j for i in range(5) for j in range(5))

    B = math.gcd(N, samples_per_step)   # samples per grid step (always divides N)
    G = N // B

    # XLA prep: spatial zero pad -> flatten -> small zero tail (no 25x im2col!).
    xp = jnp.pad(x_nchw, ((0, 0), (0, 0), (2, 2), (2, 2)))      # (N, Cin, Hp, Wp)
    xf = xp.reshape(N, Cin, Hp * Wp)
    xf = jnp.pad(xf, ((0, 0), (0, 0), (0, S - Hp * Wp)))         # (N, Cin, S)

    def kernel(x_ref, w_ref, b_ref, o_ref, stack_ref):
        w = w_ref[...]                                           # (Cout, K), hoisted
        bias = b_ref[...]                                        # (Cout, 1), hoisted

        @pl.loop(0, B)
        def _(b):
            x = x_ref[b]                                         # (Cin, S)
            # Implicit im2col: pack the 25 shifted lane-slices into the K axis
            # of a single VMEM scratch (re-used every sample / grid step).
            for t, off in enumerate(offs):
                stack_ref[t * Cin:(t + 1) * Cin, :] = x[:, off:off + A]
            # ONE MXU contraction, K = 25*Cin, accumulated inside the MXU.
            acc = jnp.dot(w, stack_ref[...],
                          preferred_element_type=jnp.float32) + bias    # (Cout, A)
            # 2x2 max-pool epilogue: horizontal then vertical shifted maxima.
            hmax = jnp.maximum(acc[:, :A - 1], acc[:, 1:A])      # (Cout, V + Wp)
            vmax = jnp.maximum(hmax[:, :V], hmax[:, Wp:Wp + V])  # (Cout, V)
            o_ref[b] = vmax.astype(o_ref.dtype)                  # lane-dense store

    flops = 2 * N * Cout * K * A
    bytes_accessed = 4 * (N * Cin * S + Cout * K + Cout + N * Cout * V)

    out = pl.pallas_call(
        kernel,
        out_shape=jax.ShapeDtypeStruct((N, Cout, V), jnp.float32),
        grid=(G,),
        in_specs=[pl.BlockSpec((B, Cin, S), lambda g: (g, 0, 0)),
                  pl.BlockSpec((Cout, K), lambda g: (0, 0)),
                  pl.BlockSpec((Cout, 1), lambda g: (0, 0))],
        out_specs=pl.BlockSpec((B, Cout, V), lambda g: (g, 0, 0)),
        scratch_shapes=[pltpu.VMEM((K, A), jnp.float32)],
        compiler_params=pltpu.CompilerParams(
            dimension_semantics=("parallel",),
            vmem_limit_bytes=48 * 1024 * 1024),
        cost_estimate=pl.CostEstimate(
            flops=int(flops), transcendentals=0,
            bytes_accessed=int(bytes_accessed)),
    )(xf, w_fold, bias_col)

    # Pool-winner compaction (valid positions sit at even (h, w)); tiny strided
    # copy left to XLA.  TODO(synk): move into the kernel epilogue (see header).
    pooled = out.reshape(N, Cout, H, Wp)[:, :, 0:H:2, 0:W:2]     # (N, Cout, H/2, W/2)
    return pooled


# -------------------------- fused Linear(1024,64)+Linear(64,10) ------------------

def fc_pair(x, w1, b1, w2, b2):
    """y = (x @ w1 + b1) @ w2 + b2 in one kernel.  w1:(K,64), w2:(64,10) pre-transposed."""
    N, Kd = x.shape
    H1 = w1.shape[1]
    O = w2.shape[1]
    tm = N if N <= 512 else 512

    def kernel(x_ref, w1_ref, b1_ref, w2_ref, b2_ref, o_ref):
        h = jnp.dot(x_ref[...], w1_ref[...],
                    preferred_element_type=jnp.float32) + b1_ref[...]
        y = jnp.dot(h, w2_ref[...],
                    preferred_element_type=jnp.float32) + b2_ref[...]
        o_ref[...] = y.astype(o_ref.dtype)

    flops = 2 * N * (Kd * H1 + H1 * O)
    bytes_accessed = 4 * (N * Kd + Kd * H1 + H1 + H1 * O + O + N * O)

    return pl.pallas_call(
        kernel,
        out_shape=jax.ShapeDtypeStruct((N, O), jnp.float32),
        grid=(pl.cdiv(N, tm),),
        in_specs=[pl.BlockSpec((tm, Kd), lambda i: (i, 0)),
                  pl.BlockSpec((Kd, H1), lambda i: (0, 0)),
                  pl.BlockSpec((1, H1), lambda i: (0, 0)),
                  pl.BlockSpec((H1, O), lambda i: (0, 0)),
                  pl.BlockSpec((1, O), lambda i: (0, 0))],
        out_specs=pl.BlockSpec((tm, O), lambda i: (i, 0)),
        compiler_params=pltpu.CompilerParams(
            dimension_semantics=("parallel",),
            vmem_limit_bytes=48 * 1024 * 1024),
        cost_estimate=pl.CostEstimate(
            flops=int(flops), transcendentals=0,
            bytes_accessed=int(bytes_accessed)),
    )(x, w1, b1, w2, b2)


# ------------------------------ params & forward ---------------------------------

def init_params(key):
    """Parameters in the original PyTorch layout."""
    ks = jax.random.split(key, 10)
    s = 0.05
    return {
        "c1_w": jax.random.normal(ks[0], (32, 3, 5, 5), jnp.float32) * s,
        "c1_b": jax.random.normal(ks[1], (32,), jnp.float32) * s,
        "c2_w": jax.random.normal(ks[2], (32, 32, 5, 5), jnp.float32) * s,
        "c2_b": jax.random.normal(ks[3], (32,), jnp.float32) * s,
        "c3_w": jax.random.normal(ks[4], (64, 32, 5, 5), jnp.float32) * s,
        "c3_b": jax.random.normal(ks[5], (64,), jnp.float32) * s,
        "l1_w": jax.random.normal(ks[6], (64, 64 * 4 * 4), jnp.float32) * s,
        "l1_b": jax.random.normal(ks[7], (64,), jnp.float32) * s,
        "l2_w": jax.random.normal(ks[8], (10, 64), jnp.float32) * s,
        "l2_b": jax.random.normal(ks[9], (10,), jnp.float32) * s,
    }


def prepare_params(params):
    """One-time rearrangement of the torch-layout weights into kernel layout."""
    def conv_fold(w):
        # (Cout, Cin, 5, 5) -> (Cout, 25*Cin); column index = (i*5 + j)*Cin + c,
        # matching the tap-major / channel-minor row order of the stacked operand.
        cout, cin = w.shape[0], w.shape[1]
        return jnp.transpose(w, (0, 2, 3, 1)).reshape(cout, 25 * cin)
    return {
        "c1_wf": conv_fold(params["c1_w"]), "c1_b": params["c1_b"].reshape(-1, 1),
        "c2_wf": conv_fold(params["c2_w"]), "c2_b": params["c2_b"].reshape(-1, 1),
        "c3_wf": conv_fold(params["c3_w"]), "c3_b": params["c3_b"].reshape(-1, 1),
        "l1_wt": params["l1_w"].T, "l1_b": params["l1_b"].reshape(1, -1),
        "l2_wt": params["l2_w"].T, "l2_b": params["l2_b"].reshape(1, -1),
    }


def tudui_forward(p, x):
    x = conv_pool_block(x, p["c1_wf"], p["c1_b"])     # (N, 32, 16, 16)
    x = conv_pool_block(x, p["c2_wf"], p["c2_b"])     # (N, 32,  8,  8)
    x = conv_pool_block(x, p["c3_wf"], p["c3_b"])     # (N, 64,  4,  4)
    x = x.reshape(x.shape[0], -1)                     # torch Flatten order (C,H,W)
    return fc_pair(x, p["l1_wt"], p["l1_b"], p["l2_wt"], p["l2_b"])   # (N, 10)


def tudui_reference(params, x):
    """Pure-JAX reference (same math as the PyTorch module) for verification."""
    def conv(x, w, b):
        y = jax.lax.conv_general_dilated(
            x, w, (1, 1), ((2, 2), (2, 2)),
            dimension_numbers=("NCHW", "OIHW", "NCHW"))
        return y + b[None, :, None, None]

    def pool(x):
        return jax.lax.reduce_window(x, -jnp.inf, jax.lax.max,
                                     (1, 1, 2, 2), (1, 1, 2, 2), "VALID")

    x = pool(conv(x, params["c1_w"], params["c1_b"]))
    x = pool(conv(x, params["c2_w"], params["c2_b"]))
    x = pool(conv(x, params["c3_w"], params["c3_b"]))
    x = x.reshape(x.shape[0], -1)
    x = x @ params["l1_w"].T + params["l1_b"]
    x = x @ params["l2_w"].T + params["l2_b"]
    return x


if __name__ == "__main__":
    key = jax.random.PRNGKey(0)
    pkey, xkey = jax.random.split(key)
    params = init_params(pkey)
    # Linear(64*4*4, 64) after three 2x pools implies a 32x32 spatial input.
    x = jax.random.normal(xkey, (2, 3, 32, 32), jnp.float32)

    prepared = prepare_params(params)          # one-time weight layout prep

    out = jax.jit(tudui_forward)(prepared, x)
    out = jax.block_until_ready(out)
    assert out.shape == (2, 10), out.shape

    ref = tudui_reference(params, x)
    assert jnp.allclose(out, ref, atol=2e-3, rtol=2e-3), \
        float(jnp.max(jnp.abs(out - ref)))

    print("KERNEL_OK")
</pallas_src>

<mosaic_0001>
module attributes {stable_mosaic.version = 11 : i64} {
  func.func @kernel(%arg0: i32, %arg1: memref<2x3x1337xf32, #tpu.memory_space<vmem>>, %arg2: memref<32x75xf32, #tpu.memory_space<vmem>>, %arg3: memref<32x1xf32, #tpu.memory_space<vmem>>, %arg4: memref<2x32x1152xf32, #tpu.memory_space<vmem>>, %arg5: memref<75x1189xf32, #tpu.memory_space<vmem>>) attributes {dimension_semantics = [#tpu.dimension_semantics<parallel>], iteration_bounds = array<i64: 1>, scalar_prefetch = 0 : i64, scratch_operands = 1 : i64, tpu.core_type = #tpu.core_type<tc>, window_params = [{transform_indices = @transform_0, window_bounds = array<i64: 2, 3, 1337>}, {pipeline_mode = #tpu.pipeline_mode<synchronous>, transform_indices = @transform_1, window_bounds = array<i64: 32, 75>}, {pipeline_mode = #tpu.pipeline_mode<synchronous>, transform_indices = @transform_2, window_bounds = array<i64: 32, 1>}, {transform_indices = @transform_3, window_bounds = array<i64: 2, 32, 1152>}]} {
    %c0 = arith.constant 0 : index
    %c0_0 = arith.constant 0 : index
    %0 = vector.load %arg2[%c0, %c0_0] : memref<32x75xf32, #tpu.memory_space<vmem>>, vector<32x75xf32>
    %c0_1 = arith.constant 0 : index
    %c0_2 = arith.constant 0 : index
    %1 = vector.load %arg3[%c0_1, %c0_2] : memref<32x1xf32, #tpu.memory_space<vmem>>, vector<32x1xf32>
    %c0_i32 = arith.constant 0 : i32
    %c2_i32 = arith.constant 2 : i32
    %2 = arith.addi %c0_i32, %c2_i32 : i32
    %c1_i32 = arith.constant 1 : i32
    scf.for %arg6 = %c0_i32 to %2 step %c1_i32  : i32 {
      %c1_i32_4 = arith.constant 1 : i32
      %3 = arith.muli %arg6, %c1_i32_4 : i32
      %c0_i32_5 = arith.constant 0 : i32
      %4 = arith.addi %c0_i32_5, %3 : i32
      %5 = arith.index_cast %4 : i32 to index
      %c0_6 = arith.constant 0 : index
      %c0_7 = arith.constant 0 : index
      %6 = vector.load %arg1[%5, %c0_6, %c0_7] : memref<2x3x1337xf32, #tpu.memory_space<vmem>>, vector<1x3x1337xf32>
      %7 = vector.shape_cast %6 : vector<1x3x1337xf32> to vector<3x1337xf32>
      %8 = vector.extract_strided_slice %7 {offsets = [0, 0], sizes = [3, 1189], strides = [1, 1]} : vector<3x1337xf32> to vector<3x1189xf32>
      %c0_8 = arith.constant 0 : index
      %c0_9 = arith.constant 0 : index
      %9 = vector.load %arg5[%c0_8, %c0_9] : memref<75x1189xf32, #tpu.memory_space<vmem>>, vector<3x1189xf32>
      tpu.vector_store %arg5[%c0_8, %c0_9], %8 {strides = array<i32>} : memref<75x1189xf32, #tpu.memory_space<vmem>>, vector<3x1189xf32>,
      %10 = vector.extract_strided_slice %7 {offsets = [0, 1], sizes = [3, 1189], strides = [1, 1]} : vector<3x1337xf32> to vector<3x1189xf32>
      %c3 = arith.constant 3 : index
      %c0_10 = arith.constant 0 : index
      %11 = vector.load %arg5[%c3, %c0_10] : memref<75x1189xf32, #tpu.memory_space<vmem>>, vector<3x1189xf32>
      tpu.vector_store %arg5[%c3, %c0_10], %10 {strides = array<i32>} : memref<75x1189xf32, #tpu.memory_space<vmem>>, vector<3x1189xf32>,
      %12 = vector.extract_strided_slice %7 {offsets = [0, 2], sizes = [3, 1189], strides = [1, 1]} : vector<3x1337xf32> to vector<3x1189xf32>
      %c6 = arith.constant 6 : index
      %c0_11 = arith.constant 0 : index
      %13 = vector.load %arg5[%c6, %c0_11] : memref<75x1189xf32, #tpu.memory_space<vmem>>, vector<3x1189xf32>
      tpu.vector_store %arg5[%c6, %c0_11], %12 {strides = array<i32>} : memref<75x1189xf32, #tpu.memory_space<vmem>>, vector<3x1189xf32>,
      %14 = vector.extract_strided_slice %7 {offsets = [0, 3], sizes = [3, 1189], strides = [1, 1]} : vector<3x1337xf32> to vector<3x1189xf32>
      %c9 = arith.constant 9 : index
      %c0_12 = arith.constant 0 : index
      %15 = vector.load %arg5[%c9, %c0_12] : memref<75x1189xf32, #tpu.memory_space<vmem>>, vector<3x1189xf32>
      tpu.vector_store %arg5[%c9, %c0_12], %14 {strides = array<i32>} : memref<75x1189xf32, #tpu.memory_space<vmem>>, vector<3x1189xf32>,
      %16 = vector.extract_strided_slice %7 {offsets = [0, 4], sizes = [3, 1189], strides = [1, 1]} : vector<3x1337xf32> to vector<3x1189xf32>
      %c12 = arith.constant 12 : index
      %c0_13 = arith.constant 0 : index
      %17 = vector.load %arg5[%c12, %c0_13] : memref<75x1189xf32, #tpu.memory_space<vmem>>, vector<3x1189xf32>
      tpu.vector_store %arg5[%c12, %c0_13], %16 {strides = array<i32>} : memref<75x1189xf32, #tpu.memory_space<vmem>>, vector<3x1189xf32>,
      %18 = vector.extract_strided_slice %7 {offsets = [0, 36], sizes = [3, 1189], strides = [1, 1]} : vector<3x1337xf32> to vector<3x1189xf32>
      %c15 = arith.constant 15 : index
      %c0_14 = arith.constant 0 : index
      %19 = vector.load %arg5[%c15, %c0_14] : memref<75x1189xf32, #tpu.memory_space<vmem>>, vector<3x1189xf32>
      tpu.vector_store %arg5[%c15, %c0_14], %18 {strides = array<i32>} : memref<75x1189xf32, #tpu.memory_space<vmem>>, vector<3x1189xf32>,
      %20 = vector.extract_strided_slice %7 {offsets = [0, 37], sizes = [3, 1189], strides = [1, 1]} : vector<3x1337xf32> to vector<3x1189xf32>
      %c18 = arith.constant 18 : index
      %c0_15 = arith.constant 0 : index
      %21 = vector.load %arg5[%c18, %c0_15] : memref<75x1189xf32, #tpu.memory_space<vmem>>, vector<3x1189xf32>
      tpu.vector_store %arg5[%c18, %c0_15], %20 {strides = array<i32>} : memref<75x1189xf32, #tpu.memory_space<vmem>>, vector<3x1189xf32>,
      %22 = vector.extract_strided_slice %7 {offsets = [0, 38], sizes = [3, 1189], strides = [1, 1]} : vector<3x1337xf32> to vector<3x1189xf32>
      %c21 = arith.constant 21 : index
      %c0_16 = arith.constant 0 : index
      %23 = vector.load %arg5[%c21, %c0_16] : memref<75x1189xf32, #tpu.memory_space<vmem>>, vector<3x1189xf32>
      tpu.vector_store %arg5[%c21, %c0_16], %22 {strides = array<i32>} : memref<75x1189xf32, #tpu.memory_space<vmem>>, vector<3x1189xf32>,
      %24 = vector.extract_strided_slice %7 {offsets = [0, 39], sizes = [3, 1189], strides = [1, 1]} : vector<3x1337xf32> to vector<3x1189xf32>
      %c24 = arith.constant 24 : index
      %c0_17 = arith.constant 0 : index
      %25 = vector.load %arg5[%c24, %c0_17] : memref<75x1189xf32, #tpu.memory_space<vmem>>, vector<3x1189xf32>
      tpu.vector_store %arg5[%c24, %c0_17], %24 {strides = array<i32>} : memref<75x1189xf32, #tpu.memory_space<vmem>>, vector<3x1189xf32>,
      %26 = vector.extract_strided_slice %7 {offsets = [0, 40], sizes = [3, 1189], strides = [1, 1]} : vector<3x1337xf32> to vector<3x1189xf32>
      %c27 = arith.constant 27 : index
      %c0_18 = arith.constant 0 : index
      %27 = vector.load %arg5[%c27, %c0_18] : memref<75x1189xf32, #tpu.memory_space<vmem>>, vector<3x1189xf32>
      tpu.vector_store %arg5[%c27, %c0_18], %26 {strides = array<i32>} : memref<75x1189xf32, #tpu.memory_space<vmem>>, vector<3x1189xf32>,
      %28 = vector.extract_strided_slice %7 {offsets = [0, 72], sizes = [3, 1189], strides = [1, 1]} : vector<3x1337xf32> to vector<3x1189xf32>
      %c30 = arith.constant 30 : index
      %c0_19 = arith.constant 0 : index
      %29 = vector.load %arg5[%c30, %c0_19] : memref<75x1189xf32, #tpu.memory_space<vmem>>, vector<3x1189xf32>
      tpu.vector_store %arg5[%c30, %c0_19], %28 {strides = array<i32>} : memref<75x1189xf32, #tpu.memory_space<vmem>>, vector<3x1189xf32>,
      %30 = vector.extract_strided_slice %7 {offsets = [0, 73], sizes = [3, 1189], strides = [1, 1]} : vector<3x1337xf32> to vector<3x1189xf32>
      %c33 = arith.constant 33 : index
      %c0_20 = arith.constant 0 : index
      %31 = vector.load %arg5[%c33, %c0_20] : memref<75x1189xf32, #tpu.memory_space<vmem>>, vector<3x1189xf32>
      tpu.vector_store %arg5[%c33, %c0_20], %30 {strides = array<i32>} : memref<75x1189xf32, #tpu.memory_space<vmem>>, vector<3x1189xf32>,
      %32 = vector.extract_strided_slice %7 {offsets = [0, 74], sizes = [3, 1189], strides = [1, 1]} : vector<3x1337xf32> to vector<3x1189xf32>
      %c36 = arith.constant 36 : index
      %c0_21 = arith.constant 0 : index
      %33 = vector.load %arg5[%c36, %c0_21] : memref<75x1189xf32, #tpu.memory_space<vmem>>, vector<3x1189xf32>
      tpu.vector_store %arg5[%c36, %c0_21], %32 {strides = array<i32>} : memref<75x1189xf32, #tpu.memory_space<vmem>>, vector<3x1189xf32>,
      %34 = vector.extract_strided_slice %7 {offsets = [0, 75], sizes = [3, 1189], strides = [1, 1]} : vector<3x1337xf32> to vector<3x1189xf32>
      %c39 = arith.constant 39 : index
      %c0_22 = arith.constant 0 : index
      %35 = vector.load %arg5[%c39, %c0_22] : memref<75x1189xf32, #tpu.memory_space<vmem>>, vector<3x1189xf32>
      tpu.vector_store %arg5[%c39, %c0_22], %34 {strides = array<i32>} : memref<75x1189xf32, #tpu.memory_space<vmem>>, vector<3x1189xf32>,
      %36 = vector.extract_strided_slice %7 {offsets = [0, 76], sizes = [3, 1189], strides = [1, 1]} : vector<3x1337xf32> to vector<3x1189xf32>
      %c42 = arith.constant 42 : index
      %c0_23 = arith.constant 0 : index
      %37 = vector.load %arg5[%c42, %c0_23] : memref<75x1189xf32, #tpu.memory_space<vmem>>, vector<3x1189xf32>
      tpu.vector_store %arg5[%c42, %c0_23], %36 {strides = array<i32>} : memref<75x1189xf32, #tpu.memory_space<vmem>>, vector<3x1189xf32>,
      %38 = vector.extract_strided_slice %7 {offsets = [0, 108], sizes = [3, 1189], strides = [1, 1]} : vector<3x1337xf32> to vector<3x1189xf32>
      %c45 = arith.constant 45 : index
      %c0_24 = arith.constant 0 : index
      %39 = vector.load %arg5[%c45, %c0_24] : memref<75x1189xf32, #tpu.memory_space<vmem>>, vector<3x1189xf32>
      tpu.vector_store %arg5[%c45, %c0_24], %38 {strides = array<i32>} : memref<75x1189xf32, #tpu.memory_space<vmem>>, vector<3x1189xf32>,
      %40 = vector.extract_strided_slice %7 {offsets = [0, 109], sizes = [3, 1189], strides = [1, 1]} : vector<3x1337xf32> to vector<3x1189xf32>
      %c48 = arith.constant 48 : index
      %c0_25 = arith.constant 0 : index
      %41 = vector.load %arg5[%c48, %c0_25] : memref<75x1189xf32, #tpu.memory_space<vmem>>, vector<3x1189xf32>
      tpu.vector_store %arg5[%c48, %c0_25], %40 {strides = array<i32>} : memref<75x1189xf32, #tpu.memory_space<vmem>>, vector<3x1189xf32>,
      %42 = vector.extract_strided_slice %7 {offsets = [0, 110], sizes = [3, 1189], strides = [1, 1]} : vector<3x1337xf32> to vector<3x1189xf32>
      %c51 = arith.constant 51 : index
      %c0_26 = arith.constant 0 : index
      %43 = vector.load %arg5[%c51, %c0_26] : memref<75x1189xf32, #tpu.memory_space<vmem>>, vector<3x1189xf32>
      tpu.vector_store %arg5[%c51, %c0_26], %42 {strides = array<i32>} : memref<75x1189xf32, #tpu.memory_space<vmem>>, vector<3x1189xf32>,
      %44 = vector.extract_strided_slice %7 {offsets = [0, 111], sizes = [3, 1189], strides = [1, 1]} : vector<3x1337xf32> to vector<3x1189xf32>
      %c54 = arith.constant 54 : index
      %c0_27 = arith.constant 0 : index
      %45 = vector.load %arg5[%c54, %c0_27] : memref<75x1189xf32, #tpu.memory_space<vmem>>, vector<3x1189xf32>
      tpu.vector_store %arg5[%c54, %c0_27], %44 {strides = array<i32>} : memref<75x1189xf32, #tpu.memory_space<vmem>>, vector<3x1189xf32>,
      %46 = vector.extract_strided_slice %7 {offsets = [0, 112], sizes = [3, 1189], strides = [1, 1]} : vector<3x1337xf32> to vector<3x1189xf32>
      %c57 = arith.constant 57 : index
      %c0_28 = arith.constant 0 : index
      %47 = vector.load %arg5[%c57, %c0_28] : memref<75x1189xf32, #tpu.memory_space<vmem>>, vector<3x1189xf32>
      tpu.vector_store %arg5[%c57, %c0_28], %46 {strides = array<i32>} : memref<75x1189xf32, #tpu.memory_space<vmem>>, vector<3x1189xf32>,
      %48 = vector.extract_strided_slice %7 {offsets = [0, 144], sizes = [3, 1189], strides = [1, 1]} : vector<3x1337xf32> to vector<3x1189xf32>
      %c60 = arith.constant 60 : index
      %c0_29 = arith.constant 0 : index
      %49 = vector.load %arg5[%c60, %c0_29] : memref<75x1189xf32, #tpu.memory_space<vmem>>, vector<3x1189xf32>
      tpu.vector_store %arg5[%c60, %c0_29], %48 {strides = array<i32>} : memref<75x1189xf32, #tpu.memory_space<vmem>>, vector<3x1189xf32>,
      %50 = vector.extract_strided_slice %7 {offsets = [0, 145], sizes = [3, 1189], strides = [1, 1]} : vector<3x1337xf32> to vector<3x1189xf32>
      %c63 = arith.constant 63 : index
      %c0_30 = arith.constant 0 : index
      %51 = vector.load %arg5[%c63, %c0_30] : memref<75x1189xf32, #tpu.memory_space<vmem>>, vector<3x1189xf32>
      tpu.vector_store %arg5[%c63, %c0_30], %50 {strides = array<i32>} : memref<75x1189xf32, #tpu.memory_space<vmem>>, vector<3x1189xf32>,
      %52 = vector.extract_strided_slice %7 {offsets = [0, 146], sizes = [3, 1189], strides = [1, 1]} : vector<3x1337xf32> to vector<3x1189xf32>
      %c66 = arith.constant 66 : index
      %c0_31 = arith.constant 0 : index
      %53 = vector.load %arg5[%c66, %c0_31] : memref<75x1189xf32, #tpu.memory_space<vmem>>, vector<3x1189xf32>
      tpu.vector_store %arg5[%c66, %c0_31], %52 {strides = array<i32>} : memref<75x1189xf32, #tpu.memory_space<vmem>>, vector<3x1189xf32>,
      %54 = vector.extract_strided_slice %7 {offsets = [0, 147], sizes = [3, 1189], strides = [1, 1]} : vector<3x1337xf32> to vector<3x1189xf32>
      %c69 = arith.constant 69 : index
      %c0_32 = arith.constant 0 : index
      %55 = vector.load %arg5[%c69, %c0_32] : memref<75x1189xf32, #tpu.memory_space<vmem>>, vector<3x1189xf32>
      tpu.vector_store %arg5[%c69, %c0_32], %54 {strides = array<i32>} : memref<75x1189xf32, #tpu.memory_space<vmem>>, vector<3x1189xf32>,
      %56 = vector.extract_strided_slice %7 {offsets = [0, 148], sizes = [3, 1189], strides = [1, 1]} : vector<3x1337xf32> to vector<3x1189xf32>
      %c72 = arith.constant 72 : index
      %c0_33 = arith.constant 0 : index
      %57 = vector.load %arg5[%c72, %c0_33] : memref<75x1189xf32, #tpu.memory_space<vmem>>, vector<3x1189xf32>
      tpu.vector_store %arg5[%c72, %c0_33], %56 {strides = array<i32>} : memref<75x1189xf32, #tpu.memory_space<vmem>>, vector<3x1189xf32>,
      %c0_34 = arith.constant 0 : index
      %c0_35 = arith.constant 0 : index
      %58 = vector.load %arg5[%c0_34, %c0_35] : memref<75x1189xf32, #tpu.memory_space<vmem>>, vector<75x1189xf32>
      %cst = arith.constant dense<0.000000e+00> : vector<32x1189xf32>
      %59 = tpu.matmul %0, %58, %cst {dimension_numbers = #tpu.dot_dimension_numbers<[1], [0], [0], [1], [0, 0, 1, 1], [], []>} : vector<32x75xf32>, vector<75x1189xf32>, vector<32x1189xf32> -> vector<32x1189xf32>
      %60 = vector.broadcast %1 : vector<32x1xf32> to vector<32x1189xf32>
      %61 = arith.addf %59, %60 : vector<32x1189xf32>
      %62 = vector.extract_strided_slice %61 {offsets = [0, 0], sizes = [32, 1188], strides = [1, 1]} : vector<32x1189xf32> to vector<32x1188xf32>
      %63 = vector.extract_strided_slice %61 {offsets = [0, 1], sizes = [32, 1188], strides = [1, 1]} : vector<32x1189xf32> to vector<32x1188xf32>
      %64 = arith.maximumf %62, %63 : vector<32x1188xf32>
      %65 = vector.extract_strided_slice %64 {offsets = [0, 0], sizes = [32, 1152], strides = [1, 1]} : vector<32x1188xf32> to vector<32x1152xf32>
      %66 = vector.extract_strided_slice %64 {offsets = [0, 36], sizes = [32, 1152], strides = [1, 1]} : vector<32x1188xf32> to vector<32x1152xf32>
      %67 = arith.maximumf %65, %66 : vector<32x1152xf32>
      %68 = arith.index_cast %4 : i32 to index
      %c0_36 = arith.constant 0 : index
      %c0_37 = arith.constant 0 : index
      %69 = vector.load %arg4[%68, %c0_36, %c0_37] : memref<2x32x1152xf32, #tpu.memory_space<vmem>>, vector<1x32x1152xf32>
      %70 = vector.shape_cast %69 : vector<1x32x1152xf32> to vector<32x1152xf32>
      %71 = vector.shape_cast %67 : vector<32x1152xf32> to vector<1x32x1152xf32>
      tpu.vector_store %arg4[%68, %c0_36, %c0_37], %71 {strides = array<i32>} : memref<2x32x1152xf32, #tpu.memory_space<vmem>>, vector<1x32x1152xf32>,
    }
    %c2_i32_3 = arith.constant 2 : i32
    return
  }
  func.func @transform_0(%arg0: i32) -> (i32, i32, i32) {
    %c0_i32 = arith.constant 0 : i32
    %c0_i32_0 = arith.constant 0 : i32
    %c0_i32_1 = arith.constant 0 : i32
    return %arg0, %c0_i32, %c0_i32_0 : i32, i32, i32
  }
  func.func @transform_1(%arg0: i32) -> (i32, i32) {
    %c0_i32 = arith.constant 0 : i32
    %c0_i32_0 = arith.constant 0 : i32
    %c0_i32_1 = arith.constant 0 : i32
    return %c0_i32, %c0_i32_0 : i32, i32
  }
  func.func @transform_2(%arg0: i32) -> (i32, i32) {
    %c0_i32 = arith.constant 0 : i32
    %c0_i32_0 = arith.constant 0 : i32
    %c0_i32_1 = arith.constant 0 : i32
    return %c0_i32, %c0_i32_0 : i32, i32
  }
  func.func @transform_3(%arg0: i32) -> (i32, i32, i32) {
    %c0_i32 = arith.constant 0 : i32
    %c0_i32_0 = arith.constant 0 : i32
    %c0_i32_1 = arith.constant 0 : i32
    return %arg0, %c0_i32, %c0_i32_0 : i32, i32, i32
  }
}

module attributes {stable_mosaic.version = 11 : i64} {
  func.func @kernel(%arg0: i32, %arg1: memref<2x32x425xf32, #tpu.memory_space<vmem>>, %arg2: memref<32x800xf32, #tpu.memory_space<vmem>>, %arg3: memref<32x1xf32, #tpu.memory_space<vmem>>, %arg4: memref<2x32x320xf32, #tpu.memory_space<vmem>>, %arg5: memref<800x341xf32, #tpu.memory_space<vmem>>) attributes {dimension_semantics = [#tpu.dimension_semantics<parallel>], iteration_bounds = array<i64: 1>, scalar_prefetch = 0 : i64, scratch_operands = 1 : i64, tpu.core_type = #tpu.core_type<tc>, window_params = [{transform_indices = @transform_0, window_bounds = array<i64: 2, 32, 425>}, {pipeline_mode = #tpu.pipeline_mode<synchronous>, transform_indices = @transform_1, window_bounds = array<i64: 32, 800>}, {pipeline_mode = #tpu.pipeline_mode<synchronous>, transform_indices = @transform_2, window_bounds = array<i64: 32, 1>}, {transform_indices = @transform_3, window_bounds = array<i64: 2, 32, 320>}]} {
    %c0 = arith.constant 0 : index
    %c0_0 = arith.constant 0 : index
    %0 = vector.load %arg2[%c0, %c0_0] : memref<32x800xf32, #tpu.memory_space<vmem>>, vector<32x800xf32>
    %c0_1 = arith.constant 0 : index
    %c0_2 = arith.constant 0 : index
    %1 = vector.load %arg3[%c0_1, %c0_2] : memref<32x1xf32, #tpu.memory_space<vmem>>, vector<32x1xf32>
    %c0_i32 = arith.constant 0 : i32
    %c2_i32 = arith.constant 2 : i32
    %2 = arith.addi %c0_i32, %c2_i32 : i32
    %c1_i32 = arith.constant 1 : i32
    scf.for %arg6 = %c0_i32 to %2 step %c1_i32  : i32 {
      %c1_i32_4 = arith.constant 1 : i32
      %3 = arith.muli %arg6, %c1_i32_4 : i32
      %c0_i32_5 = arith.constant 0 : i32
      %4 = arith.addi %c0_i32_5, %3 : i32
      %5 = arith.index_cast %4 : i32 to index
      %c0_6 = arith.constant 0 : index
      %c0_7 = arith.constant 0 : index
      %6 = vector.load %arg1[%5, %c0_6, %c0_7] : memref<2x32x425xf32, #tpu.memory_space<vmem>>, vector<1x32x425xf32>
      %7 = vector.shape_cast %6 : vector<1x32x425xf32> to vector<32x425xf32>
      %8 = vector.extract_strided_slice %7 {offsets = [0, 0], sizes = [32, 341], strides = [1, 1]} : vector<32x425xf32> to vector<32x341xf32>
      %c0_8 = arith.constant 0 : index
      %c0_9 = arith.constant 0 : index
      %9 = vector.load %arg5[%c0_8, %c0_9] : memref<800x341xf32, #tpu.memory_space<vmem>>, vector<32x341xf32>
      tpu.vector_store %arg5[%c0_8, %c0_9], %8 {strides = array<i32>} : memref<800x341xf32, #tpu.memory_space<vmem>>, vector<32x341xf32>,
      %10 = vector.extract_strided_slice %7 {offsets = [0, 1], sizes = [32, 341], strides = [1, 1]} : vector<32x425xf32> to vector<32x341xf32>
      %c32 = arith.constant 32 : index
      %c0_10 = arith.constant 0 : index
      %11 = vector.load %arg5[%c32, %c0_10] : memref<800x341xf32, #tpu.memory_space<vmem>>, vector<32x341xf32>
      tpu.vector_store %arg5[%c32, %c0_10], %10 {strides = array<i32>} : memref<800x341xf32, #tpu.memory_space<vmem>>, vector<32x341xf32>,
      %12 = vector.extract_strided_slice %7 {offsets = [0, 2], sizes = [32, 341], strides = [1, 1]} : vector<32x425xf32> to vector<32x341xf32>
      %c64 = arith.constant 64 : index
      %c0_11 = arith.constant 0 : index
      %13 = vector.load %arg5[%c64, %c0_11] : memref<800x341xf32, #tpu.memory_space<vmem>>, vector<32x341xf32>
      tpu.vector_store %arg5[%c64, %c0_11], %12 {strides = array<i32>} : memref<800x341xf32, #tpu.memory_space<vmem>>, vector<32x341xf32>,
      %14 = vector.extract_strided_slice %7 {offsets = [0, 3], sizes = [32, 341], strides = [1, 1]} : vector<32x425xf32> to vector<32x341xf32>
      %c96 = arith.constant 96 : index
      %c0_12 = arith.constant 0 : index
      %15 = vector.load %arg5[%c96, %c0_12] : memref<800x341xf32, #tpu.memory_space<vmem>>, vector<32x341xf32>
      tpu.vector_store %arg5[%c96, %c0_12], %14 {strides = array<i32>} : memref<800x341xf32, #tpu.memory_space<vmem>>, vector<32x341xf32>,
      %16 = vector.extract_strided_slice %7 {offsets = [0, 4], sizes = [32, 341], strides = [1, 1]} : vector<32x425xf32> to vector<32x341xf32>
      %c128 = arith.constant 128 : index
      %c0_13 = arith.constant 0 : index
      %17 = vector.load %arg5[%c128, %c0_13] : memref<800x341xf32, #tpu.memory_space<vmem>>, vector<32x341xf32>
      tpu.vector_store %arg5[%c128, %c0_13], %16 {strides = array<i32>} : memref<800x341xf32, #tpu.memory_space<vmem>>, vector<32x341xf32>,
      %18 = vector.extract_strided_slice %7 {offsets = [0, 20], sizes = [32, 341], strides = [1, 1]} : vector<32x425xf32> to vector<32x341xf32>
      %c160 = arith.constant 160 : index
      %c0_14 = arith.constant 0 : index
      %19 = vector.load %arg5[%c160, %c0_14] : memref<800x341xf32, #tpu.memory_space<vmem>>, vector<32x341xf32>
      tpu.vector_store %arg5[%c160, %c0_14], %18 {strides = array<i32>} : memref<800x341xf32, #tpu.memory_space<vmem>>, vector<32x341xf32>,
      %20 = vector.extract_strided_slice %7 {offsets = [0, 21], sizes = [32, 341], strides = [1, 1]} : vector<32x425xf32> to vector<32x341xf32>
      %c192 = arith.constant 192 : index
      %c0_15 = arith.constant 0 : index
      %21 = vector.load %arg5[%c192, %c0_15] : memref<800x341xf32, #tpu.memory_space<vmem>>, vector<32x341xf32>
      tpu.vector_store %arg5[%c192, %c0_15], %20 {strides = array<i32>} : memref<800x341xf32, #tpu.memory_space<vmem>>, vector<32x341xf32>,
      %22 = vector.extract_strided_slice %7 {offsets = [0, 22], sizes = [32, 341], strides = [1, 1]} : vector<32x425xf32> to vector<32x341xf32>
      %c224 = arith.constant 224 : index
      %c0_16 = arith.constant 0 : index
      %23 = vector.load %arg5[%c224, %c0_16] : memref<800x341xf32, #tpu.memory_space<vmem>>, vector<32x341xf32>
      tpu.vector_store %arg5[%c224, %c0_16], %22 {strides = array<i32>} : memref<800x341xf32, #tpu.memory_space<vmem>>, vector<32x341xf32>,
      %24 = vector.extract_strided_slice %7 {offsets = [0, 23], sizes = [32, 341], strides = [1, 1]} : vector<32x425xf32> to vector<32x341xf32>
      %c256 = arith.constant 256 : index
      %c0_17 = arith.constant 0 : index
      %25 = vector.load %arg5[%c256, %c0_17] : memref<800x341xf32, #tpu.memory_space<vmem>>, vector<32x341xf32>
      tpu.vector_store %arg5[%c256, %c0_17], %24 {strides = array<i32>} : memref<800x341xf32, #tpu.memory_space<vmem>>, vector<32x341xf32>,
      %26 = vector.extract_strided_slice %7 {offsets = [0, 24], sizes = [32, 341], strides = [1, 1]} : vector<32x425xf32> to vector<32x341xf32>
      %c288 = arith.constant 288 : index
      %c0_18 = arith.constant 0 : index
      %27 = vector.load %arg5[%c288, %c0_18] : memref<800x341xf32, #tpu.memory_space<vmem>>, vector<32x341xf32>
      tpu.vector_store %arg5[%c288, %c0_18], %26 {strides = array<i32>} : memref<800x341xf32, #tpu.memory_space<vmem>>, vector<32x341xf32>,
      %28 = vector.extract_strided_slice %7 {offsets = [0, 40], sizes = [32, 341], strides = [1, 1]} : vector<32x425xf32> to vector<32x341xf32>
      %c320 = arith.constant 320 : index
      %c0_19 = arith.constant 0 : index
      %29 = vector.load %arg5[%c320, %c0_19] : memref<800x341xf32, #tpu.memory_space<vmem>>, vector<32x341xf32>
      tpu.vector_store %arg5[%c320, %c0_19], %28 {strides = array<i32>} : memref<800x341xf32, #tpu.memory_space<vmem>>, vector<32x341xf32>,
      %30 = vector.extract_strided_slice %7 {offsets = [0, 41], sizes = [32, 341], strides = [1, 1]} : vector<32x425xf32> to vector<32x341xf32>
      %c352 = arith.constant 352 : index
      %c0_20 = arith.constant 0 : index
      %31 = vector.load %arg5[%c352, %c0_20] : memref<800x341xf32, #tpu.memory_space<vmem>>, vector<32x341xf32>
      tpu.vector_store %arg5[%c352, %c0_20], %30 {strides = array<i32>} : memref<800x341xf32, #tpu.memory_space<vmem>>, vector<32x341xf32>,
      %32 = vector.extract_strided_slice %7 {offsets = [0, 42], sizes = [32, 341], strides = [1, 1]} : vector<32x425xf32> to vector<32x341xf32>
      %c384 = arith.constant 384 : index
      %c0_21 = arith.constant 0 : index
      %33 = vector.load %arg5[%c384, %c0_21] : memref<800x341xf32, #tpu.memory_space<vmem>>, vector<32x341xf32>
      tpu.vector_store %arg5[%c384, %c0_21], %32 {strides = array<i32>} : memref<800x341xf32, #tpu.memory_space<vmem>>, vector<32x341xf32>,
      %34 = vector.extract_strided_slice %7 {offsets = [0, 43], sizes = [32, 341], strides = [1, 1]} : vector<32x425xf32> to vector<32x341xf32>
      %c416 = arith.constant 416 : index
      %c0_22 = arith.constant 0 : index
      %35 = vector.load %arg5[%c416, %c0_22] : memref<800x341xf32, #tpu.memory_space<vmem>>, vector<32x341xf32>
      tpu.vector_store %arg5[%c416, %c0_22], %34 {strides = array<i32>} : memref<800x341xf32, #tpu.memory_space<vmem>>, vector<32x341xf32>,
      %36 = vector.extract_strided_slice %7 {offsets = [0, 44], sizes = [32, 341], strides = [1, 1]} : vector<32x425xf32> to vector<32x341xf32>
      %c448 = arith.constant 448 : index
      %c0_23 = arith.constant 0 : index
      %37 = vector.load %arg5[%c448, %c0_23] : memref<800x341xf32, #tpu.memory_space<vmem>>, vector<32x341xf32>
      tpu.vector_store %arg5[%c448, %c0_23], %36 {strides = array<i32>} : memref<800x341xf32, #tpu.memory_space<vmem>>, vector<32x341xf32>,
      %38 = vector.extract_strided_slice %7 {offsets = [0, 60], sizes = [32, 341], strides = [1, 1]} : vector<32x425xf32> to vector<32x341xf32>
      %c480 = arith.constant 480 : index
      %c0_24 = arith.constant 0 : index
      %39 = vector.load %arg5[%c480, %c0_24] : memref<800x341xf32, #tpu.memory_space<vmem>>, vector<32x341xf32>
      tpu.vector_store %arg5[%c480, %c0_24], %38 {strides = array<i32>} : memref<800x341xf32, #tpu.memory_space<vmem>>, vector<32x341xf32>,
      %40 = vector.extract_strided_slice %7 {offsets = [0, 61], sizes = [32, 341], strides = [1, 1]} : vector<32x425xf32> to vector<32x341xf32>
      %c512 = arith.constant 512 : index
      %c0_25 = arith.constant 0 : index
      %41 = vector.load %arg5[%c512, %c0_25] : memref<800x341xf32, #tpu.memory_space<vmem>>, vector<32x341xf32>
      tpu.vector_store %arg5[%c512, %c0_25], %40 {strides = array<i32>} : memref<800x341xf32, #tpu.memory_space<vmem>>, vector<32x341xf32>,
      %42 = vector.extract_strided_slice %7 {offsets = [0, 62], sizes = [32, 341], strides = [1, 1]} : vector<32x425xf32> to vector<32x341xf32>
      %c544 = arith.constant 544 : index
      %c0_26 = arith.constant 0 : index
      %43 = vector.load %arg5[%c544, %c0_26] : memref<800x341xf32, #tpu.memory_space<vmem>>, vector<32x341xf32>
      tpu.vector_store %arg5[%c544, %c0_26], %42 {strides = array<i32>} : memref<800x341xf32, #tpu.memory_space<vmem>>, vector<32x341xf32>,
      %44 = vector.extract_strided_slice %7 {offsets = [0, 63], sizes = [32, 341], strides = [1, 1]} : vector<32x425xf32> to vector<32x341xf32>
      %c576 = arith.constant 576 : index
      %c0_27 = arith.constant 0 : index
      %45 = vector.load %arg5[%c576, %c0_27] : memref<800x341xf32, #tpu.memory_space<vmem>>, vector<32x341xf32>
      tpu.vector_store %arg5[%c576, %c0_27], %44 {strides = array<i32>} : memref<800x341xf32, #tpu.memory_space<vmem>>, vector<32x341xf32>,
      %46 = vector.extract_strided_slice %7 {offsets = [0, 64], sizes = [32, 341], strides = [1, 1]} : vector<32x425xf32> to vector<32x341xf32>
      %c608 = arith.constant 608 : index
      %c0_28 = arith.constant 0 : index
      %47 = vector.load %arg5[%c608, %c0_28] : memref<800x341xf32, #tpu.memory_space<vmem>>, vector<32x341xf32>
      tpu.vector_store %arg5[%c608, %c0_28], %46 {strides = array<i32>} : memref<800x341xf32, #tpu.memory_space<vmem>>, vector<32x341xf32>,
      %48 = vector.extract_strided_slice %7 {offsets = [0, 80], sizes = [32, 341], strides = [1, 1]} : vector<32x425xf32> to vector<32x341xf32>
      %c640 = arith.constant 640 : index
      %c0_29 = arith.constant 0 : index
      %49 = vector.load %arg5[%c640, %c0_29] : memref<800x341xf32, #tpu.memory_space<vmem>>, vector<32x341xf32>
      tpu.vector_store %arg5[%c640, %c0_29], %48 {strides = array<i32>} : memref<800x341xf32, #tpu.memory_space<vmem>>, vector<32x341xf32>,
      %50 = vector.extract_strided_slice %7 {offsets = [0, 81], sizes = [32, 341], strides = [1, 1]} : vector<32x425xf32> to vector<32x341xf32>
      %c672 = arith.constant 672 : index
      %c0_30 = arith.constant 0 : index
      %51 = vector.load %arg5[%c672, %c0_30] : memref<800x341xf32, #tpu.memory_space<vmem>>, vector<32x341xf32>
      tpu.vector_store %arg5[%c672, %c0_30], %50 {strides = array<i32>} : memref<800x341xf32, #tpu.memory_space<vmem>>, vector<32x341xf32>,
      %52 = vector.extract_strided_slice %7 {offsets = [0, 82], sizes = [32, 341], strides = [1, 1]} : vector<32x425xf32> to vector<32x341xf32>
      %c704 = arith.constant 704 : index
      %c0_31 = arith.constant 0 : index
      %53 = vector.load %arg5[%c704, %c0_31] : memref<800x341xf32, #tpu.memory_space<vmem>>, vector<32x341xf32>
      tpu.vector_store %arg5[%c704, %c0_31], %52 {strides = array<i32>} : memref<800x341xf32, #tpu.memory_space<vmem>>, vector<32x341xf32>,
      %54 = vector.extract_strided_slice %7 {offsets = [0, 83], sizes = [32, 341], strides = [1, 1]} : vector<32x425xf32> to vector<32x341xf32>
      %c736 = arith.constant 736 : index
      %c0_32 = arith.constant 0 : index
      %55 = vector.load %arg5[%c736, %c0_32] : memref<800x341xf32, #tpu.memory_space<vmem>>, vector<32x341xf32>
      tpu.vector_store %arg5[%c736, %c0_32], %54 {strides = array<i32>} : memref<800x341xf32, #tpu.memory_space<vmem>>, vector<32x341xf32>,
      %56 = vector.extract_strided_slice %7 {offsets = [0, 84], sizes = [32, 341], strides = [1, 1]} : vector<32x425xf32> to vector<32x341xf32>
      %c768 = arith.constant 768 : index
      %c0_33 = arith.constant 0 : index
      %57 = vector.load %arg5[%c768, %c0_33] : memref<800x341xf32, #tpu.memory_space<vmem>>, vector<32x341xf32>
      tpu.vector_store %arg5[%c768, %c0_33], %56 {strides = array<i32>} : memref<800x341xf32, #tpu.memory_space<vmem>>, vector<32x341xf32>,
      %c0_34 = arith.constant 0 : index
      %c0_35 = arith.constant 0 : index
      %58 = vector.load %arg5[%c0_34, %c0_35] : memref<800x341xf32, #tpu.memory_space<vmem>>, vector<800x341xf32>
      %cst = arith.constant dense<0.000000e+00> : vector<32x341xf32>
      %59 = tpu.matmul %0, %58, %cst {dimension_numbers = #tpu.dot_dimension_numbers<[1], [0], [0], [1], [0, 0, 1, 1], [], []>} : vector<32x800xf32>, vector<800x341xf32>, vector<32x341xf32> -> vector<32x341xf32>
      %60 = vector.broadcast %1 : vector<32x1xf32> to vector<32x341xf32>
      %61 = arith.addf %59, %60 : vector<32x341xf32>
      %62 = vector.extract_strided_slice %61 {offsets = [0, 0], sizes = [32, 340], strides = [1, 1]} : vector<32x341xf32> to vector<32x340xf32>
      %63 = vector.extract_strided_slice %61 {offsets = [0, 1], sizes = [32, 340], strides = [1, 1]} : vector<32x341xf32> to vector<32x340xf32>
      %64 = arith.maximumf %62, %63 : vector<32x340xf32>
      %65 = vector.extract_strided_slice %64 {offsets = [0, 0], sizes = [32, 320], strides = [1, 1]} : vector<32x340xf32> to vector<32x320xf32>
      %66 = vector.extract_strided_slice %64 {offsets = [0, 20], sizes = [32, 320], strides = [1, 1]} : vector<32x340xf32> to vector<32x320xf32>
      %67 = arith.maximumf %65, %66 : vector<32x320xf32>
      %68 = arith.index_cast %4 : i32 to index
      %c0_36 = arith.constant 0 : index
      %c0_37 = arith.constant 0 : index
      %69 = vector.load %arg4[%68, %c0_36, %c0_37] : memref<2x32x320xf32, #tpu.memory_space<vmem>>, vector<1x32x320xf32>
      %70 = vector.shape_cast %69 : vector<1x32x320xf32> to vector<32x320xf32>
      %71 = vector.shape_cast %67 : vector<32x320xf32> to vector<1x32x320xf32>
      tpu.vector_store %arg4[%68, %c0_36, %c0_37], %71 {strides = array<i32>} : memref<2x32x320xf32, #tpu.memory_space<vmem>>, vector<1x32x320xf32>,
    }
    %c2_i32_3 = arith.constant 2 : i32
    return
  }
  func.func @transform_0(%arg0: i32) -> (i32, i32, i32) {
    %c0_i32 = arith.constant 0 : i32
    %c0_i32_0 = arith.constant 0 : i32
    %c0_i32_1 = arith.constant 0 : i32
    return %arg0, %c0_i32, %c0_i32_0 : i32, i32, i32
  }
  func.func @transform_1(%arg0: i32) -> (i32, i32) {
    %c0_i32 = arith.constant 0 : i32
    %c0_i32_0 = arith.constant 0 : i32
    %c0_i32_1 = arith.constant 0 : i32
    return %c0_i32, %c0_i32_0 : i32, i32
  }
  func.func @transform_2(%arg0: i32) -> (i32, i32) {
    %c0_i32 = arith.constant 0 : i32
    %c0_i32_0 = arith.constant 0 : i32
    %c0_i32_1 = arith.constant 0 : i32
    return %c0_i32, %c0_i32_0 : i32, i32
  }
  func.func @transform_3(%arg0: i32) -> (i32, i32, i32) {
    %c0_i32 = arith.constant 0 : i32
    %c0_i32_0 = arith.constant 0 : i32
    %c0_i32_1 = arith.constant 0 : i32
    return %arg0, %c0_i32, %c0_i32_0 : i32, i32, i32
  }
}

module attributes {stable_mosaic.version = 11 : i64} {
  func.func @kernel(%arg0: i32, %arg1: memref<2x32x161xf32, #tpu.memory_space<vmem>>, %arg2: memref<64x800xf32, #tpu.memory_space<vmem>>, %arg3: memref<64x1xf32, #tpu.memory_space<vmem>>, %arg4: memref<2x64x96xf32, #tpu.memory_space<vmem>>, %arg5: memref<800x109xf32, #tpu.memory_space<vmem>>) attributes {dimension_semantics = [#tpu.dimension_semantics<parallel>], iteration_bounds = array<i64: 1>, scalar_prefetch = 0 : i64, scratch_operands = 1 : i64, tpu.core_type = #tpu.core_type<tc>, window_params = [{transform_indices = @transform_0, window_bounds = array<i64: 2, 32, 161>}, {pipeline_mode = #tpu.pipeline_mode<synchronous>, transform_indices = @transform_1, window_bounds = array<i64: 64, 800>}, {pipeline_mode = #tpu.pipeline_mode<synchronous>, transform_indices = @transform_2, window_bounds = array<i64: 64, 1>}, {transform_indices = @transform_3, window_bounds = array<i64: 2, 64, 96>}]} {
    %c0 = arith.constant 0 : index
    %c0_0 = arith.constant 0 : index
    %0 = vector.load %arg2[%c0, %c0_0] : memref<64x800xf32, #tpu.memory_space<vmem>>, vector<64x800xf32>
    %c0_1 = arith.constant 0 : index
    %c0_2 = arith.constant 0 : index
    %1 = vector.load %arg3[%c0_1, %c0_2] : memref<64x1xf32, #tpu.memory_space<vmem>>, vector<64x1xf32>
    %c0_i32 = arith.constant 0 : i32
    %c2_i32 = arith.constant 2 : i32
    %2 = arith.addi %c0_i32, %c2_i32 : i32
    %c1_i32 = arith.constant 1 : i32
    scf.for %arg6 = %c0_i32 to %2 step %c1_i32  : i32 {
      %c1_i32_4 = arith.constant 1 : i32
      %3 = arith.muli %arg6, %c1_i32_4 : i32
      %c0_i32_5 = arith.constant 0 : i32
      %4 = arith.addi %c0_i32_5, %3 : i32
      %5 = arith.index_cast %4 : i32 to index
      %c0_6 = arith.constant 0 : index
      %c0_7 = arith.constant 0 : index
      %6 = vector.load %arg1[%5, %c0_6, %c0_7] : memref<2x32x161xf32, #tpu.memory_space<vmem>>, vector<1x32x161xf32>
      %7 = vector.shape_cast %6 : vector<1x32x161xf32> to vector<32x161xf32>
      %8 = vector.extract_strided_slice %7 {offsets = [0, 0], sizes = [32, 109], strides = [1, 1]} : vector<32x161xf32> to vector<32x109xf32>
      %c0_8 = arith.constant 0 : index
      %c0_9 = arith.constant 0 : index
      %9 = vector.load %arg5[%c0_8, %c0_9] : memref<800x109xf32, #tpu.memory_space<vmem>>, vector<32x109xf32>
      tpu.vector_store %arg5[%c0_8, %c0_9], %8 {strides = array<i32>} : memref<800x109xf32, #tpu.memory_space<vmem>>, vector<32x109xf32>,
      %10 = vector.extract_strided_slice %7 {offsets = [0, 1], sizes = [32, 109], strides = [1, 1]} : vector<32x161xf32> to vector<32x109xf32>
      %c32 = arith.constant 32 : index
      %c0_10 = arith.constant 0 : index
      %11 = vector.load %arg5[%c32, %c0_10] : memref<800x109xf32, #tpu.memory_space<vmem>>, vector<32x109xf32>
      tpu.vector_store %arg5[%c32, %c0_10], %10 {strides = array<i32>} : memref<800x109xf32, #tpu.memory_space<vmem>>, vector<32x109xf32>,
      %12 = vector.extract_strided_slice %7 {offsets = [0, 2], sizes = [32, 109], strides = [1, 1]} : vector<32x161xf32> to vector<32x109xf32>
      %c64 = arith.constant 64 : index
      %c0_11 = arith.constant 0 : index
      %13 = vector.load %arg5[%c64, %c0_11] : memref<800x109xf32, #tpu.memory_space<vmem>>, vector<32x109xf32>
      tpu.vector_store %arg5[%c64, %c0_11], %12 {strides = array<i32>} : memref<800x109xf32, #tpu.memory_space<vmem>>, vector<32x109xf32>,
      %14 = vector.extract_strided_slice %7 {offsets = [0, 3], sizes = [32, 109], strides = [1, 1]} : vector<32x161xf32> to vector<32x109xf32>
      %c96 = arith.constant 96 : index
      %c0_12 = arith.constant 0 : index
      %15 = vector.load %arg5[%c96, %c0_12] : memref<800x109xf32, #tpu.memory_space<vmem>>, vector<32x109xf32>
      tpu.vector_store %arg5[%c96, %c0_12], %14 {strides = array<i32>} : memref<800x109xf32, #tpu.memory_space<vmem>>, vector<32x109xf32>,
      %16 = vector.extract_strided_slice %7 {offsets = [0, 4], sizes = [32, 109], strides = [1, 1]} : vector<32x161xf32> to vector<32x109xf32>
      %c128 = arith.constant 128 : index
      %c0_13 = arith.constant 0 : index
      %17 = vector.load %arg5[%c128, %c0_13] : memref<800x109xf32, #tpu.memory_space<vmem>>, vector<32x109xf32>
      tpu.vector_store %arg5[%c128, %c0_13], %16 {strides = array<i32>} : memref<800x109xf32, #tpu.memory_space<vmem>>, vector<32x109xf32>,
      %18 = vector.extract_strided_slice %7 {offsets = [0, 12], sizes = [32, 109], strides = [1, 1]} : vector<32x161xf32> to vector<32x109xf32>
      %c160 = arith.constant 160 : index
      %c0_14 = arith.constant 0 : index
      %19 = vector.load %arg5[%c160, %c0_14] : memref<800x109xf32, #tpu.memory_space<vmem>>, vector<32x109xf32>
      tpu.vector_store %arg5[%c160, %c0_14], %18 {strides = array<i32>} : memref<800x109xf32, #tpu.memory_space<vmem>>, vector<32x109xf32>,
      %20 = vector.extract_strided_slice %7 {offsets = [0, 13], sizes = [32, 109], strides = [1, 1]} : vector<32x161xf32> to vector<32x109xf32>
      %c192 = arith.constant 192 : index
      %c0_15 = arith.constant 0 : index
      %21 = vector.load %arg5[%c192, %c0_15] : memref<800x109xf32, #tpu.memory_space<vmem>>, vector<32x109xf32>
      tpu.vector_store %arg5[%c192, %c0_15], %20 {strides = array<i32>} : memref<800x109xf32, #tpu.memory_space<vmem>>, vector<32x109xf32>,
      %22 = vector.extract_strided_slice %7 {offsets = [0, 14], sizes = [32, 109], strides = [1, 1]} : vector<32x161xf32> to vector<32x109xf32>
      %c224 = arith.constant 224 : index
      %c0_16 = arith.constant 0 : index
      %23 = vector.load %arg5[%c224, %c0_16] : memref<800x109xf32, #tpu.memory_space<vmem>>, vector<32x109xf32>
      tpu.vector_store %arg5[%c224, %c0_16], %22 {strides = array<i32>} : memref<800x109xf32, #tpu.memory_space<vmem>>, vector<32x109xf32>,
      %24 = vector.extract_strided_slice %7 {offsets = [0, 15], sizes = [32, 109], strides = [1, 1]} : vector<32x161xf32> to vector<32x109xf32>
      %c256 = arith.constant 256 : index
      %c0_17 = arith.constant 0 : index
      %25 = vector.load %arg5[%c256, %c0_17] : memref<800x109xf32, #tpu.memory_space<vmem>>, vector<32x109xf32>
      tpu.vector_store %arg5[%c256, %c0_17], %24 {strides = array<i32>} : memref<800x109xf32, #tpu.memory_space<vmem>>, vector<32x109xf32>,
      %26 = vector.extract_strided_slice %7 {offsets = [0, 16], sizes = [32, 109], strides = [1, 1]} : vector<32x161xf32> to vector<32x109xf32>
      %c288 = arith.constant 288 : index
      %c0_18 = arith.constant 0 : index
      %27 = vector.load %arg5[%c288, %c0_18] : memref<800x109xf32, #tpu.memory_space<vmem>>, vector<32x109xf32>
      tpu.vector_store %arg5[%c288, %c0_18], %26 {strides = array<i32>} : memref<800x109xf32, #tpu.memory_space<vmem>>, vector<32x109xf32>,
      %28 = vector.extract_strided_slice %7 {offsets = [0, 24], sizes = [32, 109], strides = [1, 1]} : vector<32x161xf32> to vector<32x109xf32>
      %c320 = arith.constant 320 : index
      %c0_19 = arith.constant 0 : index
      %29 = vector.load %arg5[%c320, %c0_19] : memref<800x109xf32, #tpu.memory_space<vmem>>, vector<32x109xf32>
      tpu.vector_store %arg5[%c320, %c0_19], %28 {strides = array<i32>} : memref<800x109xf32, #tpu.memory_space<vmem>>, vector<32x109xf32>,
      %30 = vector.extract_strided_slice %7 {offsets = [0, 25], sizes = [32, 109], strides = [1, 1]} : vector<32x161xf32> to vector<32x109xf32>
      %c352 = arith.constant 352 : index
      %c0_20 = arith.constant 0 : index
      %31 = vector.load %arg5[%c352, %c0_20] : memref<800x109xf32, #tpu.memory_space<vmem>>, vector<32x109xf32>
      tpu.vector_store %arg5[%c352, %c0_20], %30 {strides = array<i32>} : memref<800x109xf32, #tpu.memory_space<vmem>>, vector<32x109xf32>,
      %32 = vector.extract_strided_slice %7 {offsets = [0, 26], sizes = [32, 109], strides = [1, 1]} : vector<32x161xf32> to vector<32x109xf32>
      %c384 = arith.constant 384 : index
      %c0_21 = arith.constant 0 : index
      %33 = vector.load %arg5[%c384, %c0_21] : memref<800x109xf32, #tpu.memory_space<vmem>>, vector<32x109xf32>
      tpu.vector_store %arg5[%c384, %c0_21], %32 {strides = array<i32>} : memref<800x109xf32, #tpu.memory_space<vmem>>, vector<32x109xf32>,
      %34 = vector.extract_strided_slice %7 {offsets = [0, 27], sizes = [32, 109], strides = [1, 1]} : vector<32x161xf32> to vector<32x109xf32>
      %c416 = arith.constant 416 : index
      %c0_22 = arith.constant 0 : index
      %35 = vector.load %arg5[%c416, %c0_22] : memref<800x109xf32, #tpu.memory_space<vmem>>, vector<32x109xf32>
      tpu.vector_store %arg5[%c416, %c0_22], %34 {strides = array<i32>} : memref<800x109xf32, #tpu.memory_space<vmem>>, vector<32x109xf32>,
      %36 = vector.extract_strided_slice %7 {offsets = [0, 28], sizes = [32, 109], strides = [1, 1]} : vector<32x161xf32> to vector<32x109xf32>
      %c448 = arith.constant 448 : index
      %c0_23 = arith.constant 0 : index
      %37 = vector.load %arg5[%c448, %c0_23] : memref<800x109xf32, #tpu.memory_space<vmem>>, vector<32x109xf32>
      tpu.vector_store %arg5[%c448, %c0_23], %36 {strides = array<i32>} : memref<800x109xf32, #tpu.memory_space<vmem>>, vector<32x109xf32>,
      %38 = vector.extract_strided_slice %7 {offsets = [0, 36], sizes = [32, 109], strides = [1, 1]} : vector<32x161xf32> to vector<32x109xf32>
      %c480 = arith.constant 480 : index
      %c0_24 = arith.constant 0 : index
      %39 = vector.load %arg5[%c480, %c0_24] : memref<800x109xf32, #tpu.memory_space<vmem>>, vector<32x109xf32>
      tpu.vector_store %arg5[%c480, %c0_24], %38 {strides = array<i32>} : memref<800x109xf32, #tpu.memory_space<vmem>>, vector<32x109xf32>,
      %40 = vector.extract_strided_slice %7 {offsets = [0, 37], sizes = [32, 109], strides = [1, 1]} : vector<32x161xf32> to vector<32x109xf32>
      %c512 = arith.constant 512 : index
      %c0_25 = arith.constant 0 : index
      %41 = vector.load %arg5[%c512, %c0_25] : memref<800x109xf32, #tpu.memory_space<vmem>>, vector<32x109xf32>
      tpu.vector_store %arg5[%c512, %c0_25], %40 {strides = array<i32>} : memref<800x109xf32, #tpu.memory_space<vmem>>, vector<32x109xf32>,
      %42 = vector.extract_strided_slice %7 {offsets = [0, 38], sizes = [32, 109], strides = [1, 1]} : vector<32x161xf32> to vector<32x109xf32>
      %c544 = arith.constant 544 : index
      %c0_26 = arith.constant 0 : index
      %43 = vector.load %arg5[%c544, %c0_26] : memref<800x109xf32, #tpu.memory_space<vmem>>, vector<32x109xf32>
      tpu.vector_store %arg5[%c544, %c0_26], %42 {strides = array<i32>} : memref<800x109xf32, #tpu.memory_space<vmem>>, vector<32x109xf32>,
      %44 = vector.extract_strided_slice %7 {offsets = [0, 39], sizes = [32, 109], strides = [1, 1]} : vector<32x161xf32> to vector<32x109xf32>
      %c576 = arith.constant 576 : index
      %c0_27 = arith.constant 0 : index
      %45 = vector.load %arg5[%c576, %c0_27] : memref<800x109xf32, #tpu.memory_space<vmem>>, vector<32x109xf32>
      tpu.vector_store %arg5[%c576, %c0_27], %44 {strides = array<i32>} : memref<800x109xf32, #tpu.memory_space<vmem>>, vector<32x109xf32>,
      %46 = vector.extract_strided_slice %7 {offsets = [0, 40], sizes = [32, 109], strides = [1, 1]} : vector<32x161xf32> to vector<32x109xf32>
      %c608 = arith.constant 608 : index
      %c0_28 = arith.constant 0 : index
      %47 = vector.load %arg5[%c608, %c0_28] : memref<800x109xf32, #tpu.memory_space<vmem>>, vector<32x109xf32>
      tpu.vector_store %arg5[%c608, %c0_28], %46 {strides = array<i32>} : memref<800x109xf32, #tpu.memory_space<vmem>>, vector<32x109xf32>,
      %48 = vector.extract_strided_slice %7 {offsets = [0, 48], sizes = [32, 109], strides = [1, 1]} : vector<32x161xf32> to vector<32x109xf32>
      %c640 = arith.constant 640 : index
      %c0_29 = arith.constant 0 : index
      %49 = vector.load %arg5[%c640, %c0_29] : memref<800x109xf32, #tpu.memory_space<vmem>>, vector<32x109xf32>
      tpu.vector_store %arg5[%c640, %c0_29], %48 {strides = array<i32>} : memref<800x109xf32, #tpu.memory_space<vmem>>, vector<32x109xf32>,
      %50 = vector.extract_strided_slice %7 {offsets = [0, 49], sizes = [32, 109], strides = [1, 1]} : vector<32x161xf32> to vector<32x109xf32>
      %c672 = arith.constant 672 : index
      %c0_30 = arith.constant 0 : index
      %51 = vector.load %arg5[%c672, %c0_30] : memref<800x109xf32, #tpu.memory_space<vmem>>, vector<32x109xf32>
      tpu.vector_store %arg5[%c672, %c0_30], %50 {strides = array<i32>} : memref<800x109xf32, #tpu.memory_space<vmem>>, vector<32x109xf32>,
      %52 = vector.extract_strided_slice %7 {offsets = [0, 50], sizes = [32, 109], strides = [1, 1]} : vector<32x161xf32> to vector<32x109xf32>
      %c704 = arith.constant 704 : index
      %c0_31 = arith.constant 0 : index
      %53 = vector.load %arg5[%c704, %c0_31] : memref<800x109xf32, #tpu.memory_space<vmem>>, vector<32x109xf32>
      tpu.vector_store %arg5[%c704, %c0_31], %52 {strides = array<i32>} : memref<800x109xf32, #tpu.memory_space<vmem>>, vector<32x109xf32>,
      %54 = vector.extract_strided_slice %7 {offsets = [0, 51], sizes = [32, 109], strides = [1, 1]} : vector<32x161xf32> to vector<32x109xf32>
      %c736 = arith.constant 736 : index
      %c0_32 = arith.constant 0 : index
      %55 = vector.load %arg5[%c736, %c0_32] : memref<800x109xf32, #tpu.memory_space<vmem>>, vector<32x109xf32>
      tpu.vector_store %arg5[%c736, %c0_32], %54 {strides = array<i32>} : memref<800x109xf32, #tpu.memory_space<vmem>>, vector<32x109xf32>,
      %56 = vector.extract_strided_slice %7 {offsets = [0, 52], sizes = [32, 109], strides = [1, 1]} : vector<32x161xf32> to vector<32x109xf32>
      %c768 = arith.constant 768 : index
      %c0_33 = arith.constant 0 : index
      %57 = vector.load %arg5[%c768, %c0_33] : memref<800x109xf32, #tpu.memory_space<vmem>>, vector<32x109xf32>
      tpu.vector_store %arg5[%c768, %c0_33], %56 {strides = array<i32>} : memref<800x109xf32, #tpu.memory_space<vmem>>, vector<32x109xf32>,
      %c0_34 = arith.constant 0 : index
      %c0_35 = arith.constant 0 : index
      %58 = vector.load %arg5[%c0_34, %c0_35] : memref<800x109xf32, #tpu.memory_space<vmem>>, vector<800x109xf32>
      %cst = arith.constant dense<0.000000e+00> : vector<64x109xf32>
      %59 = tpu.matmul %0, %58, %cst {dimension_numbers = #tpu.dot_dimension_numbers<[1], [0], [0], [1], [0, 0, 1, 1], [], []>} : vector<64x800xf32>, vector<800x109xf32>, vector<64x109xf32> -> vector<64x109xf32>
      %60 = vector.broadcast %1 : vector<64x1xf32> to vector<64x109xf32>
      %61 = arith.addf %59, %60 : vector<64x109xf32>
      %62 = vector.extract_strided_slice %61 {offsets = [0, 0], sizes = [64, 108], strides = [1, 1]} : vector<64x109xf32> to vector<64x108xf32>
      %63 = vector.extract_strided_slice %61 {offsets = [0, 1], sizes = [64, 108], strides = [1, 1]} : vector<64x109xf32> to vector<64x108xf32>
      %64 = arith.maximumf %62, %63 : vector<64x108xf32>
      %65 = vector.extract_strided_slice %64 {offsets = [0, 0], sizes = [64, 96], strides = [1, 1]} : vector<64x108xf32> to vector<64x96xf32>
      %66 = vector.extract_strided_slice %64 {offsets = [0, 12], sizes = [64, 96], strides = [1, 1]} : vector<64x108xf32> to vector<64x96xf32>
      %67 = arith.maximumf %65, %66 : vector<64x96xf32>
      %68 = arith.index_cast %4 : i32 to index
      %c0_36 = arith.constant 0 : index
      %c0_37 = arith.constant 0 : index
      %69 = vector.load %arg4[%68, %c0_36, %c0_37] : memref<2x64x96xf32, #tpu.memory_space<vmem>>, vector<1x64x96xf32>
      %70 = vector.shape_cast %69 : vector<1x64x96xf32> to vector<64x96xf32>
      %71 = vector.shape_cast %67 : vector<64x96xf32> to vector<1x64x96xf32>
      tpu.vector_store %arg4[%68, %c0_36, %c0_37], %71 {strides = array<i32>} : memref<2x64x96xf32, #tpu.memory_space<vmem>>, vector<1x64x96xf32>,
    }
    %c2_i32_3 = arith.constant 2 : i32
    return
  }
  func.func @transform_0(%arg0: i32) -> (i32, i32, i32) {
    %c0_i32 = arith.constant 0 : i32
    %c0_i32_0 = arith.constant 0 : i32
    %c0_i32_1 = arith.constant 0 : i32
    return %arg0, %c0_i32, %c0_i32_0 : i32, i32, i32
  }
  func.func @transform_1(%arg0: i32) -> (i32, i32) {
    %c0_i32 = arith.constant 0 : i32
    %c0_i32_0 = arith.constant 0 : i32
    %c0_i32_1 = arith.constant 0 : i32
    return %c0_i32, %c0_i32_0 : i32, i32
  }
  func.func @transform_2(%arg0: i32) -> (i32, i32) {
    %c0_i32 = arith.constant 0 : i32
    %c0_i32_0 = arith.constant 0 : i32
    %c0_i32_1 = arith.constant 0 : i32
    return %c0_i32, %c0_i32_0 : i32, i32
  }
  func.func @transform_3(%arg0: i32) -> (i32, i32, i32) {
    %c0_i32 = arith.constant 0 : i32
    %c0_i32_0 = arith.constant 0 : i32
    %c0_i32_1 = arith.constant 0 : i32
    return %arg0, %c0_i32, %c0_i32_0 : i32, i32, i32
  }
}

module attributes {stable_mosaic.version = 11 : i64} {
  func.func @kernel(%arg0: i32, %arg1: memref<2x1024xf32, #tpu.memory_space<vmem>>, %arg2: memref<1024x64xf32, #tpu.memory_space<vmem>>, %arg3: memref<1x64xf32, #tpu.memory_space<vmem>>, %arg4: memref<64x10xf32, #tpu.memory_space<vmem>>, %arg5: memref<1x10xf32, #tpu.memory_space<vmem>>, %arg6: memref<2x10xf32, #tpu.memory_space<vmem>>) attributes {dimension_semantics = [#tpu.dimension_semantics<parallel>], iteration_bounds = array<i64: 1>, scalar_prefetch = 0 : i64, scratch_operands = 0 : i64, tpu.core_type = #tpu.core_type<tc>, window_params = [{transform_indices = @transform_0, window_bounds = array<i64: 2, 1024>}, {pipeline_mode = #tpu.pipeline_mode<synchronous>, transform_indices = @transform_1, window_bounds = array<i64: 1024, 64>}, {pipeline_mode = #tpu.pipeline_mode<synchronous>, transform_indices = @transform_2, window_bounds = array<i64: 1, 64>}, {pipeline_mode = #tpu.pipeline_mode<synchronous>, transform_indices = @transform_3, window_bounds = array<i64: 64, 10>}, {pipeline_mode = #tpu.pipeline_mode<synchronous>, transform_indices = @transform_4, window_bounds = array<i64: 1, 10>}, {transform_indices = @transform_5, window_bounds = array<i64: 2, 10>}]} {
    %c0 = arith.constant 0 : index
    %c0_0 = arith.constant 0 : index
    %0 = vector.load %arg1[%c0, %c0_0] : memref<2x1024xf32, #tpu.memory_space<vmem>>, vector<2x1024xf32>
    %c0_1 = arith.constant 0 : index
    %c0_2 = arith.constant 0 : index
    %1 = vector.load %arg2[%c0_1, %c0_2] : memref<1024x64xf32, #tpu.memory_space<vmem>>, vector<1024x64xf32>
    %cst = arith.constant dense<0.000000e+00> : vector<2x64xf32>
    %2 = tpu.matmul %0, %1, %cst {dimension_numbers = #tpu.dot_dimension_numbers<[1], [0], [0], [1], [0, 0, 1, 1], [], []>} : vector<2x1024xf32>, vector<1024x64xf32>, vector<2x64xf32> -> vector<2x64xf32>
    %c0_3 = arith.constant 0 : index
    %c0_4 = arith.constant 0 : index
    %3 = vector.load %arg3[%c0_3, %c0_4] : memref<1x64xf32, #tpu.memory_space<vmem>>, vector<1x64xf32>
    %4 = vector.broadcast %3 : vector<1x64xf32> to vector<2x64xf32>
    %5 = arith.addf %2, %4 : vector<2x64xf32>
    %c0_5 = arith.constant 0 : index
    %c0_6 = arith.constant 0 : index
    %6 = vector.load %arg4[%c0_5, %c0_6] : memref<64x10xf32, #tpu.memory_space<vmem>>, vector<64x10xf32>
    %cst_7 = arith.constant dense<0.000000e+00> : vector<2x10xf32>
    %7 = tpu.matmul %5, %6, %cst_7 {dimension_numbers = #tpu.dot_dimension_numbers<[1], [0], [0], [1], [0, 0, 1, 1], [], []>} : vector<2x64xf32>, vector<64x10xf32>, vector<2x10xf32> -> vector<2x10xf32>
    %c0_8 = arith.constant 0 : index
    %c0_9 = arith.constant 0 : index
    %8 = vector.load %arg5[%c0_8, %c0_9] : memref<1x10xf32, #tpu.memory_space<vmem>>, vector<1x10xf32>
    %9 = vector.broadcast %8 : vector<1x10xf32> to vector<2x10xf32>
    %10 = arith.addf %7, %9 : vector<2x10xf32>
    %c0_10 = arith.constant 0 : index
    %c0_11 = arith.constant 0 : index
    %11 = vector.load %arg6[%c0_10, %c0_11] : memref<2x10xf32, #tpu.memory_space<vmem>>, vector<2x10xf32>
    tpu.vector_store %arg6[%c0_10, %c0_11], %10 {strides = array<i32>} : memref<2x10xf32, #tpu.memory_space<vmem>>, vector<2x10xf32>,
    return
  }
  func.func @transform_0(%arg0: i32) -> (i32, i32) {
    %c0_i32 = arith.constant 0 : i32
    %c0_i32_0 = arith.constant 0 : i32
    return %arg0, %c0_i32 : i32, i32
  }
  func.func @transform_1(%arg0: i32) -> (i32, i32) {
    %c0_i32 = arith.constant 0 : i32
    %c0_i32_0 = arith.constant 0 : i32
    %c0_i32_1 = arith.constant 0 : i32
    return %c0_i32, %c0_i32_0 : i32, i32
  }
  func.func @transform_2(%arg0: i32) -> (i32, i32) {
    %c0_i32 = arith.constant 0 : i32
    %c0_i32_0 = arith.constant 0 : i32
    %c0_i32_1 = arith.constant 0 : i32
    return %c0_i32, %c0_i32_0 : i32, i32
  }
  func.func @transform_3(%arg0: i32) -> (i32, i32) {
    %c0_i32 = arith.constant 0 : i32
    %c0_i32_0 = arith.constant 0 : i32
    %c0_i32_1 = arith.constant 0 : i32
    return %c0_i32, %c0_i32_0 : i32, i32
  }
  func.func @transform_4(%arg0: i32) -> (i32, i32) {
    %c0_i32 = arith.constant 0 : i32
    %c0_i32_0 = arith.constant 0 : i32
    %c0_i32_1 = arith.constant 0 : i32
    return %c0_i32, %c0_i32_0 : i32, i32
  }
  func.func @transform_5(%arg0: i32) -> (i32, i32) {
    %c0_i32 = arith.constant 0 : i32
    %c0_i32_0 = arith.constant 0 : i32
    return %arg0, %c0_i32 : i32, i32
  }
}

</mosaic_0001>

<bundles_post_ra>
// kernel: tudui_forward.4
= control target key start
LH: loop header
LB: loop body
LE: loop exit
PB: predicated region body
PF: predicated region fallthrough
CT: control target
= control target key end

     0   :  { %8 = vsyncpa [#allocation4], 0  ;;  %s2694_s12 = smov [#allocation3]   ;;  %s4449_s0 = inlined_call_operand.vmem [shape: f32[2,3,1337], index: 0, kind: input, shape index: {}]   ;;  %s4450_s1 = inlined_call_operand.hbm [shape: f32[32,75], index: 1, kind: input, shape index: {}]   ;;  %s4451_s2 = inlined_call_operand.vmem [shape: f32[32,1], index: 2, kind: input, shape index: {}]   ;;  %s4452_s3 = inlined_call_operand.vmem [shape: f32[2,32,1152], index: 3, kind: output, shape index: {}]  }
   0x1   :  { %s16_s13 = sshll.u32 %s2694_s12, 4  ;;  %s17_s13 = int_to_ptr.vmem [resolvable:$true] %s16_s13 }
   0x2   :  { %s2672_s14 = scalar_lea.vmem %s17_s13, 512  ;;  %p2677_p1 = scmp.lt.s32.totalorder %s17_s13, %s17_s13 }
   0x3   :  { %p2673_p0 = scmp.ne.s32.totalorder %s17_s13, %s2672_s14  ;;  %p2678_p2 = scmp.lt.s32.totalorder %s2672_s14, %s2672_s14 }
   0x5   :  { %p2679_p3 = por %p2678_p2, %p2677_p1 }
   0x7   :  { %p2680_p4 = pnand %p2679_p3, %p2673_p0 }
   0x9   :  { %2683 = shalt.err (!%p2680_p4)
}
   0xa   :  { %s2695_s15 = smov 128   ;;  %s2696_s16 = smov 8  }
   0xb   :  { %22 = dma.hbm_to_vmem [thread:$0]  %s4450_s1, 512, %s17_s13, [#allocation4], %s2695_s15, %s2695_s15, %s2696_s16  }
   0xc   :  { %2688 = dma.done.wait [#allocation4], 512  }
   0xd   :  { %2689 = vsyncadd [#allocation4], 4294966784  ;;  %v2746_v0 = vld [vmem:[#allocation3] sm:$0xff]  ;;  %v2748_v1 = vld [vmem:[#allocation3 + $0x8] sm:$0xff]  ;;  %s2774_s26 = smov 0  }
   0xe   :  { %4508 = vst [vmem:[#allocation6_spill] sm:$0xff] %v2746_v0  ;;  %4509 = vst [vmem:[#allocation7_spill] sm:$0xff] %v2748_v1  ;;  %v2750_v2 = vld [vmem:[#allocation3 + $0x10] sm:$0xff]  ;;  %v2752_v3 = vld [vmem:[#allocation3 + $0x18] sm:$0xff] }
   0xf   :  { %4510 = vst [vmem:[#allocation8_spill] sm:$0xff] %v2750_v2  ;;  %4511 = vst [vmem:[#allocation9_spill] sm:$0xff] %v2752_v3  ;;  %v2757_v4 = vld [vmem:[%s4451_s2] sm:$0xff]  ;;  %v2762_v5 = vld [vmem:[%s4451_s2 + $0x8] sm:$0xff] }
  0x10   :  { %4512 = vst [vmem:[#allocation10_spill] sm:$0xff] %v2757_v4  ;;  %4513 = vst [vmem:[#allocation11_spill] sm:$0xff] %v2762_v5  ;;  %v2767_v6 = vld [vmem:[%s4451_s2 + $0x10] sm:$0xff]  ;;  %v2772_v7 = vld [vmem:[%s4451_s2 + $0x18] sm:$0xff] }
  0x11   :  { %4514 = vst [vmem:[#allocation12_spill] sm:$0xff] %v2767_v6  ;;  %4515 = vst [vmem:[#allocation13_spill] sm:$0xff] %v2772_v7 }
  0x12 LB: > { %s2592_s27 = smul.u32 44, %s2692_s26  ;;  %s2697_s2 = smov 127   ;;  %vm4502_vm0 = vcmask 296960   ;;  %vm4494_vm1 = vcmask 1039360   ;;  %vm4495_vm2 = vcmask 300035   ;;  %vm168_vm3 = vcmask 1031168   ;;  %s2692_s26 = sphi %s2774_s26, %s41_s26  }
  0x13   : > { %s2698_s4 = smov 126   ;;  %s2699_s5 = smov 125   ;;  %vm4499_vm4 = vcmask 302086   ;;  %vm4498_vm5 = vcmask 294912   ;;  %vm240_vm6 = vcmask 1022976   ;;  %vm4497_vm7 = vcmask 297985  }
  0x14   : > { %s2783_s30 = scalar_lea.vmem %s4449_s0, %s2592_s27  ;;  %s2700_s6 = smov 124   ;;  %vm296_vm8 = vcmask 1014784   ;;  %vm4496_vm9 = vcmask 301060   ;;  %vm4493_vm10 = vcmask 752640   ;;  %vm386_vm11 = vcmask 302087  }
  0x15   : > { %v2786_v8 = vld [vmem:[%s2783_s30 + $0x8] sm:$0x77]  ;;  %v2789_v9 = vld [vmem:[%s2783_s30 + $0x18] sm:$0x77]  ;;  %v2792_v10 = vld [vmem:[%s2783_s30 + $0x20] sm:$0x77] }
  0x16   : > { %v2795_v11 = vrot.slane %v2786_v8, 5  ;;  %68 = vst [vmem:[#allocation2 + $0x10] sm:$0x7] %v2786_v8  ;;  %72 = vst [vmem:[#allocation2 + $0x30] sm:$0x7] %v2789_v9  ;;  %v2805_v13 = vcombine.high %v2786_v8, %v2786_v8  ;;  %v2812_v15 = vcombine.high %v2789_v9, %v2789_v9  ;;  %v2858_v24 = vcombine.high %v2792_v10, %v2792_v10  ;;  %s2701_s7 = smov 92  }
  0x17   : > { %74 = vst [vmem:[#allocation2 + $0x40] sm:$0x7] %v2792_v10  ;;  %v2801_v12 = vld [vmem:[%s2783_s30] sm:$0x77]  ;;  %v2808_v14 = vld [vmem:[%s2783_s30 + $0x10] sm:$0x77]  ;;  %v2969_v49 = vcombine.low %v2786_v8, %v2786_v8  ;;  %v2981_v51 = vcombine.low %v2789_v9, %v2789_v9  ;;  %v2987_v52 = vcombine.low %v2792_v10, %v2792_v10 }
  0x18   : > { %v2815_v16 = vrot.slane %v2801_v12, 5  ;;  %66 = vst [vmem:[#allocation2] sm:$0x7] %v2801_v12  ;;  %70 = vst [vmem:[#allocation2 + $0x20] sm:$0x7] %v2808_v14  ;;  %v2821_v17 = vcombine.high %v2808_v14, %v2808_v14  ;;  %v2825_v18 = vcombine.high %v2801_v12, %v2801_v12  ;;  %91 = vrot.lane.b32.xlu1 %v2795_v11, %s2697_s2  ;;  %v2830_v19 = vrot.slane %v2805_v13, 5 }
  0x19   : > { %69 = vst [vmem:[#allocation2 + $0x18] sm:$0x7] %v2805_v13  ;;  %73 = vst [vmem:[#allocation2 + $0x38] sm:$0x7] %v2812_v15  ;;  %v2837_v20 = vrot.slane %v2808_v14, 5  ;;  %v2854_v23 = vrot.slane %v2812_v15, 5  ;;  %v2963_v48 = vcombine.low %v2801_v12, %v2801_v12  ;;  %v2975_v50 = vcombine.low %v2808_v14, %v2808_v14 }
  0x1a   : > { %87 = vrot.lane.b32.xlu0 %v2815_v16, %s2697_s2  ;;  %71 = vst [vmem:[#allocation2 + $0x28] sm:$0x7] %v2821_v17  ;;  %67 = vst [vmem:[#allocation2 + $0x8] sm:$0x7] %v2825_v18  ;;  %v2844_v21 = vrot.slane %v2821_v17, 5  ;;  %v2849_v22 = vrot.slane %v2825_v18, 5 }
  0x1b   : > { %v2863_v25 = vrot.slane %v2789_v9, 5  ;;  %v2868_v26 = vrot.slane %v2858_v24, 5  ;;  %v2873_v27 = vrot.slane %v2792_v10, 5  ;;  %v2878_v28 = vrot.slane %v2825_v18, 2  ;;  %76 = vst.msk [vmem:[#allocation2 + $0x48] sm:$0x7] %vm4502_vm0, %v2858_v24 }
  0x1c   : > { %93 = vrot.lane.b32.xlu1 %v2830_v19, %s2697_s2  ;;  %v2883_v29 = vrot.slane %v2801_v12, 2  ;;  %v2887_v30 = vrot.slane %v2805_v13, 2  ;;  %v2891_v31 = vrot.slane %v2786_v8, 2  ;;  %v2895_v32 = vrot.slane %v2821_v17, 2  ;;  %4518 = vst [vmem:[#allocation16_spill] sm:$0xff] %v2963_v48  ;;  %4519 = vst [vmem:[#allocation17_spill] sm:$0xff] %v2969_v49 }
  0x1d   : > { %v2901_v33 = vrot.slane %v2808_v14, 2  ;;  %v2905_v34 = vrot.slane %v2812_v15, 2  ;;  %v2909_v35 = vrot.slane %v2789_v9, 2  ;;  %v2913_v36 = vrot.slane %v2858_v24, 2  ;;  %4520 = vst [vmem:[#allocation18_spill] sm:$0xff] %v2975_v50  ;;  %4521 = vst [vmem:[#allocation19_spill] sm:$0xff] %v2981_v51 }
  0x1e   : > { %95 = vrot.lane.b32.xlu0 %v2837_v20, %s2697_s2  ;;  %v2917_v37 = vrot.slane %v2792_v10, 2  ;;  %v2921_v38 = vrot.slane %v2825_v18, 7  ;;  %v2925_v39 = vrot.slane %v2801_v12, 7  ;;  %v2929_v40 = vrot.slane %v2805_v13, 7  ;;  %4522 = vst [vmem:[#allocation20_spill] sm:$0xff] %v2987_v52  ;;  %s2702_s8 = smov 91  }
  0x1f   : > { %v2933_v41 = vrot.slane %v2786_v8, 7  ;;  %v2937_v42 = vrot.slane %v2821_v17, 7  ;;  %v2941_v43 = vrot.slane %v2808_v14, 7  ;;  %v2945_v44 = vrot.slane %v2812_v15, 7  ;;  %s2703_s9 = smov 90   ;;  %s2704_s10 = smov 89  }
  0x20   : > { %97 = vrot.lane.b32.xlu1 %v2844_v21, %s2697_s2  ;;  %v2949_v45 = vrot.slane %v2789_v9, 7  ;;  %v2953_v46 = vrot.slane %v2858_v24, 7  ;;  %v2957_v47 = vrot.slane %v2792_v10, 7  ;;  %v2991_v53 = vrot.slane %v2825_v18, 1  ;;  %s2705_s11 = smov 88   ;;  %s2706_s12 = smov 56  }
  0x21   : > { %v4453_v54 = vrot.slane %v2801_v12, 1  ;;  %v2998_v55 = vrot.slane %v2805_v13, 1  ;;  %v3004_v56 = vrot.slane %v2786_v8, 1  ;;  %v3009_v57 = vrot.slane %v2821_v17, 1  ;;  %s2707_s13 = smov 55   ;;  %s2708_s14 = smov 108  }
  0x22   : > { %89 = vrot.lane.b32.xlu0 %v2849_v22, %s2697_s2  ;;  %4516 = vst [vmem:[#allocation14_spill] sm:$0xff] %v2953_v46  ;;  %4517 = vst [vmem:[#allocation15_spill] sm:$0xff] %v2957_v47  ;;  %v3014_v58 = vrot.slane %v2808_v14, 1  ;;  %v3019_v59 = vrot.slane %v2812_v15, 1  ;;  %v3024_v60 = vrot.slane %v2789_v9, 1  ;;  %v3029_v61 = vrot.slane %v2858_v24, 1 }
  0x23   : > { %v3034_v62 = vrot.slane %v2792_v10, 1  ;;  %v3039_v63 = vrot.slane %v2825_v18, 6  ;;  %v3046_v7 = vrot.slane %v2805_v13, 6  ;;  %v3051_v5 = vrot.slane %v2786_v8, 6  ;;  %s2709_s15 = smov 111   ;;  %s2710_s16 = smov 110  }
  0x24   : > { %101 = vrot.lane.b32.xlu1 %v2854_v23, %s2697_s2  ;;  %4523 = vst [vmem:[#allocation21_spill] sm:$0xff] %v3019_v59  ;;  %4524 = vst [vmem:[#allocation22_spill] sm:$0xff] %v3024_v60  ;;  %v3055_v6 = vrot.slane %v2821_v17, 6  ;;  %v3059_v3 = vrot.slane %v2808_v14, 6  ;;  %v3063_v4 = vrot.slane %v2812_v15, 6  ;;  %v3071_v2 = vrot.slane %v2858_v24, 6 }
  0x25   : > { %4525 = vst [vmem:[#allocation23_spill] sm:$0xff] %v3029_v61  ;;  %4526 = vst [vmem:[#allocation24_spill] sm:$0xff] %v3034_v62  ;;  %v3075_v1 = vrot.slane %v2792_v10, 6  ;;  %vm4503_vm12 = vcmask 295936   ;;  %vm429_vm13 = vcmask 744448   ;;  %vm4500_vm14 = vcmask 299010  }
  0x26   : > { %99 = vrot.lane.b32.xlu0 %v2863_v25, %s2697_s2  ;;  %4527 = vst [vmem:[#allocation25_spill] sm:$0xff] %v3063_v4  ;;  %4529 = vst [vmem:[#allocation27_spill] sm:$0xff] %v3071_v2  ;;  %vm490_vm15 = vcmask 736256   ;;  %s2711_s17 = smov 109   ;;  %s2712_s18 = smov 17  }
  0x27   : > { %4530 = vst [vmem:[#allocation28_spill] sm:$0xff] %v3075_v1  ;;  %s2713_s19 = smov 16   ;;  %s2714_s20 = smov 112  }
  0x28   : > { %105 = vrot.lane.b32.xlu1 %v2868_v26, %s2697_s2  ;;  %s2715_s21 = smov 19   ;;  %s2716_s22 = smov 18  }
  0x29   : > { %s2717_s1 = smov 53   ;;  %s2718_s23 = smov 52  }
  0x2a   : > { %103 = vrot.lane.b32.xlu0 %v2873_v27, %s2697_s2  ;;  %s2719_s24 = smov 20   ;;  %s2720_s25 = smov 54  }
  0x2b   : > { %s2593_s27 = smul.u32 288, %s2692_s26  ;;  %s41_s26 = sadd.s32 1, %s2692_s26  }
  0x2c   : > { %150 = vrot.lane.b32.xlu1 %v2878_v28, %s2698_s4  ;;  %p38_p5 = scmp.ge.s32.totalorder %s41_s26, 2  }
  0x2e   : > { %148 = vrot.lane.b32.xlu0 %v2883_v29, %s2698_s4 }
  0x30   : > { %154 = vrot.lane.b32.xlu1 %v2887_v30, %s2698_s4 }
  0x32   : > { %152 = vrot.lane.b32.xlu0 %v2891_v31, %s2698_s4 }
  0x34   : > { %158 = vrot.lane.b32.xlu1 %v2895_v32, %s2698_s4 }
  0x36   : > { %156 = vrot.lane.b32.xlu0 %v2901_v33, %s2698_s4 }
  0x38   : > { %162 = vrot.lane.b32.xlu1 %v2905_v34, %s2698_s4 }
  0x3a   : > { %160 = vrot.lane.b32.xlu0 %v2909_v35, %s2698_s4 }
  0x3c   : > { %166 = vrot.lane.b32.xlu1 %v2913_v36, %s2698_s4 }
  0x3e   : > { %164 = vrot.lane.b32.xlu0 %v2917_v37, %s2698_s4 }
  0x40   : > { %222 = vrot.lane.b32.xlu1 %v2921_v38, %s2699_s5 }
  0x42   : > { %220 = vrot.lane.b32.xlu0 %v2925_v39, %s2699_s5 }
  0x44   : > { %226 = vrot.lane.b32.xlu1 %v2929_v40, %s2699_s5 }
  0x46   : > { %224 = vrot.lane.b32.xlu0 %v2933_v41, %s2699_s5 }
  0x48   : > { %230 = vrot.lane.b32.xlu1 %v2937_v42, %s2699_s5 }
  0x4a   : > { %228 = vrot.lane.b32.xlu0 %v2941_v43, %s2699_s5 }
  0x4c   : > { %234 = vrot.lane.b32.xlu1 %v2945_v44, %s2699_s5 }
  0x4e   : > { %232 = vrot.lane.b32.xlu0 %v2949_v45, %s2699_s5 }
  0x50   : > { %238 = vrot.lane.b32.xlu1 %v2953_v46, %s2699_s5 }
  0x52   : > { %236 = vrot.lane.b32.xlu0 %v2957_v47, %s2699_s5  ;;  %v4483_v47 = vrot.slane %v2801_v12, 3 }
  0x54   : > { %278 = vrot.lane.b32.xlu1 %v2801_v12, %s2700_s6 }
  0x56   : > { %276 = vrot.lane.b32.xlu0 %v2963_v48, %s2700_s6 }
  0x58   : > { %282 = vrot.lane.b32.xlu1 %v2786_v8, %s2700_s6 }
  0x5a   : > { %280 = vrot.lane.b32.xlu0 %v2969_v49, %s2700_s6 }
  0x5c   : > { %286 = vrot.lane.b32.xlu1 %v2808_v14, %s2700_s6 }
  0x5e   : > { %284 = vrot.lane.b32.xlu0 %v2975_v50, %s2700_s6 }
  0x60   : > { %290 = vrot.lane.b32.xlu1 %v2789_v9, %s2700_s6 }
  0x62   : > { %288 = vrot.lane.b32.xlu0 %v2981_v51, %s2700_s6 }
  0x64   : > { %294 = vrot.lane.b32.xlu1 %v2792_v10, %s2700_s6 }
  0x66   : > { %292 = vrot.lane.b32.xlu0 %v2987_v52, %s2700_s6  ;;  %v3079_v52 = vrot.slane %v2825_v18, 3 }
  0x68   : > { %339 = vrot.lane.b32.xlu1 %v2991_v53, %s2701_s7 }
  0x6a   : > { %337 = vrot.lane.b32.xlu0 %v4453_v54, %s2701_s7  ;;  %v4455_v54 = vrot.slane %v2801_v12, 6 }
  0x6c   : > { %343 = vrot.lane.b32.xlu1 %v2998_v55, %s2701_s7 }
  0x6e   : > { %341 = vrot.lane.b32.xlu0 %v3004_v56, %s2701_s7 }
  0x70   : > { %347 = vrot.lane.b32.xlu1 %v3009_v57, %s2701_s7 }
  0x72   : > { %345 = vrot.lane.b32.xlu0 %v3014_v58, %s2701_s7 }
  0x74   : > { %351 = vrot.lane.b32.xlu1 %v3019_v59, %s2701_s7 }
  0x76   : > { %349 = vrot.lane.b32.xlu0 %v3024_v60, %s2701_s7 }
  0x78   : > { %355 = vrot.lane.b32.xlu1 %v3029_v61, %s2701_s7 }
  0x7a   : > { %353 = vrot.lane.b32.xlu0 %v3034_v62, %s2701_s7 }
  0x7c   : > { %411 = vrot.lane.b32.xlu1 %v3039_v63, %s2702_s8 }
  0x7e   : > { %409 = vrot.lane.b32.xlu0 %v4455_v54, %s2702_s8  ;;  %v3067_v54 = vrot.slane %v2789_v9, 6 }
  0x80   : > { %415 = vrot.lane.b32.xlu1 %v3046_v7, %s2702_s8  ;;  %4528 = vst [vmem:[#allocation26_spill] sm:$0xff] %v3067_v54 }
  0x82   : > { %413 = vrot.lane.b32.xlu0 %v3051_v5, %s2702_s8 }
  0x84   : > { %419 = vrot.lane.b32.xlu1 %v3055_v6, %s2702_s8 }
  0x86   : > { %417 = vrot.lane.b32.xlu0 %v3059_v3, %s2702_s8 }
  0x88   : > { %423 = vrot.lane.b32.xlu1 %v3063_v4, %s2702_s8 }
  0x8a   : > { %421 = vrot.lane.b32.xlu0 %v3067_v54, %s2702_s8  ;;  %v92_v0 = vpop.permute.xlu1 %91 }
  0x8c   : > { %v88_v46 = vpop.permute.xlu0 %87  ;;  %427 = vrot.lane.b32.xlu1 %v3071_v2, %s2702_s8  ;;  %v3088_v2 = vrot.slane %v2805_v13, 3 }
  0x8e   : > { %425 = vrot.lane.b32.xlu0 %v3075_v1, %s2702_s8  ;;  %v94_v51 = vpop.permute.xlu1 %93  ;;  %v3094_v1 = vrot.slane %v2786_v8, 3 }
  0x8f   : > { %v110_v4 = vsel %vm4494_vm1, %v92_v0, %v94_v51 }
  0x90   : > { %v96_v61 = vpop.permute.xlu0 %95  ;;  %129 = vst [vmem:[#allocation2 + $0x10] sm:$0x38] %v110_v4  ;;  %472 = vrot.lane.b32.xlu1 %v3079_v52, %s2703_s9 }
  0x91   : > { %v111_v54 = vsel %vm4494_vm1, %v94_v51, %v96_v61 }
  0x92   : > { %130 = vst [vmem:[#allocation2 + $0x18] sm:$0x38] %v111_v54  ;;  %470 = vrot.lane.b32.xlu0 %v4483_v47, %s2703_s9  ;;  %v98_v59 = vpop.permute.xlu1 %97  ;;  %v3102_v54 = vrot.slane %v2821_v17, 3  ;;  %v3107_v47 = vrot.slane %v2808_v14, 3 }
  0x93   : > { %v112_v4 = vsel %vm4494_vm1, %v96_v61, %v98_v59 }
  0x94   : > { %v90_v62 = vpop.permute.xlu0 %89  ;;  %131 = vst [vmem:[#allocation2 + $0x20] sm:$0x38] %v112_v4  ;;  %476 = vrot.lane.b32.xlu1 %v3088_v2, %s2703_s9 }
  0x95   : > { %v108_v51 = vsel %vm4494_vm1, %v88_v46, %v90_v62  ;;  %v109_v60 = vsel %vm4494_vm1, %v90_v62, %v92_v0  ;;  %v3114_v62 = vrot.slane %v2812_v15, 3 }
  0x96   : > { %127 = vst [vmem:[#allocation2] sm:$0x38] %v108_v51  ;;  %128 = vst [vmem:[#allocation2 + $0x8] sm:$0x38] %v109_v60  ;;  %474 = vrot.lane.b32.xlu0 %v3094_v1, %s2703_s9  ;;  %v102_v61 = vpop.permute.xlu1 %101  ;;  %v3119_v60 = vrot.slane %v2789_v9, 3 }
  0x97   : > { %4531 = vst [vmem:[#allocation29_spill] sm:$0xff] %v3114_v62 }
  0x98   : > { %v100_v4 = vpop.permute.xlu0 %99  ;;  %480 = vrot.lane.b32.xlu1 %v3102_v54, %s2703_s9 }
  0x99   : > { %v113_v46 = vsel %vm4494_vm1, %v98_v59, %v100_v4  ;;  %v114_v0 = vsel %vm4494_vm1, %v100_v4, %v102_v61 }
  0x9a   : > { %132 = vst [vmem:[#allocation2 + $0x28] sm:$0x38] %v113_v46  ;;  %133 = vst [vmem:[#allocation2 + $0x30] sm:$0x38] %v114_v0  ;;  %478 = vrot.lane.b32.xlu0 %v3107_v47, %s2703_s9  ;;  %v106_v51 = vpop.permute.xlu1 %105  ;;  %v3127_v46 = vrot.slane %v2858_v24, 3  ;;  %v3132_v0 = vrot.slane %v2792_v10, 3 }
  0x9b   : > { %137 = vst.msk [vmem:[#allocation2 + $0x48] sm:$0x38] %vm4495_vm2, %v106_v51 }
  0x9c   : > { %v104_v59 = vpop.permute.xlu0 %103  ;;  %484 = vrot.lane.b32.xlu1 %v3114_v62, %s2703_s9  ;;  %4532 = vst [vmem:[#allocation30_spill] sm:$0xff] %v3127_v46 }
  0x9d   : > { %v115_v4 = vsel %vm4494_vm1, %v102_v61, %v104_v59  ;;  %v116_v48 = vsel %vm4494_vm1, %v104_v59, %v106_v51  ;;  %vm1354_vm1 = vcmask 891904  }
  0x9e   : > { %134 = vst [vmem:[#allocation2 + $0x38] sm:$0x38] %v115_v4  ;;  %135 = vst [vmem:[#allocation2 + $0x40] sm:$0x38] %v116_v48  ;;  %482 = vrot.lane.b32.xlu0 %v3119_v60, %s2703_s9  ;;  %v151_v50 = vpop.permute.xlu1 %150 }
  0xa0   : > { %v149_v49 = vpop.permute.xlu0 %148  ;;  %488 = vrot.lane.b32.xlu1 %v3127_v46, %s2703_s9 }
  0xa1   : > { %v169_v61 = vsel %vm168_vm3, %v149_v49, %v151_v50 }
  0xa2   : > { %188 = vst [vmem:[#allocation2 + $0x50] ss:$-76 sps:$4 sm:$0xc1] %v169_v61   ;;  %486 = vrot.lane.b32.xlu0 %v3132_v0, %s2703_s9  ;;  %v155_v51 = vpop.permute.xlu1 %154 }
  0xa4   : > { %v153_v48 = vpop.permute.xlu0 %152  ;;  %523 = vrot.lane.b32.xlu1 %v2825_v18, %s2704_s10 }
  0xa5   : > { %v170_v59 = vsel %vm168_vm3, %v151_v50, %v153_v48  ;;  %v171_v4 = vsel %vm168_vm3, %v153_v48, %v155_v51 }
  0xa6   : > { %189 = vst [vmem:[#allocation2 + $0x58] ss:$-76 sps:$4 sm:$0xc1] %v170_v59   ;;  %190 = vst [vmem:[#allocation2 + $0x60] ss:$-76 sps:$4 sm:$0xc1] %v171_v4   ;;  %521 = vrot.lane.b32.xlu0 %v2801_v12, %s2704_s10  ;;  %v159_v49 = vpop.permute.xlu1 %158 }
  0xa8   : > { %v157_v61 = vpop.permute.xlu0 %156  ;;  %527 = vrot.lane.b32.xlu1 %v2805_v13, %s2704_s10 }
  0xa9   : > { %v172_v46 = vsel %vm168_vm3, %v155_v51, %v157_v61  ;;  %v173_v62 = vsel %vm168_vm3, %v157_v61, %v159_v49 }
  0xaa   : > { %191 = vst [vmem:[#allocation2 + $0x68] ss:$-76 sps:$4 sm:$0xc1] %v172_v46   ;;  %192 = vst [vmem:[#allocation2 + $0x70] ss:$-76 sps:$4 sm:$0xc1] %v173_v62   ;;  %525 = vrot.lane.b32.xlu0 %v2786_v8, %s2704_s10  ;;  %v163_v50 = vpop.permute.xlu1 %162 }
  0xac   : > { %v161_v48 = vpop.permute.xlu0 %160  ;;  %531 = vrot.lane.b32.xlu1 %v2821_v17, %s2704_s10 }
  0xad   : > { %v174_v59 = vsel %vm168_vm3, %v159_v49, %v161_v48  ;;  %v175_v4 = vsel %vm168_vm3, %v161_v48, %v163_v50 }
  0xae   : > { %193 = vst [vmem:[#allocation2 + $0x78] ss:$-76 sps:$4 sm:$0xc1] %v174_v59   ;;  %194 = vst [vmem:[#allocation2 + $0x80] ss:$-76 sps:$4 sm:$0xc1] %v175_v4   ;;  %529 = vrot.lane.b32.xlu0 %v2808_v14, %s2704_s10  ;;  %v167_v62 = vpop.permute.xlu1 %166 }
  0xaf   : > { %198 = vst.msk [vmem:[#allocation2 + $0x48] sm:$0xc0] %vm4499_vm4, %v167_v62 }
  0xb0   : > { %v165_v46 = vpop.permute.xlu0 %164  ;;  %209 = vst.msk [vmem:[#allocation2 + $0x98] sm:$0x1] %vm4498_vm5, %v167_v62  ;;  %535 = vrot.lane.b32.xlu1 %v2812_v15, %s2704_s10 }
  0xb1   : > { %v176_v51 = vsel %vm168_vm3, %v163_v50, %v165_v46  ;;  %v177_v49 = vsel %vm168_vm3, %v165_v46, %v167_v62  ;;  %vm4501_vm3 = vcmask 302085  }
  0xb2   : > { %195 = vst [vmem:[#allocation2 + $0x88] ss:$-76 sps:$4 sm:$0xc1] %v176_v51   ;;  %196 = vst [vmem:[#allocation2 + $0x90] ss:$-76 sps:$4 sm:$0xc1] %v177_v49   ;;  %533 = vrot.lane.b32.xlu0 %v2789_v9, %s2704_s10  ;;  %v223_v61 = vpop.permute.xlu1 %222 }
  0xb4   : > { %v221_v48 = vpop.permute.xlu0 %220  ;;  %539 = vrot.lane.b32.xlu1 %v2858_v24, %s2704_s10 }
  0xb5   : > { %v241_v59 = vsel %vm240_vm6, %v221_v48, %v223_v61 }
  0xb6   : > { %260 = vst [vmem:[#allocation2 + $0x50] sm:$0xe] %v241_v59  ;;  %537 = vrot.lane.b32.xlu0 %v2792_v10, %s2704_s10  ;;  %v227_v50 = vpop.permute.xlu1 %226 }
  0xb8   : > { %v225_v4 = vpop.permute.xlu0 %224  ;;  %573 = vrot.lane.b32.xlu1 %v2849_v22, %s2705_s11 }
  0xb9   : > { %v242_v62 = vsel %vm240_vm6, %v223_v61, %v225_v4  ;;  %v243_v46 = vsel %vm240_vm6, %v225_v4, %v227_v50 }
  0xba   : > { %261 = vst [vmem:[#allocation2 + $0x58] sm:$0xe] %v242_v62  ;;  %262 = vst [vmem:[#allocation2 + $0x60] sm:$0xe] %v243_v46  ;;  %571 = vrot.lane.b32.xlu0 %v2815_v16, %s2705_s11  ;;  %v231_v51 = vpop.permute.xlu1 %230 }
  0xbc   : > { %v229_v49 = vpop.permute.xlu0 %228  ;;  %577 = vrot.lane.b32.xlu1 %v2830_v19, %s2705_s11 }
  0xbd   : > { %v244_v48 = vsel %vm240_vm6, %v227_v50, %v229_v49  ;;  %v245_v59 = vsel %vm240_vm6, %v229_v49, %v231_v51 }
  0xbe   : > { %263 = vst [vmem:[#allocation2 + $0x68] sm:$0xe] %v244_v48  ;;  %264 = vst [vmem:[#allocation2 + $0x70] sm:$0xe] %v245_v59  ;;  %575 = vrot.lane.b32.xlu0 %v2795_v11, %s2705_s11  ;;  %v235_v61 = vpop.permute.xlu1 %234 }
  0xc0   : > { %v233_v4 = vpop.permute.xlu0 %232  ;;  %581 = vrot.lane.b32.xlu1 %v2844_v21, %s2705_s11 }
  0xc1   : > { %v246_v62 = vsel %vm240_vm6, %v231_v51, %v233_v4  ;;  %v247_v46 = vsel %vm240_vm6, %v233_v4, %v235_v61 }
  0xc2   : > { %265 = vst [vmem:[#allocation2 + $0x78] sm:$0xe] %v246_v62  ;;  %266 = vst [vmem:[#allocation2 + $0x80] sm:$0xe] %v247_v46  ;;  %579 = vrot.lane.b32.xlu0 %v2837_v20, %s2705_s11  ;;  %v239_v50 = vpop.permute.xlu1 %238 }
  0xc3   : > { %270 = vst.msk [vmem:[#allocation2 + $0x98] sm:$0xe] %vm4497_vm7, %v239_v50  ;;  %vm1192_vm7 = vcmask 916480  }
  0xc4   : > { %v237_v49 = vpop.permute.xlu0 %236  ;;  %585 = vrot.lane.b32.xlu1 %v2854_v23, %s2705_s11 }
  0xc5   : > { %v248_v48 = vsel %vm240_vm6, %v235_v61, %v237_v49  ;;  %v249_v59 = vsel %vm240_vm6, %v237_v49, %v239_v50  ;;  %vm541_vm6 = vcmask 728064  }
  0xc6   : > { %267 = vst [vmem:[#allocation2 + $0x88] sm:$0xe] %v248_v48  ;;  %268 = vst [vmem:[#allocation2 + $0x90] sm:$0xe] %v249_v59  ;;  %583 = vrot.lane.b32.xlu0 %v2863_v25, %s2705_s11  ;;  %v279_v51 = vpop.permute.xlu1 %278 }
  0xc8   : > { %v277_v4 = vpop.permute.xlu0 %276  ;;  %589 = vrot.lane.b32.xlu1 %v2868_v26, %s2705_s11 }
  0xc9   : > { %v297_v62 = vsel %vm296_vm8, %v277_v4, %v279_v51 }
  0xca   : > { %316 = vst [vmem:[#allocation2 + $0x50] sm:$0x70] %v297_v62  ;;  %587 = vrot.lane.b32.xlu0 %v2873_v27, %s2705_s11  ;;  %v283_v61 = vpop.permute.xlu1 %282 }
  0xcc   : > { %v281_v46 = vpop.permute.xlu0 %280  ;;  %623 = vrot.lane.b32.xlu1 %v2878_v28, %s2706_s12 }
  0xcd   : > { %v298_v50 = vsel %vm296_vm8, %v279_v51, %v281_v46  ;;  %v299_v49 = vsel %vm296_vm8, %v281_v46, %v283_v61 }
  0xce   : > { %317 = vst [vmem:[#allocation2 + $0x58] sm:$0x70] %v298_v50  ;;  %318 = vst [vmem:[#allocation2 + $0x60] sm:$0x70] %v299_v49  ;;  %621 = vrot.lane.b32.xlu0 %v2883_v29, %s2706_s12  ;;  %v287_v48 = vpop.permute.xlu1 %286 }
  0xd0   : > { %v285_v59 = vpop.permute.xlu0 %284  ;;  %627 = vrot.lane.b32.xlu1 %v2887_v30, %s2706_s12 }
  0xd1   : > { %v300_v4 = vsel %vm296_vm8, %v283_v61, %v285_v59  ;;  %v301_v62 = vsel %vm296_vm8, %v285_v59, %v287_v48 }
  0xd2   : > { %319 = vst [vmem:[#allocation2 + $0x68] sm:$0x70] %v300_v4  ;;  %320 = vst [vmem:[#allocation2 + $0x70] sm:$0x70] %v301_v62  ;;  %625 = vrot.lane.b32.xlu0 %v2891_v31, %s2706_s12  ;;  %v291_v51 = vpop.permute.xlu1 %290 }
  0xd4   : > { %v289_v46 = vpop.permute.xlu0 %288  ;;  %631 = vrot.lane.b32.xlu1 %v2895_v32, %s2706_s12 }
  0xd5   : > { %v302_v50 = vsel %vm296_vm8, %v287_v48, %v289_v46  ;;  %v303_v49 = vsel %vm296_vm8, %v289_v46, %v291_v51 }
  0xd6   : > { %321 = vst [vmem:[#allocation2 + $0x78] sm:$0x70] %v302_v50  ;;  %322 = vst [vmem:[#allocation2 + $0x80] sm:$0x70] %v303_v49  ;;  %629 = vrot.lane.b32.xlu0 %v2901_v33, %s2706_s12  ;;  %v295_v61 = vpop.permute.xlu1 %294 }
  0xd7   : > { %326 = vst.msk [vmem:[#allocation2 + $0x98] sm:$0x70] %vm4496_vm9, %v295_v61  ;;  %vm1140_vm9 = vcmask 130048  }
  0xd8   : > { %v293_v59 = vpop.permute.xlu0 %292  ;;  %635 = vrot.lane.b32.xlu1 %v2905_v34, %s2706_s12 }
  0xd9   : > { %v304_v4 = vsel %vm296_vm8, %v291_v51, %v293_v59  ;;  %v305_v62 = vsel %vm296_vm8, %v293_v59, %v295_v61  ;;  %vm591_vm8 = vcmask 719872  }
  0xda   : > { %323 = vst [vmem:[#allocation2 + $0x88] sm:$0x70] %v304_v4  ;;  %324 = vst [vmem:[#allocation2 + $0x90] sm:$0x70] %v305_v62  ;;  %633 = vrot.lane.b32.xlu0 %v2909_v35, %s2706_s12  ;;  %v340_v48 = vpop.permute.xlu1 %339 }
  0xdc   : > { %v338_v46 = vpop.permute.xlu0 %337  ;;  %639 = vrot.lane.b32.xlu1 %v2913_v36, %s2706_s12 }
  0xdd   : > { %v358_v50 = vsel %vm4493_vm10, %v338_v46, %v340_v48 }
  0xde   : > { %377 = vst [vmem:[#allocation2 + $0xa0] ss:$-76 sps:$4 sm:$0x83] %v358_v50   ;;  %637 = vrot.lane.b32.xlu0 %v2917_v37, %s2706_s12  ;;  %v344_v51 = vpop.permute.xlu1 %343 }
  0xe0   : > { %v342_v49 = vpop.permute.xlu0 %341  ;;  %683 = vrot.lane.b32.xlu1 %v2921_v38, %s2707_s13 }
  0xe1   : > { %v359_v61 = vsel %vm4493_vm10, %v340_v48, %v342_v49  ;;  %v360_v59 = vsel %vm4493_vm10, %v342_v49, %v344_v51 }
  0xe2   : > { %378 = vst [vmem:[#allocation2 + $0xa8] ss:$-76 sps:$4 sm:$0x83] %v359_v61   ;;  %379 = vst [vmem:[#allocation2 + $0xb0] ss:$-76 sps:$4 sm:$0x83] %v360_v59   ;;  %681 = vrot.lane.b32.xlu0 %v2925_v39, %s2707_s13  ;;  %v348_v4 = vpop.permute.xlu1 %347 }
  0xe4   : > { %v346_v62 = vpop.permute.xlu0 %345  ;;  %687 = vrot.lane.b32.xlu1 %v2929_v40, %s2707_s13 }
  0xe5   : > { %v361_v46 = vsel %vm4493_vm10, %v344_v51, %v346_v62  ;;  %v362_v50 = vsel %vm4493_vm10, %v346_v62, %v348_v4 }
  0xe6   : > { %380 = vst [vmem:[#allocation2 + $0xb8] ss:$-76 sps:$4 sm:$0x83] %v361_v46   ;;  %381 = vst [vmem:[#allocation2 + $0xc0] ss:$-76 sps:$4 sm:$0x83] %v362_v50   ;;  %685 = vrot.lane.b32.xlu0 %v2933_v41, %s2707_s13  ;;  %v352_v48 = vpop.permute.xlu1 %351 }
  0xe8   : > { %v350_v49 = vpop.permute.xlu0 %349  ;;  %691 = vrot.lane.b32.xlu1 %v2937_v42, %s2707_s13 }
  0xe9   : > { %v363_v61 = vsel %vm4493_vm10, %v348_v4, %v350_v49  ;;  %v364_v59 = vsel %vm4493_vm10, %v350_v49, %v352_v48 }
  0xea   : > { %382 = vst [vmem:[#allocation2 + $0xc8] ss:$-76 sps:$4 sm:$0x83] %v363_v61   ;;  %383 = vst [vmem:[#allocation2 + $0xd0] ss:$-76 sps:$4 sm:$0x83] %v364_v59   ;;  %689 = vrot.lane.b32.xlu0 %v2941_v43, %s2707_s13  ;;  %v356_v51 = vpop.permute.xlu1 %355 }
  0xeb   : > { %387 = vst.msk [vmem:[#allocation2 + $0x98] sm:$0x80] %vm386_vm11, %v356_v51 }
  0xec   : > { %398 = vst.msk [vmem:[#allocation2 + $0xe8] sm:$0x3] %vm4503_vm12, %v356_v51  ;;  %v354_v62 = vpop.permute.xlu0 %353  ;;  %695 = vrot.lane.b32.xlu1 %v2945_v44, %s2707_s13  ;;  %vm4507_vm12 = vcmask 441344  }
  0xed   : > { %v365_v4 = vsel %vm4493_vm10, %v352_v48, %v354_v62  ;;  %v366_v46 = vsel %vm4493_vm10, %v354_v62, %v356_v51  ;;  %vm1304_vm10 = vcmask 900096  }
  0xee   : > { %384 = vst [vmem:[#allocation2 + $0xd8] ss:$-76 sps:$4 sm:$0x83] %v365_v4   ;;  %385 = vst [vmem:[#allocation2 + $0xe0] ss:$-76 sps:$4 sm:$0x83] %v366_v46   ;;  %693 = vrot.lane.b32.xlu0 %v2949_v45, %s2707_s13  ;;  %v412_v50 = vpop.permute.xlu1 %411 }
  0xf0   : > { %v410_v49 = vpop.permute.xlu0 %409  ;;  %1388 = vrot.lane.b32.xlu1 %v2805_v13, %s2708_s14 }
  0xf1   : > { %v430_v61 = vsel %vm429_vm13, %v410_v49, %v412_v50 }
  0xf2   : > { %449 = vst [vmem:[#allocation2 + $0xa0] sm:$0x1c] %v430_v61  ;;  %1386 = vrot.lane.b32.xlu0 %v2786_v8, %s2708_s14  ;;  %v416_v48 = vpop.permute.xlu1 %415 }
  0xf4   : > { %v414_v59 = vpop.permute.xlu0 %413  ;;  %1392 = vrot.lane.b32.xlu1 %v2821_v17, %s2708_s14 }
  0xf5   : > { %v431_v51 = vsel %vm429_vm13, %v412_v50, %v414_v59  ;;  %v432_v62 = vsel %vm429_vm13, %v414_v59, %v416_v48 }
  0xf6   : > { %450 = vst [vmem:[#allocation2 + $0xa8] sm:$0x1c] %v431_v51  ;;  %451 = vst [vmem:[#allocation2 + $0xb0] sm:$0x1c] %v432_v62  ;;  %1390 = vrot.lane.b32.xlu0 %v2808_v14, %s2708_s14  ;;  %v420_v4 = vpop.permute.xlu1 %419 }
  0xf8   : > { %v418_v46 = vpop.permute.xlu0 %417  ;;  %1225 = vrot.lane.b32.xlu1 %v3004_v56, %s2709_s15 }
  0xf9   : > { %v433_v49 = vsel %vm429_vm13, %v416_v48, %v418_v46  ;;  %v434_v61 = vsel %vm429_vm13, %v418_v46, %v420_v4 }
  0xfa   : > { %452 = vst [vmem:[#allocation2 + $0xb8] sm:$0x1c] %v433_v49  ;;  %453 = vst [vmem:[#allocation2 + $0xc0] sm:$0x1c] %v434_v61  ;;  %1384 = vrot.lane.b32.xlu0 %v2825_v18, %s2708_s14  ;;  %v424_v50 = vpop.permute.xlu1 %423 }
  0xfc   : > { %v422_v59 = vpop.permute.xlu0 %421  ;;  %1229 = vrot.lane.b32.xlu1 %v3014_v58, %s2709_s15 }
  0xfd   : > { %v435_v51 = vsel %vm429_vm13, %v420_v4, %v422_v59  ;;  %v436_v62 = vsel %vm429_vm13, %v422_v59, %v424_v50 }
  0xfe   : > { %454 = vst [vmem:[#allocation2 + $0xc8] sm:$0x1c] %v435_v51  ;;  %455 = vst [vmem:[#allocation2 + $0xd0] sm:$0x1c] %v436_v62  ;;  %1227 = vrot.lane.b32.xlu0 %v2998_v55, %s2709_s15  ;;  %v428_v48 = vpop.permute.xlu1 %427 }
  0xff   : > { %459 = vst.msk [vmem:[#allocation2 + $0xe8] sm:$0x1c] %vm4500_vm14, %v428_v48  ;;  %vm801_vm14 = vcmask 433152  }
 0x100   : > { %v426_v46 = vpop.permute.xlu0 %425  ;;  %1286 = vrot.lane.b32.xlu1 %v3051_v5, %s2710_s16 }
 0x101   : > { %v437_v49 = vsel %vm429_vm13, %v424_v50, %v426_v46  ;;  %v438_v61 = vsel %vm429_vm13, %v426_v46, %v428_v48  ;;  %vm641_vm13 = vcmask 457728  }
 0x102   : > { %456 = vst [vmem:[#allocation2 + $0xd8] sm:$0x1c] %v437_v49  ;;  %457 = vst [vmem:[#allocation2 + $0xe0] sm:$0x1c] %v438_v61  ;;  %1231 = vrot.lane.b32.xlu0 %v3009_v57, %s2709_s15  ;;  %v473_v4 = vpop.permute.xlu1 %472 }
 0x104   : > { %v471_v59 = vpop.permute.xlu0 %470  ;;  %1290 = vrot.lane.b32.xlu1 %v3059_v3, %s2710_s16 }
 0x105   : > { %v491_v51 = vsel %vm490_vm15, %v471_v59, %v473_v4 }
 0x106   : > { %510 = vst [vmem:[#allocation2 + $0xa0] sm:$0xe0] %v491_v51  ;;  %1288 = vrot.lane.b32.xlu0 %v3046_v7, %s2710_s16  ;;  %v477_v50 = vpop.permute.xlu1 %476 }
 0x108   : > { %v475_v62 = vpop.permute.xlu0 %474  ;;  %1336 = vrot.lane.b32.xlu1 %v3094_v1, %s2711_s17 }
 0x109   : > { %v492_v48 = vsel %vm490_vm15, %v473_v4, %v475_v62  ;;  %v493_v46 = vsel %vm490_vm15, %v475_v62, %v477_v50 }
 0x10a   : > { %511 = vst [vmem:[#allocation2 + $0xa8] sm:$0xe0] %v492_v48  ;;  %512 = vst [vmem:[#allocation2 + $0xb0] sm:$0xe0] %v493_v46  ;;  %1292 = vrot.lane.b32.xlu0 %v3055_v6, %s2710_s16  ;;  %v481_v49 = vpop.permute.xlu1 %480 }
 0x10c   : > { %v479_v61 = vpop.permute.xlu0 %478  ;;  %1340 = vrot.lane.b32.xlu1 %v3107_v47, %s2711_s17 }
 0x10d   : > { %v494_v59 = vsel %vm490_vm15, %v477_v50, %v479_v61  ;;  %v495_v51 = vsel %vm490_vm15, %v479_v61, %v481_v49 }
 0x10e   : > { %513 = vst [vmem:[#allocation2 + $0xb8] sm:$0xe0] %v494_v59  ;;  %514 = vst [vmem:[#allocation2 + $0xc0] sm:$0xe0] %v495_v51  ;;  %1338 = vrot.lane.b32.xlu0 %v3088_v2, %s2711_s17  ;;  %v485_v4 = vpop.permute.xlu1 %484 }
 0x110   : > { %v483_v62 = vpop.permute.xlu0 %482  ;;  %1223 = vrot.lane.b32.xlu1 %v2991_v53, %s2709_s15 }
 0x111   : > { %v496_v48 = vsel %vm490_vm15, %v481_v49, %v483_v62  ;;  %v497_v46 = vsel %vm490_vm15, %v483_v62, %v485_v4 }
 0x112   : > { %515 = vst [vmem:[#allocation2 + $0xc8] sm:$0xe0] %v496_v48  ;;  %516 = vst [vmem:[#allocation2 + $0xd0] sm:$0xe0] %v497_v46  ;;  %1342 = vrot.lane.b32.xlu0 %v3102_v54, %s2711_s17  ;;  %v489_v50 = vpop.permute.xlu1 %488 }
 0x113   : > { %520 = vst.msk [vmem:[#allocation2 + $0xe8] sm:$0xe0] %vm4501_vm3, %v489_v50  ;;  %vm4505_vm3 = vcmask 424960  }
 0x114   : > { %v487_v61 = vpop.permute.xlu0 %486  ;;  %1334 = vrot.lane.b32.xlu1 %v3079_v52, %s2711_s17 }
 0x115   : > { %v498_v59 = vsel %vm490_vm15, %v485_v4, %v487_v61  ;;  %v499_v51 = vsel %vm490_vm15, %v487_v61, %v489_v50  ;;  %vm4506_vm15 = vcmask 449536  }
 0x116   : > { %517 = vst [vmem:[#allocation2 + $0xd8] sm:$0xe0] %v498_v59  ;;  %518 = vst [vmem:[#allocation2 + $0xe0] sm:$0xe0] %v499_v51  ;;  %1284 = vrot.lane.b32.xlu0 %v3039_v63, %s2710_s16  ;;  %v524_v49 = vpop.permute.xlu1 %523 }
 0x118   : > { %v522_v62 = vpop.permute.xlu0 %521  ;;  %1058 = vrot.lane.b32.xlu1 %v2891_v31, %s2712_s18 }
 0x119   : > { %v542_v48 = vsel %vm541_vm6, %v522_v62, %v524_v49 }
 0x11a   : > { %561 = vst [vmem:[#allocation2 + $0xf0] sm:$0x7] %v542_v48  ;;  %1056 = vrot.lane.b32.xlu0 %v2878_v28, %s2712_s18  ;;  %v528_v4 = vpop.permute.xlu1 %527 }
 0x11c   : > { %v526_v46 = vpop.permute.xlu0 %525  ;;  %1062 = vrot.lane.b32.xlu1 %v2901_v33, %s2712_s18 }
 0x11d   : > { %v543_v50 = vsel %vm541_vm6, %v524_v49, %v526_v46  ;;  %v544_v61 = vsel %vm541_vm6, %v526_v46, %v528_v4 }
 0x11e   : > { %562 = vst [vmem:[#allocation2 + $0xf8] sm:$0x7] %v543_v50  ;;  %563 = vst [vmem:[#allocation2 + $0x100] sm:$0x7] %v544_v61  ;;  %1060 = vrot.lane.b32.xlu0 %v2887_v30, %s2712_s18  ;;  %v532_v59 = vpop.permute.xlu1 %531  ;;  %v4534_v61 = vld [vmem:[#allocation18_spill] sm:$0xff] }
 0x120   : > { %v530_v31 = vpop.permute.xlu0 %529  ;;  %1122 = vrot.lane.b32.xlu1 %v2933_v41, %s2713_s19 }
 0x121   : > { %v545_v51 = vsel %vm541_vm6, %v528_v4, %v530_v31  ;;  %v546_v28 = vsel %vm541_vm6, %v530_v31, %v532_v59 }
 0x122   : > { %564 = vst [vmem:[#allocation2 + $0x108] sm:$0x7] %v545_v51  ;;  %565 = vst [vmem:[#allocation2 + $0x110] sm:$0x7] %v546_v28  ;;  %1120 = vrot.lane.b32.xlu0 %v2921_v38, %s2713_s19  ;;  %v536_v33 = vpop.permute.xlu1 %535 }
 0x124   : > { %v534_v49 = vpop.permute.xlu0 %533  ;;  %1126 = vrot.lane.b32.xlu1 %v2941_v43, %s2713_s19  ;;  %v4533_v43 = vld [vmem:[#allocation17_spill] sm:$0xff] }
 0x125   : > { %v547_v62 = vsel %vm541_vm6, %v532_v59, %v534_v49  ;;  %v548_v30 = vsel %vm541_vm6, %v534_v49, %v536_v33 }
 0x126   : > { %566 = vst [vmem:[#allocation2 + $0x118] sm:$0x7] %v547_v62  ;;  %567 = vst [vmem:[#allocation2 + $0x120] sm:$0x7] %v548_v30  ;;  %1124 = vrot.lane.b32.xlu0 %v2929_v40, %s2713_s19  ;;  %v540_v41 = vpop.permute.xlu1 %539 }
 0x127   : > { %570 = vst.msk [vmem:[#allocation2 + $0x138] sm:$0x7] %vm4502_vm0, %v540_v41  ;;  %vm915_vm0 = vcmask 162816  }
 0x128   : > { %v538_v48 = vpop.permute.xlu0 %537  ;;  %1176 = vrot.lane.b32.xlu1 %v2786_v8, %s2714_s20 }
 0x129   : > { %v549_v38 = vsel %vm541_vm6, %v536_v33, %v538_v48  ;;  %v550_v4 = vsel %vm541_vm6, %v538_v48, %v540_v41  ;;  %vm4504_vm6 = vcmask 883712  }
 0x12a   : > { %568 = vst [vmem:[#allocation2 + $0x128] sm:$0x7] %v549_v38  ;;  %569 = vst [vmem:[#allocation2 + $0x130] sm:$0x7] %v550_v4  ;;  %1174 = vrot.lane.b32.xlu0 %v4533_v43, %s2714_s20  ;;  %v574_v46 = vpop.permute.xlu1 %573 }
 0x12c   : > { %v572_v40 = vpop.permute.xlu0 %571  ;;  %1180 = vrot.lane.b32.xlu1 %v2808_v14, %s2714_s20 }
 0x12d   : > { %v592_v50 = vsel %vm591_vm8, %v572_v40, %v574_v46 }
 0x12e   : > { %611 = vst [vmem:[#allocation2 + $0xf0] sm:$0x38] %v592_v50  ;;  %1178 = vrot.lane.b32.xlu0 %v4534_v61, %s2714_s20  ;;  %v578_v59 = vpop.permute.xlu1 %577 }
 0x130   : > { %v576_v31 = vpop.permute.xlu0 %575  ;;  %1118 = vrot.lane.b32.xlu1 %v2925_v39, %s2713_s19 }
 0x131   : > { %v593_v51 = vsel %vm591_vm8, %v574_v46, %v576_v31  ;;  %v594_v28 = vsel %vm591_vm8, %v576_v31, %v578_v59 }
 0x132   : > { %612 = vst [vmem:[#allocation2 + $0xf8] sm:$0x38] %v593_v51  ;;  %613 = vst [vmem:[#allocation2 + $0x100] sm:$0x38] %v594_v28  ;;  %1054 = vrot.lane.b32.xlu0 %v2883_v29, %s2712_s18  ;;  %v582_v33 = vpop.permute.xlu1 %581 }
 0x134   : > { %v580_v49 = vpop.permute.xlu0 %579  ;;  %948 = vrot.lane.b32.xlu1 %v2825_v18, %s2715_s21 }
 0x135   : > { %v595_v62 = vsel %vm591_vm8, %v578_v59, %v580_v49  ;;  %v596_v30 = vsel %vm591_vm8, %v580_v49, %v582_v33 }
 0x136   : > { %614 = vst [vmem:[#allocation2 + $0x108] sm:$0x38] %v595_v62  ;;  %615 = vst [vmem:[#allocation2 + $0x110] sm:$0x38] %v596_v30  ;;  %1172 = vrot.lane.b32.xlu0 %v2801_v12, %s2714_s20  ;;  %v586_v39 = vpop.permute.xlu1 %585 }
 0x138   : > { %v584_v41 = vpop.permute.xlu0 %583  ;;  %952 = vrot.lane.b32.xlu1 %v2805_v13, %s2715_s21 }
 0x139   : > { %v597_v48 = vsel %vm591_vm8, %v582_v33, %v584_v41  ;;  %v598_v29 = vsel %vm591_vm8, %v584_v41, %v586_v39 }
 0x13a   : > { %616 = vst [vmem:[#allocation2 + $0x118] sm:$0x38] %v597_v48  ;;  %617 = vst [vmem:[#allocation2 + $0x120] sm:$0x38] %v598_v29  ;;  %950 = vrot.lane.b32.xlu0 %v2786_v8, %s2715_s21  ;;  %v590_v18 = vpop.permute.xlu1 %589 }
 0x13b   : > { %620 = vst.msk [vmem:[#allocation2 + $0x138] sm:$0x38] %vm4495_vm2, %v590_v18  ;;  %vm1076_vm2 = vcmask 138240  }
 0x13c   : > { %v588_v38 = vpop.permute.xlu0 %587  ;;  %1002 = vrot.lane.b32.xlu1 %v2849_v22, %s2716_s22 }
 0x13d   : > { %v599_v4 = vsel %vm591_vm8, %v586_v39, %v588_v38  ;;  %v600_v46 = vsel %vm591_vm8, %v588_v38, %v590_v18  ;;  %vm1567_vm8 = vcmask 1042432  }
 0x13e   : > { %618 = vst [vmem:[#allocation2 + $0x128] sm:$0x38] %v599_v4  ;;  %619 = vst [vmem:[#allocation2 + $0x130] sm:$0x38] %v600_v46  ;;  %954 = vrot.lane.b32.xlu0 %v2808_v14, %s2715_s21  ;;  %v624_v13 = vpop.permute.xlu1 %623 }
 0x140   : > { %v622_v40 = vpop.permute.xlu0 %621  ;;  %1006 = vrot.lane.b32.xlu1 %v2830_v19, %s2716_s22 }
 0x141   : > { %v642_v50 = vsel %vm641_vm13, %v622_v40, %v624_v13  ;;  %v4535_v40 = vrot.slane %v2801_v12, 1 }
 0x142   : > { %661 = vst [vmem:[#allocation2 + $0x140] ss:$-76 sps:$4 sm:$0xc1] %v642_v50   ;;  %1004 = vrot.lane.b32.xlu0 %v2795_v11, %s2716_s22  ;;  %v628_v59 = vpop.permute.xlu1 %627 }
 0x144   : > { %v626_v31 = vpop.permute.xlu0 %625  ;;  %946 = vrot.lane.b32.xlu1 %v2801_v12, %s2715_s21 }
 0x145   : > { %v643_v22 = vsel %vm641_vm13, %v624_v13, %v626_v31  ;;  %v644_v51 = vsel %vm641_vm13, %v626_v31, %v628_v59  ;;  %v4537_v31 = vrot.slane %v2801_v12, 6 }
 0x146   : > { %662 = vst [vmem:[#allocation2 + $0x148] ss:$-76 sps:$4 sm:$0xc1] %v643_v22   ;;  %663 = vst [vmem:[#allocation2 + $0x150] ss:$-76 sps:$4 sm:$0xc1] %v644_v51   ;;  %1008 = vrot.lane.b32.xlu0 %v2837_v20, %s2716_s22  ;;  %v632_v28 = vpop.permute.xlu1 %631 }
 0x148   : > { %v630_v19 = vpop.permute.xlu0 %629  ;;  %783 = vrot.lane.b32.xlu1 %v2991_v53, %s2717_s1 }
 0x149   : > { %v645_v33 = vsel %vm641_vm13, %v628_v59, %v630_v19  ;;  %v646_v11 = vsel %vm641_vm13, %v630_v19, %v632_v28  ;;  %v4536_v59 = vrot.slane %v2801_v12, 3 }
 0x14a   : > { %664 = vst [vmem:[#allocation2 + $0x158] ss:$-76 sps:$4 sm:$0xc1] %v645_v33   ;;  %665 = vst [vmem:[#allocation2 + $0x160] ss:$-76 sps:$4 sm:$0xc1] %v646_v11   ;;  %1000 = vrot.lane.b32.xlu0 %v2815_v16, %s2716_s22  ;;  %v636_v49 = vpop.permute.xlu1 %635 }
 0x14c   : > { %v634_v62 = vpop.permute.xlu0 %633  ;;  %787 = vrot.lane.b32.xlu1 %v2998_v55, %s2717_s1 }
 0x14d   : > { %v647_v30 = vsel %vm641_vm13, %v632_v28, %v634_v62  ;;  %v648_v20 = vsel %vm641_vm13, %v634_v62, %v636_v49 }
 0x14e   : > { %666 = vst [vmem:[#allocation2 + $0x168] ss:$-76 sps:$4 sm:$0xc1] %v647_v30   ;;  %667 = vst [vmem:[#allocation2 + $0x170] ss:$-76 sps:$4 sm:$0xc1] %v648_v20   ;;  %785 = vrot.lane.b32.xlu0 %v3004_v56, %s2717_s1  ;;  %v640_v53 = vpop.permute.xlu1 %639 }
 0x14f   : > { %670 = vst.msk [vmem:[#allocation2 + $0x138] sm:$0xc0] %vm4499_vm4, %v640_v53  ;;  %vm1022_vm4 = vcmask 146432  }
 0x150   : > { %v638_v39 = vpop.permute.xlu0 %637  ;;  %680 = vst.msk [vmem:[#allocation2 + $0x188] sm:$0x1] %vm4498_vm5, %v640_v53  ;;  %843 = vrot.lane.b32.xlu1 %v3039_v63, %s2718_s23  ;;  %vm968_vm5 = vcmask 154624  }
 0x151   : > { %v649_v16 = vsel %vm641_vm13, %v636_v49, %v638_v39  ;;  %v650_v41 = vsel %vm641_vm13, %v638_v39, %v640_v53  ;;  %vm1243_vm13 = vcmask 908288  }
 0x152   : > { %668 = vst [vmem:[#allocation2 + $0x178] ss:$-76 sps:$4 sm:$0xc1] %v649_v16   ;;  %669 = vst [vmem:[#allocation2 + $0x180] ss:$-76 sps:$4 sm:$0xc1] %v650_v41   ;;  %789 = vrot.lane.b32.xlu0 %v3014_v58, %s2717_s1  ;;  %v684_v55 = vpop.permute.xlu1 %683 }
 0x154   : > { %v682_v56 = vpop.permute.xlu0 %681  ;;  %847 = vrot.lane.b32.xlu1 %v3046_v7, %s2718_s23 }
 0x155   : > { %v702_v48 = vsel %vm4506_vm15, %v682_v56, %v684_v55  ;;  %v2721_v56 = vmov 0.0  }
 0x156   : > { %721 = vst [vmem:[#allocation2 + $0x140] sm:$0xe] %v702_v48  ;;  %845 = vrot.lane.b32.xlu0 %v3051_v5, %s2718_s23  ;;  %v688_v29 = vpop.permute.xlu1 %687  ;;  %1662 = vmatprep.mubr.f32.mxu0 %v2721_v56 }
 0x157   : > { %1751 = vmatprep.mubr.f32.mxu1 %v2721_v56 }
 0x158   : > { %v686_v18 = vpop.permute.xlu0 %685  ;;  %895 = vrot.lane.b32.xlu1 %v3079_v52, %s2719_s24 }
 0x159   : > { %v703_v63 = vsel %vm4506_vm15, %v684_v55, %v686_v18  ;;  %v704_v38 = vsel %vm4506_vm15, %v686_v18, %v688_v29 }
 0x15a   : > { %722 = vst [vmem:[#allocation2 + $0x148] sm:$0xe] %v703_v63  ;;  %723 = vst [vmem:[#allocation2 + $0x150] sm:$0xe] %v704_v38  ;;  %849 = vrot.lane.b32.xlu0 %v3059_v3, %s2718_s23  ;;  %v692_v7 = vpop.permute.xlu1 %691  ;;  %v4539_v63 = vld [vmem:[#allocation22_spill] sm:$0xff] }
 0x15c   : > { %v690_v58 = vpop.permute.xlu0 %689  ;;  %899 = vrot.lane.b32.xlu1 %v3088_v2, %s2719_s24 }
 0x15d   : > { %v705_v4 = vsel %vm4506_vm15, %v688_v29, %v690_v58  ;;  %v706_v5 = vsel %vm4506_vm15, %v690_v58, %v692_v7 }
 0x15e   : > { %724 = vst [vmem:[#allocation2 + $0x158] sm:$0xe] %v705_v4  ;;  %725 = vst [vmem:[#allocation2 + $0x160] sm:$0xe] %v706_v5  ;;  %897 = vrot.lane.b32.xlu0 %v3094_v1, %s2719_s24  ;;  %v3424_v52 = vpop.permute.xlu1 %695  ;;  %v4540_v4 = vld [vmem:[#allocation24_spill] sm:$0xff]  ;;  %v4541_v5 = vld [vmem:[#allocation21_spill] sm:$0xff] }
 0x160   : > { %v694_v46 = vpop.permute.xlu0 %693  ;;  %781 = vrot.lane.b32.xlu1 %v4535_v40, %s2717_s1 }
 0x161   : > { %v707_v13 = vsel %vm4506_vm15, %v692_v7, %v694_v46  ;;  %v708_v3 = vsel %vm4506_vm15, %v694_v46, %v3424_v52 }
 0x162   : > { %726 = vst [vmem:[#allocation2 + $0x168] sm:$0xe] %v707_v13  ;;  %727 = vst [vmem:[#allocation2 + $0x170] sm:$0xe] %v708_v3  ;;  %901 = vrot.lane.b32.xlu0 %v3107_v47, %s2719_s24  ;;  %v1389_v2 = vpop.permute.xlu1 %1388 }
 0x164   : > { %v1387_v1 = vpop.permute.xlu0 %1386  ;;  %893 = vrot.lane.b32.xlu1 %v4536_v59, %s2719_s24 }
 0x165   : > { %v1406_v50 = vsel %vm4504_vm6, %v1387_v1, %v1389_v2 }
 0x166   : > { %1425 = vst [vmem:[#allocation2 + $0x2d8] sm:$0x7] %v1406_v50  ;;  %841 = vrot.lane.b32.xlu0 %v4537_v31, %s2718_s23  ;;  %v3441_v22 = vpop.permute.xlu1 %1392 }
 0x168   : > { %v1391_v51 = vpop.permute.xlu0 %1390  ;;  %735 = vrot.lane.b32.xlu1 %v4533_v43, %s2720_s25 }
 0x169   : > { %v1407_v28 = vsel %vm4504_vm6, %v1389_v2, %v1391_v51  ;;  %v1408_v47 = vsel %vm4504_vm6, %v1391_v51, %v3441_v22  ;;  %v4542_v2 = vld [vmem:[#allocation26_spill] sm:$0xff] }
 0x16a   : > { %1426 = vst [vmem:[#allocation2 + $0x2e0] sm:$0x7] %v1407_v28  ;;  %1427 = vst [vmem:[#allocation2 + $0x2e8] sm:$0x7] %v1408_v47  ;;  %733 = vrot.lane.b32.xlu0 %v2801_v12, %s2720_s25  ;;  %v1226_v19 = vpop.permute.xlu1 %1225  ;;  %v4544_v28 = vld [vmem:[#allocation28_spill] sm:$0xff]  ;;  %v4545_v47 = vld [vmem:[#allocation25_spill] sm:$0xff] }
 0x16c   : > { %v1385_v33 = vpop.permute.xlu0 %1384  ;;  %739 = vrot.lane.b32.xlu1 %v4534_v61, %s2720_s25  ;;  %v4538_v61 = vld [vmem:[#allocation16_spill] sm:$0xff] }
 0x16d   : > { %v1405_v11 = vsel %vm4504_vm6, %v1385_v33, %v1387_v1  ;;  %v1525_v49 = vld [vmem:[#allocation2 + $0x2d8] sm:$0x7]  ;;  %v4543_v1 = vld [vmem:[#allocation23_spill] sm:$0xff] }
 0x16e   : > { %1424 = vst [vmem:[#allocation2 + $0x2d0] sm:$0x7] %v1405_v11  ;;  %737 = vrot.lane.b32.xlu0 %v2786_v8, %s2720_s25  ;;  %2561 = vmatprep.subr.msk.mxu0 %vm1567_vm8, %v1525_v49  ;;  %v1230_v43 = vpop.permute.xlu1 %1229 }
 0x170   : > { %v1228_v62 = vpop.permute.xlu0 %1227  ;;  %1394 = vrot.lane.b32.xlu1 %v2789_v9, %s2708_s14 }
 0x171   : > { %v1245_v12 = vsel %vm1243_vm13, %v1226_v19, %v1228_v62  ;;  %v1246_v30 = vsel %vm1243_vm13, %v1228_v62, %v1230_v43  ;;  %v1527_v20 = vld [vmem:[#allocation2 + $0x2e8] sm:$0x7]  ;;  %v1526_v53 = vld [vmem:[#allocation2 + $0x2e0] sm:$0x7] }
 0x172   : > { %1264 = vst [vmem:[#allocation2 + $0x288] ss:$-76 sps:$4 sm:$0x83] %v1245_v12   ;;  %1265 = vst [vmem:[#allocation2 + $0x290] ss:$-76 sps:$4 sm:$0x83] %v1246_v30   ;;  %731 = vrot.lane.b32.xlu0 %v4538_v61, %s2720_s25  ;;  %2567 = vmatprep.subr.msk.mxu1 %vm1567_vm8, %v1527_v20  ;;  %v1287_v8 = vpop.permute.xlu1 %1286 }
 0x173   : > { %2568 = vmatpush1.msk.msra.mxu1 %vm1567_vm8, %v1526_v53  ;;  %v4546_v62 = vld [vmem:[#allocation27_spill] sm:$0xff]  ;;  %v4547_v61 = vld [vmem:[#allocation29_spill] sm:$0xff] }
 0x174   : > { %v3464_v39 = vpop.permute.xlu0 %1231  ;;  %1398 = vrot.lane.b32.xlu1 %v2792_v10, %s2708_s14 }
 0x175   : > { %v1247_v16 = vsel %vm1243_vm13, %v1230_v43, %v3464_v39  ;;  %v1524_v41 = vld [vmem:[#allocation2 + $0x2d0] sm:$0x7] }
 0x176   : > { %1266 = vst [vmem:[#allocation2 + $0x298] ss:$-76 sps:$4 sm:$0x83] %v1247_v16   ;;  %1396 = vrot.lane.b32.xlu0 %v2812_v15, %s2708_s14  ;;  %2562 = vmatpush1.msk.msra.mxu0 %vm1567_vm8, %v1524_v41  ;;  %v1291_v55 = vpop.permute.xlu1 %1290 }
 0x178   : > { %v1289_v48 = vpop.permute.xlu0 %1288  ;;  %1233 = vrot.lane.b32.xlu1 %v4539_v63, %s2709_s15 }
 0x179   : > { %v1306_v29 = vsel %vm1304_vm10, %v1287_v8, %v1289_v48  ;;  %v1307_v18 = vsel %vm1304_vm10, %v1289_v48, %v1291_v55 }
 0x17a   : > { %1325 = vst [vmem:[#allocation2 + $0x288] sm:$0x1c] %v1306_v29  ;;  %1326 = vst [vmem:[#allocation2 + $0x290] sm:$0x1c] %v1307_v18  ;;  %1400 = vrot.lane.b32.xlu0 %v2858_v24, %s2708_s14  ;;  %v1337_v38 = vpop.permute.xlu1 %1336  ;;  %v4548_v18 = vld [vmem:[#allocation30_spill] sm:$0xff] }
 0x17c   : > { %v3481_v7 = vpop.permute.xlu0 %1292  ;;  %1237 = vrot.lane.b32.xlu1 %v4540_v4, %s2709_s15 }
 0x17d   : > { %v1308_v58 = vsel %vm1304_vm10, %v1291_v55, %v3481_v7 }
 0x17e   : > { %1327 = vst [vmem:[#allocation2 + $0x298] sm:$0x1c] %v1308_v58  ;;  %1235 = vrot.lane.b32.xlu0 %v4541_v5, %s2709_s15  ;;  %v1341_v46 = vpop.permute.xlu1 %1340 }
 0x180   : > { %v1339_v13 = vpop.permute.xlu0 %1338  ;;  %1294 = vrot.lane.b32.xlu1 %v4542_v2, %s2710_s16 }
 0x181   : > { %v1356_v3 = vsel %vm1354_vm1, %v1337_v38, %v1339_v13  ;;  %v1357_v40 = vsel %vm1354_vm1, %v1339_v13, %v1341_v46 }
 0x182   : > { %1375 = vst [vmem:[#allocation2 + $0x288] sm:$0xe0] %v1356_v3  ;;  %1376 = vst [vmem:[#allocation2 + $0x290] sm:$0xe0] %v1357_v40  ;;  %1239 = vrot.lane.b32.xlu0 %v4543_v1, %s2709_s15  ;;  %v1224_v50 = vpop.permute.xlu1 %1223 }
 0x183   : > { %v1244_v59 = vsel %vm1243_vm13, %v1224_v50, %v1226_v19 }
 0x184   : > { %v3496_v31 = vpop.permute.xlu0 %1342  ;;  %1263 = vst [vmem:[#allocation2 + $0x280] ss:$-76 sps:$4 sm:$0x83] %v1244_v59   ;;  %1298 = vrot.lane.b32.xlu1 %v4544_v28, %s2710_s16 }
 0x185   : > { %v1358_v51 = vsel %vm1354_vm1, %v1341_v46, %v3496_v31 }
 0x186   : > { %1377 = vst [vmem:[#allocation2 + $0x298] sm:$0xe0] %v1358_v51  ;;  %1296 = vrot.lane.b32.xlu0 %v4545_v47, %s2710_s16  ;;  %v1335_v33 = vpop.permute.xlu1 %1334 }
 0x187   : > { %v1355_v11 = vsel %vm1354_vm1, %v1335_v33, %v1337_v38  ;;  %v4549_v33 = vld [vmem:[#allocation19_spill] sm:$0xff] }
 0x188   : > { %v1285_v49 = vpop.permute.xlu0 %1284  ;;  %1374 = vst [vmem:[#allocation2 + $0x280] sm:$0xe0] %v1355_v11  ;;  %1344 = vrot.lane.b32.xlu1 %v3119_v60, %s2711_s17  ;;  %v4550_v11 = vld [vmem:[#allocation15_spill] sm:$0xff] }
 0x189   : > { %v1305_v19 = vsel %vm1304_vm10, %v1285_v49, %v1287_v8  ;;  %v1515_v43 = vld [vmem:[#allocation2 + $0x288] sm:$0xff]  ;;  %v1516_v8 = vld [vmem:[#allocation2 + $0x290] sm:$0xff] }
 0x18a   : > { %1324 = vst [vmem:[#allocation2 + $0x280] sm:$0x1c] %v1305_v19  ;;  %1300 = vrot.lane.b32.xlu0 %v4546_v62, %s2710_s16  ;;  %1612 = vmatprep.subr.mxu0 %v1515_v43  ;;  %v1059_v12 = vpop.permute.xlu1 %1058  ;;  %v4551_v43 = vld [vmem:[#allocation20_spill] sm:$0xff] }
 0x18c   : > { %v1057_v30 = vpop.permute.xlu0 %1056  ;;  %1348 = vrot.lane.b32.xlu1 %v3132_v0, %s2711_s17 }
 0x18d   : > { %v1078_v20 = vsel %vm1076_vm2, %v1057_v30, %v1059_v12  ;;  %v1517_v53 = vld [vmem:[#allocation2 + $0x298] sm:$0xff] }
 0x18e   : > { %1098 = vst [vmem:[#allocation2 + $0x238] ss:$-76 sps:$4 sm:$0xc1] %v1078_v20   ;;  %1346 = vrot.lane.b32.xlu0 %v4547_v61, %s2711_s17  ;;  %1701 = vmatprep.subr.mxu1 %v1517_v53  ;;  %v3515_v16 = vpop.permute.xlu1 %1062 }
 0x18f   : > { %1702 = vmatpush1.msra.mxu1 %v1516_v8 }
 0x190   : > { %v1061_v41 = vpop.permute.xlu0 %1060  ;;  %1064 = vrot.lane.b32.xlu1 %v2895_v32, %s2712_s18 }
 0x191   : > { %v1079_v55 = vsel %vm1076_vm2, %v1059_v12, %v1061_v41  ;;  %v1080_v48 = vsel %vm1076_vm2, %v1061_v41, %v3515_v16  ;;  %v1514_v29 = vld [vmem:[#allocation2 + $0x280] sm:$0xff] }
 0x192   : > { %1099 = vst [vmem:[#allocation2 + $0x240] ss:$-76 sps:$4 sm:$0xc1] %v1079_v55   ;;  %1100 = vst [vmem:[#allocation2 + $0x248] ss:$-76 sps:$4 sm:$0xc1] %v1080_v48   ;;  %1350 = vrot.lane.b32.xlu0 %v4548_v18, %s2711_s17  ;;  %1613 = vmatpush1.msra.mxu0 %v1514_v29  ;;  %v1123_v38 = vpop.permute.xlu1 %1122 }
 0x194   : > { %v1121_v58 = vpop.permute.xlu0 %1120  ;;  %1068 = vrot.lane.b32.xlu1 %v2905_v34, %s2712_s18 }
 0x195   : > { %v1142_v46 = vsel %vm1140_vm9, %v1121_v58, %v1123_v38 }
 0x196   : > { %1162 = vst [vmem:[#allocation2 + $0x238] sm:$0xe] %v1142_v46  ;;  %1066 = vrot.lane.b32.xlu0 %v2909_v35, %s2712_s18  ;;  %v3529_v32 = vpop.permute.xlu1 %1126 }
 0x198   : > { %v1125_v13 = vpop.permute.xlu0 %1124  ;;  %1128 = vrot.lane.b32.xlu1 %v2937_v42, %s2713_s19 }
 0x199   : > { %v1143_v3 = vsel %vm1140_vm9, %v1123_v38, %v1125_v13  ;;  %v1144_v40 = vsel %vm1140_vm9, %v1125_v13, %v3529_v32 }
 0x19a   : > { %1163 = vst [vmem:[#allocation2 + $0x240] sm:$0xe] %v1143_v3  ;;  %1164 = vst [vmem:[#allocation2 + $0x248] sm:$0xe] %v1144_v40  ;;  %1070 = vrot.lane.b32.xlu0 %v2917_v37, %s2712_s18  ;;  %v1177_v34 = vpop.permute.xlu1 %1176 }
 0x19c   : > { %v1175_v50 = vpop.permute.xlu0 %1174  ;;  %1132 = vrot.lane.b32.xlu1 %v2945_v44, %s2713_s19 }
 0x19d   : > { %v1194_v35 = vsel %vm1192_vm7, %v1175_v50, %v1177_v34 }
 0x19e   : > { %1213 = vst [vmem:[#allocation2 + $0x238] sm:$0x70] %v1194_v35  ;;  %1130 = vrot.lane.b32.xlu0 %v2949_v45, %s2713_s19  ;;  %v3543_v59 = vpop.permute.xlu1 %1180 }
 0x1a0   : > { %v1179_v42 = vpop.permute.xlu0 %1178  ;;  %1182 = vrot.lane.b32.xlu1 %v4549_v33, %s2714_s20 }
 0x1a1   : > { %v1195_v51 = vsel %vm1192_vm7, %v1177_v34, %v1179_v42  ;;  %v1196_v37 = vsel %vm1192_vm7, %v1179_v42, %v3543_v59 }
 0x1a2   : > { %1214 = vst [vmem:[#allocation2 + $0x240] sm:$0x70] %v1195_v51  ;;  %1215 = vst [vmem:[#allocation2 + $0x248] sm:$0x70] %v1196_v37  ;;  %1134 = vrot.lane.b32.xlu0 %v4550_v11, %s2713_s19  ;;  %v1119_v44 = vpop.permute.xlu1 %1118  ;;  %v2722_v51 = vmov 0  }
 0x1a3   : > { %v1141_v49 = vsel %vm1140_vm9, %v1119_v44, %v1121_v58  ;;  %2651 = vset.pattern.permute.xlu1 %v2722_v51  ;;  %2652 = vset.pattern.permute.xlu0 %v2722_v51 }
 0x1a4   : > { %v1055_v45 = vpop.permute.xlu0 %1054  ;;  %1161 = vst [vmem:[#allocation2 + $0x230] sm:$0xe] %v1141_v49  ;;  %1186 = vrot.lane.b32.xlu1 %v4551_v43, %s2714_s20 }
 0x1a5   : > { %v1077_v19 = vsel %vm1076_vm2, %v1055_v45, %v1057_v30  ;;  %v1505_v12 = vld [vmem:[#allocation2 + $0x238] sm:$0xff] }
 0x1a6   : > { %1097 = vst [vmem:[#allocation2 + $0x230] ss:$-76 sps:$4 sm:$0xc1] %v1077_v19   ;;  %1184 = vrot.lane.b32.xlu0 %v2789_v9, %s2714_s20  ;;  %1614 = vmatprep.subr.mxu0 %v1505_v12  ;;  %v949_v20 = vpop.permute.xlu1 %948 }
 0x1a8   : > { %v1173_v53 = vpop.permute.xlu0 %1172  ;;  %956 = vrot.lane.b32.xlu1 %v2821_v17, %s2715_s21 }
 0x1a9   : > { %v1193_v8 = vsel %vm1192_vm7, %v1173_v53, %v1175_v50  ;;  %v1507_v41 = vld [vmem:[#allocation2 + $0x248] sm:$0xff]  ;;  %v1506_v55 = vld [vmem:[#allocation2 + $0x240] sm:$0xff] }
 0x1aa   : > { %1212 = vst [vmem:[#allocation2 + $0x230] sm:$0x70] %v1193_v8  ;;  %1188 = vrot.lane.b32.xlu0 %v2792_v10, %s2714_s20  ;;  %1703 = vmatprep.subr.mxu1 %v1507_v41  ;;  %v953_v30 = vpop.permute.xlu1 %952 }
 0x1ab   : > { %1704 = vmatpush1.msra.mxu1 %v1506_v55 }
 0x1ac   : > { %v951_v48 = vpop.permute.xlu0 %950  ;;  %960 = vrot.lane.b32.xlu1 %v2812_v15, %s2715_s21 }
 0x1ad   : > { %v970_v29 = vsel %vm968_vm5, %v949_v20, %v951_v48  ;;  %v971_v38 = vsel %vm968_vm5, %v951_v48, %v953_v30 }
 0x1ae   : > { %990 = vst [vmem:[#allocation2 + $0x1e8] sm:$0x7] %v970_v29  ;;  %991 = vst [vmem:[#allocation2 + $0x1f0] sm:$0x7] %v971_v38  ;;  %958 = vrot.lane.b32.xlu0 %v2789_v9, %s2715_s21  ;;  %v1003_v17 = vpop.permute.xlu1 %1002 }
 0x1b0   : > { %v3569_v58 = vpop.permute.xlu0 %954  ;;  %1010 = vrot.lane.b32.xlu1 %v2844_v21, %s2716_s22 }
 0x1b1   : > { %v972_v46 = vsel %vm968_vm5, %v953_v30, %v3569_v58  ;;  %v1504_v13 = vld [vmem:[#allocation2 + $0x230] sm:$0xff] }
 0x1b2   : > { %992 = vst [vmem:[#allocation2 + $0x1f8] sm:$0x7] %v972_v46  ;;  %962 = vrot.lane.b32.xlu0 %v2792_v10, %s2715_s21  ;;  %1615 = vmatpush1.msra.mxu0 %v1504_v13  ;;  %v1007_v15 = vpop.permute.xlu1 %1006 }
 0x1b4   : > { %v1005_v3 = vpop.permute.xlu0 %1004  ;;  %1014 = vrot.lane.b32.xlu1 %v2854_v23, %s2716_s22 }
 0x1b5   : > { %v1024_v40 = vsel %vm1022_vm4, %v1003_v17, %v1005_v3  ;;  %v1025_v34 = vsel %vm1022_vm4, %v1005_v3, %v1007_v15 }
 0x1b6   : > { %1044 = vst [vmem:[#allocation2 + $0x1e8] sm:$0x38] %v1024_v40  ;;  %1045 = vst [vmem:[#allocation2 + $0x1f0] sm:$0x38] %v1025_v34  ;;  %1012 = vrot.lane.b32.xlu0 %v2863_v25, %s2716_s22  ;;  %v947_v21 = vpop.permute.xlu1 %946 }
 0x1b7   : > { %v969_v50 = vsel %vm968_vm5, %v947_v21, %v949_v20 }
 0x1b8   : > { %v3584_v35 = vpop.permute.xlu0 %1008  ;;  %989 = vst [vmem:[#allocation2 + $0x1e0] sm:$0x7] %v969_v50  ;;  %791 = vrot.lane.b32.xlu1 %v3009_v57, %s2717_s1 }
 0x1b9   : > { %v1026_v42 = vsel %vm1022_vm4, %v1007_v15, %v3584_v35 }
 0x1ba   : > { %1046 = vst [vmem:[#allocation2 + $0x1f8] sm:$0x38] %v1026_v42  ;;  %1016 = vrot.lane.b32.xlu0 %v2873_v27, %s2716_s22  ;;  %v784_v23 = vpop.permute.xlu1 %783 }
 0x1bc   : > { %v1001_v25 = vpop.permute.xlu0 %1000  ;;  %795 = vrot.lane.b32.xlu1 %v4541_v5, %s2717_s1 }
 0x1bd   : > { %v1023_v37 = vsel %vm1022_vm4, %v1001_v25, %v1003_v17  ;;  %v1495_v44 = vld [vmem:[#allocation2 + $0x1e8] sm:$0xff]  ;;  %v1496_v5 = vld [vmem:[#allocation2 + $0x1f0] sm:$0xff] }
 0x1be   : > { %1043 = vst [vmem:[#allocation2 + $0x1e0] sm:$0x38] %v1023_v37  ;;  %793 = vrot.lane.b32.xlu0 %v4539_v63, %s2717_s1  ;;  %1616 = vmatprep.subr.mxu0 %v1495_v44  ;;  %v788_v57 = vpop.permute.xlu1 %787 }
 0x1c0   : > { %v786_v49 = vpop.permute.xlu0 %785  ;;  %851 = vrot.lane.b32.xlu1 %v3055_v6, %s2718_s23 }
 0x1c1   : > { %v803_v27 = vsel %vm801_vm14, %v784_v23, %v786_v49  ;;  %v804_v45 = vsel %vm801_vm14, %v786_v49, %v788_v57  ;;  %v1497_v19 = vld [vmem:[#allocation2 + $0x1f8] sm:$0xff] }
 0x1c2   : > { %822 = vst [vmem:[#allocation2 + $0x198] ss:$-76 sps:$4 sm:$0x83] %v803_v27   ;;  %823 = vst [vmem:[#allocation2 + $0x1a0] ss:$-76 sps:$4 sm:$0x83] %v804_v45   ;;  %797 = vrot.lane.b32.xlu0 %v4540_v4, %s2717_s1  ;;  %1705 = vmatprep.subr.mxu1 %v1497_v19  ;;  %v844_v63 = vpop.permute.xlu1 %843 }
 0x1c3   : > { %1706 = vmatpush1.msra.mxu1 %v1496_v5 }
 0x1c4   : > { %v3603_v12 = vpop.permute.xlu0 %789  ;;  %855 = vrot.lane.b32.xlu1 %v4545_v47, %s2718_s23 }
 0x1c5   : > { %v805_v20 = vsel %vm801_vm14, %v788_v57, %v3603_v12  ;;  %v1494_v53 = vld [vmem:[#allocation2 + $0x1e0] sm:$0xff] }
 0x1c6   : > { %824 = vst [vmem:[#allocation2 + $0x1a8] ss:$-76 sps:$4 sm:$0x83] %v805_v20   ;;  %853 = vrot.lane.b32.xlu0 %v4542_v2, %s2718_s23  ;;  %1617 = vmatpush1.msra.mxu0 %v1494_v53  ;;  %v848_v6 = vpop.permute.xlu1 %847 }
 0x1c8   : > { %v846_v4 = vpop.permute.xlu0 %845  ;;  %903 = vrot.lane.b32.xlu1 %v3102_v54, %s2719_s24 }
 0x1c9   : > { %v863_v8 = vsel %vm4505_vm3, %v844_v63, %v846_v4  ;;  %v864_v41 = vsel %vm4505_vm3, %v846_v4, %v848_v6  ;;  %v4552_v4 = vld [vmem:[#allocation14_spill] sm:$0xff] }
 0x1ca   : > { %882 = vst [vmem:[#allocation2 + $0x198] sm:$0x1c] %v863_v8  ;;  %883 = vst [vmem:[#allocation2 + $0x1a0] sm:$0x1c] %v864_v41  ;;  %857 = vrot.lane.b32.xlu0 %v4544_v28, %s2718_s23  ;;  %v896_v47 = vpop.permute.xlu1 %895  ;;  %v1467_v41 = vld [vmem:[#allocation2 + $0x108] sm:$0xff] }
 0x1cc   : > { %v3617_v55 = vpop.permute.xlu0 %849  ;;  %907 = vrot.lane.b32.xlu1 %v4547_v61, %s2719_s24 }
 0x1cd   : > { %v865_v2 = vsel %vm4505_vm3, %v848_v6, %v3617_v55 }
 0x1ce   : > { %884 = vst [vmem:[#allocation2 + $0x1a8] sm:$0x1c] %v865_v2  ;;  %905 = vrot.lane.b32.xlu0 %v3119_v60, %s2719_s24  ;;  %v900_v54 = vpop.permute.xlu1 %899 }
 0x1d0   : > { %v898_v30 = vpop.permute.xlu0 %897  ;;  %697 = vrot.lane.b32.xlu1 %v4550_v11, %s2707_s13  ;;  %v3641_v11 = vld [vmem:[%s2783_s30 + $0x28] sm:$0x7]  ;;  %s4335_s30 = scalar_lea.vmem %s4452_s3, %s2593_s27 }
 0x1d1   : > { %v917_v48 = vsel %vm915_vm0, %v896_v47, %v898_v30  ;;  %v918_v28 = vsel %vm915_vm0, %v898_v30, %v900_v54  ;;  %v1222_v3 = vrot.slane %v3641_v11, 1  ;;  %v892_v21 = vrot.slane %v3641_v11, 3 }
 0x1d2   : > { %937 = vst [vmem:[#allocation2 + $0x198] sm:$0xe0] %v917_v48  ;;  %938 = vst [vmem:[#allocation2 + $0x1a0] sm:$0xe0] %v918_v28  ;;  %909 = vrot.lane.b32.xlu0 %v3132_v0, %s2719_s24  ;;  %v782_v61 = vpop.permute.xlu1 %781  ;;  %v1283_v50 = vrot.slane %v3641_v11, 6  ;;  %v1053_v37 = vrot.slane %v3641_v11, 2 }
 0x1d3   : > { %v802_v29 = vsel %vm801_vm14, %v782_v61, %v784_v23  ;;  %v1117_v19 = vrot.slane %v3641_v11, 7  ;;  %v1457_v28 = vld [vmem:[#allocation2 + $0xb8] sm:$0xff] }
 0x1d4   : > { %v3632_v60 = vpop.permute.xlu0 %901  ;;  %821 = vst [vmem:[#allocation2 + $0x190] ss:$-76 sps:$4 sm:$0x83] %v802_v29   ;;  %743 = vrot.lane.b32.xlu1 %v4549_v33, %s2720_s25  ;;  %v1465_v61 = vld [vmem:[#allocation2 + $0xf8] sm:$0xff] }
 0x1d5   : > { %v919_v38 = vsel %vm915_vm0, %v900_v54, %v3632_v60  ;;  %v1466_v54 = vld [vmem:[#allocation2 + $0x100] sm:$0xff] }
 0x1d6   : > { %939 = vst [vmem:[#allocation2 + $0x1a8] sm:$0xe0] %v919_v38  ;;  %741 = vrot.lane.b32.xlu0 %v2808_v14, %s2720_s25  ;;  %v894_v17 = vpop.permute.xlu1 %893  ;;  %v1464_v38 = vld [vmem:[#allocation2 + $0xf0] sm:$0xff] }
 0x1d7   : > { %v916_v0 = vsel %vm915_vm0, %v894_v17, %v896_v47  ;;  %v1447_v17 = vld [vmem:[#allocation2 + $0x68] sm:$0xff] }
 0x1d8   : > { %v842_v46 = vpop.permute.xlu0 %841  ;;  %936 = vst [vmem:[#allocation2 + $0x190] sm:$0xe0] %v916_v0  ;;  %747 = vrot.lane.b32.xlu1 %v4551_v43, %s2720_s25 }
 0x1d9   : > { %v862_v13 = vsel %vm4505_vm3, %v842_v46, %v844_v63  ;;  %v1485_v15 = vld [vmem:[#allocation2 + $0x198] sm:$0xff]  ;;  %v1486_v43 = vld [vmem:[#allocation2 + $0x1a0] sm:$0xff]  ;;  %v1455_v46 = vld [vmem:[#allocation2 + $0xa8] sm:$0xff] }
 0x1da   : > { %881 = vst [vmem:[#allocation2 + $0x190] sm:$0x1c] %v862_v13  ;;  %745 = vrot.lane.b32.xlu0 %v2789_v9, %s2720_s25  ;;  %1618 = vmatprep.subr.mxu0 %v1485_v15  ;;  %v736_v14 = vpop.permute.xlu1 %735  ;;  %v1446_v15 = vld [vmem:[#allocation2 + $0x60] sm:$0xff] }
 0x1dc   : > { %v734_v33 = vpop.permute.xlu0 %733  ;;  %1241 = vrot.lane.b32.xlu1 %v1222_v3, %s2709_s15  ;;  %v1454_v3 = vld [vmem:[#allocation2 + $0xa0] sm:$0xff] }
 0x1dd   : > { %v753_v40 = vsel %vm4507_vm12, %v734_v33, %v736_v14  ;;  %v1487_v34 = vld [vmem:[#allocation2 + $0x1a8] sm:$0xff] }
 0x1de   : > { %772 = vst [vmem:[#allocation2 + $0x148] sm:$0x70] %v753_v40  ;;  %1402 = vrot.lane.b32.xlu0 %v3641_v11, %s2708_s14  ;;  %1707 = vmatprep.subr.mxu1 %v1487_v34  ;;  %v3656_v9 = vpop.permute.xlu1 %739  ;;  %v999_v34 = vrot.slane %v3641_v11, 5 }
 0x1df   : > { %1708 = vmatpush1.msra.mxu1 %v1486_v43  ;;  %v1436_v43 = vld [vmem:[#allocation2 + $0x10] sm:$0xff] }
 0x1e0   : > { %v738_v42 = vpop.permute.xlu0 %737  ;;  %1352 = vrot.lane.b32.xlu1 %v892_v21, %s2711_s17 }
 0x1e1   : > { %v754_v23 = vsel %vm4507_vm12, %v736_v14, %v738_v42  ;;  %v755_v51 = vsel %vm4507_vm12, %v738_v42, %v3656_v9  ;;  %v1484_v25 = vld [vmem:[#allocation2 + $0x190] sm:$0xff]  ;;  %v1437_v14 = vld [vmem:[#allocation2 + $0x18] sm:$0xff] }
 0x1e2   : > { %773 = vst [vmem:[#allocation2 + $0x150] sm:$0x70] %v754_v23  ;;  %774 = vst [vmem:[#allocation2 + $0x158] sm:$0x70] %v755_v51  ;;  %1302 = vrot.lane.b32.xlu0 %v1283_v50, %s2710_s16  ;;  %1619 = vmatpush1.msra.mxu0 %v1484_v25  ;;  %v1395_v44 = vpop.permute.xlu1 %1394  ;;  %v1444_v42 = vld [vmem:[#allocation2 + $0x50] sm:$0xff]  ;;  %v1435_v51 = vld [vmem:[#allocation2 + $0x8] sm:$0xff] }
 0x1e3   : > { %v1409_v57 = vsel %vm4504_vm6, %v3441_v22, %v1395_v44 }
 0x1e4   : > { %v732_v49 = vpop.permute.xlu0 %731  ;;  %1428 = vst [vmem:[#allocation2 + $0x2f0] sm:$0x7] %v1409_v57  ;;  %1074 = vrot.lane.b32.xlu1 %v1053_v37, %s2712_s18  ;;  %v1434_v37 = vld [vmem:[#allocation2] sm:$0xff] }
 0x1e5   : > { %v752_v27 = vsel %vm4507_vm12, %v732_v49, %v734_v33  ;;  %v1475_v45 = vld [vmem:[#allocation2 + $0x148] sm:$0xff]  ;;  %v1445_v33 = vld [vmem:[#allocation2 + $0x58] sm:$0xff] }
 0x1e6   : > { %771 = vst [vmem:[#allocation2 + $0x140] sm:$0x70] %v752_v27  ;;  %1072 = vrot.lane.b32.xlu0 %v2913_v36, %s2712_s18  ;;  %1620 = vmatprep.subr.mxu0 %v1475_v45  ;;  %v1399_v5 = vpop.permute.xlu1 %1398  ;;  %v1171_v36 = vcombine.low %v3641_v11, %v3641_v11 }
 0x1e8   : > { %v1397_v63 = vpop.permute.xlu0 %1396  ;;  %1138 = vrot.lane.b32.xlu1 %v1117_v19, %s2713_s19 }
 0x1e9   : > { %v1410_v20 = vsel %vm4504_vm6, %v1395_v44, %v1397_v63  ;;  %v1411_v22 = vsel %vm4504_vm6, %v1397_v63, %v1399_v5  ;;  %v1477_v53 = vld [vmem:[#allocation2 + $0x158] sm:$0xff]  ;;  %v1476_v6 = vld [vmem:[#allocation2 + $0x150] sm:$0xff]  ;;  %v4553_v44 = vld [vmem:[#allocation6_spill] sm:$0xff] }
 0x1ea   : > { %1429 = vst [vmem:[#allocation2 + $0x2f8] sm:$0x7] %v1410_v20  ;;  %1430 = vst [vmem:[#allocation2 + $0x300] sm:$0x7] %v1411_v22  ;;  %1136 = vrot.lane.b32.xlu0 %v4552_v4, %s2713_s19  ;;  %1709 = vmatprep.subr.mxu1 %v1477_v53  ;;  %v1234_v8 = vpop.permute.xlu1 %1233  ;;  %v4554_v53 = vld [vmem:[#allocation7_spill] sm:$0xff] }
 0x1eb   : > { %1710 = vmatpush1.msra.mxu1 %v1476_v6  ;;  %v1248_v47 = vsel %vm1243_vm13, %v3464_v39, %v1234_v8  ;;  %v1456_v39 = vld [vmem:[#allocation2 + $0xb0] sm:$0xff] }
 0x1ec   : > { %1711 = vmatprep.subr.mxu1 %v1467_v41  ;;  %v3682_v2 = vpop.permute.xlu0 %1400  ;;  %1267 = vst [vmem:[#allocation2 + $0x2a0] ss:$-76 sps:$4 sm:$0x83] %v1248_v47   ;;  %964 = vrot.lane.b32.xlu1 %v2858_v24, %s2715_s21  ;;  %v1528_v19 = vld [vmem:[#allocation2 + $0x2f0] sm:$0x7]  ;;  %v4557_v47 = vld [vmem:[#allocation9_spill] sm:$0xff] }
 0x1ed   : > { %v1412_v30 = vsel %vm4504_vm6, %v1399_v5, %v3682_v2  ;;  %1712 = vmatpush1.msra.mxu1 %v1466_v54  ;;  %v1474_v48 = vld [vmem:[#allocation2 + $0x140] sm:$0xff]  ;;  %vm1554_vm6 = vcmask 613376   ;;  %v4555_v6 = vld [vmem:[#allocation8_spill] sm:$0xff] }
 0x1ee   : > { %1431 = vst [vmem:[#allocation2 + $0x308] sm:$0x7] %v1412_v30  ;;  %1190 = vrot.lane.b32.xlu0 %v1171_v36, %s2714_s20  ;;  %1621 = vmatpush1.msra.mxu0 %v1474_v48  ;;  %v1238_v29 = vpop.permute.xlu1 %1237  ;;  %v4558_v54 = vld [vmem:[#allocation12_spill] sm:$0xff] }
 0x1ef   : > { %1713 = vmatprep.subr.mxu1 %v1457_v28  ;;  %1622 = vmatprep.subr.mxu0 %v1465_v61 }
 0x1f0   : > { %1714 = vmatpush1.msra.mxu1 %v1456_v39  ;;  %1623 = vmatpush1.msra.mxu0 %v1464_v38  ;;  %v1236_v0 = vpop.permute.xlu0 %1235  ;;  %v4560_v38 = vld [vmem:[#allocation13_spill] sm:$0xff] }
 0x1f1   : > { %1715 = vmatprep.subr.mxu1 %v1447_v17  ;;  %v1249_v24 = vsel %vm1243_vm13, %v1234_v8, %v1236_v0  ;;  %v1250_v13 = vsel %vm1243_vm13, %v1236_v0, %v1238_v29  ;;  %1624 = vmatprep.subr.mxu0 %v1455_v46  ;;  %v1529_v57 = vld [vmem:[#allocation2 + $0x2f8] sm:$0x7]  ;;  %v1530_v27 = vld [vmem:[#allocation2 + $0x300] sm:$0x7] }
 0x1f2   : > { %1268 = vst [vmem:[#allocation2 + $0x2a8] ss:$-76 sps:$4 sm:$0x83] %v1249_v24   ;;  %1269 = vst [vmem:[#allocation2 + $0x2b0] ss:$-76 sps:$4 sm:$0x83] %v1250_v13   ;;  %1716 = vmatpush1.msra.mxu1 %v1446_v15  ;;  %1018 = vrot.lane.b32.xlu1 %v2868_v26, %s2716_s22  ;;  %v1295_v40 = vpop.permute.xlu1 %1294 }
 0x1f3   : > { %966 = vrot.lane.b32.xlu0 %v3641_v11, %s2715_s21  ;;  %1625 = vmatpush1.msra.mxu0 %v1454_v3  ;;  %v1309_v50 = vsel %vm1304_vm10, %v3481_v7, %v1295_v40 }
 0x1f4   : > { %1717 = vmatprep.subr.mxu1 %v1437_v14  ;;  %1626 = vmatprep.subr.mxu0 %v1445_v33  ;;  %v3698_v23 = vpop.permute.xlu0 %1239  ;;  %1328 = vst [vmem:[#allocation2 + $0x2a0] sm:$0x1c] %v1309_v50 }
 0x1f5   : > { %1718 = vmatpush1.msra.mxu1 %v1436_v43  ;;  %1627 = vmatpush1.msra.mxu0 %v1444_v42  ;;  %v1251_v26 = vsel %vm1243_vm13, %v1238_v29, %v3698_v23  ;;  %v1531_v25 = vld [vmem:[#allocation2 + $0x308] sm:$0x7] }
 0x1f6   : > { %1270 = vst [vmem:[#allocation2 + $0x2b8] ss:$-76 sps:$4 sm:$0x83] %v1251_v26   ;;  %1628 = vmatprep.subr.mxu0 %v1435_v51  ;;  %911 = vrot.lane.b32.xlu1 %v4548_v18, %s2719_s24  ;;  %v1299_v7 = vpop.permute.xlu1 %1298 }
 0x1f7   : > { %1020 = vrot.lane.b32.xlu0 %v999_v34, %s2716_s22  ;;  %1629 = vmatpush1.msra.mxu0 %v1434_v37 }
 0x1f8   : > { %2579 = vmatprep.subr.msk.mxu1 %vm1567_vm8, %v1531_v25  ;;  %2563 = vmatmul.mubr.msk.f32.vlgmr.msra.gmra.mxu0 %vm1554_vm6, %v4553_v44  ;;  %v1297_v49 = vpop.permute.xlu0 %1296 }
 0x1f9   : > { %2569 = vmatmul.mubr.msk.f32.vlgmr.msra.gmra.mxu1 %vm1554_vm6, %v4553_v44  ;;  %2573 = vmatprep.subr.msk.mxu0 %vm1567_vm8, %v1529_v57  ;;  %v1310_v18 = vsel %vm1304_vm10, %v1295_v40, %v1297_v49  ;;  %v1311_v45 = vsel %vm1304_vm10, %v1297_v49, %v1299_v7 }
 0x1fa   : > { %2580 = vmatpush1.msk.msra.mxu1 %vm1567_vm8, %v1530_v27  ;;  %1329 = vst [vmem:[#allocation2 + $0x2a8] sm:$0x1c] %v1310_v18  ;;  %1330 = vst [vmem:[#allocation2 + $0x2b0] sm:$0x1c] %v1311_v45  ;;  %2574 = vmatpush1.msk.msra.mxu0 %vm1567_vm8, %v1528_v19  ;;  %v1345_v5 = vpop.permute.xlu1 %1344 }
 0x1fb   : > { %799 = vrot.lane.b32.xlu1 %v4543_v1, %s2717_s1  ;;  %913 = vrot.lane.b32.xlu0 %v892_v21, %s2719_s24  ;;  %v1359_v63 = vsel %vm1354_vm1, %v3496_v31, %v1345_v5 }
 0x1fc   : > { %v3722_v20 = vpop.permute.xlu0 %1300  ;;  %1668 = vmatprep.mubr.f32.mxu0 %v2721_v56  ;;  %1757 = vmatprep.mubr.f32.mxu1 %v2721_v56  ;;  %1378 = vst [vmem:[#allocation2 + $0x2a0] sm:$0xe0] %v1359_v63 }
 0x1fd   : > { %v1312_v22 = vsel %vm1304_vm10, %v1299_v7, %v3722_v20  ;;  %2564 = vmatmul.mubr.msk.f32.gmra.mxu0 %vm1554_vm6, %v4554_v53  ;;  %2570 = vmatmul.mubr.msk.f32.gmra.mxu1 %vm1554_vm6, %v4554_v53 }
 0x1fe   : > { %1331 = vst [vmem:[#allocation2 + $0x2b8] sm:$0x1c] %v1312_v22  ;;  %1674 = vmatprep.mubr.f32.mxu0 %v2721_v56  ;;  %1763 = vmatprep.mubr.f32.mxu1 %v2721_v56  ;;  %v1349_v1 = vpop.permute.xlu1 %1348 }
 0x1ff   : > { %699 = vrot.lane.b32.xlu1 %v4552_v4, %s2707_s13  ;;  %859 = vrot.lane.b32.xlu0 %v4546_v62, %s2718_s23  ;;  %v4556_v4 = vld [vmem:[#allocation10_spill] sm:$0xff] }
 0x200   : > { %v1347_v31 = vpop.permute.xlu0 %1346 }
 0x201   : > { %v1360_v11 = vsel %vm1354_vm1, %v1345_v5, %v1347_v31  ;;  %v1361_v21 = vsel %vm1354_vm1, %v1347_v31, %v1349_v1  ;;  %2565 = vmatmul.mubr.msk.f32.gmra.mxu0 %vm1554_vm6, %v4555_v6  ;;  %2571 = vmatmul.mubr.msk.f32.gmra.mxu1 %vm1554_vm6, %v4555_v6 }
 0x202   : > { %1379 = vst [vmem:[#allocation2 + $0x2a8] sm:$0xe0] %v1360_v11  ;;  %1380 = vst [vmem:[#allocation2 + $0x2b0] sm:$0xe0] %v1361_v21  ;;  %1680 = vmatprep.mubr.f32.mxu0 %v2721_v56  ;;  %1769 = vmatprep.mubr.f32.mxu1 %v2721_v56  ;;  %v1065_v62 = vpop.permute.xlu1 %1064 }
 0x203   : > { %749 = vrot.lane.b32.xlu0 %v2792_v10, %s2720_s25  ;;  %1536 = vperm.xlu1 %2651, %v4556_v4   ;;  %v1081_v36 = vsel %vm1076_vm2, %v3515_v16, %v1065_v62  ;;  %v4559_v16 = vld [vmem:[#allocation11_spill] sm:$0xff]  ;;  %v1518_v39 = vld [vmem:[#allocation2 + $0x2a0] sm:$0xff] }
 0x204   : > { %v3751_v8 = vpop.permute.xlu0 %1350  ;;  %1101 = vst [vmem:[#allocation2 + $0x250] ss:$-76 sps:$4 sm:$0xc1] %v1081_v36  }
 0x205   : > { %v1362_v41 = vsel %vm1354_vm1, %v1349_v1, %v3751_v8  ;;  %2566 = vmatmul.mubr.msk.f32.gmra.mxu0 %vm1554_vm6, %v4557_v47  ;;  %2572 = vmatmul.mubr.msk.f32.gmra.mxu1 %vm1554_vm6, %v4557_v47 }
 0x206   : > { %1381 = vst [vmem:[#allocation2 + $0x2b8] sm:$0xe0] %v1362_v41  ;;  %1840 = vmatprep.mubr.f32.mxu0 %v2721_v56  ;;  %1929 = vmatprep.mubr.f32.mxu1 %v2721_v56  ;;  %v1069_v10 = vpop.permute.xlu1 %1068 }
 0x207   : > { %1546 = vperm.xlu1 %2651, %v4558_v54   ;;  %1541 = vperm.xlu0 %2652, %v4559_v16  }
 0x208   : > { %v1067_v30 = vpop.permute.xlu0 %1066 }
 0x209   : > { %v1082_v48 = vsel %vm1076_vm2, %v1065_v62, %v1067_v30  ;;  %v1083_v28 = vsel %vm1076_vm2, %v1067_v30, %v1069_v10  ;;  %v1519_v61 = vld [vmem:[#allocation2 + $0x2a8] sm:$0xff]  ;;  %v1520_v13 = vld [vmem:[#allocation2 + $0x2b0] sm:$0xff] }
 0x20a   : > { %1102 = vst [vmem:[#allocation2 + $0x258] ss:$-76 sps:$4 sm:$0xc1] %v1082_v48   ;;  %1103 = vst [vmem:[#allocation2 + $0x260] ss:$-76 sps:$4 sm:$0xc1] %v1083_v28   ;;  %1790 = vmatprep.subr.mxu0 %v1519_v61  ;;  %v1129_v29 = vpop.permute.xlu1 %1128 }
 0x20b   : > { %1791 = vmatpush1.msra.mxu0 %v1518_v39  ;;  %1551 = vperm.xlu1 %2651, %v4560_v38   ;;  %v1145_v17 = vsel %vm1140_vm9, %v3529_v32, %v1129_v29 }
 0x20c   : > { %v3768_v0 = vpop.permute.xlu0 %1070  ;;  %1165 = vst [vmem:[#allocation2 + $0x250] sm:$0xe] %v1145_v17 }
 0x20d   : > { %v1084_v46 = vsel %vm1076_vm2, %v1069_v10, %v3768_v0  ;;  %v1521_v24 = vld [vmem:[#allocation2 + $0x2b8] sm:$0xff] }
 0x20e   : > { %1104 = vst [vmem:[#allocation2 + $0x268] ss:$-76 sps:$4 sm:$0xc1] %v1084_v46   ;;  %1879 = vmatprep.subr.mxu1 %v1521_v24  ;;  %v1133_v15 = vpop.permute.xlu1 %1132 }
 0x20f   : > { %1880 = vmatpush1.msra.mxu1 %v1520_v13 }
 0x210   : > { %v1131_v3 = vpop.permute.xlu0 %1130 }
 0x211   : > { %v1146_v14 = vsel %vm1140_vm9, %v1129_v29, %v1131_v3  ;;  %v1147_v33 = vsel %vm1140_vm9, %v1131_v3, %v1133_v15 }
 0x212   : > { %1166 = vst [vmem:[#allocation2 + $0x258] sm:$0xe] %v1146_v14  ;;  %1167 = vst [vmem:[#allocation2 + $0x260] sm:$0xe] %v1147_v33  ;;  %v1183_v32 = vpop.permute.xlu1 %1182 }
 0x213   : > { %v1197_v40 = vsel %vm1192_vm7, %v3543_v59, %v1183_v32 }
 0x214   : > { %v3776_v34 = vpop.permute.xlu0 %1134  ;;  %1216 = vst [vmem:[#allocation2 + $0x250] sm:$0x70] %v1197_v40 }
 0x215   : > { %v1148_v43 = vsel %vm1140_vm9, %v1133_v15, %v3776_v34 }
 0x216   : > { %1168 = vst [vmem:[#allocation2 + $0x268] sm:$0xe] %v1148_v43  ;;  %v1187_v50 = vpop.permute.xlu1 %1186 }
 0x218   : > { %v1185_v42 = vpop.permute.xlu0 %1184 }
 0x219   : > { %v1198_v26 = vsel %vm1192_vm7, %v1183_v32, %v1185_v42  ;;  %v1199_v51 = vsel %vm1192_vm7, %v1185_v42, %v1187_v50 }
 0x21a   : > { %1217 = vst [vmem:[#allocation2 + $0x258] sm:$0x70] %v1198_v26  ;;  %1218 = vst [vmem:[#allocation2 + $0x260] sm:$0x70] %v1199_v51  ;;  %v957_v25 = vpop.permute.xlu1 %956 }
 0x21b   : > { %v973_v37 = vsel %vm968_vm5, %v3569_v58, %v957_v25  ;;  %v1508_v19 = vld [vmem:[#allocation2 + $0x250] sm:$0xff] }
 0x21c   : > { %v3784_v59 = vpop.permute.xlu0 %1188  ;;  %993 = vst [vmem:[#allocation2 + $0x200] sm:$0x7] %v973_v37 }
 0x21d   : > { %v1200_v7 = vsel %vm1192_vm7, %v1187_v50, %v3784_v59 }
 0x21e   : > { %1219 = vst [vmem:[#allocation2 + $0x268] sm:$0x70] %v1200_v7  ;;  %v961_v57 = vpop.permute.xlu1 %960 }
 0x220   : > { %v959_v49 = vpop.permute.xlu0 %958 }
 0x221   : > { %v974_v27 = vsel %vm968_vm5, %v957_v25, %v959_v49  ;;  %v975_v18 = vsel %vm968_vm5, %v959_v49, %v961_v57  ;;  %v1509_v45 = vld [vmem:[#allocation2 + $0x258] sm:$0xff]  ;;  %v1510_v31 = vld [vmem:[#allocation2 + $0x260] sm:$0xff] }
 0x222   : > { %994 = vst [vmem:[#allocation2 + $0x208] sm:$0x7] %v974_v27  ;;  %995 = vst [vmem:[#allocation2 + $0x210] sm:$0x7] %v975_v18  ;;  %1792 = vmatprep.subr.mxu0 %v1509_v45  ;;  %v1011_v58 = vpop.permute.xlu1 %1010 }
 0x223   : > { %1793 = vmatpush1.msra.mxu0 %v1508_v19  ;;  %v1027_v5 = vsel %vm1022_vm4, %v3584_v35, %v1011_v58 }
 0x224   : > { %v3792_v63 = vpop.permute.xlu0 %962  ;;  %1047 = vst [vmem:[#allocation2 + $0x200] sm:$0x38] %v1027_v5 }
 0x225   : > { %v976_v22 = vsel %vm968_vm5, %v961_v57, %v3792_v63  ;;  %v1511_v1 = vld [vmem:[#allocation2 + $0x268] sm:$0xff] }
 0x226   : > { %996 = vst [vmem:[#allocation2 + $0x218] sm:$0x7] %v976_v22  ;;  %1881 = vmatprep.subr.mxu1 %v1511_v1  ;;  %v1015_v11 = vpop.permute.xlu1 %1014 }
 0x227   : > { %1882 = vmatpush1.msra.mxu1 %v1510_v31 }
 0x228   : > { %v1013_v21 = vpop.permute.xlu0 %1012 }
 0x229   : > { %v1028_v62 = vsel %vm1022_vm4, %v1011_v58, %v1013_v21  ;;  %v1029_v4 = vsel %vm1022_vm4, %v1013_v21, %v1015_v11 }
 0x22a   : > { %1048 = vst [vmem:[#allocation2 + $0x208] sm:$0x38] %v1028_v62  ;;  %1049 = vst [vmem:[#allocation2 + $0x210] sm:$0x38] %v1029_v4  ;;  %v792_v35 = vpop.permute.xlu1 %791 }
 0x22b   : > { %v806_v36 = vsel %vm801_vm14, %v3603_v12, %v792_v35  ;;  %v1498_v61 = vld [vmem:[#allocation2 + $0x200] sm:$0xff] }
 0x22c   : > { %v3800_v41 = vpop.permute.xlu0 %1016  ;;  %825 = vst [vmem:[#allocation2 + $0x1b0] ss:$-76 sps:$4 sm:$0x83] %v806_v36  }
 0x22d   : > { %v1030_v10 = vsel %vm1022_vm4, %v1015_v11, %v3800_v41 }
 0x22e   : > { %1050 = vst [vmem:[#allocation2 + $0x218] sm:$0x38] %v1030_v10  ;;  %v796_v54 = vpop.permute.xlu1 %795  ;;  %v1468_v10 = vld [vmem:[#allocation2 + $0x110] sm:$0xff] }
 0x230   : > { %v794_v16 = vpop.permute.xlu0 %793 }
 0x231   : > { %v807_v30 = vsel %vm801_vm14, %v792_v35, %v794_v16  ;;  %v808_v48 = vsel %vm801_vm14, %v794_v16, %v796_v54  ;;  %v1499_v28 = vld [vmem:[#allocation2 + $0x208] sm:$0xff]  ;;  %v1500_v46 = vld [vmem:[#allocation2 + $0x210] sm:$0xff]  ;;  %v1469_v35 = vld [vmem:[#allocation2 + $0x118] sm:$0xff] }
 0x232   : > { %826 = vst [vmem:[#allocation2 + $0x1b8] ss:$-76 sps:$4 sm:$0x83] %v807_v30   ;;  %827 = vst [vmem:[#allocation2 + $0x1c0] ss:$-76 sps:$4 sm:$0x83] %v808_v48   ;;  %1794 = vmatprep.subr.mxu0 %v1499_v28  ;;  %v852_v12 = vpop.permute.xlu1 %851 }
 0x233   : > { %1795 = vmatpush1.msra.mxu0 %v1498_v61  ;;  %v866_v39 = vsel %vm4505_vm3, %v3617_v55, %v852_v12  ;;  %v1458_v48 = vld [vmem:[#allocation2 + $0xc0] sm:$0xff]  ;;  %v1471_v28 = vld [vmem:[#allocation2 + $0x128] sm:$0xff]  ;;  %v1449_v61 = vld [vmem:[#allocation2 + $0x78] sm:$0xff] }
 0x234   : > { %v3808_v29 = vpop.permute.xlu0 %797  ;;  %885 = vst [vmem:[#allocation2 + $0x1b0] sm:$0x1c] %v866_v39  ;;  %v1448_v39 = vld [vmem:[#allocation2 + $0x70] sm:$0xff] }
 0x235   : > { %v809_v38 = vsel %vm801_vm14, %v796_v54, %v3808_v29  ;;  %v1501_v17 = vld [vmem:[#allocation2 + $0x218] sm:$0xff]  ;;  %v1459_v54 = vld [vmem:[#allocation2 + $0xc8] sm:$0xff] }
 0x236   : > { %828 = vst [vmem:[#allocation2 + $0x1c8] ss:$-76 sps:$4 sm:$0x83] %v809_v38   ;;  %1883 = vmatprep.subr.mxu1 %v1501_v17  ;;  %v856_v24 = vpop.permute.xlu1 %855 }
 0x237   : > { %1884 = vmatpush1.msra.mxu1 %v1500_v46  ;;  %v1439_v46 = vld [vmem:[#allocation2 + $0x28] sm:$0xff] }
 0x238   : > { %v854_v13 = vpop.permute.xlu0 %853 }
 0x239   : > { %v867_v15 = vsel %vm4505_vm3, %v852_v12, %v854_v13  ;;  %v868_v3 = vsel %vm4505_vm3, %v854_v13, %v856_v24  ;;  %v1438_v13 = vld [vmem:[#allocation2 + $0x20] sm:$0xff] }
 0x23a   : > { %886 = vst [vmem:[#allocation2 + $0x1b8] sm:$0x1c] %v867_v15  ;;  %887 = vst [vmem:[#allocation2 + $0x1c0] sm:$0x1c] %v868_v3  ;;  %v904_v55 = vpop.permute.xlu1 %903  ;;  %v1460_v15 = vld [vmem:[#allocation2 + $0xd0] sm:$0xff] }
 0x23b   : > { %v920_v14 = vsel %vm915_vm0, %v3632_v60, %v904_v55 }
 0x23c   : > { %v3816_v33 = vpop.permute.xlu0 %857  ;;  %940 = vst [vmem:[#allocation2 + $0x1b0] sm:$0xe0] %v920_v14 }
 0x23d   : > { %v869_v32 = vsel %vm4505_vm3, %v856_v24, %v3816_v33  ;;  %vm4561_vm3 = vcmask 295936   ;;  %v1461_v24 = vld [vmem:[#allocation2 + $0xd8] sm:$0xff] }
 0x23e   : > { %888 = vst [vmem:[#allocation2 + $0x1c8] sm:$0x1c] %v869_v32  ;;  %v908_v40 = vpop.permute.xlu1 %907  ;;  %v1450_v32 = vld [vmem:[#allocation2 + $0x80] sm:$0xff] }
 0x240   : > { %v906_v43 = vpop.permute.xlu0 %905 }
 0x241   : > { %v921_v50 = vsel %vm915_vm0, %v904_v55, %v906_v43  ;;  %v922_v42 = vsel %vm915_vm0, %v906_v43, %v908_v40  ;;  %v1451_v55 = vld [vmem:[#allocation2 + $0x88] sm:$0xff] }
 0x242   : > { %941 = vst [vmem:[#allocation2 + $0x1b8] sm:$0xe0] %v921_v50  ;;  %942 = vst [vmem:[#allocation2 + $0x1c0] sm:$0xe0] %v922_v42  ;;  %v3822_v26 = vpop.permute.xlu1 %697 }
 0x243   : > { %v709_v60 = vsel %vm4506_vm15, %v3424_v52, %v3822_v26  ;;  %v1488_v18 = vld [vmem:[#allocation2 + $0x1b0] sm:$0xff]  ;;  %vm4562_vm15 = vcmask 883712  }
 0x244   : > { %v3827_v51 = vpop.permute.xlu0 %909  ;;  %728 = vst [vmem:[#allocation2 + $0x178] sm:$0xe] %v709_v60  ;;  %v1441_v60 = vld [vmem:[#allocation2 + $0x38] sm:$0xff] }
 0x245   : > { %v923_v25 = vsel %vm915_vm0, %v908_v40, %v3827_v51 }
 0x246   : > { %943 = vst [vmem:[#allocation2 + $0x1c8] sm:$0xe0] %v923_v25  ;;  %v744_v37 = vpop.permute.xlu1 %743 }
 0x248   : > { %v742_v7 = vpop.permute.xlu0 %741 }
 0x249   : > { %v756_v57 = vsel %vm4507_vm12, %v3656_v9, %v742_v7  ;;  %v757_v49 = vsel %vm4507_vm12, %v742_v7, %v744_v37  ;;  %v1489_v27 = vld [vmem:[#allocation2 + $0x1b8] sm:$0xff]  ;;  %v1490_v9 = vld [vmem:[#allocation2 + $0x1c0] sm:$0xff] }
 0x24a   : > { %775 = vst [vmem:[#allocation2 + $0x160] sm:$0x70] %v756_v57  ;;  %776 = vst [vmem:[#allocation2 + $0x168] sm:$0x70] %v757_v49  ;;  %1796 = vmatprep.subr.mxu0 %v1489_v27  ;;  %v3834_v52 = vpop.permute.xlu1 %747 }
 0x24b   : > { %1797 = vmatpush1.msra.mxu0 %v1488_v18 }
 0x24c   : > { %v746_v45 = vpop.permute.xlu0 %745 }
 0x24d   : > { %v758_v19 = vsel %vm4507_vm12, %v744_v37, %v746_v45  ;;  %v759_v58 = vsel %vm4507_vm12, %v746_v45, %v3834_v52  ;;  %v1491_v5 = vld [vmem:[#allocation2 + $0x1c8] sm:$0xff]  ;;  %vm4563_vm12 = vcmask 296960   ;;  %v1440_v37 = vld [vmem:[#allocation2 + $0x30] sm:$0xff] }
 0x24e   : > { %777 = vst [vmem:[#allocation2 + $0x170] sm:$0x70] %v758_v19  ;;  %778 = vst [vmem:[#allocation2 + $0x178] sm:$0x70] %v759_v58  ;;  %1885 = vmatprep.subr.mxu1 %v1491_v5  ;;  %v1242_v22 = vpop.permute.xlu1 %1241 }
 0x24f   : > { %1886 = vmatpush1.msra.mxu1 %v1490_v9  ;;  %v1252_v1 = vsel %vm1243_vm13, %v3698_v23, %v1242_v22  ;;  %1272 = vst.msk [vmem:[#allocation2 + $0x278] sm:$0x80] %vm386_vm11, %v1242_v22  ;;  %vm4564_vm13 = vcmask 302085  }
 0x250   : > { %1282 = vst.msk [vmem:[#allocation2 + $0x2c8] sm:$0x3] %vm4561_vm3, %v1242_v22  ;;  %v1403_v31 = vpop.permute.xlu0 %1402  ;;  %1271 = vst [vmem:[#allocation2 + $0x2c0] ss:$-76 sps:$4 sm:$0x83] %v1252_v1  }
 0x251   : > { %v1413_v11 = vsel %vm4562_vm15, %v3682_v2, %v1403_v31  ;;  %1433 = vst.msk [vmem:[#allocation2 + $0x318] sm:$0x7] %vm4563_vm12, %v1403_v31  ;;  %v1479_v21 = vld [vmem:[#allocation2 + $0x168] sm:$0xff]  ;;  %v1478_v62 = vld [vmem:[#allocation2 + $0x160] sm:$0xff]  ;;  %vm4565_vm12 = vcmask 299010   ;;  %vm4574_vm15 = vcmask 449536  }
 0x252   : > { %1432 = vst [vmem:[#allocation2 + $0x310] sm:$0x7] %v1413_v11  ;;  %1798 = vmatprep.subr.mxu0 %v1479_v21  ;;  %v1353_v4 = vpop.permute.xlu1 %1352 }
 0x253   : > { %1799 = vmatpush1.msra.mxu0 %v1478_v62  ;;  %v1363_v23 = vsel %vm1354_vm1, %v3751_v8, %v1353_v4  ;;  %1383 = vst.msk [vmem:[#allocation2 + $0x2c8] sm:$0xe0] %vm4564_vm13, %v1353_v4  ;;  %vm4566_vm1 = vcmask 302086  }
 0x254   : > { %v1303_v36 = vpop.permute.xlu0 %1302  ;;  %1800 = vmatprep.subr.mxu0 %v1469_v35  ;;  %1382 = vst [vmem:[#allocation2 + $0x2c0] sm:$0xe0] %v1363_v23 }
 0x255   : > { %v1313_v2 = vsel %vm1304_vm10, %v3722_v20, %v1303_v36  ;;  %1333 = vst.msk [vmem:[#allocation2 + $0x2c8] sm:$0x1c] %vm4565_vm12, %v1303_v36  ;;  %1801 = vmatpush1.msra.mxu0 %v1468_v10  ;;  %v1481_v16 = vld [vmem:[#allocation2 + $0x178] sm:$0xff]  ;;  %v1480_v30 = vld [vmem:[#allocation2 + $0x170] sm:$0xff]  ;;  %v1470_v20 = vld [vmem:[#allocation2 + $0x120] sm:$0xff]  ;;  %vm4567_vm10 = vcmask 294912  }
 0x256   : > { %1332 = vst [vmem:[#allocation2 + $0x2c0] sm:$0x1c] %v1313_v2  ;;  %1802 = vmatprep.subr.mxu0 %v1459_v54  ;;  %1887 = vmatprep.subr.mxu1 %v1481_v16  ;;  %v1075_v8 = vpop.permute.xlu1 %1074  ;;  %v1473_v54 = vld [vmem:[#allocation2 + $0x138] sm:$0xff]  ;;  %v1472_v16 = vld [vmem:[#allocation2 + $0x130] sm:$0xff] }
 0x257   : > { %1803 = vmatpush1.msra.mxu0 %v1458_v48  ;;  %1888 = vmatpush1.msra.mxu1 %v1480_v30  ;;  %v1462_v30 = vld [vmem:[#allocation2 + $0xe0] sm:$0xff]  ;;  %v1453_v48 = vld [vmem:[#allocation2 + $0x98] sm:$0xff] }
 0x258   : > { %1889 = vmatprep.subr.mxu1 %v1471_v28  ;;  %v1073_v12 = vpop.permute.xlu0 %1072  ;;  %1804 = vmatprep.subr.mxu0 %v1449_v61  ;;  %v1533_v14 = vld [vmem:[#allocation2 + $0x318] sm:$0x7]  ;;  %v1443_v28 = vld [vmem:[#allocation2 + $0x48] sm:$0xff]  ;;  %v1442_v61 = vld [vmem:[#allocation2 + $0x40] sm:$0xff] }
 0x259   : > { %v1085_v38 = vsel %vm1076_vm2, %v3768_v0, %v1073_v12  ;;  %v1086_v17 = vsel %vm1076_vm2, %v1073_v12, %v1075_v8  ;;  %1805 = vmatpush1.msra.mxu0 %v1448_v39  ;;  %1890 = vmatpush1.msra.mxu1 %v1470_v20  ;;  %v1532_v42 = vld [vmem:[#allocation2 + $0x310] sm:$0x7]  ;;  %vm4568_vm2 = vcmask 297985  }
 0x25a   : > { %1105 = vst [vmem:[#allocation2 + $0x270] ss:$-76 sps:$4 sm:$0xc1] %v1085_v38   ;;  %1106 = vst.msk [vmem:[#allocation2 + $0x228] sm:$0xc0] %vm4566_vm1, %v1086_v17  ;;  %1806 = vmatprep.subr.mxu0 %v1439_v46  ;;  %1891 = vmatprep.subr.mxu1 %v1461_v24  ;;  %v1139_v3 = vpop.permute.xlu1 %1138  ;;  %v1452_v8 = vld [vmem:[#allocation2 + $0x90] sm:$0xff] }
 0x25b   : > { %1116 = vst.msk [vmem:[#allocation2 + $0x278] sm:$0x1] %vm4567_vm10, %v1086_v17  ;;  %1807 = vmatpush1.msra.mxu0 %v1438_v13  ;;  %1892 = vmatpush1.msra.mxu1 %v1460_v15 }
 0x25c   : > { %1893 = vmatprep.subr.mxu1 %v1451_v55  ;;  %v1137_v0 = vpop.permute.xlu0 %1136  ;;  %2575 = vmatmul.mubr.msk.f32.vlgmr.msra.gmra.mxu0 %vm1554_vm6, %v4553_v44  ;;  %v1523_v40 = vld [vmem:[#allocation2 + $0x2c8] sm:$0xff] }
 0x25d   : > { %v1149_v43 = vsel %vm1140_vm9, %v3776_v34, %v1137_v0  ;;  %v1150_v50 = vsel %vm1140_vm9, %v1137_v0, %v1139_v3  ;;  %2585 = vmatprep.subr.msk.mxu0 %vm1567_vm8, %v1533_v14  ;;  %1894 = vmatpush1.msra.mxu1 %v1450_v32  ;;  %v1522_v25 = vld [vmem:[#allocation2 + $0x2c0] sm:$0xff]  ;;  %vm4569_vm9 = vcmask 301060  }
 0x25e   : > { %1169 = vst [vmem:[#allocation2 + $0x270] sm:$0xe] %v1149_v43  ;;  %1170 = vst.msk [vmem:[#allocation2 + $0x278] sm:$0xe] %vm4568_vm2, %v1150_v50  ;;  %2586 = vmatpush1.msk.msra.mxu0 %vm1567_vm8, %v1532_v42  ;;  %1895 = vmatprep.subr.mxu1 %v1441_v60  ;;  %v965_v7 = vpop.permute.xlu1 %964 }
 0x25f   : > { %1968 = vmatprep.subr.mxu0 %v1523_v40  ;;  %1896 = vmatpush1.msra.mxu1 %v1440_v37  ;;  %v977_v34 = vsel %vm968_vm5, %v3792_v63, %v965_v7 }
 0x260   : > { %1969 = vmatpush1.msra.mxu0 %v1522_v25  ;;  %2581 = vmatmul.mubr.msk.f32.vlgmr.msra.gmra.mxu1 %vm1554_vm6, %v4553_v44  ;;  %v1191_v57 = vpop.permute.xlu0 %1190  ;;  %997 = vst [vmem:[#allocation2 + $0x220] sm:$0x7] %v977_v34 }
 0x261   : > { %2594 = vmatprep.subr.msk.mxu1 %vm1567_vm8, %v1533_v14  ;;  %v1201_v49 = vsel %vm1192_vm7, %v3784_v59, %v1191_v57  ;;  %1221 = vst.msk [vmem:[#allocation2 + $0x278] sm:$0x70] %vm4569_vm9, %v1191_v57  ;;  %1935 = vmatprep.mubr.f32.mxu1 %v2721_v56  ;;  %vm4570_vm7 = vcmask 296960  }
 0x262   : > { %1220 = vst [vmem:[#allocation2 + $0x270] sm:$0x70] %v1201_v49  ;;  %2604 = vmatpush1.msk.msra.mxu1 %vm1567_vm8, %v1532_v42  ;;  %1846 = vmatprep.mubr.f32.mxu0 %v2721_v56  ;;  %vm4577_vm8 = vmmov %vm4565_vm12 }
 0x263   : > { %2595 = vmatprep.subr.mxu1 %v1523_v40  ;;  %2576 = vmatmul.mubr.msk.f32.gmra.mxu0 %vm1554_vm6, %v4554_v53 }
 0x264   : > { %2605 = vmatpush1.msra.mxu1 %v1522_v25  ;;  %v1019_v63 = vpop.permute.xlu1 %1018  ;;  %1852 = vmatprep.mubr.f32.mxu0 %v2721_v56 }
 0x265   : > { %v1031_v59 = vsel %vm1022_vm4, %v3800_v41, %v1019_v63  ;;  %v967_v27 = vpop.permute.xlu0 %966  ;;  %2582 = vmatmul.mubr.msk.f32.gmra.mxu1 %vm1554_vm6, %v4554_v53 }
 0x266   : > { %1051 = vst [vmem:[#allocation2 + $0x220] sm:$0x38] %v1031_v59  ;;  %v978_v18 = vsel %vm968_vm5, %v965_v7, %v967_v27  ;;  %1941 = vmatprep.mubr.f32.mxu1 %v2721_v56  ;;  %vm4571_vm5 = vcmask 300035  }
 0x267   : > { %998 = vst.msk [vmem:[#allocation2 + $0x228] sm:$0x7] %vm4570_vm7, %v978_v18  ;;  %2577 = vmatmul.mubr.msk.f32.gmra.mxu0 %vm1554_vm6, %v4555_v6 }
 0x268   : > { %v912_v45 = vpop.permute.xlu1 %911  ;;  %v1513_v19 = vld [vmem:[#allocation2 + $0x278] sm:$0xff]  ;;  %1858 = vmatprep.mubr.f32.mxu0 %v2721_v56 }
 0x269   : > { %v924_v41 = vsel %vm915_vm0, %v3827_v51, %v912_v45  ;;  %v1021_v58 = vpop.permute.xlu0 %1020  ;;  %1970 = vmatprep.subr.mxu0 %v1513_v19  ;;  %2596 = vmatprep.subr.mxu1 %v1513_v19  ;;  %v1512_v5 = vld [vmem:[#allocation2 + $0x270] sm:$0xff] }
 0x26a   : > { %944 = vst [vmem:[#allocation2 + $0x1d0] sm:$0xe0] %v924_v41  ;;  %v1032_v9 = vsel %vm1022_vm4, %v1019_v63, %v1021_v58  ;;  %1971 = vmatpush1.msra.mxu0 %v1512_v5  ;;  %2606 = vmatpush1.msra.mxu1 %v1512_v5  ;;  %vm4572_vm4 = vmmov %vm4561_vm3 }
 0x26b   : > { %1052 = vst.msk [vmem:[#allocation2 + $0x228] sm:$0x38] %vm4571_vm5, %v1032_v9  ;;  %2583 = vmatmul.mubr.msk.f32.gmra.mxu1 %vm1554_vm6, %v4555_v6  ;;  %2578 = vmatmul.mubr.msk.f32.gmra.mxu0 %vm1554_vm6, %v4557_v47  ;;  %vm4573_vm3 = vmmov %vm4564_vm13 }
 0x26c   : > { %1947 = vmatprep.mubr.f32.mxu1 %v2721_v56  ;;  %2018 = vmatprep.mubr.f32.mxu0 %v2721_v56  ;;  %vm4579_vm13 = vmmov %vm4569_vm9 }
 0x26d   : > { %v800_v51 = vpop.permute.xlu1 %799  ;;  %v914_v22 = vpop.permute.xlu0 %913  ;;  %v1502_v35 = vld [vmem:[#allocation2 + $0x220] sm:$0xff] }
 0x26e   : > { %v810_v1 = vsel %vm801_vm14, %v3808_v29, %v800_v51  ;;  %830 = vst.msk [vmem:[#allocation2 + $0x188] sm:$0x80] %vm386_vm11, %v800_v51  ;;  %v925_v31 = vsel %vm915_vm0, %v912_v45, %v914_v22  ;;  %vm4575_vm14 = vmmov %vm4568_vm2  ;;  %vm4576_vm11 = vcmask 424960   ;;  %vm4578_vm0 = vcmask 441344  }
 0x26f   : > { %840 = vst.msk [vmem:[#allocation2 + $0x1d8] sm:$0x3] %vm4572_vm4, %v800_v51  ;;  %829 = vst [vmem:[#allocation2 + $0x1d0] ss:$-76 sps:$4 sm:$0x83] %v810_v1   ;;  %2584 = vmatmul.mubr.msk.f32.gmra.mxu1 %vm1554_vm6, %v4557_v47 }
 0x270   : > { %945 = vst.msk [vmem:[#allocation2 + $0x1d8] sm:$0xe0] %vm4573_vm3, %v925_v31  ;;  %2030 = vmatprep.mubr.f32.mxu1 %v2721_v56 }
 0x271   : > { %v700_v11 = vpop.permute.xlu1 %699  ;;  %v860_v21 = vpop.permute.xlu0 %859 }
 0x272   : > { %v710_v62 = vsel %vm4574_vm15, %v3822_v26, %v700_v11  ;;  %730 = vst.msk [vmem:[#allocation2 + $0x188] sm:$0xe] %vm4575_vm14, %v700_v11  ;;  %v870_v29 = vsel %vm4576_vm11, %v3816_v33, %v860_v21  ;;  %v1503_v4 = vld [vmem:[#allocation2 + $0x228] sm:$0xff] }
 0x273   : > { %890 = vst.msk [vmem:[#allocation2 + $0x1d8] sm:$0x1c] %vm4577_vm8, %v860_v21  ;;  %729 = vst [vmem:[#allocation2 + $0x180] sm:$0xe] %v710_v62  ;;  %1972 = vmatprep.subr.mxu0 %v1503_v4  ;;  %2597 = vmatprep.subr.mxu1 %v1503_v4 }
 0x274   : > { %889 = vst [vmem:[#allocation2 + $0x1d0] sm:$0x1c] %v870_v29  ;;  %1973 = vmatpush1.msra.mxu0 %v1502_v35  ;;  %2607 = vmatpush1.msra.mxu1 %v1502_v35 }
 0x275   : > { %v750_v23 = vpop.permute.xlu0 %749 }
 0x276   : > { %v760_v36 = vsel %vm4578_vm0, %v3834_v52, %v750_v23  ;;  %780 = vst.msk [vmem:[#allocation2 + $0x188] sm:$0x70] %vm4579_vm13, %v750_v23  ;;  %v1463_v52 = vld [vmem:[#allocation2 + $0xe8] sm:$0xff] }
 0x277   : > { %779 = vst [vmem:[#allocation2 + $0x180] sm:$0x70] %v760_v36 }
 0x27a   : > { %v1493_v26 = vld [vmem:[#allocation2 + $0x1d8] sm:$0xff] }
 0x27b   : > { %1974 = vmatprep.subr.mxu0 %v1493_v26  ;;  %2598 = vmatprep.subr.mxu1 %v1493_v26  ;;  %v1492_v33 = vld [vmem:[#allocation2 + $0x1d0] sm:$0xff] }
 0x27c   : > { %1975 = vmatpush1.msra.mxu0 %v1492_v33  ;;  %2608 = vmatpush1.msra.mxu1 %v1492_v33 }
 0x27d   : > { %v1483_v10 = vld [vmem:[#allocation2 + $0x188] sm:$0xff] }
 0x27e   : > { %1976 = vmatprep.subr.mxu0 %v1483_v10  ;;  %2599 = vmatprep.subr.mxu1 %v1483_v10  ;;  %v1482_v2 = vld [vmem:[#allocation2 + $0x180] sm:$0xff]  ;;  %v1537_v12 = vpop.permute.xlu1 %1536 }
 0x27f   : > { %1977 = vmatpush1.msra.mxu0 %v1482_v2  ;;  %2609 = vmatpush1.msra.mxu1 %v1482_v2 }
 0x280   : > { %1978 = vmatprep.subr.mxu0 %v1473_v54  ;;  %2600 = vmatprep.subr.mxu1 %v1473_v54 }
 0x281   : > { %1979 = vmatpush1.msra.mxu0 %v1472_v16  ;;  %2610 = vmatpush1.msra.mxu1 %v1472_v16 }
 0x282   : > { %1980 = vmatprep.subr.mxu0 %v1463_v52  ;;  %2601 = vmatprep.subr.mxu1 %v1463_v52  ;;  %v1542_v22 = vpop.permute.xlu0 %1541 }
 0x283   : > { %1981 = vmatpush1.msra.mxu0 %v1462_v30  ;;  %2611 = vmatpush1.msra.mxu1 %v1462_v30  ;;  %v1547_v30 = vpop.permute.xlu1 %1546 }
 0x284   : > { %1982 = vmatprep.subr.mxu0 %v1453_v48  ;;  %2602 = vmatprep.subr.mxu1 %v1453_v48 }
 0x285   : > { %1983 = vmatpush1.msra.mxu0 %v1452_v8  ;;  %2612 = vmatpush1.msra.mxu1 %v1452_v8 }
 0x286   : > { %1984 = vmatprep.subr.mxu0 %v1443_v28  ;;  %2603 = vmatprep.subr.mxu1 %v1443_v28 }
 0x287   : > { %1985 = vmatpush1.msra.mxu0 %v1442_v61  ;;  %2613 = vmatpush1.msra.mxu1 %v1442_v61 }
 0x288   : > { %2587 = vmatmul.mubr.msk.f32.vlgmr.msra.gmra.mxu0 %vm1554_vm6, %v4553_v44  ;;  %2589 = vmatmul.mubr.msk.f32.vlgmr.msra.gmra.mxu1 %vm1554_vm6, %v4555_v6 }
 0x289   : > { %2024 = vmatprep.mubr.f32.mxu0 %v2721_v56  ;;  %2036 = vmatprep.mubr.f32.mxu1 %v2721_v56 }
 0x28c   : > { %2588 = vmatmul.mubr.msk.f32.gmra.mxu0 %vm1554_vm6, %v4554_v53  ;;  %2590 = vmatmul.mubr.msk.f32.gmra.mxu1 %vm1554_vm6, %v4557_v47  ;;  %vm4580_vm6 = vcmask 1039360  }
 0x28d   : > { %vm4581_vm12 = vmmov %vm4580_vm6 }
 0x28e   : > { %vm4582_vm1 = vmmov %vm4580_vm6 }
 0x28f   : > { %vm4583_vm10 = vmmov %vm4582_vm1 }
 0x290   : > { %vm4584_vm2 = vmmov %vm4582_vm1 }
 0x291   : > { %vm4585_vm9 = vmmov %vm4582_vm1 }
 0x292   : > { %vm4586_vm7 = vmmov %vm4582_vm1 }
 0x293   : > { %vm4587_vm5 = vmmov %vm4582_vm1 }
 0x294   : > { %vm4588_vm4 = vmmov %vm4582_vm1 }
 0x295   : > { %vm4589_vm3 = vmmov %vm4582_vm1 }
 0x296   : > { %vm4590_vm15 = vmmov %vm4582_vm1 }
 0x297   : > { %vm4591_vm14 = vmmov %vm4582_vm1 }
 0x298   : > { %vm4592_vm11 = vmmov %vm4582_vm1 }
 0x299   : > { %vm4593_vm8 = vmmov %vm4582_vm1 }
 0x29a   : > { %vm4594_vm0 = vmmov %vm4582_vm1 }
 0x29b   : > { %vm4595_vm13 = vmmov %vm4594_vm0 }
 0x2b8   : > { %v1664_v39 = vpop.f32.mrf.mxu0 }
 0x2b9   : > { %v3927_v20 = vadd.f32 %v1664_v39, %v1537_v12  ;;  %v1753_v38 = vpop.f32.mrf.mxu1 }
 0x2ba   : > { %v1666_v17 = vpop.f32.mrf.mxu0  ;;  %v3933_v24 = vadd.f32 %v1753_v38, %v1537_v12 }
 0x2bb   : > { %v3929_v46 = vadd.f32 %v1666_v17, %v1537_v12  ;;  %2083 = vrot.lane.b32.xlu0 %v3927_v20, %s2697_s2  ;;  %v1755_v56 = vpop.f32.mrf.mxu1 }
 0x2bc   : > { %v3937_v13 = vadd.f32 %v1755_v56, %v1537_v12 }
 0x2bd   : > { %2085 = vrot.lane.b32.xlu1 %v3929_v46, %s2697_s2  ;;  %v1670_v15 = vpop.f32.mrf.mxu0  ;;  %v1759_v55 = vpop.f32.mrf.mxu1 }
 0x2be   : > { %v3981_v11 = vadd.f32 %v1670_v15, %v1542_v22  ;;  %v3989_v62 = vadd.f32 %v1759_v55, %v1542_v22 }
 0x2bf   : > { %2087 = vrot.lane.b32.xlu0 %v3933_v24, %s2697_s2  ;;  %v1672_v3 = vpop.f32.mrf.mxu0  ;;  %v1761_v14 = vpop.f32.mrf.mxu1 }
 0x2c0   : > { %v3985_v21 = vadd.f32 %v1672_v3, %v1542_v22  ;;  %v3993_v29 = vadd.f32 %v1761_v14, %v1542_v22 }
 0x2c1   : > { %2089 = vrot.lane.b32.xlu1 %v3937_v13, %s2697_s2  ;;  %v1676_v0 = vpop.f32.mrf.mxu0  ;;  %v1765_v40 = vpop.f32.mrf.mxu1 }
 0x2c2   : > { %v4021_v48 = vadd.f32 %v1676_v0, %v1547_v30  ;;  %v4029_v61 = vadd.f32 %v1765_v40, %v1547_v30  ;;  %v1552_v40 = vpop.permute.xlu1 %1551 }
 0x2c3   : > { %v1678_v32 = vpop.f32.mrf.mxu0  ;;  %v3945_v50 = vpop.f32.mrf.mxu1 }
 0x2c4   : > { %v4025_v28 = vadd.f32 %v1678_v32, %v1547_v30  ;;  %v4034_v39 = vadd.f32 %v3945_v50, %v1547_v30 }
 0x2c5   : > { %v3943_v43 = vpop.f32.mrf.mxu0  ;;  %v3949_v60 = vpop.f32.mrf.mxu1 }
 0x2c6   : > { %v4063_v50 = vadd.f32 %v3943_v43, %v1552_v40 }
 0x2c7   : > { %v3947_v42 = vpop.f32.mrf.mxu0  ;;  %v3951_v37 = vpop.f32.mrf.mxu1 }
 0x31c   : > { %v1842_v25 = vpop.f32.mrf.mxu0 }
 0x31d   : > { %v3953_v7 = vadd.f32 %v1842_v25, %v1537_v12  ;;  %v4068_v25 = vadd.f32 %v3947_v42, %v1552_v40 }
 0x31e   : > { %v1844_v34 = vpop.f32.mrf.mxu0 }
 0x31f   : > { %v3955_v57 = vadd.f32 %v1844_v34, %v1537_v12  ;;  %2091 = vrot.lane.b32.xlu0 %v3953_v7, %s2697_s2  ;;  %v4073_v34 = vadd.f32 %v3949_v60, %v1552_v40 }
 0x320   : > { %v1931_v49 = vpop.f32.mrf.mxu1 }
 0x321   : > { %v3959_v63 = vadd.f32 %v1931_v49, %v1537_v12  ;;  %2093 = vrot.lane.b32.xlu1 %v3955_v57, %s2697_s2  ;;  %v4078_v49 = vadd.f32 %v3951_v37, %v1552_v40 }
 0x322   : > { %v1933_v59 = vpop.f32.mrf.mxu1 }
 0x323   : > { %v3963_v27 = vadd.f32 %v1933_v59, %v1537_v12  ;;  %2095 = vrot.lane.b32.xlu0 %v3959_v63, %s2697_s2  ;;  %v1848_v18 = vpop.f32.mrf.mxu0 }
 0x324   : > { %v3995_v4 = vadd.f32 %v1848_v18, %v1542_v22 }
 0x325   : > { %2097 = vrot.lane.b32.xlu1 %v3963_v27, %s2697_s2  ;;  %v1850_v45 = vpop.f32.mrf.mxu0  ;;  %v1937_v35 = vpop.f32.mrf.mxu1 }
 0x326   : > { %v3999_v23 = vadd.f32 %v1850_v45, %v1542_v22  ;;  %v4003_v26 = vadd.f32 %v1937_v35, %v1542_v22 }
 0x327   : > { %v1854_v19 = vpop.f32.mrf.mxu0  ;;  %v1939_v33 = vpop.f32.mrf.mxu1 }
 0x328   : > { %v4007_v10 = vadd.f32 %v1939_v33, %v1542_v22  ;;  %v4036_v38 = vadd.f32 %v1854_v19, %v1547_v30 }
 0x329   : > { %v1856_v41 = vpop.f32.mrf.mxu0 }
 0x32a   : > { %v4040_v56 = vadd.f32 %v1856_v41, %v1547_v30 }
 0x32b   : > { %v3969_v58 = vpop.f32.mrf.mxu0  ;;  %v1943_v16 = vpop.f32.mrf.mxu1 }
 0x32c   : > { %v4044_v3 = vadd.f32 %v1943_v16, %v1547_v30  ;;  %v4081_v43 = vadd.f32 %v3969_v58, %v1552_v40 }
 0x32d   : > { %v3971_v5 = vpop.f32.mrf.mxu0  ;;  %v1945_v8 = vpop.f32.mrf.mxu1 }
 0x32e   : > { %v4048_v55 = vadd.f32 %v1945_v8, %v1547_v30  ;;  %v2084_v42 = vpop.permute.xlu0 %2083  ;;  %v4086_v59 = vadd.f32 %v3971_v5, %v1552_v40 }
 0x32f   : > { %v2086_v18 = vpop.permute.xlu1 %2085 }
 0x330   : > { %v2163_v5 = vsel %vm4580_vm6, %v2084_v42, %v2086_v18  ;;  %vm4596_vm6 = vmmov %vm4594_vm0 }
 0x331   : > { %v4109_v35 = vmax.f32 %v3927_v20, %v2163_v5 }
 0x332   : > { %v2088_v41 = vpop.permute.xlu0 %2087 }
 0x348   : > { %v2020_v9 = vpop.f32.mrf.mxu0 }
 0x349   : > { %v3973_v51 = vadd.f32 %v2020_v9, %v1537_v12  ;;  %v2090_v9 = vpop.permute.xlu1 %2089 }
 0x34a   : > { %v2022_v1 = vpop.f32.mrf.mxu0 }
 0x34b   : > { %v3975_v31 = vadd.f32 %v2022_v1, %v1537_v12  ;;  %2099 = vrot.lane.b32.xlu0 %v3973_v51, %s2697_s2  ;;  %v1949_v12 = vpop.f32.mrf.mxu1  ;;  %v2164_v1 = vsel %vm4581_vm12, %v2086_v18, %v2088_v41  ;;  %vm4597_vm12 = vmmov %vm4594_vm0 }
 0x34c   : > { %v2026_v36 = vpop.f32.mrf.mxu0  ;;  %v4090_v45 = vadd.f32 %v1949_v12, %v1552_v40  ;;  %v4115_v33 = vmax.f32 %v3929_v46, %v2164_v1 }
 0x34d   : > { %2101 = vrot.lane.b32.xlu1 %v3975_v31, %s2697_s2  ;;  %v4011_v54 = vadd.f32 %v2026_v36, %v1542_v22  ;;  %v1951_v17 = vpop.f32.mrf.mxu1  ;;  %v2165_v36 = vsel %vm4582_vm1, %v2088_v41, %v2090_v9  ;;  %vm4598_vm1 = vmmov %vm4594_vm0 }
 0x34e   : > { %v2028_v2 = vpop.f32.mrf.mxu0  ;;  %v4094_v37 = vadd.f32 %v1951_v17, %v1552_v40 }
 0x34f   : > { %2103 = vrot.lane.b32.xlu0 %v3981_v11, %s2697_s2  ;;  %v4015_v52 = vadd.f32 %v2028_v2, %v1542_v22  ;;  %v2032_v15 = vpop.f32.mrf.mxu1  ;;  %v4120_v2 = vmax.f32 %v3933_v24, %v2165_v36 }
 0x350   : > { %v4052_v14 = vadd.f32 %v2032_v15, %v1547_v30 }
 0x351   : > { %2105 = vrot.lane.b32.xlu1 %v3985_v21, %s2697_s2  ;;  %v2034_v0 = vpop.f32.mrf.mxu1 }
 0x352   : > { %v4056_v32 = vadd.f32 %v2034_v0, %v1547_v30 }
 0x353   : > { %2107 = vrot.lane.b32.xlu0 %v3989_v62, %s2697_s2  ;;  %v2038_v60 = vpop.f32.mrf.mxu1 }
 0x354   : > { %v4098_v58 = vadd.f32 %v2038_v60, %v1552_v40 }
 0x355   : > { %2109 = vrot.lane.b32.xlu1 %v3993_v29, %s2697_s2  ;;  %v2040_v19 = vpop.f32.mrf.mxu1 }
 0x356   : > { %v4103_v22 = vadd.f32 %v2040_v19, %v1552_v40 }
 0x357   : > { %2111 = vrot.lane.b32.xlu0 %v3995_v4, %s2697_s2 }
 0x359   : > { %2113 = vrot.lane.b32.xlu1 %v3999_v23, %s2697_s2 }
 0x35b   : > { %2115 = vrot.lane.b32.xlu0 %v4003_v26, %s2697_s2 }
 0x35d   : > { %2117 = vrot.lane.b32.xlu1 %v4007_v10, %s2697_s2 }
 0x35f   : > { %2119 = vrot.lane.b32.xlu0 %v4011_v54, %s2697_s2 }
 0x361   : > { %2121 = vrot.lane.b32.xlu1 %v4015_v52, %s2697_s2 }
 0x363   : > { %2123 = vrot.lane.b32.xlu0 %v4021_v48, %s2697_s2 }
 0x365   : > { %2125 = vrot.lane.b32.xlu1 %v4025_v28, %s2697_s2 }
 0x367   : > { %2127 = vrot.lane.b32.xlu0 %v4029_v61, %s2697_s2 }
 0x369   : > { %2129 = vrot.lane.b32.xlu1 %v4034_v39, %s2697_s2 }
 0x36b   : > { %2131 = vrot.lane.b32.xlu0 %v4036_v38, %s2697_s2 }
 0x36d   : > { %2133 = vrot.lane.b32.xlu1 %v4040_v56, %s2697_s2 }
 0x36f   : > { %2135 = vrot.lane.b32.xlu0 %v4044_v3, %s2697_s2 }
 0x371   : > { %2137 = vrot.lane.b32.xlu1 %v4048_v55, %s2697_s2 }
 0x373   : > { %2139 = vrot.lane.b32.xlu0 %v4052_v14, %s2697_s2 }
 0x375   : > { %2141 = vrot.lane.b32.xlu1 %v4056_v32, %s2697_s2 }
 0x377   : > { %2143 = vrot.lane.b32.xlu0 %v4063_v50, %s2697_s2 }
 0x379   : > { %2145 = vrot.lane.b32.xlu1 %v4068_v25, %s2697_s2 }
 0x37b   : > { %2147 = vrot.lane.b32.xlu0 %v4073_v34, %s2697_s2 }
 0x37d   : > { %2149 = vrot.lane.b32.xlu1 %v4078_v49, %s2697_s2 }
 0x37f   : > { %2151 = vrot.lane.b32.xlu0 %v4081_v43, %s2697_s2 }
 0x381   : > { %2153 = vrot.lane.b32.xlu1 %v4086_v59, %s2697_s2 }
 0x383   : > { %2155 = vrot.lane.b32.xlu0 %v4090_v45, %s2697_s2 }
 0x385   : > { %2157 = vrot.lane.b32.xlu1 %v4094_v37, %s2697_s2 }
 0x387   : > { %2159 = vrot.lane.b32.xlu0 %v4098_v58, %s2697_s2 }
 0x389   : > { %2161 = vrot.lane.b32.xlu1 %v4103_v22, %s2697_s2 }
 0x38b   : > { %2319 = vrot.lane.b32.xlu0 %v4109_v35, %s2701_s7 }
 0x38d   : > { %2321 = vrot.lane.b32.xlu1 %v4115_v33, %s2701_s7 }
 0x38f   : > { %2323 = vrot.lane.b32.xlu0 %v4120_v2, %s2701_s7 }
 0x391   : > { %v2092_v20 = vpop.permute.xlu0 %2091 }
 0x392   : > { %v2166_v16 = vsel %vm4583_vm10, %v2090_v9, %v2092_v20  ;;  %vm4599_vm10 = vmmov %vm4594_vm0 }
 0x393   : > { %v4128_v30 = vmax.f32 %v3937_v13, %v2166_v16  ;;  %v2094_v46 = vpop.permute.xlu1 %2093 }
 0x394   : > { %v2167_v8 = vsel %vm4584_vm2, %v2092_v20, %v2094_v46  ;;  %vm4600_vm2 = vmmov %vm4594_vm0 }
 0x395   : > { %v4132_v12 = vmax.f32 %v3953_v7, %v2167_v8  ;;  %2325 = vrot.lane.b32.xlu1 %v4128_v30, %s2701_s7  ;;  %v2096_v24 = vpop.permute.xlu0 %2095 }
 0x396   : > { %v2168_v17 = vsel %vm4585_vm9, %v2094_v46, %v2096_v24  ;;  %vm4601_vm9 = vmmov %vm4594_vm0 }
 0x397   : > { %v4138_v15 = vmax.f32 %v3955_v57, %v2168_v17  ;;  %v2098_v0 = vpop.permute.xlu1 %2097  ;;  %2327 = vrot.lane.b32.xlu0 %v4132_v12, %s2701_s7 }
 0x398   : > { %v2169_v13 = vsel %vm4586_vm7, %v2096_v24, %v2098_v0  ;;  %vm4602_vm7 = vmmov %vm4594_vm0 }
 0x399   : > { %v4144_v40 = vmax.f32 %v3959_v63, %v2169_v13  ;;  %2329 = vrot.lane.b32.xlu1 %v4138_v15, %s2701_s7 }
 0x39b   : > { %2331 = vrot.lane.b32.xlu0 %v4144_v40, %s2701_s7 }
 0x3bd   : > { %v2100_v7 = vpop.permute.xlu0 %2099 }
 0x3be   : > { %v2170_v42 = vsel %vm4587_vm5, %v2098_v0, %v2100_v7  ;;  %vm4603_vm5 = vmmov %vm4594_vm0 }
 0x3bf   : > { %v4152_v57 = vmax.f32 %v3963_v27, %v2170_v42  ;;  %v2102_v60 = vpop.permute.xlu1 %2101 }
 0x3c0   : > { %v2171_v18 = vsel %vm4588_vm4, %v2100_v7, %v2102_v60  ;;  %v2248_v41 = vmax.f32 %v3975_v31, %v2102_v60  ;;  %vm4604_vm4 = vmmov %vm4594_vm0 }
 0x3c1   : > { %v4156_v19 = vmax.f32 %v3973_v51, %v2171_v18  ;;  %2333 = vrot.lane.b32.xlu1 %v4152_v57, %s2701_s7  ;;  %v2104_v63 = vpop.permute.xlu0 %2103 }
 0x3c3   : > { %v2106_v5 = vpop.permute.xlu1 %2105  ;;  %2335 = vrot.lane.b32.xlu0 %v4156_v19, %s2701_s7 }
 0x3c4   : > { %v2172_v9 = vsel %vm4589_vm3, %v2104_v63, %v2106_v5  ;;  %vm4605_vm3 = vmmov %vm4594_vm0 }
 0x3c5   : > { %v4165_v27 = vmax.f32 %v3981_v11, %v2172_v9  ;;  %2337 = vrot.lane.b32.xlu1 %v2248_v41, %s2701_s7  ;;  %v2108_v1 = vpop.permute.xlu0 %2107 }
 0x3c6   : > { %v2173_v51 = vsel %vm4590_vm15, %v2106_v5, %v2108_v1  ;;  %vm4606_vm15 = vmmov %vm4594_vm0 }
 0x3c7   : > { %v4170_v36 = vmax.f32 %v3985_v21, %v2173_v51  ;;  %v2110_v20 = vpop.permute.xlu1 %2109  ;;  %2339 = vrot.lane.b32.xlu0 %v4165_v27, %s2701_s7 }
 0x3c8   : > { %v2174_v31 = vsel %vm4591_vm14, %v2108_v1, %v2110_v20  ;;  %vm4607_vm14 = vmmov %vm4594_vm0 }
 0x3c9   : > { %v4176_v16 = vmax.f32 %v3989_v62, %v2174_v31  ;;  %2341 = vrot.lane.b32.xlu1 %v4170_v36, %s2701_s7  ;;  %v2112_v11 = vpop.permute.xlu0 %2111 }
 0x3ca   : > { %v2175_v46 = vsel %vm4592_vm11, %v2110_v20, %v2112_v11  ;;  %vm4608_vm11 = vmmov %vm4594_vm0 }
 0x3cb   : > { %v4182_v8 = vmax.f32 %v3993_v29, %v2175_v46  ;;  %v2114_v21 = vpop.permute.xlu1 %2113  ;;  %2343 = vrot.lane.b32.xlu0 %v4176_v16, %s2701_s7 }
 0x3cc   : > { %v2176_v24 = vsel %vm4593_vm8, %v2112_v11, %v2114_v21  ;;  %vm4609_vm8 = vmmov %vm4594_vm0 }
 0x3cd   : > { %v4188_v17 = vmax.f32 %v3995_v4, %v2176_v24  ;;  %2345 = vrot.lane.b32.xlu1 %v4182_v8, %s2701_s7  ;;  %v2116_v62 = vpop.permute.xlu0 %2115 }
 0x3ce   : > { %v2177_v0 = vsel %vm4594_vm0, %v2114_v21, %v2116_v62 }
 0x3cf   : > { %v4194_v13 = vmax.f32 %v3999_v23, %v2177_v0  ;;  %v2118_v29 = vpop.permute.xlu1 %2117  ;;  %2347 = vrot.lane.b32.xlu0 %v4188_v17, %s2701_s7 }
 0x3d0   : > { %v2178_v7 = vsel %vm4595_vm13, %v2116_v62, %v2118_v29  ;;  %vm4610_vm13 = vmmov %vm4594_vm0 }
 0x3d1   : > { %v4200_v42 = vmax.f32 %v4003_v26, %v2178_v7  ;;  %2349 = vrot.lane.b32.xlu1 %v4194_v13, %s2701_s7  ;;  %v2120_v4 = vpop.permute.xlu0 %2119 }
 0x3d2   : > { %v2179_v60 = vsel %vm4596_vm6, %v2118_v29, %v2120_v4  ;;  %vm4611_vm6 = vmmov %vm4594_vm0 }
 0x3d3   : > { %v4206_v18 = vmax.f32 %v4007_v10, %v2179_v60  ;;  %v2122_v23 = vpop.permute.xlu1 %2121  ;;  %2351 = vrot.lane.b32.xlu0 %v4200_v42, %s2701_s7 }
 0x3d4   : > { %v2180_v63 = vsel %vm4597_vm12, %v2120_v4, %v2122_v23  ;;  %v2258_v5 = vmax.f32 %v4015_v52, %v2122_v23  ;;  %vm4612_vm12 = vmmov %vm4594_vm0 }
 0x3d5   : > { %v4212_v41 = vmax.f32 %v4011_v54, %v2180_v63  ;;  %2353 = vrot.lane.b32.xlu1 %v4206_v18, %s2701_s7  ;;  %v2124_v26 = vpop.permute.xlu0 %2123 }
 0x3d7   : > { %v2126_v9 = vpop.permute.xlu1 %2125  ;;  %2355 = vrot.lane.b32.xlu0 %v4212_v41, %s2701_s7 }
 0x3d8   : > { %v2181_v10 = vsel %vm4598_vm1, %v2124_v26, %v2126_v9  ;;  %vm4613_vm1 = vmmov %vm4594_vm0 }
 0x3d9   : > { %v4221_v1 = vmax.f32 %v4021_v48, %v2181_v10  ;;  %2357 = vrot.lane.b32.xlu1 %v2258_v5, %s2701_s7  ;;  %v2128_v51 = vpop.permute.xlu0 %2127 }
 0x3da   : > { %v2182_v54 = vsel %vm4599_vm10, %v2126_v9, %v2128_v51  ;;  %vm4614_vm10 = vmmov %vm4594_vm0 }
 0x3db   : > { %v4226_v20 = vmax.f32 %v4025_v28, %v2182_v54  ;;  %v2130_v31 = vpop.permute.xlu1 %2129  ;;  %2359 = vrot.lane.b32.xlu0 %v4221_v1, %s2701_s7 }
 0x3dc   : > { %v2183_v52 = vsel %vm4600_vm2, %v2128_v51, %v2130_v31  ;;  %vm4615_vm2 = vcmask 752640  }
 0x3dd   : > { %v4232_v11 = vmax.f32 %v4029_v61, %v2183_v52  ;;  %2361 = vrot.lane.b32.xlu1 %v4226_v20, %s2701_s7  ;;  %v2132_v48 = vpop.permute.xlu0 %2131 }
 0x3de   : > { %v2184_v46 = vsel %vm4601_vm9, %v2130_v31, %v2132_v48  ;;  %vm4616_vm9 = vmmov %vm4615_vm2 }
 0x3df   : > { %v4238_v21 = vmax.f32 %v4034_v39, %v2184_v46  ;;  %v2134_v28 = vpop.permute.xlu1 %2133  ;;  %2363 = vrot.lane.b32.xlu0 %v4232_v11, %s2701_s7 }
 0x3e0   : > { %v2185_v24 = vsel %vm4602_vm7, %v2132_v48, %v2134_v28  ;;  %vm4617_vm7 = vmmov %vm4615_vm2 }
 0x3e1   : > { %v4244_v62 = vmax.f32 %v4036_v38, %v2185_v24  ;;  %2365 = vrot.lane.b32.xlu1 %v4238_v21, %s2701_s7  ;;  %v2136_v61 = vpop.permute.xlu0 %2135 }
 0x3e2   : > { %v2186_v0 = vsel %vm4603_vm5, %v2134_v28, %v2136_v61  ;;  %vm4618_vm5 = vmmov %vm4615_vm2 }
 0x3e3   : > { %v4250_v29 = vmax.f32 %v4040_v56, %v2186_v0  ;;  %v2138_v39 = vpop.permute.xlu1 %2137  ;;  %2367 = vrot.lane.b32.xlu0 %v4244_v62, %s2701_s7 }
 0x3e4   : > { %v2187_v7 = vsel %vm4604_vm4, %v2136_v61, %v2138_v39  ;;  %vm4619_vm4 = vmmov %vm4615_vm2 }
 0x3e5   : > { %v4256_v4 = vmax.f32 %v4044_v3, %v2187_v7  ;;  %2369 = vrot.lane.b32.xlu1 %v4250_v29, %s2701_s7  ;;  %v2140_v38 = vpop.permute.xlu0 %2139 }
 0x3e6   : > { %v2188_v60 = vsel %vm4605_vm3, %v2138_v39, %v2140_v38  ;;  %vm4620_vm3 = vmmov %vm4615_vm2 }
 0x3e7   : > { %v4262_v23 = vmax.f32 %v4048_v55, %v2188_v60  ;;  %v2142_v56 = vpop.permute.xlu1 %2141  ;;  %2371 = vrot.lane.b32.xlu0 %v4256_v4, %s2701_s7 }
 0x3e8   : > { %v2189_v63 = vsel %vm4606_vm15, %v2140_v38, %v2142_v56  ;;  %v2268_v5 = vmax.f32 %v4056_v32, %v2142_v56  ;;  %vm4621_vm15 = vmmov %vm4615_vm2 }
 0x3e9   : > { %v4268_v26 = vmax.f32 %v4052_v14, %v2189_v63  ;;  %2373 = vrot.lane.b32.xlu1 %v4262_v23, %s2701_s7  ;;  %v2144_v3 = vpop.permute.xlu0 %2143 }
 0x3eb   : > { %v2146_v9 = vpop.permute.xlu1 %2145  ;;  %2375 = vrot.lane.b32.xlu0 %v4268_v26, %s2701_s7 }
 0x3ec   : > { %v2190_v55 = vsel %vm4607_vm14, %v2144_v3, %v2146_v9  ;;  %vm4622_vm14 = vmmov %vm4615_vm2 }
 0x3ed   : > { %v4277_v10 = vmax.f32 %v4063_v50, %v2190_v55  ;;  %2377 = vrot.lane.b32.xlu1 %v2268_v5, %s2701_s7  ;;  %v2148_v51 = vpop.permute.xlu0 %2147 }
 0x3ee   : > { %v2191_v14 = vsel %vm4608_vm11, %v2146_v9, %v2148_v51  ;;  %vm4623_vm11 = vmmov %vm4615_vm2 }
 0x3ef   : > { %v4282_v54 = vmax.f32 %v4068_v25, %v2191_v14  ;;  %v2150_v31 = vpop.permute.xlu1 %2149  ;;  %2379 = vrot.lane.b32.xlu0 %v4277_v10, %s2701_s7 }
 0x3f0   : > { %v2192_v32 = vsel %vm4609_vm8, %v2148_v51, %v2150_v31  ;;  %vm4624_vm8 = vmmov %vm4615_vm2 }
 0x3f1   : > { %v4288_v52 = vmax.f32 %v4073_v34, %v2192_v32  ;;  %2381 = vrot.lane.b32.xlu1 %v4282_v54, %s2701_s7  ;;  %v2152_v50 = vpop.permute.xlu0 %2151 }
 0x3f2   : > { %v2193_v48 = vsel %vm4594_vm0, %v2150_v31, %v2152_v50  ;;  %vm4625_vm0 = vmmov %vm4615_vm2 }
 0x3f3   : > { %v4294_v46 = vmax.f32 %v4078_v49, %v2193_v48  ;;  %v2154_v25 = vpop.permute.xlu1 %2153  ;;  %2383 = vrot.lane.b32.xlu0 %v4288_v52, %s2701_s7 }
 0x3f4   : > { %v2194_v28 = vsel %vm4610_vm13, %v2152_v50, %v2154_v25  ;;  %vm4626_vm13 = vmmov %vm4625_vm0 }
 0x3f5   : > { %v4300_v24 = vmax.f32 %v4081_v43, %v2194_v28  ;;  %2385 = vrot.lane.b32.xlu1 %v4294_v46, %s2701_s7  ;;  %v2156_v34 = vpop.permute.xlu0 %2155 }
 0x3f6   : > { %v2195_v61 = vsel %vm4611_vm6, %v2154_v25, %v2156_v34  ;;  %vm4627_vm6 = vmmov %vm4625_vm0 }
 0x3f7   : > { %v4306_v0 = vmax.f32 %v4086_v59, %v2195_v61  ;;  %v2158_v49 = vpop.permute.xlu1 %2157  ;;  %2387 = vrot.lane.b32.xlu0 %v4300_v24, %s2701_s7 }
 0x3f8   : > { %v2196_v39 = vsel %vm4612_vm12, %v2156_v34, %v2158_v49  ;;  %vm4628_vm12 = vmmov %vm4625_vm0 }
 0x3f9   : > { %v4312_v7 = vmax.f32 %v4090_v45, %v2196_v39  ;;  %2389 = vrot.lane.b32.xlu1 %v4306_v0, %s2701_s7  ;;  %v2160_v43 = vpop.permute.xlu0 %2159 }
 0x3fa   : > { %v2197_v38 = vsel %vm4613_vm1, %v2158_v49, %v2160_v43  ;;  %vm4629_vm1 = vmmov %vm4625_vm0 }
 0x3fb   : > { %v4318_v60 = vmax.f32 %v4094_v37, %v2197_v38  ;;  %v2162_v59 = vpop.permute.xlu1 %2161  ;;  %2391 = vrot.lane.b32.xlu0 %v4312_v7, %s2701_s7 }
 0x3fc   : > { %v2198_v56 = vsel %vm4614_vm10, %v2160_v43, %v2162_v59  ;;  %v2278_v3 = vmax.f32 %v4103_v22, %v2162_v59  ;;  %vm4630_vm10 = vmmov %vm4625_vm0 }
 0x3fd   : > { %v4325_v63 = vmax.f32 %v4098_v58, %v2198_v56  ;;  %2393 = vrot.lane.b32.xlu1 %v4318_v60, %s2701_s7  ;;  %v2320_v45 = vpop.permute.xlu0 %2319 }
 0x3ff   : > { %v2322_v5 = vpop.permute.xlu1 %2321  ;;  %2395 = vrot.lane.b32.xlu0 %v4325_v63, %s2701_s7 }
 0x400   : > { %v2399_v37 = vsel %vm4615_vm2, %v2320_v45, %v2322_v5  ;;  %vm4631_vm2 = vmmov %vm4625_vm0 }
 0x401   : > { %v2471_v58 = vmax.f32 %v4109_v35, %v2399_v37  ;;  %2397 = vrot.lane.b32.xlu1 %v2278_v3, %s2701_s7  ;;  %v2324_v22 = vpop.permute.xlu0 %2323 }
 0x402   : > { %v2400_v9 = vsel %vm4616_vm9, %v2322_v5, %v2324_v22  ;;  %vm4632_vm9 = vmmov %vm4625_vm0 }
 0x403   : > { %2510 = vst [vmem:[%s4335_s30] sm:$0xff] %v2471_v58  ;;  %v2472_v55 = vmax.f32 %v4115_v33, %v2400_v9 }
 0x405   : > { %2511 = vst [vmem:[%s4335_s30 + $0x8] sm:$0xff] %v2472_v55 }
 0x407   : > { %v2326_v51 = vpop.permute.xlu1 %2325 }
 0x408   : > { %v2401_v14 = vsel %vm4617_vm7, %v2324_v22, %v2326_v51  ;;  %vm4633_vm7 = vmmov %vm4625_vm0 }
 0x409   : > { %v2473_v31 = vmax.f32 %v4120_v2, %v2401_v14  ;;  %v2328_v32 = vpop.permute.xlu0 %2327 }
 0x40a   : > { %v2402_v35 = vsel %vm4618_vm5, %v2326_v51, %v2328_v32  ;;  %vm4634_vm5 = vmmov %vm4625_vm0 }
 0x40b   : > { %2512 = vst [vmem:[%s4335_s30 + $0x10] sm:$0xff] %v2473_v31  ;;  %v2474_v50 = vmax.f32 %v4128_v30, %v2402_v35  ;;  %v2330_v48 = vpop.permute.xlu1 %2329 }
 0x40c   : > { %v2403_v25 = vsel %vm4619_vm4, %v2328_v32, %v2330_v48  ;;  %vm4635_vm4 = vmmov %vm4625_vm0 }
 0x40d   : > { %2513 = vst [vmem:[%s4335_s30 + $0x18] sm:$0xff] %v2474_v50  ;;  %v2475_v33 = vmax.f32 %v4132_v12, %v2403_v25  ;;  %v2332_v28 = vpop.permute.xlu0 %2331 }
 0x40e   : > { %v2404_v34 = vsel %vm4620_vm3, %v2330_v48, %v2332_v28  ;;  %vm4636_vm3 = vmmov %vm4625_vm0 }
 0x40f   : > { %2514 = vst [vmem:[%s4335_s30 + $0x20] sm:$0xff] %v2475_v33  ;;  %v2476_v2 = vmax.f32 %v4138_v15, %v2404_v34 }
 0x411   : > { %2515 = vst [vmem:[%s4335_s30 + $0x28] sm:$0xff] %v2476_v2 }
 0x433   : > { %v2334_v61 = vpop.permute.xlu1 %2333 }
 0x434   : > { %v2405_v49 = vsel %vm4621_vm15, %v2332_v28, %v2334_v61  ;;  %vm4637_vm15 = vmmov %vm4625_vm0 }
 0x435   : > { %v2477_v30 = vmax.f32 %v4144_v40, %v2405_v49  ;;  %v2336_v39 = vpop.permute.xlu0 %2335 }
 0x436   : > { %v2406_v43 = vsel %vm4622_vm14, %v2334_v61, %v2336_v39  ;;  %vm4638_vm14 = vmmov %vm4625_vm0 }
 0x437   : > { %2516 = vst [vmem:[%s4335_s30 + $0x30] sm:$0xff] %v2477_v30  ;;  %v2478_v12 = vmax.f32 %v4152_v57, %v2406_v43  ;;  %v2338_v38 = vpop.permute.xlu1 %2337 }
 0x438   : > { %v2407_v59 = vsel %vm4623_vm11, %v2336_v39, %v2338_v38  ;;  %vm4639_vm11 = vmmov %vm4625_vm0 }
 0x439   : > { %2517 = vst [vmem:[%s4335_s30 + $0x38] sm:$0xff] %v2478_v12  ;;  %v2479_v15 = vmax.f32 %v4156_v19, %v2407_v59  ;;  %v2340_v56 = vpop.permute.xlu0 %2339 }
 0x43b   : > { %2518 = vst [vmem:[%s4335_s30 + $0x40] sm:$0xff] %v2479_v15  ;;  %v2342_v45 = vpop.permute.xlu1 %2341 }
 0x43c   : > { %v2408_v40 = vsel %vm4624_vm8, %v2340_v56, %v2342_v45  ;;  %vm4640_vm8 = vmmov %vm4625_vm0 }
 0x43d   : > { %v2480_v3 = vmax.f32 %v4165_v27, %v2408_v40  ;;  %v2344_v5 = vpop.permute.xlu0 %2343 }
 0x43e   : > { %v2409_v37 = vsel %vm4625_vm0, %v2342_v45, %v2344_v5 }
 0x43f   : > { %2519 = vst [vmem:[%s4335_s30 + $0x48] sm:$0xff] %v2480_v3  ;;  %v2481_v57 = vmax.f32 %v4170_v36, %v2409_v37  ;;  %v2346_v58 = vpop.permute.xlu1 %2345 }
 0x440   : > { %v2410_v22 = vsel %vm4626_vm13, %v2344_v5, %v2346_v58  ;;  %vm4641_vm13 = vmmov %vm4625_vm0 }
 0x441   : > { %2520 = vst [vmem:[%s4335_s30 + $0x50] sm:$0xff] %v2481_v57  ;;  %v2482_v19 = vmax.f32 %v4176_v16, %v2410_v22  ;;  %v2348_v9 = vpop.permute.xlu0 %2347 }
 0x442   : > { %v2411_v55 = vsel %vm4627_vm6, %v2346_v58, %v2348_v9  ;;  %vm4642_vm6 = vmmov %vm4625_vm0 }
 0x443   : > { %2521 = vst [vmem:[%s4335_s30 + $0x58] sm:$0xff] %v2482_v19  ;;  %v2483_v27 = vmax.f32 %v4182_v8, %v2411_v55  ;;  %v2350_v51 = vpop.permute.xlu1 %2349 }
 0x444   : > { %v2412_v14 = vsel %vm4628_vm12, %v2348_v9, %v2350_v51  ;;  %vm4643_vm12 = vmmov %vm4625_vm0 }
 0x445   : > { %2522 = vst [vmem:[%s4335_s30 + $0x60] sm:$0xff] %v2483_v27  ;;  %v2484_v36 = vmax.f32 %v4188_v17, %v2412_v14  ;;  %v2352_v31 = vpop.permute.xlu0 %2351 }
 0x446   : > { %v2413_v32 = vsel %vm4629_vm1, %v2350_v51, %v2352_v31  ;;  %vm4644_vm1 = vmmov %vm4625_vm0 }
 0x447   : > { %2523 = vst [vmem:[%s4335_s30 + $0x68] sm:$0xff] %v2484_v36  ;;  %v2485_v16 = vmax.f32 %v4194_v13, %v2413_v32  ;;  %v2354_v35 = vpop.permute.xlu1 %2353 }
 0x448   : > { %v2414_v50 = vsel %vm4630_vm10, %v2352_v31, %v2354_v35  ;;  %vm4645_vm10 = vmmov %vm4625_vm0 }
 0x449   : > { %2524 = vst [vmem:[%s4335_s30 + $0x70] sm:$0xff] %v2485_v16  ;;  %v2486_v8 = vmax.f32 %v4200_v42, %v2414_v50  ;;  %v2356_v48 = vpop.permute.xlu0 %2355 }
 0x44a   : > { %v2415_v25 = vsel %vm4631_vm2, %v2354_v35, %v2356_v48  ;;  %vm4646_vm2 = vmmov %vm4625_vm0 }
 0x44b   : > { %2525 = vst [vmem:[%s4335_s30 + $0x78] sm:$0xff] %v2486_v8  ;;  %v2487_v17 = vmax.f32 %v4206_v18, %v2415_v25  ;;  %v2358_v33 = vpop.permute.xlu1 %2357 }
 0x44c   : > { %v2416_v28 = vsel %vm4632_vm9, %v2356_v48, %v2358_v33  ;;  %vm4647_vm9 = vmmov %vm4625_vm0 }
 0x44d   : > { %2526 = vst [vmem:[%s4335_s30 + $0x80] sm:$0xff] %v2487_v17  ;;  %v2488_v13 = vmax.f32 %v4212_v41, %v2416_v28  ;;  %v2360_v34 = vpop.permute.xlu0 %2359 }
 0x44f   : > { %2527 = vst [vmem:[%s4335_s30 + $0x88] sm:$0xff] %v2488_v13  ;;  %v2362_v2 = vpop.permute.xlu1 %2361 }
 0x450   : > { %v2417_v42 = vsel %vm4633_vm7, %v2360_v34, %v2362_v2  ;;  %vm4648_vm7 = vmmov %vm4625_vm0 }
 0x451   : > { %v2489_v61 = vmax.f32 %v4221_v1, %v2417_v42  ;;  %v2364_v49 = vpop.permute.xlu0 %2363 }
 0x452   : > { %v2418_v30 = vsel %vm4634_vm5, %v2362_v2, %v2364_v49  ;;  %vm4649_vm5 = vmmov %vm4625_vm0 }
 0x453   : > { %2528 = vst [vmem:[%s4335_s30 + $0x90] sm:$0xff] %v2489_v61  ;;  %v2490_v18 = vmax.f32 %v4226_v20, %v2418_v30  ;;  %v2366_v39 = vpop.permute.xlu1 %2365 }
 0x454   : > { %v2419_v43 = vsel %vm4635_vm4, %v2364_v49, %v2366_v39 }
 0x455   : > { %2529 = vst [vmem:[%s4335_s30 + $0x98] sm:$0xff] %v2490_v18  ;;  %v2491_v41 = vmax.f32 %v4232_v11, %v2419_v43  ;;  %v2368_v12 = vpop.permute.xlu0 %2367 }
 0x456   : > { %v2420_v38 = vsel %vm4636_vm3, %v2366_v39, %v2368_v12 }
 0x457   : > { %2530 = vst [vmem:[%s4335_s30 + $0xa0] sm:$0xff] %v2491_v41  ;;  %v2492_v1 = vmax.f32 %v4238_v21, %v2420_v38  ;;  %v2370_v59 = vpop.permute.xlu1 %2369 }
 0x458   : > { %v2421_v15 = vsel %vm4637_vm15, %v2368_v12, %v2370_v59 }
 0x459   : > { %2531 = vst [vmem:[%s4335_s30 + $0xa8] sm:$0xff] %v2492_v1  ;;  %v2493_v20 = vmax.f32 %v4244_v62, %v2421_v15  ;;  %v2372_v56 = vpop.permute.xlu0 %2371 }
 0x45a   : > { %v2422_v45 = vsel %vm4638_vm14, %v2370_v59, %v2372_v56 }
 0x45b   : > { %2532 = vst [vmem:[%s4335_s30 + $0xb0] sm:$0xff] %v2493_v20  ;;  %v2494_v11 = vmax.f32 %v4250_v29, %v2422_v45  ;;  %v2374_v40 = vpop.permute.xlu1 %2373 }
 0x45c   : > { %v2423_v3 = vsel %vm4639_vm11, %v2372_v56, %v2374_v40 }
 0x45d   : > { %2533 = vst [vmem:[%s4335_s30 + $0xb8] sm:$0xff] %v2494_v11  ;;  %v2495_v21 = vmax.f32 %v4256_v4, %v2423_v3  ;;  %v2376_v5 = vpop.permute.xlu0 %2375 }
 0x45e   : > { %v2424_v37 = vsel %vm4640_vm8, %v2374_v40, %v2376_v5 }
 0x45f   : > { %2534 = vst [vmem:[%s4335_s30 + $0xc0] sm:$0xff] %v2495_v21  ;;  %v2496_v62 = vmax.f32 %v4262_v23, %v2424_v37  ;;  %v2378_v57 = vpop.permute.xlu1 %2377 }
 0x460   : > { %v2425_v58 = vsel %vm4625_vm0, %v2376_v5, %v2378_v57 }
 0x461   : > { %2535 = vst [vmem:[%s4335_s30 + $0xc8] sm:$0xff] %v2496_v62  ;;  %v2497_v29 = vmax.f32 %v4268_v26, %v2425_v58  ;;  %v2380_v22 = vpop.permute.xlu0 %2379 }
 0x463   : > { %2536 = vst [vmem:[%s4335_s30 + $0xd0] sm:$0xff] %v2497_v29  ;;  %v2382_v19 = vpop.permute.xlu1 %2381 }
 0x464   : > { %v2426_v4 = vsel %vm4641_vm13, %v2380_v22, %v2382_v19 }
 0x465   : > { %v2498_v9 = vmax.f32 %v4277_v10, %v2426_v4  ;;  %v2384_v55 = vpop.permute.xlu0 %2383 }
 0x466   : > { %v2427_v27 = vsel %vm4642_vm6, %v2382_v19, %v2384_v55 }
 0x467   : > { %2537 = vst [vmem:[%s4335_s30 + $0xd8] sm:$0xff] %v2498_v9  ;;  %v2499_v23 = vmax.f32 %v4282_v54, %v2427_v27  ;;  %v2386_v51 = vpop.permute.xlu1 %2385 }
 0x468   : > { %v2428_v14 = vsel %vm4643_vm12, %v2384_v55, %v2386_v51 }
 0x469   : > { %2538 = vst [vmem:[%s4335_s30 + $0xe0] sm:$0xff] %v2499_v23  ;;  %v2500_v26 = vmax.f32 %v4288_v52, %v2428_v14  ;;  %v2388_v36 = vpop.permute.xlu0 %2387 }
 0x46a   : > { %v2429_v31 = vsel %vm4644_vm1, %v2386_v51, %v2388_v36 }
 0x46b   : > { %2539 = vst [vmem:[%s4335_s30 + $0xe8] sm:$0xff] %v2500_v26  ;;  %v2501_v10 = vmax.f32 %v4294_v46, %v2429_v31  ;;  %v2390_v32 = vpop.permute.xlu1 %2389 }
 0x46c   : > { %v2430_v16 = vsel %vm4645_vm10, %v2388_v36, %v2390_v32 }
 0x46d   : > { %2540 = vst [vmem:[%s4335_s30 + $0xf0] sm:$0xff] %v2501_v10  ;;  %v2502_v54 = vmax.f32 %v4300_v24, %v2430_v16  ;;  %v2392_v35 = vpop.permute.xlu0 %2391 }
 0x46e   : > { %v2431_v50 = vsel %vm4646_vm2, %v2390_v32, %v2392_v35 }
 0x46f   : > { %2541 = vst [vmem:[%s4335_s30 + $0xf8] sm:$0xff] %v2502_v54  ;;  %v2503_v52 = vmax.f32 %v4306_v0, %v2431_v50  ;;  %v2394_v8 = vpop.permute.xlu1 %2393 }
 0x470   : > { %v2432_v48 = vsel %vm4647_vm9, %v2392_v35, %v2394_v8 }
 0x471   : > { %2542 = vst [vmem:[%s4335_s30 + $0x100] sm:$0xff] %v2503_v52  ;;  %v2504_v46 = vmax.f32 %v4312_v7, %v2432_v48  ;;  %v2396_v25 = vpop.permute.xlu0 %2395 }
 0x472   : > { %v2433_v17 = vsel %vm4648_vm7, %v2394_v8, %v2396_v25 }
 0x473   : > { %2543 = vst [vmem:[%s4335_s30 + $0x108] sm:$0xff] %v2504_v46  ;;  %v2505_v33 = vmax.f32 %v4318_v60, %v2433_v17  ;;  %v2398_v24 = vpop.permute.xlu1 %2397  ;;  %40 = sbr.rel (!%p38_p5) target bundleno = 18 (0x12), region = 45 }
 0x474   : > { %v2434_v28 = vsel %vm4649_vm5, %v2396_v25, %v2398_v24 }
 0x475   : > { %2544 = vst [vmem:[%s4335_s30 + $0x110] sm:$0xff] %v2505_v33  ;;  %v2506_v13 = vmax.f32 %v4325_v63, %v2434_v28 }
 0x477   : > { %2545 = vst [vmem:[%s4335_s30 + $0x118] sm:$0xff] %v2506_v13 }
 0x478   :  { %2550 = vsyncpa [#allocation4], 1 }

// kernel: tudui_forward.5
= control target key start
LH: loop header
LB: loop body
LE: loop exit
PB: predicated region body
PF: predicated region fallthrough
CT: control target
= control target key end

     0   :  { %s4783_s0 = inlined_call_operand.vmem [shape: f32[2,32,425], index: 0, kind: input, shape index: {}]   ;;  %s4784_s1 = inlined_call_operand.vmem [shape: f32[32,800], index: 1, kind: input, shape index: {}]   ;;  %s4785_s3 = inlined_call_operand.vmem [shape: f32[2,32,320], index: 3, kind: output, shape index: {}]   ;;  %s4786_s2 = inlined_call_operand.vmem [shape: f32[32,1], index: 2, kind: input, shape index: {}]  }
   0x1   :  { %v3066_v0 = vld [vmem:[%s4784_s1] sm:$0xff]  ;;  %v3071_v1 = vld [vmem:[%s4784_s1 + $0x8] sm:$0xff]  ;;  %v3076_v2 = vld [vmem:[%s4784_s1 + $0x10] sm:$0xff] }
   0x2   :  { %4817 = vst [vmem:[#allocation3_spill] sm:$0xff] %v3066_v0  ;;  %4818 = vst [vmem:[#allocation4_spill] sm:$0xff] %v3071_v1  ;;  %v3081_v3 = vld [vmem:[%s4784_s1 + $0x18] sm:$0xff]  ;;  %v3086_v4 = vld [vmem:[%s4784_s1 + $0x20] sm:$0xff] }
   0x3   :  { %4819 = vst [vmem:[#allocation5_spill] sm:$0xff] %v3076_v2  ;;  %4820 = vst [vmem:[#allocation6_spill] sm:$0xff] %v3081_v3  ;;  %v3091_v5 = vld [vmem:[%s4784_s1 + $0x28] sm:$0xff]  ;;  %v3096_v6 = vld [vmem:[%s4784_s1 + $0x30] sm:$0xff] }
   0x4   :  { %4821 = vst [vmem:[#allocation7_spill] sm:$0xff] %v3086_v4  ;;  %4822 = vst [vmem:[#allocation8_spill] sm:$0xff] %v3091_v5  ;;  %v3101_v7 = vld [vmem:[%s4784_s1 + $0x38] sm:$0xff]  ;;  %v3106_v8 = vld [vmem:[%s4784_s1 + $0x40] sm:$0xff] }
   0x5   :  { %4823 = vst [vmem:[#allocation9_spill] sm:$0xff] %v3096_v6  ;;  %4824 = vst [vmem:[#allocation10_spill] sm:$0xff] %v3101_v7  ;;  %v3111_v9 = vld [vmem:[%s4784_s1 + $0x48] sm:$0xff]  ;;  %v3116_v10 = vld [vmem:[%s4784_s1 + $0x50] sm:$0xff] }
   0x6   :  { %4825 = vst [vmem:[#allocation11_spill] sm:$0xff] %v3106_v8  ;;  %4826 = vst [vmem:[#allocation12_spill] sm:$0xff] %v3111_v9  ;;  %v3121_v11 = vld [vmem:[%s4784_s1 + $0x58] sm:$0xff]  ;;  %v3126_v12 = vld [vmem:[%s4784_s1 + $0x60] sm:$0xff] }
   0x7   :  { %4827 = vst [vmem:[#allocation13_spill] sm:$0xff] %v3116_v10  ;;  %4828 = vst [vmem:[#allocation14_spill] sm:$0xff] %v3121_v11  ;;  %v3131_v13 = vld [vmem:[%s4784_s1 + $0x68] sm:$0xff]  ;;  %v3136_v14 = vld [vmem:[%s4784_s1 + $0x70] sm:$0xff] }
   0x8   :  { %4829 = vst [vmem:[#allocation15_spill] sm:$0xff] %v3126_v12  ;;  %4830 = vst [vmem:[#allocation16_spill] sm:$0xff] %v3131_v13  ;;  %v3141_v15 = vld [vmem:[%s4784_s1 + $0x78] sm:$0xff]  ;;  %v3146_v16 = vld [vmem:[%s4784_s1 + $0x80] sm:$0xff] }
   0x9   :  { %4831 = vst [vmem:[#allocation17_spill] sm:$0xff] %v3136_v14  ;;  %4832 = vst [vmem:[#allocation18_spill] sm:$0xff] %v3141_v15  ;;  %v3151_v17 = vld [vmem:[%s4784_s1 + $0x88] sm:$0xff]  ;;  %v3156_v18 = vld [vmem:[%s4784_s1 + $0x90] sm:$0xff] }
   0xa   :  { %4833 = vst [vmem:[#allocation19_spill] sm:$0xff] %v3146_v16  ;;  %4834 = vst [vmem:[#allocation20_spill] sm:$0xff] %v3151_v17  ;;  %v3161_v19 = vld [vmem:[%s4784_s1 + $0x98] sm:$0xff]  ;;  %v3166_v20 = vld [vmem:[%s4784_s1 + $0xa0] sm:$0xff] }
   0xb   :  { %4835 = vst [vmem:[#allocation21_spill] sm:$0xff] %v3156_v18  ;;  %4836 = vst [vmem:[#allocation22_spill] sm:$0xff] %v3161_v19  ;;  %v3171_v21 = vld [vmem:[%s4784_s1 + $0xa8] sm:$0xff]  ;;  %v3176_v22 = vld [vmem:[%s4784_s1 + $0xb0] sm:$0xff] }
   0xc   :  { %4837 = vst [vmem:[#allocation23_spill] sm:$0xff] %v3166_v20  ;;  %4838 = vst [vmem:[#allocation24_spill] sm:$0xff] %v3171_v21  ;;  %v3181_v23 = vld [vmem:[%s4784_s1 + $0xb8] sm:$0xff]  ;;  %v3186_v24 = vld [vmem:[%s4784_s1 + $0xc0] sm:$0xff] }
   0xd   :  { %4839 = vst [vmem:[#allocation25_spill] sm:$0xff] %v3176_v22  ;;  %4840 = vst [vmem:[#allocation26_spill] sm:$0xff] %v3181_v23  ;;  %v3191_v25 = vld [vmem:[%s4784_s1 + $0xc8] sm:$0xff]  ;;  %v3196_v26 = vld [vmem:[%s4784_s1 + $0xd0] sm:$0xff] }
   0xe   :  { %4841 = vst [vmem:[#allocation27_spill] sm:$0xff] %v3186_v24  ;;  %4842 = vst [vmem:[#allocation28_spill] sm:$0xff] %v3191_v25  ;;  %v3201_v27 = vld [vmem:[%s4784_s1 + $0xd8] sm:$0xff]  ;;  %v3206_v28 = vld [vmem:[%s4786_s2] sm:$0xff]  ;;  %s3223_s1 = smov 0  }
   0xf   :  { %4843 = vst [vmem:[#allocation29_spill] sm:$0xff] %v3196_v26  ;;  %4844 = vst [vmem:[#allocation30_spill] sm:$0xff] %v3201_v27  ;;  %v3211_v29 = vld [vmem:[%s4786_s2 + $0x8] sm:$0xff]  ;;  %v3216_v30 = vld [vmem:[%s4786_s2 + $0x10] sm:$0xff] }
  0x10   :  { %4845 = vst [vmem:[#allocation31_spill] sm:$0xff] %v3206_v28  ;;  %4846 = vst [vmem:[#allocation32_spill] sm:$0xff] %v3211_v29  ;;  %v3221_v31 = vld [vmem:[%s4786_s2 + $0x18] sm:$0xff] }
  0x11   :  { %4847 = vst [vmem:[#allocation33_spill] sm:$0xff] %v3216_v30  ;;  %4848 = vst [vmem:[#allocation34_spill] sm:$0xff] %v3221_v31 }
  0x12 LB: > { %v4850_v17 = vld [vmem:[#allocation20_spill] sm:$0xff]  ;;  %v4851_v16 = vld [vmem:[#allocation19_spill] sm:$0xff]  ;;  %v4852_v10 = vld [vmem:[#allocation13_spill] sm:$0xff]  ;;  %s2803_s22 = sshll.u32 %s3015_s1, 7  ;;  %vm73_vm0 = vcmask 695296   ;;  %s3017_s2 = smov 127   ;;  %s3015_s1 = sphi %s3223_s1, %s51_s1  }
  0x13   : > { %v4853_v9 = vld [vmem:[#allocation12_spill] sm:$0xff]  ;;  %v4855_v2 = vld [vmem:[#allocation5_spill] sm:$0xff]  ;;  %v4858_v15 = vld [vmem:[#allocation18_spill] sm:$0xff]  ;;  %s3234_s25 = scalar_lea.vmem %s4783_s0, %s2803_s22  ;;  %s3018_s26 = smov 126   ;;  %vm120_vm1 = vcmask 1039360   ;;  %vm177_vm2 = vcmask 1031168  }
  0x14   : > { %v4854_v5 = vld [vmem:[#allocation8_spill] sm:$0xff]  ;;  %v4856_v22 = vld [vmem:[#allocation25_spill] sm:$0xff]  ;;  %v4860_v8 = vld [vmem:[#allocation11_spill] sm:$0xff]  ;;  %s3019_s27 = smov 125   ;;  %s3020_s28 = smov 124   ;;  %vm234_vm3 = vcmask 1022976  }
  0x15   : > { %v4849_v24 = vld [vmem:[#allocation27_spill] sm:$0xff]  ;;  %v4857_v21 = vld [vmem:[#allocation24_spill] sm:$0xff]  ;;  %v4859_v14 = vld [vmem:[#allocation17_spill] sm:$0xff]  ;;  %s3021_s29 = smov 108   ;;  %s3022_s30 = smov 107   ;;  %vm291_vm4 = vcmask 1014784  }
  0x16   : > { %v4861_v7 = vld [vmem:[#allocation10_spill] sm:$0xff]  ;;  %v4862_v0 = vld [vmem:[#allocation3_spill] sm:$0xff]  ;;  %v4863_v1 = vld [vmem:[#allocation4_spill] sm:$0xff]  ;;  %s3023_s4 = smov 106   ;;  %s3024_s5 = smov 105   ;;  %vm348_vm5 = vcmask 883712  }
  0x17   : > { %1996 = vmatprep.mubr.f32.mxu0 %v4863_v1  ;;  %v4864_v3 = vld [vmem:[#allocation6_spill] sm:$0xff]  ;;  %v3237_v32 = vld [vmem:[%s3234_s25 + $0x10] sm:$0xff]  ;;  %v3240_v33 = vld [vmem:[%s3234_s25] sm:$0xff]  ;;  %s3025_s6 = smov 87   ;;  %s3026_s7 = smov 88   ;;  %vm405_vm6 = vcmask 875520  }
  0x18   : > { %2085 = vmatprep.mubr.f32.mxu1 %v4864_v3  ;;  %v3243_v34 = vld [vmem:[%s3234_s25 + $0x20] sm:$0xff]  ;;  %100 = vrot.lane.b32.xlu1 %v3237_v32, %s3017_s2  ;;  %71 = vst [vmem:[#allocation2] sm:$0xff] %v3240_v33  ;;  %v3252_v35 = vld [vmem:[%s3234_s25 + $0x8] sm:$0xff]  ;;  %v3255_v36 = vld [vmem:[%s3234_s25 + $0x30] sm:$0xff]  ;;  %s3027_s8 = smov 104   ;;  %vm462_vm7 = vcmask 867328  }
  0x19   : > { %96 = vrot.lane.b32.xlu0 %v3240_v33, %s3017_s2  ;;  %75 = vst [vmem:[#allocation2 + $0x18] sm:$0xff] %v3243_v34  ;;  %74 = vst.msk [vmem:[#allocation2 + $0x10] sm:$0xff] %vm73_vm0, %v3237_v32  ;;  %v3261_v37 = vld [vmem:[%s3234_s25 + $0x28] sm:$0xff]  ;;  %v3267_v39 = vld [vmem:[%s3234_s25 + $0x40] sm:$0xff]  ;;  %s3028_s9 = smov 68   ;;  %vm519_vm8 = vcmask 859136  }
  0x1a   : > { %72 = vst [vmem:[#allocation2 + $0x8] sm:$0xff] %v3252_v35  ;;  %v3264_v38 = vld [vmem:[%s3234_s25 + $0x48] sm:$0xff]  ;;  %77 = vst.msk [vmem:[#allocation2 + $0x28] sm:$0xff] %vm73_vm0, %v3255_v36  ;;  %v3275_v40 = vld [vmem:[%s3234_s25 + $0x60] sm:$0xff]  ;;  %s3029_s10 = smov 84   ;;  %vm690_vm9 = vcmask 711680  }
  0x1b   : > { %76 = vst [vmem:[#allocation2 + $0x20] sm:$0xff] %v3261_v37  ;;  %79 = vst [vmem:[#allocation2 + $0x38] sm:$0xff] %v3264_v38  ;;  %v3278_v41 = vld [vmem:[%s3234_s25 + $0x50] sm:$0xff]  ;;  %v3285_v43 = vld [vmem:[%s3234_s25 + $0x68] sm:$0xff]  ;;  %s3030_s11 = smov 85   ;;  %vm633_vm10 = vcmask 719872  }
  0x1c   : > { %78 = vst [vmem:[#allocation2 + $0x30] sm:$0xff] %v3267_v39  ;;  %v3281_v42 = vld [vmem:[%s3234_s25 + $0x70] sm:$0xff]  ;;  %81 = vst [vmem:[#allocation2 + $0x48] sm:$0xff] %v3275_v40  ;;  %102 = vrot.lane.b32.xlu1 %v3243_v34, %s3017_s2  ;;  %s3031_s12 = smov 64   ;;  %vm576_vm11 = vcmask 850944   ;;  %s3032_s13 = smov 86  }
  0x1d   : > { %80 = vst.msk [vmem:[#allocation2 + $0x40] sm:$0xff] %vm73_vm0, %v3278_v41  ;;  %83 = vst.msk [vmem:[#allocation2 + $0x58] sm:$0xff] %vm73_vm0, %v3281_v42  ;;  %98 = vrot.lane.b32.xlu0 %v3252_v35, %s3017_s2  ;;  %s3033_s14 = smov 65   ;;  %vm941_vm12 = vcmask 556032   ;;  %vm872_vm13 = vcmask 687104   ;;  %s3034_s15 = smov 66  }
  0x1e   : > { %82 = vst [vmem:[#allocation2 + $0x50] sm:$0xff] %v3285_v43  ;;  %s3035_s16 = smov 44   ;;  %vm1217_vm14 = vcmask 523264   ;;  %s3036_s17 = smov 67   ;;  %vm747_vm15 = vcmask 703488  }
  0x1f   : > { %s3037_s18 = smov 45   ;;  %s3038_s19 = smov 46  }
  0x20   : > { %106 = vrot.lane.b32.xlu1 %v3255_v36, %s3017_s2  ;;  %s3040_s20 = smov 47   ;;  %s3041_s21 = smov 48  }
  0x21   : > { %104 = vrot.lane.b32.xlu0 %v3261_v37, %s3017_s2  ;;  %s2804_s22 = smul.u32 96, %s3015_s1  ;;  %s51_s1 = sadd.s32 1, %s3015_s1  }
  0x22   : > { %p48_p0 = scmp.ge.s32.totalorder %s51_s1, 2  }
  0x24   : > { %110 = vrot.lane.b32.xlu1 %v3264_v38, %s3017_s2 }
  0x25   : > { %108 = vrot.lane.b32.xlu0 %v3267_v39, %s3017_s2 }
  0x28   : > { %114 = vrot.lane.b32.xlu1 %v3275_v40, %s3017_s2 }
  0x29   : > { %112 = vrot.lane.b32.xlu0 %v3278_v41, %s3017_s2 }
  0x2c   : > { %118 = vrot.lane.b32.xlu1 %v3281_v42, %s3017_s2 }
  0x2d   : > { %116 = vrot.lane.b32.xlu0 %v3285_v43, %s3017_s2 }
  0x30   : > { %155 = vrot.lane.b32.xlu1 %v3252_v35, %s3018_s26 }
  0x31   : > { %153 = vrot.lane.b32.xlu0 %v3240_v33, %s3018_s26 }
  0x34   : > { %159 = vrot.lane.b32.xlu1 %v3243_v34, %s3018_s26 }
  0x35   : > { %157 = vrot.lane.b32.xlu0 %v3237_v32, %s3018_s26 }
  0x38   : > { %163 = vrot.lane.b32.xlu1 %v3255_v36, %s3018_s26 }
  0x39   : > { %161 = vrot.lane.b32.xlu0 %v3261_v37, %s3018_s26 }
  0x3c   : > { %167 = vrot.lane.b32.xlu1 %v3264_v38, %s3018_s26 }
  0x3d   : > { %165 = vrot.lane.b32.xlu0 %v3267_v39, %s3018_s26 }
  0x40   : > { %171 = vrot.lane.b32.xlu1 %v3275_v40, %s3018_s26 }
  0x41   : > { %169 = vrot.lane.b32.xlu0 %v3278_v41, %s3018_s26 }
  0x44   : > { %175 = vrot.lane.b32.xlu1 %v3281_v42, %s3018_s26 }
  0x45   : > { %173 = vrot.lane.b32.xlu0 %v3285_v43, %s3018_s26 }
  0x48   : > { %212 = vrot.lane.b32.xlu1 %v3252_v35, %s3019_s27 }
  0x49   : > { %210 = vrot.lane.b32.xlu0 %v3240_v33, %s3019_s27 }
  0x4c   : > { %216 = vrot.lane.b32.xlu1 %v3243_v34, %s3019_s27 }
  0x4d   : > { %214 = vrot.lane.b32.xlu0 %v3237_v32, %s3019_s27 }
  0x50   : > { %220 = vrot.lane.b32.xlu1 %v3255_v36, %s3019_s27 }
  0x51   : > { %218 = vrot.lane.b32.xlu0 %v3261_v37, %s3019_s27 }
  0x54   : > { %224 = vrot.lane.b32.xlu1 %v3264_v38, %s3019_s27 }
  0x55   : > { %222 = vrot.lane.b32.xlu0 %v3267_v39, %s3019_s27 }
  0x58   : > { %228 = vrot.lane.b32.xlu1 %v3275_v40, %s3019_s27 }
  0x59   : > { %226 = vrot.lane.b32.xlu0 %v3278_v41, %s3019_s27 }
  0x5c   : > { %232 = vrot.lane.b32.xlu1 %v3281_v42, %s3019_s27 }
  0x5d   : > { %230 = vrot.lane.b32.xlu0 %v3285_v43, %s3019_s27 }
  0x60   : > { %269 = vrot.lane.b32.xlu1 %v3252_v35, %s3020_s28 }
  0x61   : > { %267 = vrot.lane.b32.xlu0 %v3240_v33, %s3020_s28 }
  0x64   : > { %273 = vrot.lane.b32.xlu1 %v3243_v34, %s3020_s28 }
  0x65   : > { %271 = vrot.lane.b32.xlu0 %v3237_v32, %s3020_s28 }
  0x68   : > { %277 = vrot.lane.b32.xlu1 %v3255_v36, %s3020_s28 }
  0x69   : > { %275 = vrot.lane.b32.xlu0 %v3261_v37, %s3020_s28 }
  0x6c   : > { %281 = vrot.lane.b32.xlu1 %v3264_v38, %s3020_s28 }
  0x6d   : > { %279 = vrot.lane.b32.xlu0 %v3267_v39, %s3020_s28 }
  0x70   : > { %285 = vrot.lane.b32.xlu1 %v3275_v40, %s3020_s28 }
  0x71   : > { %283 = vrot.lane.b32.xlu0 %v3278_v41, %s3020_s28 }
  0x74   : > { %289 = vrot.lane.b32.xlu1 %v3281_v42, %s3020_s28 }
  0x75   : > { %287 = vrot.lane.b32.xlu0 %v3285_v43, %s3020_s28 }
  0x78   : > { %326 = vrot.lane.b32.xlu1 %v3252_v35, %s3021_s29 }
  0x79   : > { %324 = vrot.lane.b32.xlu0 %v3240_v33, %s3021_s29 }
  0x7c   : > { %330 = vrot.lane.b32.xlu1 %v3243_v34, %s3021_s29 }
  0x7d   : > { %328 = vrot.lane.b32.xlu0 %v3237_v32, %s3021_s29 }
  0x80   : > { %334 = vrot.lane.b32.xlu1 %v3255_v36, %s3021_s29 }
  0x81   : > { %332 = vrot.lane.b32.xlu0 %v3261_v37, %s3021_s29 }
  0x84   : > { %338 = vrot.lane.b32.xlu1 %v3264_v38, %s3021_s29 }
  0x85   : > { %336 = vrot.lane.b32.xlu0 %v3267_v39, %s3021_s29 }
  0x88   : > { %342 = vrot.lane.b32.xlu1 %v3275_v40, %s3021_s29 }
  0x89   : > { %340 = vrot.lane.b32.xlu0 %v3278_v41, %s3021_s29 }
  0x8a   : > { %v101_v44 = vpop.permute.xlu1 %100 }
  0x8b   : > { %v97_v45 = vpop.permute.xlu0 %96  ;;  %143 = vst.msk [vmem:[#allocation2 + $0x70] sm:$0xff] %vm73_vm0, %v101_v44 }
  0x8c   : > { %346 = vrot.lane.b32.xlu1 %v3281_v42, %s3021_s29 }
  0x8d   : > { %344 = vrot.lane.b32.xlu0 %v3285_v43, %s3021_s29 }
  0x8e   : > { %v103_v46 = vpop.permute.xlu1 %102 }
  0x8f   : > { %v99_v47 = vpop.permute.xlu0 %98 }
  0x90   : > { %v3374_v48 = vsel %vm120_vm1, %v97_v45, %v99_v47  ;;  %v3377_v49 = vsel %vm120_vm1, %v99_v47, %v101_v44  ;;  %383 = vrot.lane.b32.xlu1 %v3252_v35, %s3022_s30 }
  0x91   : > { %381 = vrot.lane.b32.xlu0 %v3240_v33, %s3022_s30 }
  0x92   : > { %v107_v50 = vpop.permute.xlu1 %106 }
  0x93   : > { %v105_v51 = vpop.permute.xlu0 %104  ;;  %146 = vst.msk [vmem:[#allocation2 + $0x88] sm:$0xff] %vm73_vm0, %v107_v50 }
  0x94   : > { %v3385_v52 = vsel %vm120_vm1, %v103_v46, %v105_v51  ;;  %v3388_v53 = vsel %vm120_vm1, %v105_v51, %v107_v50  ;;  %387 = vrot.lane.b32.xlu1 %v3243_v34, %s3022_s30 }
  0x95   : > { %385 = vrot.lane.b32.xlu0 %v3237_v32, %s3022_s30 }
  0x96   : > { %v111_v54 = vpop.permute.xlu1 %110 }
  0x97   : > { %v109_v55 = vpop.permute.xlu0 %108 }
  0x98   : > { %v3395_v56 = vsel %vm120_vm1, %v109_v55, %v111_v54  ;;  %391 = vrot.lane.b32.xlu1 %v3255_v36, %s3022_s30 }
  0x99   : > { %389 = vrot.lane.b32.xlu0 %v3261_v37, %s3022_s30 }
  0x9a   : > { %v115_v57 = vpop.permute.xlu1 %114 }
  0x9b   : > { %v113_v58 = vpop.permute.xlu0 %112 }
  0x9c   : > { %v3402_v59 = vsel %vm120_vm1, %v111_v54, %v113_v58  ;;  %149 = vst.msk [vmem:[#allocation2 + $0xa0] sm:$0xff] %vm73_vm0, %v113_v58  ;;  %395 = vrot.lane.b32.xlu1 %v3264_v38, %s3022_s30 }
  0x9d   : > { %393 = vrot.lane.b32.xlu0 %v3267_v39, %s3022_s30 }
  0x9e   : > { %v119_v60 = vpop.permute.xlu1 %118 }
  0x9f   : > { %v117_v61 = vpop.permute.xlu0 %116  ;;  %152 = vst.msk [vmem:[#allocation2 + $0xb8] sm:$0xff] %vm73_vm0, %v119_v60 }
  0xa0   : > { %v3411_v62 = vsel %vm120_vm1, %v115_v57, %v117_v61  ;;  %v3414_v63 = vsel %vm120_vm1, %v117_v61, %v119_v60  ;;  %399 = vrot.lane.b32.xlu1 %v3275_v40, %s3022_s30 }
  0xa1   : > { %397 = vrot.lane.b32.xlu0 %v3278_v41, %s3022_s30 }
  0xa2   : > { %v156_v44 = vpop.permute.xlu1 %155 }
  0xa3   : > { %v154_v45 = vpop.permute.xlu0 %153 }
  0xa4   : > { %v3421_v46 = vsel %vm177_vm2, %v154_v45, %v156_v44  ;;  %403 = vrot.lane.b32.xlu1 %v3281_v42, %s3022_s30 }
  0xa5   : > { %401 = vrot.lane.b32.xlu0 %v3285_v43, %s3022_s30 }
  0xa6   : > { %v160_v47 = vpop.permute.xlu1 %159 }
  0xa7   : > { %v158_v50 = vpop.permute.xlu0 %157 }
  0xa8   : > { %v3428_v51 = vsel %vm177_vm2, %v156_v44, %v158_v50  ;;  %200 = vst.msk [vmem:[#allocation2 + $0xd0] sm:$0xff] %vm73_vm0, %v158_v50  ;;  %440 = vrot.lane.b32.xlu1 %v3252_v35, %s3023_s4 }
  0xa9   : > { %438 = vrot.lane.b32.xlu0 %v3240_v33, %s3023_s4 }
  0xaa   : > { %v164_v54 = vpop.permute.xlu1 %163 }
  0xab   : > { %v162_v55 = vpop.permute.xlu0 %161  ;;  %203 = vst.msk [vmem:[#allocation2 + $0xe8] sm:$0xff] %vm73_vm0, %v164_v54 }
  0xac   : > { %v3437_v57 = vsel %vm177_vm2, %v160_v47, %v162_v55  ;;  %v3440_v58 = vsel %vm177_vm2, %v162_v55, %v164_v54  ;;  %444 = vrot.lane.b32.xlu1 %v3243_v34, %s3023_s4 }
  0xad   : > { %442 = vrot.lane.b32.xlu0 %v3237_v32, %s3023_s4 }
  0xae   : > { %v168_v60 = vpop.permute.xlu1 %167 }
  0xaf   : > { %v166_v61 = vpop.permute.xlu0 %165 }
  0xb0   : > { %v3447_v44 = vsel %vm177_vm2, %v166_v61, %v168_v60  ;;  %448 = vrot.lane.b32.xlu1 %v3255_v36, %s3023_s4 }
  0xb1   : > { %446 = vrot.lane.b32.xlu0 %v3261_v37, %s3023_s4 }
  0xb2   : > { %v172_v45 = vpop.permute.xlu1 %171 }
  0xb3   : > { %v170_v47 = vpop.permute.xlu0 %169 }
  0xb4   : > { %v3454_v50 = vsel %vm177_vm2, %v168_v60, %v170_v47  ;;  %206 = vst.msk [vmem:[#allocation2 + $0x100] sm:$0xff] %vm73_vm0, %v170_v47  ;;  %452 = vrot.lane.b32.xlu1 %v3264_v38, %s3023_s4 }
  0xb5   : > { %450 = vrot.lane.b32.xlu0 %v3267_v39, %s3023_s4 }
  0xb6   : > { %v176_v54 = vpop.permute.xlu1 %175 }
  0xb7   : > { %v174_v55 = vpop.permute.xlu0 %173  ;;  %209 = vst.msk [vmem:[#allocation2 + $0x118] sm:$0xff] %vm73_vm0, %v176_v54 }
  0xb8   : > { %v3463_v61 = vsel %vm177_vm2, %v172_v45, %v174_v55  ;;  %v3466_v25 = vsel %vm177_vm2, %v174_v55, %v176_v54  ;;  %456 = vrot.lane.b32.xlu1 %v3275_v40, %s3023_s4  ;;  %vm1148_vm2 = vcmask 531456  }
  0xb9   : > { %454 = vrot.lane.b32.xlu0 %v3278_v41, %s3023_s4 }
  0xba   : > { %v213_v60 = vpop.permute.xlu1 %212 }
  0xbb   : > { %v211_v47 = vpop.permute.xlu0 %210 }
  0xbc   : > { %v235_v26 = vsel %vm234_vm3, %v211_v47, %v213_v60  ;;  %460 = vrot.lane.b32.xlu1 %v3281_v42, %s3023_s4 }
  0xbd   : > { %458 = vrot.lane.b32.xlu0 %v3285_v43, %s3023_s4 }
  0xbe   : > { %v217_v45 = vpop.permute.xlu1 %216 }
  0xbf   : > { %v215_v54 = vpop.permute.xlu0 %214 }
  0xc0   : > { %v236_v55 = vsel %vm234_vm3, %v213_v60, %v215_v54  ;;  %257 = vst.msk [vmem:[#allocation2 + $0x130] sm:$0xff] %vm73_vm0, %v215_v54  ;;  %497 = vrot.lane.b32.xlu1 %v3252_v35, %s3024_s5 }
  0xc1   : > { %495 = vrot.lane.b32.xlu0 %v3240_v33, %s3024_s5 }
  0xc2   : > { %v221_v47 = vpop.permute.xlu1 %220 }
  0xc3   : > { %v219_v18 = vpop.permute.xlu0 %218  ;;  %260 = vst.msk [vmem:[#allocation2 + $0x148] sm:$0xff] %vm73_vm0, %v221_v47 }
  0xc4   : > { %v237_v19 = vsel %vm234_vm3, %v217_v45, %v219_v18  ;;  %v238_v11 = vsel %vm234_vm3, %v219_v18, %v221_v47  ;;  %501 = vrot.lane.b32.xlu1 %v3243_v34, %s3024_s5 }
  0xc5   : > { %499 = vrot.lane.b32.xlu0 %v3237_v32, %s3024_s5 }
  0xc6   : > { %v225_v60 = vpop.permute.xlu1 %224 }
  0xc7   : > { %v223_v54 = vpop.permute.xlu0 %222 }
  0xc8   : > { %v239_v12 = vsel %vm234_vm3, %v223_v54, %v225_v60  ;;  %505 = vrot.lane.b32.xlu1 %v3255_v36, %s3024_s5 }
  0xc9   : > { %503 = vrot.lane.b32.xlu0 %v3261_v37, %s3024_s5 }
  0xca   : > { %v229_v4 = vpop.permute.xlu1 %228 }
  0xcb   : > { %v227_v45 = vpop.permute.xlu0 %226 }
  0xcc   : > { %v240_v18 = vsel %vm234_vm3, %v225_v60, %v227_v45  ;;  %263 = vst.msk [vmem:[#allocation2 + $0x160] sm:$0xff] %vm73_vm0, %v227_v45  ;;  %688 = vrot.lane.b32.xlu1 %v3281_v42, %s3025_s6 }
  0xcd   : > { %686 = vrot.lane.b32.xlu0 %v3285_v43, %s3025_s6 }
  0xce   : > { %v233_v47 = vpop.permute.xlu1 %232 }
  0xcf   : > { %v231_v54 = vpop.permute.xlu0 %230  ;;  %266 = vst.msk [vmem:[#allocation2 + $0x178] sm:$0xff] %vm73_vm0, %v233_v47 }
  0xd0   : > { %v241_v31 = vsel %vm234_vm3, %v229_v4, %v231_v54  ;;  %v242_v30 = vsel %vm234_vm3, %v231_v54, %v233_v47  ;;  %680 = vrot.lane.b32.xlu1 %v3264_v38, %s3025_s6  ;;  %vm1079_vm3 = vcmask 539648  }
  0xd1   : > { %684 = vrot.lane.b32.xlu0 %v3275_v40, %s3025_s6  ;;  %1932 = vmatprep.subr.mxu0 %v242_v30 }
  0xd2   : > { %v270_v60 = vpop.permute.xlu1 %269  ;;  %1933 = vmatpush1.msra.mxu0 %v241_v31 }
  0xd3   : > { %v268_v45 = vpop.permute.xlu0 %267  ;;  %1934 = vmatprep.subr.mxu0 %v240_v18 }
  0xd4   : > { %v3509_v28 = vsel %vm291_vm4, %v268_v45, %v270_v60  ;;  %678 = vrot.lane.b32.xlu1 %v3267_v39, %s3025_s6  ;;  %1935 = vmatpush1.msra.mxu0 %v239_v12 }
  0xd5   : > { %682 = vrot.lane.b32.xlu0 %v3278_v41, %s3025_s6  ;;  %1936 = vmatprep.subr.mxu0 %v238_v11 }
  0xd6   : > { %v274_v4 = vpop.permute.xlu1 %273  ;;  %1937 = vmatpush1.msra.mxu0 %v237_v19 }
  0xd7   : > { %v272_v47 = vpop.permute.xlu0 %271  ;;  %1938 = vmatprep.subr.mxu0 %v236_v55 }
  0xd8   : > { %v3516_v54 = vsel %vm291_vm4, %v270_v60, %v272_v47  ;;  %314 = vst.msk [vmem:[#allocation2 + $0x190] sm:$0xff] %vm73_vm0, %v272_v47  ;;  %676 = vrot.lane.b32.xlu1 %v3255_v36, %s3025_s6  ;;  %1939 = vmatpush1.msra.mxu0 %v235_v26 }
  0xd9   : > { %674 = vrot.lane.b32.xlu0 %v3261_v37, %s3025_s6  ;;  %1940 = vmatprep.subr.mxu0 %v3466_v25 }
  0xda   : > { %v278_v30 = vpop.permute.xlu1 %277  ;;  %1941 = vmatpush1.msra.mxu0 %v3463_v61 }
  0xdb   : > { %v276_v31 = vpop.permute.xlu0 %275  ;;  %317 = vst.msk [vmem:[#allocation2 + $0x1a8] sm:$0xff] %vm73_vm0, %v278_v30  ;;  %1942 = vmatprep.subr.mxu0 %v3454_v50 }
  0xdc   : > { %v3525_v11 = vsel %vm291_vm4, %v274_v4, %v276_v31  ;;  %v3528_v12 = vsel %vm291_vm4, %v276_v31, %v278_v30  ;;  %668 = vrot.lane.b32.xlu1 %v3252_v35, %s3025_s6  ;;  %1943 = vmatpush1.msra.mxu0 %v3447_v44 }
  0xdd   : > { %672 = vrot.lane.b32.xlu0 %v3243_v34, %s3025_s6  ;;  %1944 = vmatprep.subr.mxu0 %v3440_v58 }
  0xde   : > { %v282_v19 = vpop.permute.xlu1 %281  ;;  %1945 = vmatpush1.msra.mxu0 %v3437_v57 }
  0xdf   : > { %v280_v26 = vpop.permute.xlu0 %279  ;;  %1946 = vmatprep.subr.mxu0 %v3428_v51 }
  0xe0   : > { %v3538_v55 = vsel %vm291_vm4, %v280_v26, %v282_v19  ;;  %666 = vrot.lane.b32.xlu1 %v3240_v33, %s3025_s6  ;;  %1947 = vmatpush1.msra.mxu0 %v3421_v46 }
  0xe1   : > { %670 = vrot.lane.b32.xlu0 %v3237_v32, %s3025_s6  ;;  %1948 = vmatprep.subr.mxu0 %v3414_v63 }
  0xe2   : > { %v286_v25 = vpop.permute.xlu1 %285  ;;  %1949 = vmatpush1.msra.mxu0 %v3411_v62 }
  0xe3   : > { %v284_v18 = vpop.permute.xlu0 %283  ;;  %1950 = vmatprep.subr.mxu0 %v3402_v59 }
  0xe4   : > { %v3548_v61 = vsel %vm291_vm4, %v282_v19, %v284_v18  ;;  %320 = vst.msk [vmem:[#allocation2 + $0x1c0] sm:$0xff] %vm73_vm0, %v284_v18  ;;  %631 = vrot.lane.b32.xlu1 %v3281_v42, %s3026_s7  ;;  %1951 = vmatpush1.msra.mxu0 %v3395_v56 }
  0xe5   : > { %629 = vrot.lane.b32.xlu0 %v3285_v43, %s3026_s7  ;;  %1952 = vmatprep.subr.mxu0 %v3388_v53 }
  0xe6   : > { %v290_v58 = vpop.permute.xlu1 %289  ;;  %1953 = vmatpush1.msra.mxu0 %v3385_v52 }
  0xe7   : > { %v288_v44 = vpop.permute.xlu0 %287  ;;  %323 = vst.msk [vmem:[#allocation2 + $0x1d8] sm:$0xff] %vm73_vm0, %v290_v58  ;;  %1954 = vmatprep.subr.mxu0 %v3377_v49 }
  0xe8   : > { %v3560_v57 = vsel %vm291_vm4, %v286_v25, %v288_v44  ;;  %v3563_v51 = vsel %vm291_vm4, %v288_v44, %v290_v58  ;;  %623 = vrot.lane.b32.xlu1 %v3264_v38, %s3026_s7  ;;  %1955 = vmatpush1.msra.mxu0 %v3374_v48  ;;  %vm1562_vm4 = vcmask 359424  }
  0xe9   : > { %627 = vrot.lane.b32.xlu0 %v3275_v40, %s3026_s7  ;;  %1956 = vmatprep.subr.mxu0 %v3285_v43 }
  0xea   : > { %v327_v63 = vpop.permute.xlu1 %326  ;;  %1957 = vmatpush1.msra.mxu0 %v3275_v40 }
  0xeb   : > { %v325_v46 = vpop.permute.xlu0 %324  ;;  %1958 = vmatprep.subr.mxu0 %v3264_v38 }
  0xec   : > { %v3573_v50 = vsel %vm348_vm5, %v325_v46, %v327_v63  ;;  %621 = vrot.lane.b32.xlu1 %v3267_v39, %s3026_s7  ;;  %1959 = vmatpush1.msra.mxu0 %v3267_v39 }
  0xed   : > { %625 = vrot.lane.b32.xlu0 %v3278_v41, %s3026_s7  ;;  %1960 = vmatprep.subr.mxu0 %v3261_v37 }
  0xee   : > { %v331_v62 = vpop.permute.xlu1 %330  ;;  %1961 = vmatpush1.msra.mxu0 %v3243_v34 }
  0xef   : > { %v329_v59 = vpop.permute.xlu0 %328  ;;  %1962 = vmatprep.subr.mxu0 %v3252_v35 }
  0xf0   : > { %v3583_v60 = vsel %vm348_vm5, %v327_v63, %v329_v59  ;;  %371 = vst.msk [vmem:[#allocation2 + $0x1f0] sm:$0xff] %vm73_vm0, %v329_v59  ;;  %619 = vrot.lane.b32.xlu1 %v3255_v36, %s3026_s7  ;;  %1963 = vmatpush1.msra.mxu0 %v3240_v33 }
  0xf1   : > { %617 = vrot.lane.b32.xlu0 %v3261_v37, %s3026_s7 }
  0xf2   : > { %v335_v52 = vpop.permute.xlu1 %334 }
  0xf3   : > { %v333_v53 = vpop.permute.xlu0 %332  ;;  %374 = vst.msk [vmem:[#allocation2 + $0x208] sm:$0xff] %vm73_vm0, %v335_v52 }
  0xf4   : > { %v3595_v49 = vsel %vm348_vm5, %v331_v62, %v333_v53  ;;  %v3598_v56 = vsel %vm348_vm5, %v333_v53, %v335_v52  ;;  %611 = vrot.lane.b32.xlu1 %v3252_v35, %s3026_s7 }
  0xf5   : > { %615 = vrot.lane.b32.xlu0 %v3243_v34, %s3026_s7 }
  0xf6   : > { %v339_v48 = vpop.permute.xlu1 %338 }
  0xf7   : > { %v337_v45 = vpop.permute.xlu0 %336 }
  0xf8   : > { %v3608_v4 = vsel %vm348_vm5, %v337_v45, %v339_v48  ;;  %609 = vrot.lane.b32.xlu1 %v3240_v33, %s3026_s7 }
  0xf9   : > { %613 = vrot.lane.b32.xlu0 %v3237_v32, %s3026_s7 }
  0xfa   : > { %v343_v47 = vpop.permute.xlu1 %342 }
  0xfb   : > { %v341_v30 = vpop.permute.xlu0 %340 }
  0xfc   : > { %v3618_v31 = vsel %vm348_vm5, %v339_v48, %v341_v30  ;;  %377 = vst.msk [vmem:[#allocation2 + $0x220] sm:$0xff] %vm73_vm0, %v341_v30  ;;  %574 = vrot.lane.b32.xlu1 %v3281_v42, %s3027_s8 }
  0xfd   : > { %572 = vrot.lane.b32.xlu0 %v3285_v43, %s3027_s8 }
  0xfe   : > { %v347_v19 = vpop.permute.xlu1 %346 }
  0xff   : > { %v345_v26 = vpop.permute.xlu0 %344  ;;  %380 = vst.msk [vmem:[#allocation2 + $0x238] sm:$0xff] %vm73_vm0, %v347_v19 }
 0x100   : > { %v3627_v25 = vsel %vm348_vm5, %v343_v47, %v345_v26  ;;  %v3630_v18 = vsel %vm348_vm5, %v345_v26, %v347_v19  ;;  %566 = vrot.lane.b32.xlu1 %v3264_v38, %s3027_s8 }
 0x101   : > { %570 = vrot.lane.b32.xlu0 %v3275_v40, %s3027_s8 }
 0x102   : > { %v384_v58 = vpop.permute.xlu1 %383 }
 0x103   : > { %v382_v44 = vpop.permute.xlu0 %381 }
 0x104   : > { %v3637_v63 = vsel %vm405_vm6, %v382_v44, %v384_v58  ;;  %564 = vrot.lane.b32.xlu1 %v3267_v39, %s3027_s8 }
 0x105   : > { %568 = vrot.lane.b32.xlu0 %v3278_v41, %s3027_s8 }
 0x106   : > { %v388_v46 = vpop.permute.xlu1 %387 }
 0x107   : > { %v386_v62 = vpop.permute.xlu0 %385 }
 0x108   : > { %v3644_v59 = vsel %vm405_vm6, %v384_v58, %v386_v62  ;;  %428 = vst.msk [vmem:[#allocation2 + $0x250] sm:$0xff] %vm73_vm0, %v386_v62  ;;  %562 = vrot.lane.b32.xlu1 %v3255_v36, %s3027_s8 }
 0x109   : > { %560 = vrot.lane.b32.xlu0 %v3261_v37, %s3027_s8 }
 0x10a   : > { %v392_v52 = vpop.permute.xlu1 %391 }
 0x10b   : > { %v390_v53 = vpop.permute.xlu0 %389  ;;  %431 = vst.msk [vmem:[#allocation2 + $0x268] sm:$0xff] %vm73_vm0, %v392_v52 }
 0x10c   : > { %v3653_v48 = vsel %vm405_vm6, %v388_v46, %v390_v53  ;;  %v3656_v45 = vsel %vm405_vm6, %v390_v53, %v392_v52  ;;  %554 = vrot.lane.b32.xlu1 %v3252_v35, %s3027_s8 }
 0x10d   : > { %558 = vrot.lane.b32.xlu0 %v3243_v34, %s3027_s8 }
 0x10e   : > { %v396_v47 = vpop.permute.xlu1 %395 }
 0x10f   : > { %v394_v30 = vpop.permute.xlu0 %393 }
 0x110   : > { %v3663_v19 = vsel %vm405_vm6, %v394_v30, %v396_v47  ;;  %552 = vrot.lane.b32.xlu1 %v3240_v33, %s3027_s8 }
 0x111   : > { %556 = vrot.lane.b32.xlu0 %v3237_v32, %s3027_s8 }
 0x112   : > { %v400_v26 = vpop.permute.xlu1 %399 }
 0x113   : > { %v398_v58 = vpop.permute.xlu0 %397 }
 0x114   : > { %v3670_v44 = vsel %vm405_vm6, %v396_v47, %v398_v58  ;;  %434 = vst.msk [vmem:[#allocation2 + $0x280] sm:$0xff] %vm73_vm0, %v398_v58  ;;  %517 = vrot.lane.b32.xlu1 %v3281_v42, %s3024_s5 }
 0x115   : > { %515 = vrot.lane.b32.xlu0 %v3285_v43, %s3024_s5 }
 0x116   : > { %v404_v46 = vpop.permute.xlu1 %403 }
 0x117   : > { %v402_v62 = vpop.permute.xlu0 %401  ;;  %437 = vst.msk [vmem:[#allocation2 + $0x298] sm:$0xff] %vm73_vm0, %v404_v46 }
 0x118   : > { %v3679_v52 = vsel %vm405_vm6, %v400_v26, %v402_v62  ;;  %v3682_v53 = vsel %vm405_vm6, %v402_v62, %v404_v46  ;;  %509 = vrot.lane.b32.xlu1 %v3264_v38, %s3024_s5  ;;  %vm1010_vm6 = vcmask 547840  }
 0x119   : > { %513 = vrot.lane.b32.xlu0 %v3275_v40, %s3024_s5 }
 0x11a   : > { %v441_v47 = vpop.permute.xlu1 %440 }
 0x11b   : > { %v439_v30 = vpop.permute.xlu0 %438 }
 0x11c   : > { %v463_v58 = vsel %vm462_vm7, %v439_v30, %v441_v47  ;;  %507 = vrot.lane.b32.xlu1 %v3267_v39, %s3024_s5 }
 0x11d   : > { %511 = vrot.lane.b32.xlu0 %v3278_v41, %s3024_s5 }
 0x11e   : > { %v445_v26 = vpop.permute.xlu1 %444 }
 0x11f   : > { %v443_v46 = vpop.permute.xlu0 %442 }
 0x120   : > { %v464_v62 = vsel %vm462_vm7, %v441_v47, %v443_v46  ;;  %485 = vst.msk [vmem:[#allocation2 + $0x2b0] sm:$0xff] %vm73_vm0, %v443_v46  ;;  %937 = vrot.lane.b32.xlu1 %v3281_v42, %s3028_s9 }
 0x121   : > { %935 = vrot.lane.b32.xlu0 %v3285_v43, %s3028_s9 }
 0x122   : > { %v449_v30 = vpop.permute.xlu1 %448 }
 0x123   : > { %v447_v29 = vpop.permute.xlu0 %446  ;;  %488 = vst.msk [vmem:[#allocation2 + $0x2c8] sm:$0xff] %vm73_vm0, %v449_v30 }
 0x124   : > { %v465_v3 = vsel %vm462_vm7, %v445_v26, %v447_v29  ;;  %v466_v1 = vsel %vm462_vm7, %v447_v29, %v449_v30  ;;  %927 = vrot.lane.b32.xlu1 %v3264_v38, %s3028_s9 }
 0x125   : > { %933 = vrot.lane.b32.xlu0 %v3275_v40, %s3028_s9 }
 0x126   : > { %v453_v47 = vpop.permute.xlu1 %452 }
 0x127   : > { %v451_v46 = vpop.permute.xlu0 %450 }
 0x128   : > { %v467_v27 = vsel %vm462_vm7, %v451_v46, %v453_v47  ;;  %925 = vrot.lane.b32.xlu1 %v3267_v39, %s3028_s9 }
 0x129   : > { %929 = vrot.lane.b32.xlu0 %v3278_v41, %s3028_s9 }
 0x12a   : > { %v457_v20 = vpop.permute.xlu1 %456 }
 0x12b   : > { %v455_v26 = vpop.permute.xlu0 %454 }
 0x12c   : > { %v468_v29 = vsel %vm462_vm7, %v453_v47, %v455_v26  ;;  %491 = vst.msk [vmem:[#allocation2 + $0x2e0] sm:$0xff] %vm73_vm0, %v455_v26  ;;  %921 = vrot.lane.b32.xlu1 %v3255_v36, %s3028_s9 }
 0x12d   : > { %919 = vrot.lane.b32.xlu0 %v3261_v37, %s3028_s9 }
 0x12e   : > { %v461_v30 = vpop.permute.xlu1 %460 }
 0x12f   : > { %v459_v46 = vpop.permute.xlu0 %458  ;;  %494 = vst.msk [vmem:[#allocation2 + $0x2f8] sm:$0xff] %vm73_vm0, %v461_v30 }
 0x130   : > { %v469_v13 = vsel %vm462_vm7, %v457_v20, %v459_v46  ;;  %v470_v6 = vsel %vm462_vm7, %v459_v46, %v461_v30  ;;  %911 = vrot.lane.b32.xlu1 %v3252_v35, %s3028_s9  ;;  %vm1919_vm7 = vcmask 261120  }
 0x131   : > { %917 = vrot.lane.b32.xlu0 %v3243_v34, %s3028_s9  ;;  %1964 = vmatprep.subr.mxu0 %v470_v6 }
 0x132   : > { %v498_v47 = vpop.permute.xlu1 %497  ;;  %1965 = vmatpush2.msra.mxu0 %v469_v13 }
 0x133   : > { %v496_v26 = vpop.permute.xlu0 %495  ;;  %1966 = vmatprep.subr.mxu0 %v468_v29  ;;  %v3840_v29 = vld [vmem:[#allocation2 + $0x20] sm:$0xff] }
 0x134   : > { %v3725_v23 = vsel %vm519_vm8, %v496_v26, %v498_v47  ;;  %909 = vrot.lane.b32.xlu1 %v3240_v33, %s3028_s9  ;;  %1967 = vmatpush2.msra.mxu0 %v467_v27 }
 0x135   : > { %913 = vrot.lane.b32.xlu0 %v3237_v32, %s3028_s9  ;;  %1968 = vmatprep.subr.mxu0 %v466_v1 }
 0x136   : > { %v502_v20 = vpop.permute.xlu1 %501  ;;  %1969 = vmatpush2.msra.mxu0 %v465_v3 }
 0x137   : > { %v500_v30 = vpop.permute.xlu0 %499  ;;  %1970 = vmatprep.subr.mxu0 %v464_v62 }
 0x138   : > { %v3732_v46 = vsel %vm519_vm8, %v498_v47, %v500_v30  ;;  %542 = vst.msk [vmem:[#allocation2 + $0x310] sm:$0xff] %vm73_vm0, %v500_v30  ;;  %868 = vrot.lane.b32.xlu1 %v3281_v42, %s3029_s10  ;;  %1971 = vmatpush2.msra.mxu0 %v463_v58  ;;  %v3848_v30 = vld [vmem:[#allocation2 + $0x18] sm:$0xff] }
 0x139   : > { %866 = vrot.lane.b32.xlu0 %v3285_v43, %s3029_s10  ;;  %1972 = vmatprep.subr.mxu0 %v3682_v53 }
 0x13a   : > { %v506_v6 = vpop.permute.xlu1 %505  ;;  %1973 = vmatpush2.msra.mxu0 %v3679_v52 }
 0x13b   : > { %v504_v13 = vpop.permute.xlu0 %503  ;;  %545 = vst.msk [vmem:[#allocation2 + $0x328] sm:$0xff] %vm73_vm0, %v506_v6  ;;  %1974 = vmatprep.subr.mxu0 %v3670_v44 }
 0x13c   : > { %v3741_v1 = vsel %vm519_vm8, %v502_v20, %v504_v13  ;;  %v3744_v27 = vsel %vm519_vm8, %v504_v13, %v506_v6  ;;  %858 = vrot.lane.b32.xlu1 %v3264_v38, %s3029_s10  ;;  %1975 = vmatpush2.msra.mxu0 %v3663_v19 }
 0x13d   : > { %864 = vrot.lane.b32.xlu0 %v3275_v40, %s3029_s10  ;;  %1976 = vmatprep.subr.mxu0 %v3656_v45 }
 0x13e   : > { %v689_v3 = vpop.permute.xlu1 %688  ;;  %1977 = vmatpush2.msra.mxu0 %v3653_v48 }
 0x13f   : > { %v687_v33 = vpop.permute.xlu0 %686  ;;  %722 = vst.msk [vmem:[#allocation2 + $0x478] sm:$0xff] %vm73_vm0, %v689_v3  ;;  %1978 = vmatprep.subr.mxu0 %v3644_v59 }
 0x140   : > { %v698_v58 = vsel %vm690_vm9, %v687_v33, %v689_v3  ;;  %856 = vrot.lane.b32.xlu1 %v3267_v39, %s3029_s10  ;;  %1979 = vmatpush2.msra.mxu0 %v3637_v63 }
 0x141   : > { %860 = vrot.lane.b32.xlu0 %v3278_v41, %s3029_s10  ;;  %2021 = vmatprep.subr.mxu1 %v698_v58 }
 0x142   : > { %v681_v38 = vpop.permute.xlu1 %680  ;;  %1980 = vmatprep.subr.mxu0 %v3630_v18 }
 0x143   : > { %v685_v40 = vpop.permute.xlu0 %684  ;;  %1981 = vmatpush2.msra.mxu0 %v3627_v25  ;;  %v3783_v25 = vld [vmem:[#allocation2] sm:$0xff] }
 0x144   : > { %v697_v44 = vsel %vm690_vm9, %v685_v40, %v687_v33  ;;  %852 = vrot.lane.b32.xlu1 %v3255_v36, %s3029_s10  ;;  %1982 = vmatprep.subr.mxu0 %v3618_v31 }
 0x145   : > { %850 = vrot.lane.b32.xlu0 %v3261_v37, %s3029_s10  ;;  %2022 = vmatpush1.msra.mxu1 %v697_v44  ;;  %v3866_v44 = vld [vmem:[#allocation2 + $0x8] sm:$0xff] }
 0x146   : > { %v679_v39 = vpop.permute.xlu1 %678  ;;  %1983 = vmatpush2.msra.mxu0 %v3608_v4 }
 0x147   : > { %v683_v45 = vpop.permute.xlu0 %682  ;;  %v695_v19 = vsel %vm690_vm9, %v679_v39, %v681_v38  ;;  %1984 = vmatprep.subr.mxu0 %v3598_v56 }
 0x148   : > { %v696_v48 = vsel %vm690_vm9, %v681_v38, %v683_v45  ;;  %719 = vst.msk [vmem:[#allocation2 + $0x460] sm:$0xff] %vm73_vm0, %v683_v45  ;;  %842 = vrot.lane.b32.xlu1 %v3252_v35, %s3029_s10  ;;  %1985 = vmatpush2.msra.mxu0 %v3595_v49 }
 0x149   : > { %848 = vrot.lane.b32.xlu0 %v3243_v34, %s3029_s10  ;;  %2023 = vmatprep.subr.mxu1 %v696_v48 }
 0x14a   : > { %v677_v37 = vpop.permute.xlu1 %676  ;;  %2024 = vmatpush1.msra.mxu1 %v695_v19  ;;  %1986 = vmatprep.subr.mxu0 %v3583_v60 }
 0x14b   : > { %v675_v63 = vpop.permute.xlu0 %674  ;;  %716 = vst.msk [vmem:[#allocation2 + $0x448] sm:$0xff] %vm73_vm0, %v677_v37  ;;  %1987 = vmatpush2.msra.mxu0 %v3573_v50  ;;  %v3804_v50 = vld [vmem:[#allocation2 + $0x38] sm:$0xff] }
 0x14c   : > { %v694_v18 = vsel %vm690_vm9, %v675_v63, %v677_v37  ;;  %840 = vrot.lane.b32.xlu1 %v3783_v25, %s3029_s10  ;;  %1988 = vmatprep.subr.mxu0 %v3563_v51 }
 0x14d   : > { %844 = vrot.lane.b32.xlu0 %v3237_v32, %s3029_s10  ;;  %2025 = vmatprep.subr.mxu1 %v694_v18 }
 0x14e   : > { %v669_v34 = vpop.permute.xlu1 %668  ;;  %1989 = vmatpush2.msra.mxu0 %v3560_v57 }
 0x14f   : > { %v673_v35 = vpop.permute.xlu0 %672  ;;  %1990 = vmatprep.subr.mxu0 %v3548_v61  ;;  %v3818_v61 = vld [vmem:[#allocation2 + $0x30] sm:$0xff] }
 0x150   : > { %v693_v4 = vsel %vm690_vm9, %v673_v35, %v675_v63  ;;  %802 = vrot.lane.b32.xlu1 %v3281_v42, %s3030_s11  ;;  %1991 = vmatpush2.msra.mxu0 %v3538_v55 }
 0x151   : > { %800 = vrot.lane.b32.xlu0 %v3285_v43, %s3030_s11  ;;  %2026 = vmatpush1.msra.mxu1 %v693_v4  ;;  %v3808_v43 = vld [vmem:[#allocation2 + $0x48] sm:$0xff] }
 0x152   : > { %v667_v49 = vpop.permute.xlu1 %666  ;;  %1992 = vmatprep.subr.mxu0 %v3528_v12 }
 0x153   : > { %v671_v56 = vpop.permute.xlu0 %670  ;;  %v691_v60 = vsel %vm690_vm9, %v667_v49, %v669_v34  ;;  %1993 = vmatpush2.msra.mxu0 %v3525_v11 }
 0x154   : > { %v692_v31 = vsel %vm690_vm9, %v669_v34, %v671_v56  ;;  %713 = vst.msk [vmem:[#allocation2 + $0x430] sm:$0xff] %vm73_vm0, %v671_v56  ;;  %794 = vrot.lane.b32.xlu1 %v3804_v50, %s3030_s11  ;;  %1994 = vmatprep.subr.mxu0 %v3516_v54  ;;  %vm1424_vm9 = vcmask 375808  }
 0x155   : > { %798 = vrot.lane.b32.xlu0 %v3808_v43, %s3030_s11  ;;  %2027 = vmatprep.subr.mxu1 %v692_v31 }
 0x156   : > { %v632_v57 = vpop.permute.xlu1 %631  ;;  %2028 = vmatpush1.msra.mxu1 %v691_v60  ;;  %1995 = vmatpush2.msra.mxu0 %v3509_v28  ;;  %v3829_v28 = vld [vmem:[#allocation2 + $0x50] sm:$0xff] }
 0x157   : > { %v630_v51 = vpop.permute.xlu0 %629  ;;  %665 = vst.msk [vmem:[#allocation2 + $0x418] sm:$0xff] %vm73_vm0, %v632_v57  ;;  %1997 = vmatmul.mubr.f32.vlgmr.msra.gmra.mxu0 %v4862_v0 }
 0x158   : > { %v641_v55 = vsel %vm633_vm10, %v630_v51, %v632_v57  ;;  %792 = vrot.lane.b32.xlu1 %v3818_v61, %s3030_s11  ;;  %2002 = vmatprep.mubr.f32.mxu0 %v4860_v8 }
 0x159   : > { %796 = vrot.lane.b32.xlu0 %v3278_v41, %s3030_s11  ;;  %2029 = vmatprep.subr.mxu1 %v641_v55 }
 0x15a   : > { %v624_v11 = vpop.permute.xlu1 %623 }
 0x15b   : > { %v628_v12 = vpop.permute.xlu0 %627  ;;  %2003 = vmatmul.mubr.f32.gmra.mxu0 %v4861_v7 }
 0x15c   : > { %v640_v59 = vsel %vm633_vm10, %v628_v12, %v630_v51  ;;  %1213 = vrot.lane.b32.xlu1 %v3281_v42, %s3031_s12  ;;  %2008 = vmatprep.mubr.f32.mxu0 %v4858_v15 }
 0x15d   : > { %2030 = vmatpush1.msra.mxu1 %v640_v59  ;;  %1211 = vrot.lane.b32.xlu0 %v3829_v28, %s3031_s12 }
 0x15e   : > { %v622_v54 = vpop.permute.xlu1 %621 }
 0x15f   : > { %v626_v52 = vpop.permute.xlu0 %625  ;;  %v638_v53 = vsel %vm633_vm10, %v622_v54, %v624_v11  ;;  %2009 = vmatmul.mubr.f32.gmra.mxu0 %v4859_v14 }
 0x160   : > { %v639_v62 = vsel %vm633_vm10, %v624_v11, %v626_v52  ;;  %662 = vst.msk [vmem:[#allocation2 + $0x400] sm:$0xff] %vm73_vm0, %v626_v52  ;;  %790 = vrot.lane.b32.xlu1 %v3255_v36, %s3030_s11  ;;  %2014 = vmatprep.mubr.f32.mxu0 %v4856_v22 }
 0x161   : > { %2031 = vmatprep.subr.mxu1 %v639_v62  ;;  %788 = vrot.lane.b32.xlu0 %v3840_v29, %s3030_s11 }
 0x162   : > { %2032 = vmatpush1.msra.mxu1 %v638_v53  ;;  %v620_v47 = vpop.permute.xlu1 %619 }
 0x163   : > { %v618_v26 = vpop.permute.xlu0 %617  ;;  %659 = vst.msk [vmem:[#allocation2 + $0x3e8] sm:$0xff] %vm73_vm0, %v620_v47  ;;  %2015 = vmatmul.mubr.f32.gmra.mxu0 %v4857_v21 }
 0x164   : > { %v637_v20 = vsel %vm633_vm10, %v618_v26, %v620_v47  ;;  %786 = vrot.lane.b32.xlu1 %v3848_v30, %s3030_s11  ;;  %2174 = vmatprep.mubr.f32.mxu0 %v4854_v5 }
 0x165   : > { %2033 = vmatprep.subr.mxu1 %v637_v20  ;;  %1209 = vrot.lane.b32.xlu0 %v3808_v43, %s3031_s12 }
 0x166   : > { %v612_v6 = vpop.permute.xlu1 %611 }
 0x167   : > { %v616_v13 = vpop.permute.xlu0 %615 }
 0x168   : > { %v636_v3 = vsel %vm633_vm10, %v616_v13, %v618_v26  ;;  %1205 = vrot.lane.b32.xlu1 %v3278_v41, %s3031_s12 }
 0x169   : > { %2034 = vmatpush1.msra.mxu1 %v636_v3  ;;  %1203 = vrot.lane.b32.xlu0 %v3804_v50, %s3031_s12 }
 0x16a   : > { %v610_v33 = vpop.permute.xlu1 %609 }
 0x16b   : > { %v614_v58 = vpop.permute.xlu0 %613  ;;  %v634_v38 = vsel %vm633_vm10, %v610_v33, %v612_v6 }
 0x16c   : > { %v635_v40 = vsel %vm633_vm10, %v612_v6, %v614_v58  ;;  %656 = vst.msk [vmem:[#allocation2 + $0x3d0] sm:$0xff] %vm73_vm0, %v614_v58  ;;  %784 = vrot.lane.b32.xlu1 %v3237_v32, %s3030_s11  ;;  %vm1355_vm10 = vcmask 384000  }
 0x16d   : > { %2035 = vmatprep.subr.mxu1 %v635_v40  ;;  %782 = vrot.lane.b32.xlu0 %v3866_v44, %s3030_s11 }
 0x16e   : > { %2036 = vmatpush1.msra.mxu1 %v634_v38  ;;  %v575_v39 = vpop.permute.xlu1 %574 }
 0x16f   : > { %v573_v45 = vpop.permute.xlu0 %572  ;;  %608 = vst.msk [vmem:[#allocation2 + $0x3b8] sm:$0xff] %vm73_vm0, %v575_v39 }
 0x170   : > { %v584_v19 = vsel %vm576_vm11, %v573_v45, %v575_v39  ;;  %780 = vrot.lane.b32.xlu1 %v3783_v25, %s3030_s11 }
 0x171   : > { %2037 = vmatprep.subr.mxu1 %v584_v19  ;;  %1201 = vrot.lane.b32.xlu0 %v3818_v61, %s3031_s12 }
 0x172   : > { %v567_v48 = vpop.permute.xlu1 %566 }
 0x173   : > { %v571_v37 = vpop.permute.xlu0 %570 }
 0x174   : > { %v583_v63 = vsel %vm576_vm11, %v571_v37, %v573_v45  ;;  %1197 = vrot.lane.b32.xlu1 %v3255_v36, %s3031_s12 }
 0x175   : > { %2038 = vmatpush1.msra.mxu1 %v583_v63  ;;  %1195 = vrot.lane.b32.xlu0 %v3840_v29, %s3031_s12 }
 0x176   : > { %v565_v18 = vpop.permute.xlu1 %564 }
 0x177   : > { %v569_v34 = vpop.permute.xlu0 %568  ;;  %v581_v35 = vsel %vm576_vm11, %v565_v18, %v567_v48 }
 0x178   : > { %v582_v4 = vsel %vm576_vm11, %v567_v48, %v569_v34  ;;  %605 = vst.msk [vmem:[#allocation2 + $0x3a0] sm:$0xff] %vm73_vm0, %v569_v34  ;;  %745 = vrot.lane.b32.xlu1 %v3281_v42, %s3032_s13 }
 0x179   : > { %2039 = vmatprep.subr.mxu1 %v582_v4  ;;  %743 = vrot.lane.b32.xlu0 %v3829_v28, %s3032_s13 }
 0x17a   : > { %2040 = vmatpush1.msra.mxu1 %v581_v35  ;;  %v563_v49 = vpop.permute.xlu1 %562 }
 0x17b   : > { %v561_v56 = vpop.permute.xlu0 %560  ;;  %602 = vst.msk [vmem:[#allocation2 + $0x388] sm:$0xff] %vm73_vm0, %v563_v49 }
 0x17c   : > { %v580_v60 = vsel %vm576_vm11, %v561_v56, %v563_v49  ;;  %741 = vrot.lane.b32.xlu1 %v3808_v43, %s3032_s13 }
 0x17d   : > { %2041 = vmatprep.subr.mxu1 %v580_v60  ;;  %1193 = vrot.lane.b32.xlu0 %v3848_v30, %s3031_s12 }
 0x17e   : > { %v555_v31 = vpop.permute.xlu1 %554 }
 0x17f   : > { %v559_v57 = vpop.permute.xlu0 %558 }
 0x180   : > { %v579_v51 = vsel %vm576_vm11, %v559_v57, %v561_v56  ;;  %1189 = vrot.lane.b32.xlu1 %v3237_v32, %s3031_s12 }
 0x181   : > { %2042 = vmatpush1.msra.mxu1 %v579_v51  ;;  %1187 = vrot.lane.b32.xlu0 %v3866_v44, %s3031_s12 }
 0x182   : > { %v553_v55 = vpop.permute.xlu1 %552 }
 0x183   : > { %v557_v11 = vpop.permute.xlu0 %556  ;;  %v577_v12 = vsel %vm576_vm11, %v553_v55, %v555_v31 }
 0x184   : > { %v578_v59 = vsel %vm576_vm11, %v555_v31, %v557_v11  ;;  %599 = vst.msk [vmem:[#allocation2 + $0x370] sm:$0xff] %vm73_vm0, %v557_v11  ;;  %739 = vrot.lane.b32.xlu1 %v3278_v41, %s3032_s13  ;;  %vm1286_vm11 = vcmask 392192  }
 0x185   : > { %2043 = vmatprep.subr.mxu1 %v578_v59  ;;  %737 = vrot.lane.b32.xlu0 %v3804_v50, %s3032_s13 }
 0x186   : > { %2044 = vmatpush1.msra.mxu1 %v577_v12  ;;  %v518_v54 = vpop.permute.xlu1 %517 }
 0x187   : > { %v516_v52 = vpop.permute.xlu0 %515  ;;  %551 = vst.msk [vmem:[#allocation2 + $0x358] sm:$0xff] %vm73_vm0, %v518_v54 }
 0x188   : > { %v527_v53 = vsel %vm519_vm8, %v516_v52, %v518_v54  ;;  %735 = vrot.lane.b32.xlu1 %v3818_v61, %s3032_s13 }
 0x189   : > { %2045 = vmatprep.subr.mxu1 %v527_v53  ;;  %1185 = vrot.lane.b32.xlu0 %v3783_v25, %s3031_s12 }
 0x18a   : > { %v510_v62 = vpop.permute.xlu1 %509 }
 0x18b   : > { %v514_v47 = vpop.permute.xlu0 %513 }
 0x18c   : > { %v526_v26 = vsel %vm519_vm8, %v514_v47, %v516_v52  ;;  %1144 = vrot.lane.b32.xlu1 %v3281_v42, %s3033_s14 }
 0x18d   : > { %2046 = vmatpush1.msra.mxu1 %v526_v26  ;;  %1142 = vrot.lane.b32.xlu0 %v3829_v28, %s3033_s14 }
 0x18e   : > { %v508_v20 = vpop.permute.xlu1 %507 }
 0x18f   : > { %v512_v6 = vpop.permute.xlu0 %511  ;;  %v524_v13 = vsel %vm519_vm8, %v508_v20, %v510_v62 }
 0x190   : > { %v525_v3 = vsel %vm519_vm8, %v510_v62, %v512_v6  ;;  %548 = vst.msk [vmem:[#allocation2 + $0x340] sm:$0xff] %vm73_vm0, %v512_v6  ;;  %733 = vrot.lane.b32.xlu1 %v3255_v36, %s3032_s13  ;;  %vm1493_vm8 = vcmask 367616  }
 0x191   : > { %2047 = vmatprep.subr.mxu1 %v525_v3  ;;  %731 = vrot.lane.b32.xlu0 %v3840_v29, %s3032_s13 }
 0x192   : > { %2048 = vmatpush1.msra.mxu1 %v524_v13  ;;  %v3924_v33 = vpop.permute.xlu1 %937 }
 0x193   : > { %v936_v58 = vpop.permute.xlu0 %935  ;;  %2049 = vmatprep.subr.mxu1 %v3744_v27 }
 0x194   : > { %v952_v38 = vsel %vm941_vm12, %v936_v58, %v3924_v33  ;;  %2050 = vmatpush1.msra.mxu1 %v3741_v1  ;;  %729 = vrot.lane.b32.xlu1 %v3848_v30, %s3032_s13 }
 0x195   : > { %2051 = vmatprep.subr.mxu1 %v3732_v46  ;;  %1140 = vrot.lane.b32.xlu0 %v3808_v43, %s3033_s14 }
 0x196   : > { %2052 = vmatpush1.msra.mxu1 %v3725_v23  ;;  %v928_v40 = vpop.permute.xlu1 %927 }
 0x197   : > { %v934_v39 = vpop.permute.xlu0 %933  ;;  %2053 = vmatprep.subr.mxu1 %v952_v38 }
 0x198   : > { %v951_v27 = vsel %vm941_vm12, %v934_v39, %v936_v58  ;;  %1136 = vrot.lane.b32.xlu1 %v3278_v41, %s3033_s14 }
 0x199   : > { %2054 = vmatpush2.msra.mxu1 %v951_v27  ;;  %1134 = vrot.lane.b32.xlu0 %v3804_v50, %s3033_s14 }
 0x19a   : > { %v926_v1 = vpop.permute.xlu1 %925 }
 0x19b   : > { %v3941_v45 = vpop.permute.xlu0 %929  ;;  %v948_v46 = vsel %vm941_vm12, %v926_v1, %v928_v40 }
 0x19c   : > { %v949_v23 = vsel %vm941_vm12, %v928_v40, %v3941_v45  ;;  %727 = vrot.lane.b32.xlu1 %v3237_v32, %s3032_s13 }
 0x19d   : > { %2055 = vmatprep.subr.mxu1 %v949_v23  ;;  %725 = vrot.lane.b32.xlu0 %v3866_v44, %s3032_s13 }
 0x19e   : > { %2056 = vmatpush2.msra.mxu1 %v948_v46  ;;  %v3950_v19 = vpop.permute.xlu1 %921 }
 0x19f   : > { %v920_v48 = vpop.permute.xlu0 %919 }
 0x1a0   : > { %v946_v37 = vsel %vm941_vm12, %v920_v48, %v3950_v19  ;;  %723 = vrot.lane.b32.xlu1 %v3783_v25, %s3032_s13 }
 0x1a1   : > { %2057 = vmatprep.subr.mxu1 %v946_v37  ;;  %1132 = vrot.lane.b32.xlu0 %v3818_v61, %s3033_s14 }
 0x1a2   : > { %v912_v63 = vpop.permute.xlu1 %911 }
 0x1a3   : > { %v918_v18 = vpop.permute.xlu0 %917 }
 0x1a4   : > { %v945_v34 = vsel %vm941_vm12, %v918_v18, %v920_v48  ;;  %1128 = vrot.lane.b32.xlu1 %v3255_v36, %s3033_s14 }
 0x1a5   : > { %2058 = vmatpush2.msra.mxu1 %v945_v34  ;;  %1126 = vrot.lane.b32.xlu0 %v3840_v29, %s3033_s14 }
 0x1a6   : > { %v910_v35 = vpop.permute.xlu1 %909 }
 0x1a7   : > { %v3963_v4 = vpop.permute.xlu0 %913  ;;  %v942_v49 = vsel %vm941_vm12, %v910_v35, %v912_v63 }
 0x1a8   : > { %v943_v56 = vsel %vm941_vm12, %v912_v63, %v3963_v4  ;;  %1118 = vrot.lane.b32.xlu1 %v3866_v44, %s3033_s14 }
 0x1a9   : > { %2059 = vmatprep.subr.mxu1 %v943_v56  ;;  %1124 = vrot.lane.b32.xlu0 %v3848_v30, %s3033_s14 }
 0x1aa   : > { %2060 = vmatpush2.msra.mxu1 %v942_v49  ;;  %v3972_v60 = vpop.permute.xlu1 %868 }
 0x1ab   : > { %v867_v31 = vpop.permute.xlu0 %866 }
 0x1ac   : > { %v883_v57 = vsel %vm872_vm13, %v867_v31, %v3972_v60  ;;  %1116 = vrot.lane.b32.xlu1 %v3783_v25, %s3033_s14 }
 0x1ad   : > { %2061 = vmatprep.subr.mxu1 %v883_v57  ;;  %1120 = vrot.lane.b32.xlu0 %v3237_v32, %s3033_s14 }
 0x1ae   : > { %v859_v51 = vpop.permute.xlu1 %858 }
 0x1af   : > { %v865_v55 = vpop.permute.xlu0 %864 }
 0x1b0   : > { %v882_v11 = vsel %vm872_vm13, %v865_v55, %v867_v31  ;;  %1075 = vrot.lane.b32.xlu1 %v3281_v42, %s3034_s15 }
 0x1b1   : > { %2062 = vmatpush2.msra.mxu1 %v882_v11  ;;  %1073 = vrot.lane.b32.xlu0 %v3829_v28, %s3034_s15 }
 0x1b2   : > { %v857_v12 = vpop.permute.xlu1 %856 }
 0x1b3   : > { %v3985_v59 = vpop.permute.xlu0 %860  ;;  %v879_v54 = vsel %vm872_vm13, %v857_v12, %v859_v51 }
 0x1b4   : > { %v880_v52 = vsel %vm872_vm13, %v859_v51, %v3985_v59  ;;  %1065 = vrot.lane.b32.xlu1 %v3804_v50, %s3034_s15 }
 0x1b5   : > { %2063 = vmatprep.subr.mxu1 %v880_v52  ;;  %1071 = vrot.lane.b32.xlu0 %v3808_v43, %s3034_s15 }
 0x1b6   : > { %2064 = vmatpush2.msra.mxu1 %v879_v54  ;;  %v3994_v53 = vpop.permute.xlu1 %852 }
 0x1b7   : > { %v851_v62 = vpop.permute.xlu0 %850 }
 0x1b8   : > { %v877_v47 = vsel %vm872_vm13, %v851_v62, %v3994_v53  ;;  %1063 = vrot.lane.b32.xlu1 %v3818_v61, %s3034_s15 }
 0x1b9   : > { %2065 = vmatprep.subr.mxu1 %v877_v47  ;;  %1067 = vrot.lane.b32.xlu0 %v3278_v41, %s3034_s15 }
 0x1ba   : > { %v843_v26 = vpop.permute.xlu1 %842 }
 0x1bb   : > { %v849_v20 = vpop.permute.xlu0 %848 }
 0x1bc   : > { %v876_v6 = vsel %vm872_vm13, %v849_v20, %v851_v62  ;;  %1059 = vrot.lane.b32.xlu1 %v3255_v36, %s3034_s15 }
 0x1bd   : > { %2066 = vmatpush2.msra.mxu1 %v876_v6  ;;  %1057 = vrot.lane.b32.xlu0 %v3840_v29, %s3034_s15 }
 0x1be   : > { %v841_v13 = vpop.permute.xlu1 %840 }
 0x1bf   : > { %v4007_v3 = vpop.permute.xlu0 %844  ;;  %v873_v58 = vsel %vm872_vm13, %v841_v13, %v843_v26 }
 0x1c0   : > { %v874_v38 = vsel %vm872_vm13, %v843_v26, %v4007_v3  ;;  %1558 = vrot.lane.b32.xlu1 %v3281_v42, %s3035_s16 }
 0x1c1   : > { %2067 = vmatprep.subr.mxu1 %v874_v38  ;;  %1556 = vrot.lane.b32.xlu0 %v3829_v28, %s3035_s16 }
 0x1c2   : > { %2068 = vmatpush2.msra.mxu1 %v873_v58  ;;  %v803_v40 = vpop.permute.xlu1 %802 }
 0x1c3   : > { %v801_v39 = vpop.permute.xlu0 %800  ;;  %835 = vst.msk [vmem:[#allocation2 + $0x538] sm:$0xff] %vm73_vm0, %v803_v40 }
 0x1c4   : > { %v811_v27 = vsel %vm73_vm0, %v801_v39, %v803_v40  ;;  %1554 = vrot.lane.b32.xlu1 %v3808_v43, %s3035_s16 }
 0x1c5   : > { %2069 = vmatprep.subr.mxu1 %v811_v27  ;;  %1055 = vrot.lane.b32.xlu0 %v3848_v30, %s3034_s15 }
 0x1c6   : > { %v795_v1 = vpop.permute.xlu1 %794 }
 0x1c7   : > { %v799_v46 = vpop.permute.xlu0 %798 }
 0x1c8   : > { %v810_v23 = vsel %vm73_vm0, %v799_v46, %v801_v39  ;;  %1051 = vrot.lane.b32.xlu1 %v3237_v32, %s3034_s15 }
 0x1c9   : > { %1049 = vrot.lane.b32.xlu0 %v3866_v44, %s3034_s15  ;;  %2070 = vmatpush2.msra.mxu1 %v810_v23 }
 0x1ca   : > { %v793_v48 = vpop.permute.xlu1 %792 }
 0x1cb   : > { %v808_v37 = vsel %vm73_vm0, %v793_v48, %v795_v1  ;;  %v797_v63 = vpop.permute.xlu0 %796 }
 0x1cc   : > { %v809_v18 = vsel %vm73_vm0, %v795_v1, %v797_v63  ;;  %832 = vst.msk [vmem:[#allocation2 + $0x520] sm:$0xff] %vm73_vm0, %v797_v63  ;;  %1550 = vrot.lane.b32.xlu1 %v3278_v41, %s3035_s16 }
 0x1cd   : > { %1548 = vrot.lane.b32.xlu0 %v3804_v50, %s3035_s16  ;;  %2071 = vmatprep.subr.mxu1 %v809_v18 }
 0x1ce   : > { %v4034_v34 = vpop.permute.xlu1 %1213  ;;  %2072 = vmatpush2.msra.mxu1 %v808_v37 }
 0x1cf   : > { %v1212_v35 = vpop.permute.xlu0 %1211 }
 0x1d0   : > { %v1228_v49 = vsel %vm1217_vm14, %v1212_v35, %v4034_v34  ;;  %1546 = vrot.lane.b32.xlu1 %v3818_v61, %s3035_s16 }
 0x1d1   : > { %1047 = vrot.lane.b32.xlu0 %v3783_v25, %s3034_s15  ;;  %2110 = vmatprep.subr.mxu0 %v1228_v49 }
 0x1d2   : > { %v791_v56 = vpop.permute.xlu1 %790 }
 0x1d3   : > { %829 = vst.msk [vmem:[#allocation2 + $0x508] sm:$0xff] %vm73_vm0, %v791_v56  ;;  %v789_v31 = vpop.permute.xlu0 %788 }
 0x1d4   : > { %v807_v57 = vsel %vm73_vm0, %v789_v31, %v791_v56  ;;  %1006 = vrot.lane.b32.xlu1 %v3281_v42, %s3036_s17 }
 0x1d5   : > { %1004 = vrot.lane.b32.xlu0 %v3829_v28, %s3036_s17  ;;  %2073 = vmatprep.subr.mxu1 %v807_v57 }
 0x1d6   : > { %v787_v51 = vpop.permute.xlu1 %786 }
 0x1d7   : > { %v806_v55 = vsel %vm73_vm0, %v787_v51, %v789_v31  ;;  %v1210_v11 = vpop.permute.xlu0 %1209 }
 0x1d8   : > { %v1227_v12 = vsel %vm1217_vm14, %v1210_v11, %v1212_v35  ;;  %1542 = vrot.lane.b32.xlu1 %v3255_v36, %s3035_s16  ;;  %2074 = vmatpush2.msra.mxu1 %v806_v55 }
 0x1d9   : > { %1540 = vrot.lane.b32.xlu0 %v3840_v29, %s3035_s16  ;;  %2111 = vmatpush1.msra.mxu0 %v1227_v12 }
 0x1da   : > { %v4054_v54 = vpop.permute.xlu1 %1205 }
 0x1db   : > { %v1204_v52 = vpop.permute.xlu0 %1203 }
 0x1dc   : > { %v1225_v62 = vsel %vm1217_vm14, %v1204_v52, %v4054_v54  ;;  %1538 = vrot.lane.b32.xlu1 %v3848_v30, %s3035_s16 }
 0x1dd   : > { %1002 = vrot.lane.b32.xlu0 %v3808_v43, %s3036_s17  ;;  %2112 = vmatprep.subr.mxu0 %v1225_v62 }
 0x1de   : > { %v785_v47 = vpop.permute.xlu1 %784 }
 0x1df   : > { %826 = vst.msk [vmem:[#allocation2 + $0x4f0] sm:$0xff] %vm73_vm0, %v785_v47  ;;  %v783_v26 = vpop.permute.xlu0 %782 }
 0x1e0   : > { %v805_v20 = vsel %vm73_vm0, %v783_v26, %v785_v47  ;;  %998 = vrot.lane.b32.xlu1 %v3278_v41, %s3036_s17 }
 0x1e1   : > { %996 = vrot.lane.b32.xlu0 %v3804_v50, %s3036_s17  ;;  %2075 = vmatprep.subr.mxu1 %v805_v20 }
 0x1e2   : > { %v781_v6 = vpop.permute.xlu1 %780 }
 0x1e3   : > { %v804_v13 = vsel %vm73_vm0, %v781_v6, %v783_v26  ;;  %v1202_v58 = vpop.permute.xlu0 %1201 }
 0x1e4   : > { %v1224_v38 = vsel %vm1217_vm14, %v1202_v58, %v1204_v52  ;;  %1534 = vrot.lane.b32.xlu1 %v3237_v32, %s3035_s16  ;;  %2076 = vmatpush2.msra.mxu1 %v804_v13 }
 0x1e5   : > { %1532 = vrot.lane.b32.xlu0 %v3866_v44, %s3035_s16  ;;  %2113 = vmatpush1.msra.mxu0 %v1224_v38 }
 0x1e6   : > { %v4074_v40 = vpop.permute.xlu1 %1197 }
 0x1e7   : > { %v1196_v39 = vpop.permute.xlu0 %1195 }
 0x1e8   : > { %v1222_v27 = vsel %vm1217_vm14, %v1196_v39, %v4074_v40  ;;  %1530 = vrot.lane.b32.xlu1 %v3783_v25, %s3035_s16 }
 0x1e9   : > { %994 = vrot.lane.b32.xlu0 %v3818_v61, %s3036_s17  ;;  %2114 = vmatprep.subr.mxu0 %v1222_v27 }
 0x1ea   : > { %v746_v1 = vpop.permute.xlu1 %745 }
 0x1eb   : > { %779 = vst.msk [vmem:[#allocation2 + $0x4d8] sm:$0xff] %vm73_vm0, %v746_v1  ;;  %v744_v46 = vpop.permute.xlu0 %743 }
 0x1ec   : > { %v755_v23 = vsel %vm747_vm15, %v744_v46, %v746_v1  ;;  %990 = vrot.lane.b32.xlu1 %v3255_v36, %s3036_s17 }
 0x1ed   : > { %988 = vrot.lane.b32.xlu0 %v3840_v29, %s3036_s17  ;;  %2077 = vmatprep.subr.mxu1 %v755_v23 }
 0x1ee   : > { %v742_v48 = vpop.permute.xlu1 %741 }
 0x1ef   : > { %v754_v37 = vsel %vm747_vm15, %v742_v48, %v744_v46  ;;  %v1194_v63 = vpop.permute.xlu0 %1193 }
 0x1f0   : > { %v1221_v18 = vsel %vm1217_vm14, %v1194_v63, %v1196_v39  ;;  %980 = vrot.lane.b32.xlu1 %v3866_v44, %s3036_s17  ;;  %2078 = vmatpush2.msra.mxu1 %v754_v37 }
 0x1f1   : > { %986 = vrot.lane.b32.xlu0 %v3848_v30, %s3036_s17  ;;  %2115 = vmatpush1.msra.mxu0 %v1221_v18 }
 0x1f2   : > { %v4094_v35 = vpop.permute.xlu1 %1189 }
 0x1f3   : > { %v1188_v49 = vpop.permute.xlu0 %1187 }
 0x1f4   : > { %v1219_v56 = vsel %vm1217_vm14, %v1188_v49, %v4094_v35  ;;  %978 = vrot.lane.b32.xlu1 %v3783_v25, %s3036_s17 }
 0x1f5   : > { %982 = vrot.lane.b32.xlu0 %v3237_v32, %s3036_s17  ;;  %2116 = vmatprep.subr.mxu0 %v1219_v56 }
 0x1f6   : > { %v740_v31 = vpop.permute.xlu1 %739 }
 0x1f7   : > { %776 = vst.msk [vmem:[#allocation2 + $0x4c0] sm:$0xff] %vm73_vm0, %v740_v31  ;;  %v738_v57 = vpop.permute.xlu0 %737 }
 0x1f8   : > { %v753_v51 = vsel %vm747_vm15, %v738_v57, %v740_v31  ;;  %1489 = vrot.lane.b32.xlu1 %v3281_v42, %s3037_s18 }
 0x1f9   : > { %1487 = vrot.lane.b32.xlu0 %v3829_v28, %s3037_s18  ;;  %2079 = vmatprep.subr.mxu1 %v753_v51 }
 0x1fa   : > { %v736_v55 = vpop.permute.xlu1 %735 }
 0x1fb   : > { %v752_v11 = vsel %vm747_vm15, %v736_v55, %v738_v57  ;;  %v1186_v12 = vpop.permute.xlu0 %1185 }
 0x1fc   : > { %v1218_v52 = vsel %vm1217_vm14, %v1186_v12, %v1188_v49  ;;  %1479 = vrot.lane.b32.xlu1 %v3804_v50, %s3037_s18  ;;  %2080 = vmatpush2.msra.mxu1 %v752_v11 }
 0x1fd   : > { %1485 = vrot.lane.b32.xlu0 %v3808_v43, %s3037_s18  ;;  %2117 = vmatpush1.msra.mxu0 %v1218_v52 }
 0x1fe   : > { %v4114_v62 = vpop.permute.xlu1 %1144 }
 0x1ff   : > { %v1143_v47 = vpop.permute.xlu0 %1142 }
 0x200   : > { %v1159_v26 = vsel %vm1148_vm2, %v1143_v47, %v4114_v62  ;;  %1477 = vrot.lane.b32.xlu1 %v3818_v61, %s3037_s18 }
 0x201   : > { %1481 = vrot.lane.b32.xlu0 %v3278_v41, %s3037_s18  ;;  %2118 = vmatprep.subr.mxu0 %v1159_v26 }
 0x202   : > { %v734_v20 = vpop.permute.xlu1 %733 }
 0x203   : > { %773 = vst.msk [vmem:[#allocation2 + $0x4a8] sm:$0xff] %vm73_vm0, %v734_v20  ;;  %v732_v6 = vpop.permute.xlu0 %731 }
 0x204   : > { %v751_v13 = vsel %vm747_vm15, %v732_v6, %v734_v20  ;;  %1473 = vrot.lane.b32.xlu1 %v3255_v36, %s3037_s18 }
 0x205   : > { %1471 = vrot.lane.b32.xlu0 %v3840_v29, %s3037_s18  ;;  %2081 = vmatprep.subr.mxu1 %v751_v13 }
 0x206   : > { %v730_v58 = vpop.permute.xlu1 %729 }
 0x207   : > { %v750_v38 = vsel %vm747_vm15, %v730_v58, %v732_v6  ;;  %v1141_v39 = vpop.permute.xlu0 %1140  ;;  %v4865_v58 = vld [vmem:[#allocation26_spill] sm:$0xff] }
 0x208   : > { %v1158_v27 = vsel %vm1148_vm2, %v1141_v39, %v1143_v47  ;;  %1463 = vrot.lane.b32.xlu1 %v3866_v44, %s3037_s18  ;;  %2082 = vmatpush2.msra.mxu1 %v750_v38  ;;  %v3039_v39 = vmov 0.0  }
 0x209   : > { %1469 = vrot.lane.b32.xlu0 %v3848_v30, %s3037_s18  ;;  %2119 = vmatpush1.msra.mxu0 %v1158_v27 }
 0x20a   : > { %v4134_v1 = vpop.permute.xlu1 %1136 }
 0x20b   : > { %v1135_v46 = vpop.permute.xlu0 %1134 }
 0x20c   : > { %v1156_v23 = vsel %vm1148_vm2, %v1135_v46, %v4134_v1  ;;  %1461 = vrot.lane.b32.xlu1 %v3783_v25, %s3037_s18 }
 0x20d   : > { %1465 = vrot.lane.b32.xlu0 %v3237_v32, %s3037_s18  ;;  %2120 = vmatprep.subr.mxu0 %v1156_v23 }
 0x20e   : > { %v728_v48 = vpop.permute.xlu1 %727 }
 0x20f   : > { %770 = vst.msk [vmem:[#allocation2 + $0x490] sm:$0xff] %vm73_vm0, %v728_v48  ;;  %v726_v37 = vpop.permute.xlu0 %725 }
 0x210   : > { %v749_v63 = vsel %vm747_vm15, %v726_v37, %v728_v48  ;;  %1420 = vrot.lane.b32.xlu1 %v3281_v42, %s3038_s19 }
 0x211   : > { %1418 = vrot.lane.b32.xlu0 %v3829_v28, %s3038_s19  ;;  %2083 = vmatprep.subr.mxu1 %v749_v63 }
 0x212   : > { %v724_v18 = vpop.permute.xlu1 %723 }
 0x213   : > { %v748_v49 = vsel %vm747_vm15, %v724_v18, %v726_v37  ;;  %v1133_v56 = vpop.permute.xlu0 %1132 }
 0x214   : > { %v1155_v31 = vsel %vm1148_vm2, %v1133_v56, %v1135_v46  ;;  %1410 = vrot.lane.b32.xlu1 %v3804_v50, %s3038_s19  ;;  %2084 = vmatpush2.msra.mxu1 %v748_v49 }
 0x215   : > { %1416 = vrot.lane.b32.xlu0 %v3808_v43, %s3038_s19  ;;  %2121 = vmatpush1.msra.mxu0 %v1155_v31 }
 0x216   : > { %v4154_v57 = vpop.permute.xlu1 %1128  ;;  %2086 = vmatmul.mubr.f32.vlgmr.msra.gmra.mxu1 %v4855_v2 }
 0x217   : > { %v1127_v51 = vpop.permute.xlu0 %1126  ;;  %2091 = vmatprep.mubr.f32.mxu1 %v4852_v10 }
 0x218   : > { %v1153_v55 = vsel %vm1148_vm2, %v1127_v51, %v4154_v57  ;;  %1408 = vrot.lane.b32.xlu1 %v3818_v61, %s3038_s19 }
 0x219   : > { %1412 = vrot.lane.b32.xlu0 %v3278_v41, %s3038_s19  ;;  %2122 = vmatprep.subr.mxu0 %v1153_v55 }
 0x21a   : > { %v1119_v11 = vpop.permute.xlu1 %1118  ;;  %2092 = vmatmul.mubr.f32.gmra.mxu1 %v4853_v9 }
 0x21b   : > { %v1125_v12 = vpop.permute.xlu0 %1124  ;;  %2097 = vmatprep.mubr.f32.mxu1 %v4850_v17 }
 0x21c   : > { %v1152_v52 = vsel %vm1148_vm2, %v1125_v12, %v1127_v51  ;;  %1404 = vrot.lane.b32.xlu1 %v3255_v36, %s3038_s19 }
 0x21d   : > { %1402 = vrot.lane.b32.xlu0 %v3840_v29, %s3038_s19  ;;  %2123 = vmatpush1.msra.mxu0 %v1152_v52 }
 0x21e   : > { %v1117_v47 = vpop.permute.xlu1 %1116  ;;  %2098 = vmatmul.mubr.f32.gmra.mxu1 %v4851_v16 }
 0x21f   : > { %v1149_v26 = vsel %vm1148_vm2, %v1117_v47, %v1119_v11  ;;  %v4173_v20 = vpop.permute.xlu0 %1120  ;;  %2103 = vmatprep.mubr.f32.mxu1 %v4849_v24 }
 0x220   : > { %v1150_v6 = vsel %vm1148_vm2, %v1119_v11, %v4173_v20  ;;  %1394 = vrot.lane.b32.xlu1 %v3866_v44, %s3038_s19 }
 0x221   : > { %1400 = vrot.lane.b32.xlu0 %v3848_v30, %s3038_s19  ;;  %2124 = vmatprep.subr.mxu0 %v1150_v6 }
 0x222   : > { %v4182_v13 = vpop.permute.xlu1 %1075  ;;  %2125 = vmatpush1.msra.mxu0 %v1149_v26  ;;  %2104 = vmatmul.mubr.f32.gmra.mxu1 %v4865_v58  ;;  %v3003_v26 = vld [vmem:[#allocation2] sm:$0xff] }
 0x223   : > { %v1074_v38 = vpop.permute.xlu0 %1073  ;;  %2263 = vmatprep.mubr.f32.mxu1 %v3039_v39 }
 0x224   : > { %v1090_v27 = vsel %vm1079_vm3, %v1074_v38, %v4182_v13  ;;  %1392 = vrot.lane.b32.xlu1 %v3783_v25, %s3038_s19 }
 0x225   : > { %1396 = vrot.lane.b32.xlu0 %v3237_v32, %s3038_s19  ;;  %2126 = vmatprep.subr.mxu0 %v1090_v27 }
 0x226   : > { %v1066_v46 = vpop.permute.xlu1 %1065 }
 0x227   : > { %v1072_v23 = vpop.permute.xlu0 %1071 }
 0x228   : > { %v1089_v48 = vsel %vm1079_vm3, %v1072_v23, %v1074_v38  ;;  %1351 = vrot.lane.b32.xlu1 %v3281_v42, %s3040_s20 }
 0x229   : > { %1349 = vrot.lane.b32.xlu0 %v3829_v28, %s3040_s20  ;;  %2127 = vmatpush1.msra.mxu0 %v1089_v48 }
 0x22a   : > { %v1064_v37 = vpop.permute.xlu1 %1063 }
 0x22b   : > { %v1086_v63 = vsel %vm1079_vm3, %v1064_v37, %v1066_v46  ;;  %v4198_v25 = vpop.permute.xlu0 %1067  ;;  %v3004_v37 = vld [vmem:[#allocation2 + $0x38] sm:$0xff] }
 0x22c   : > { %v1087_v18 = vsel %vm1079_vm3, %v1066_v46, %v4198_v25  ;;  %1341 = vrot.lane.b32.xlu1 %v3804_v50, %s3040_s20 }
 0x22d   : > { %1347 = vrot.lane.b32.xlu0 %v3808_v43, %s3040_s20  ;;  %2128 = vmatprep.subr.mxu0 %v1087_v18 }
 0x22e   : > { %v4206_v49 = vpop.permute.xlu1 %1059  ;;  %2129 = vmatpush1.msra.mxu0 %v1086_v63  ;;  %v3005_v63 = vld [vmem:[#allocation2 + $0x48] sm:$0xff] }
 0x22f   : > { %v1058_v56 = vpop.permute.xlu0 %1057 }
 0x230   : > { %v1084_v31 = vsel %vm1079_vm3, %v1058_v56, %v4206_v49  ;;  %1339 = vrot.lane.b32.xlu1 %v3818_v61, %s3040_s20 }
 0x231   : > { %1343 = vrot.lane.b32.xlu0 %v3278_v41, %s3040_s20  ;;  %2130 = vmatprep.subr.mxu0 %v1084_v31 }
 0x232   : > { %v4214_v50 = vpop.permute.xlu1 %1558 }
 0x233   : > { %v1557_v51 = vpop.permute.xlu0 %1556 }
 0x234   : > { %v1573_v43 = vsel %vm1562_vm4, %v1557_v51, %v4214_v50  ;;  %1335 = vrot.lane.b32.xlu1 %v3255_v36, %s3040_s20 }
 0x235   : > { %1333 = vrot.lane.b32.xlu0 %v3840_v29, %s3040_s20  ;;  %2223 = vmatprep.subr.mxu1 %v1573_v43 }
 0x236   : > { %v1555_v55 = vpop.permute.xlu1 %1554 }
 0x237   : > { %v1572_v61 = vsel %vm1562_vm4, %v1555_v55, %v1557_v51  ;;  %v1056_v11 = vpop.permute.xlu0 %1055  ;;  %v4257_v51 = vld [vmem:[%s3234_s25 + $0x78] sm:$0xff] }
 0x238   : > { %v1083_v12 = vsel %vm1079_vm3, %v1056_v11, %v1058_v56  ;;  %1325 = vrot.lane.b32.xlu1 %v3866_v44, %s3040_s20  ;;  %2224 = vmatpush1.msra.mxu1 %v1572_v61  ;;  %v3006_v56 = vld [vmem:[#allocation2 + $0x30] sm:$0xff]  ;;  %v3007_v61 = vld [vmem:[#allocation2 + $0x20] sm:$0xff] }
 0x239   : > { %1331 = vrot.lane.b32.xlu0 %v3848_v30, %s3040_s20  ;;  %2131 = vmatpush1.msra.mxu0 %v1083_v12 }
 0x23a   : > { %v4228_v52 = vpop.permute.xlu1 %1051 }
 0x23b   : > { %v1050_v47 = vpop.permute.xlu0 %1049 }
 0x23c   : > { %v1081_v29 = vsel %vm1079_vm3, %v1050_v47, %v4228_v52  ;;  %1323 = vrot.lane.b32.xlu1 %v3003_v26, %s3040_s20 }
 0x23d   : > { %1327 = vrot.lane.b32.xlu0 %v3237_v32, %s3040_s20  ;;  %2132 = vmatprep.subr.mxu0 %v1081_v29  ;;  %v3008_v29 = vld [vmem:[#allocation2 + $0x18] sm:$0xff] }
 0x23e   : > { %v4235_v6 = vpop.permute.xlu1 %1550 }
 0x23f   : > { %v1549_v38 = vpop.permute.xlu0 %1548 }
 0x240   : > { %v1570_v30 = vsel %vm1562_vm4, %v1549_v38, %v4235_v6  ;;  %1282 = vrot.lane.b32.xlu1 %v3281_v42, %s3041_s21 }
 0x241   : > { %1280 = vrot.lane.b32.xlu0 %v3829_v28, %s3041_s21  ;;  %2225 = vmatprep.subr.mxu1 %v1570_v30  ;;  %v4272_v30 = vld [vmem:[%s3234_s25 + $0x58] sm:$0xff] }
 0x242   : > { %v1547_v27 = vpop.permute.xlu1 %1546 }
 0x243   : > { %v1569_v46 = vsel %vm1562_vm4, %v1547_v27, %v1549_v38  ;;  %v1048_v23 = vpop.permute.xlu0 %1047 }
 0x244   : > { %v1080_v48 = vsel %vm1079_vm3, %v1048_v23, %v1050_v47  ;;  %1272 = vrot.lane.b32.xlu1 %v3004_v37, %s3041_s21  ;;  %2226 = vmatpush1.msra.mxu1 %v1569_v46 }
 0x245   : > { %1278 = vrot.lane.b32.xlu0 %v3005_v63, %s3041_s21  ;;  %2133 = vmatpush1.msra.mxu0 %v1080_v48  ;;  %v4288_v63 = vld [vmem:[%s3234_s25 + $0x38] sm:$0xff] }
 0x246   : > { %v4247_v42 = vpop.permute.xlu1 %1006 }
 0x247   : > { %v1005_v28 = vpop.permute.xlu0 %1004 }
 0x248   : > { %v1021_v18 = vsel %vm1010_vm6, %v1005_v28, %v4247_v42  ;;  %1270 = vrot.lane.b32.xlu1 %v3006_v56, %s3041_s21 }
 0x249   : > { %1274 = vrot.lane.b32.xlu0 %v3278_v41, %s3041_s21  ;;  %2134 = vmatprep.subr.mxu0 %v1021_v18 }
 0x24a   : > { %v4254_v31 = vpop.permute.xlu1 %1542 }
 0x24b   : > { %v1541_v43 = vpop.permute.xlu0 %1540 }
 0x24c   : > { %v1567_v55 = vsel %vm1562_vm4, %v1541_v43, %v4254_v31  ;;  %1264 = vrot.lane.b32.xlu1 %v3007_v61, %s3041_s21 }
 0x24d   : > { %939 = vrot.lane.b32.xlu0 %v4257_v51, %s3028_s9  ;;  %2227 = vmatprep.subr.mxu1 %v1567_v55  ;;  %v1646_v55 = vld [vmem:[#allocation2 + $0x178] sm:$0xff] }
 0x24e   : > { %v1539_v11 = vpop.permute.xlu1 %1538 }
 0x24f   : > { %v1566_v41 = vsel %vm1562_vm4, %v1539_v11, %v1541_v43  ;;  %v1003_v12 = vpop.permute.xlu0 %1002  ;;  %v4866_v43 = vld [vmem:[#allocation9_spill] sm:$0xff]  ;;  %v1691_v11 = vld [vmem:[#allocation2 + $0x2e0] sm:$0xff] }
 0x250   : > { %v1020_v47 = vsel %vm1010_vm6, %v1003_v12, %v1005_v28  ;;  %1262 = vrot.lane.b32.xlu1 %v3008_v29, %s3041_s21  ;;  %2228 = vmatpush1.msra.mxu1 %v1566_v41  ;;  %v1643_v12 = vld [vmem:[#allocation2 + $0x160] sm:$0xff]  ;;  %v1688_v29 = vld [vmem:[#allocation2 + $0x2c8] sm:$0xff] }
 0x251   : > { %1266 = vrot.lane.b32.xlu0 %v3255_v36, %s3041_s21  ;;  %2135 = vmatpush1.msra.mxu0 %v1020_v47 }
 0x252   : > { %v4269_v38 = vpop.permute.xlu1 %998 }
 0x253   : > { %v997_v27 = vpop.permute.xlu0 %996 }
 0x254   : > { %v1018_v46 = vsel %vm1010_vm6, %v997_v27, %v4269_v38  ;;  %1256 = vrot.lane.b32.xlu1 %v3866_v44, %s3041_s21 }
 0x255   : > { %931 = vrot.lane.b32.xlu0 %v4272_v30, %s3028_s9  ;;  %2136 = vmatprep.subr.mxu0 %v1018_v46  ;;  %v1640_v46 = vld [vmem:[#allocation2 + $0x148] sm:$0xff] }
 0x256   : > { %v4280_v23 = vpop.permute.xlu1 %1534 }
 0x257   : > { %v1533_v36 = vpop.permute.xlu0 %1532 }
 0x258   : > { %v1564_v48 = vsel %vm1562_vm4, %v1533_v36, %v4280_v23  ;;  %1254 = vrot.lane.b32.xlu1 %v3003_v26, %s3041_s21  ;;  %v4297_v26 = vld [vmem:[%s3234_s25 + $0x18] sm:$0xff]  ;;  %s4754_s25 = scalar_lea.vmem %s4785_s3, %s2804_s22 }
 0x259   : > { %1258 = vrot.lane.b32.xlu0 %v3237_v32, %s3041_s21  ;;  %2229 = vmatprep.subr.mxu1 %v1564_v48  ;;  %v1694_v32 = vld [vmem:[#allocation2 + $0x2f8] sm:$0xff] }
 0x25a   : > { %v1531_v37 = vpop.permute.xlu1 %1530 }
 0x25b   : > { %v1563_v44 = vsel %vm1562_vm4, %v1531_v37, %v1533_v36  ;;  %v995_v28 = vpop.permute.xlu0 %994  ;;  %v4867_v36 = vld [vmem:[#allocation16_spill] sm:$0xff]  ;;  %v1685_v37 = vld [vmem:[#allocation2 + $0x2b0] sm:$0xff] }
 0x25c   : > { %v1017_v18 = vsel %vm1010_vm6, %v995_v28, %v997_v27  ;;  %1491 = vrot.lane.b32.xlu1 %v4257_v51, %s3037_s18  ;;  %2230 = vmatpush1.msra.mxu1 %v1563_v44  ;;  %v1637_v44 = vld [vmem:[#allocation2 + $0x130] sm:$0xff] }
 0x25d   : > { %923 = vrot.lane.b32.xlu0 %v4288_v63, %s3028_s9  ;;  %2137 = vmatpush1.msra.mxu0 %v1017_v18  ;;  %v1682_v18 = vld [vmem:[#allocation2 + $0x298] sm:$0xff] }
 0x25e   : > { %v4299_v56 = vpop.permute.xlu1 %990  ;;  %2805 = vmatprep.subr.mxu1 %v1694_v32  ;;  %2794 = vmatmul.mubr.msk.f32.vlgmr.msra.gmra.mxu1 %vm1919_vm7, %v4866_v43 }
 0x25f   : > { %v989_v61 = vpop.permute.xlu0 %988  ;;  %2806 = vmatpush3.msra.mxu1 %v1646_v55  ;;  %2269 = vmatprep.mubr.f32.mxu1 %v3039_v39 }
 0x260   : > { %v1015_v41 = vsel %vm1010_vm6, %v989_v61, %v4299_v56  ;;  %915 = vrot.lane.b32.xlu1 %v4297_v26, %s3028_s9  ;;  %2807 = vmatprep.subr.mxu1 %v1691_v11 }
 0x261   : > { %1215 = vrot.lane.b32.xlu0 %v4257_v51, %s3031_s12  ;;  %2138 = vmatprep.subr.mxu0 %v1015_v41  ;;  %v1679_v41 = vld [vmem:[#allocation2 + $0x280] sm:$0xff] }
 0x262   : > { %v981_v47 = vpop.permute.xlu1 %980  ;;  %2808 = vmatpush3.msra.mxu1 %v1643_v12  ;;  %v1631_v12 = vld [vmem:[#allocation2 + $0x100] sm:$0xff] }
 0x263   : > { %v987_v27 = vpop.permute.xlu0 %986  ;;  %2809 = vmatprep.subr.mxu1 %v1688_v29  ;;  %2795 = vmatmul.mubr.msk.f32.gmra.mxu1 %vm1919_vm7, %v4867_v36 }
 0x264   : > { %v1014_v48 = vsel %vm1010_vm6, %v987_v27, %v989_v61  ;;  %1207 = vrot.lane.b32.xlu1 %v4272_v30, %s3031_s12  ;;  %2810 = vmatpush3.msra.mxu1 %v1640_v46  ;;  %v1634_v61 = vld [vmem:[#allocation2 + $0x118] sm:$0xff]  ;;  %v1676_v27 = vld [vmem:[#allocation2 + $0x268] sm:$0xff] }
 0x265   : > { %1483 = vrot.lane.b32.xlu0 %v4272_v30, %s3037_s18  ;;  %2811 = vmatprep.subr.mxu1 %v1685_v37  ;;  %v1673_v37 = vld [vmem:[#allocation2 + $0x250] sm:$0xff] }
 0x266   : > { %v979_v28 = vpop.permute.xlu1 %978  ;;  %2139 = vmatpush1.msra.mxu0 %v1014_v48  ;;  %2812 = vmatpush3.msra.mxu1 %v1637_v44  ;;  %v1625_v44 = vld [vmem:[#allocation2 + $0xd0] sm:$0xff] }
 0x267   : > { %v1011_v32 = vsel %vm1010_vm6, %v979_v28, %v981_v47  ;;  %v4318_v55 = vpop.permute.xlu0 %982  ;;  %2813 = vmatprep.subr.mxu1 %v1682_v18  ;;  %2275 = vmatprep.mubr.f32.mxu1 %v3039_v39  ;;  %v1670_v18 = vld [vmem:[#allocation2 + $0x238] sm:$0xff] }
 0x268   : > { %v1012_v11 = vsel %vm1010_vm6, %v981_v47, %v4318_v55  ;;  %1475 = vrot.lane.b32.xlu1 %v4288_v63, %s3037_s18  ;;  %2814 = vmatpush3.msra.mxu1 %v1634_v61  ;;  %v1628_v47 = vld [vmem:[#allocation2 + $0xe8] sm:$0xff]  ;;  %v1622_v61 = vld [vmem:[#allocation2 + $0xb8] sm:$0xff] }
 0x269   : > { %870 = vrot.lane.b32.xlu0 %v4257_v51, %s3029_s10  ;;  %2815 = vmatprep.subr.mxu1 %v1679_v41 }
 0x26a   : > { %v4327_v29 = vpop.permute.xlu1 %1489  ;;  %2140 = vmatprep.subr.mxu0 %v1012_v11  ;;  %2816 = vmatpush3.msra.mxu1 %v1631_v12  ;;  %v4868_v11 = vld [vmem:[#allocation23_spill] sm:$0xff] }
 0x26b   : > { %v1488_v46 = vpop.permute.xlu0 %1487  ;;  %2141 = vmatpush1.msra.mxu0 %v1011_v32  ;;  %2817 = vmatprep.subr.mxu1 %v1676_v27  ;;  %v1667_v12 = vld [vmem:[#allocation2 + $0x220] sm:$0xff] }
 0x26c   : > { %v1504_v48 = vsel %vm1493_vm8, %v1488_v46, %v4327_v29  ;;  %862 = vrot.lane.b32.xlu1 %v4272_v30, %s3029_s10  ;;  %2818 = vmatpush3.msra.mxu1 %v1628_v47  ;;  %v1619_v27 = vld [vmem:[#allocation2 + $0xa0] sm:$0xff] }
 0x26d   : > { %1199 = vrot.lane.b32.xlu0 %v4288_v63, %s3031_s12  ;;  %2819 = vmatprep.subr.mxu1 %v1673_v37 }
 0x26e   : > { %v1480_v28 = vpop.permute.xlu1 %1479  ;;  %2142 = vmatprep.subr.mxu0 %v1504_v48  ;;  %2820 = vmatpush3.msra.mxu1 %v1625_v44  ;;  %v1664_v48 = vld [vmem:[#allocation2 + $0x208] sm:$0xff] }
 0x26f   : > { %v1486_v32 = vpop.permute.xlu0 %1485  ;;  %2821 = vmatprep.subr.mxu1 %v1670_v18  ;;  %2796 = vmatmul.mubr.msk.f32.gmra.mxu1 %vm1919_vm7, %v4868_v11 }
 0x270   : > { %v1503_v41 = vsel %vm1493_vm8, %v1486_v32, %v1488_v46  ;;  %1191 = vrot.lane.b32.xlu1 %v4297_v26, %s3031_s12  ;;  %2822 = vmatpush3.msra.mxu1 %v1622_v61  ;;  %v1616_v46 = vld [vmem:[#allocation2 + $0x88] sm:$0xff]  ;;  %v1661_v32 = vld [vmem:[#allocation2 + $0x1f0] sm:$0xff] }
 0x271   : > { %1467 = vrot.lane.b32.xlu0 %v4297_v26, %s3037_s18  ;;  %2823 = vmatprep.subr.mxu1 %v1667_v12  ;;  %v1613_v61 = vld [vmem:[#allocation2 + $0x70] sm:$0xff] }
 0x272   : > { %v1478_v47 = vpop.permute.xlu1 %1477  ;;  %2143 = vmatpush2.msra.mxu0 %v1503_v41  ;;  %2824 = vmatpush3.msra.mxu1 %v1619_v27  ;;  %v1610_v41 = vld [vmem:[#allocation2 + $0x58] sm:$0xff] }
 0x273   : > { %v1500_v37 = vsel %vm1493_vm8, %v1478_v47, %v1480_v28  ;;  %v4343_v44 = vpop.permute.xlu0 %1481  ;;  %2825 = vmatprep.subr.mxu1 %v1664_v48  ;;  %2281 = vmatprep.mubr.f32.mxu1 %v3039_v39  ;;  %v1658_v27 = vld [vmem:[#allocation2 + $0x1d8] sm:$0xff]  ;;  %v1655_v48 = vld [vmem:[#allocation2 + $0x1c0] sm:$0xff] }
 0x274   : > { %v1501_v18 = vsel %vm1493_vm8, %v1480_v28, %v4343_v44  ;;  %1422 = vrot.lane.b32.xlu1 %v4257_v51, %s3038_s19  ;;  %2826 = vmatpush3.msra.mxu1 %v1616_v46  ;;  %v1607_v28 = vld [vmem:[#allocation2 + $0x40] sm:$0xff]  ;;  %v1604_v46 = vld [vmem:[#allocation2 + $0x28] sm:$0xff] }
 0x275   : > { %854 = vrot.lane.b32.xlu0 %v4288_v63, %s3029_s10  ;;  %2827 = vmatprep.subr.mxu1 %v1661_v32  ;;  %v1652_v32 = vld [vmem:[#allocation2 + $0x1a8] sm:$0xff] }
 0x276   : > { %v4352_v12 = vpop.permute.xlu1 %1473  ;;  %2144 = vmatprep.subr.mxu0 %v1501_v18  ;;  %2828 = vmatpush3.msra.mxu1 %v1613_v61  ;;  %v4869_v61 = vld [vmem:[#allocation30_spill] sm:$0xff] }
 0x277   : > { %v1472_v39 = vpop.permute.xlu0 %1471  ;;  %2145 = vmatpush2.msra.mxu0 %v1500_v37  ;;  %2829 = vmatprep.subr.mxu1 %v1658_v27  ;;  %v1601_v27 = vld [vmem:[#allocation2 + $0x10] sm:$0xff] }
 0x278   : > { %v1498_v47 = vsel %vm1493_vm8, %v1472_v39, %v4352_v12  ;;  %846 = vrot.lane.b32.xlu1 %v4297_v26, %s3029_s10  ;;  %2830 = vmatpush3.msra.mxu1 %v1610_v41  ;;  %v1649_v41 = vld [vmem:[#allocation2 + $0x190] sm:$0xff] }
 0x279   : > { %1146 = vrot.lane.b32.xlu0 %v4257_v51, %s3033_s14  ;;  %2831 = vmatprep.subr.mxu1 %v1655_v48 }
 0x27a   : > { %v1464_v18 = vpop.permute.xlu1 %1463  ;;  %2146 = vmatprep.subr.mxu0 %v1498_v47  ;;  %2832 = vmatpush3.msra.mxu1 %v1607_v28 }
 0x27b   : > { %v1470_v37 = vpop.permute.xlu0 %1469  ;;  %2833 = vmatprep.subr.mxu1 %v1652_v32  ;;  %2797 = vmatmul.mubr.msk.f32.gmra.mxu1 %vm1919_vm7, %v4869_v61  ;;  %v4870_v32 = vld [vmem:[#allocation4_spill] sm:$0xff] }
 0x27c   : > { %v1497_v11 = vsel %vm1493_vm8, %v1470_v37, %v1472_v39  ;;  %1138 = vrot.lane.b32.xlu1 %v4272_v30, %s3033_s14  ;;  %2834 = vmatpush3.msra.mxu1 %v1604_v46  ;;  %v4882_v61 = vld [vmem:[#allocation28_spill] sm:$0xff] }
 0x27d   : > { %1414 = vrot.lane.b32.xlu0 %v4272_v30, %s3038_s19  ;;  %2835 = vmatprep.subr.mxu1 %v1649_v41 }
 0x27e   : > { %v1462_v47 = vpop.permute.xlu1 %1461  ;;  %2147 = vmatpush2.msra.mxu0 %v1497_v11  ;;  %2836 = vmatpush3.msra.mxu1 %v1601_v27 }
 0x27f   : > { %v1494_v28 = vsel %vm1493_vm8, %v1462_v47, %v1464_v18  ;;  %v4368_v48 = vpop.permute.xlu0 %1465  ;;  %2352 = vmatprep.mubr.f32.mxu1 %v4870_v32 }
 0x280   : > { %v1495_v39 = vsel %vm1493_vm8, %v1464_v18, %v4368_v48  ;;  %1130 = vrot.lane.b32.xlu1 %v4288_v63, %s3033_s14  ;;  %2353 = vmatmul.mubr.f32.vlgmr.msra.gmra.mxu1 %v4862_v0 }
 0x281   : > { %1406 = vrot.lane.b32.xlu0 %v4288_v63, %s3038_s19  ;;  %2148 = vmatprep.subr.mxu0 %v1495_v39 }
 0x282   : > { %v4378_v11 = vpop.permute.xlu1 %1420  ;;  %2149 = vmatpush2.msra.mxu0 %v1494_v28  ;;  %2357 = vmatprep.mubr.f32.mxu1 %v4860_v8 }
 0x283   : > { %v1419_v46 = vpop.permute.xlu0 %1418 }
 0x284   : > { %v1435_v37 = vsel %vm1424_vm9, %v1419_v46, %v4378_v11  ;;  %1122 = vrot.lane.b32.xlu1 %v4297_v26, %s3033_s14  ;;  %2358 = vmatmul.mubr.f32.gmra.mxu1 %v4861_v7 }
 0x285   : > { %1398 = vrot.lane.b32.xlu0 %v4297_v26, %s3038_s19  ;;  %2150 = vmatprep.subr.mxu0 %v1435_v37  ;;  %v4871_v37 = vld [vmem:[#allocation6_spill] sm:$0xff] }
 0x286   : > { %v1411_v18 = vpop.permute.xlu1 %1410  ;;  %2362 = vmatprep.mubr.f32.mxu1 %v4858_v15 }
 0x287   : > { %v1417_v27 = vpop.permute.xlu0 %1416 }
 0x288   : > { %v1434_v41 = vsel %vm1424_vm9, %v1417_v27, %v1419_v46  ;;  %1077 = vrot.lane.b32.xlu1 %v4257_v51, %s3034_s15  ;;  %2363 = vmatmul.mubr.f32.gmra.mxu1 %v4859_v14 }
 0x289   : > { %1353 = vrot.lane.b32.xlu0 %v4257_v51, %s3040_s20  ;;  %2151 = vmatpush2.msra.mxu0 %v1434_v41 }
 0x28a   : > { %v1409_v47 = vpop.permute.xlu1 %1408  ;;  %2367 = vmatprep.mubr.f32.mxu1 %v4856_v22 }
 0x28b   : > { %v1431_v28 = vsel %vm1424_vm9, %v1409_v47, %v1411_v18  ;;  %v4397_v32 = vpop.permute.xlu0 %1412 }
 0x28c   : > { %v1432_v39 = vsel %vm1424_vm9, %v1411_v18, %v4397_v32  ;;  %1069 = vrot.lane.b32.xlu1 %v4272_v30, %s3034_s15  ;;  %2368 = vmatmul.mubr.f32.gmra.mxu1 %v4857_v21 }
 0x28d   : > { %1345 = vrot.lane.b32.xlu0 %v4272_v30, %s3040_s20  ;;  %2152 = vmatprep.subr.mxu0 %v1432_v39 }
 0x28e   : > { %v4406_v46 = vpop.permute.xlu1 %1404  ;;  %2153 = vmatpush2.msra.mxu0 %v1431_v28  ;;  %2437 = vmatprep.mubr.f32.mxu1 %v4871_v37  ;;  %v3042_v37 = vmov 0  }
 0x28f   : > { %v1403_v27 = vpop.permute.xlu0 %1402  ;;  %2993 = vset.pattern.permute.xlu0 %v3042_v37  ;;  %2994 = vset.pattern.permute.xlu1 %v3042_v37 }
 0x290   : > { %v1429_v41 = vsel %vm1424_vm9, %v1403_v27, %v4406_v46  ;;  %1061 = vrot.lane.b32.xlu1 %v4288_v63, %s3034_s15 }
 0x291   : > { %1337 = vrot.lane.b32.xlu0 %v4288_v63, %s3040_s20  ;;  %2154 = vmatprep.subr.mxu0 %v1429_v41 }
 0x292   : > { %v1395_v18 = vpop.permute.xlu1 %1394 }
 0x293   : > { %v1401_v47 = vpop.permute.xlu0 %1400 }
 0x294   : > { %v1428_v39 = vsel %vm1424_vm9, %v1401_v47, %v1403_v27  ;;  %1053 = vrot.lane.b32.xlu1 %v4297_v26, %s3034_s15 }
 0x295   : > { %1329 = vrot.lane.b32.xlu0 %v4297_v26, %s3040_s20  ;;  %2155 = vmatpush2.msra.mxu0 %v1428_v39 }
 0x296   : > { %v1393_v28 = vpop.permute.xlu1 %1392 }
 0x297   : > { %v1425_v0 = vsel %vm1424_vm9, %v1393_v28, %v1395_v18  ;;  %v4421_v7 = vpop.permute.xlu0 %1396 }
 0x298   : > { %v1426_v41 = vsel %vm1424_vm9, %v1395_v18, %v4421_v7  ;;  %1008 = vrot.lane.b32.xlu1 %v4257_v51, %s3036_s17 }
 0x299   : > { %1284 = vrot.lane.b32.xlu0 %v4257_v51, %s3041_s21  ;;  %2156 = vmatprep.subr.mxu0 %v1426_v41 }
 0x29a   : > { %v4429_v27 = vpop.permute.xlu1 %1351  ;;  %2157 = vmatpush2.msra.mxu0 %v1425_v0 }
 0x29b   : > { %v1350_v47 = vpop.permute.xlu0 %1349 }
 0x29c   : > { %v1366_v39 = vsel %vm1355_vm10, %v1350_v47, %v4429_v27  ;;  %1000 = vrot.lane.b32.xlu1 %v4272_v30, %s3036_s17 }
 0x29d   : > { %1276 = vrot.lane.b32.xlu0 %v4272_v30, %s3041_s21  ;;  %2158 = vmatprep.subr.mxu0 %v1366_v39 }
 0x29e   : > { %v1342_v18 = vpop.permute.xlu1 %1341 }
 0x29f   : > { %v1348_v28 = vpop.permute.xlu0 %1347 }
 0x2a0   : > { %v1365_v37 = vsel %vm1355_vm10, %v1348_v28, %v1350_v47  ;;  %992 = vrot.lane.b32.xlu1 %v4288_v63, %s3036_s17 }
 0x2a1   : > { %1268 = vrot.lane.b32.xlu0 %v4288_v63, %s3041_s21  ;;  %2159 = vmatpush2.msra.mxu0 %v1365_v37 }
 0x2a2   : > { %v1340_v0 = vpop.permute.xlu1 %1339 }
 0x2a3   : > { %v1362_v41 = vsel %vm1355_vm10, %v1340_v0, %v1342_v18  ;;  %v4443_v8 = vpop.permute.xlu0 %1343 }
 0x2a4   : > { %v1363_v14 = vsel %vm1355_vm10, %v1342_v18, %v4443_v8  ;;  %984 = vrot.lane.b32.xlu1 %v4297_v26, %s3036_s17 }
 0x2a5   : > { %1260 = vrot.lane.b32.xlu0 %v4297_v26, %s3041_s21  ;;  %2160 = vmatprep.subr.mxu0 %v1363_v14 }
 0x2a6   : > { %v4451_v47 = vpop.permute.xlu1 %1335  ;;  %2161 = vmatpush2.msra.mxu0 %v1362_v41 }
 0x2a7   : > { %v1334_v39 = vpop.permute.xlu0 %1333 }
 0x2a8   : > { %v1360_v28 = vsel %vm1355_vm10, %v1334_v39, %v4451_v47  ;;  %1552 = vrot.lane.b32.xlu1 %v4272_v30, %s3035_s16  ;;  %v4872_v30 = vld [vmem:[#allocation32_spill] sm:$0xff] }
 0x2a9   : > { %1560 = vrot.lane.b32.xlu0 %v4257_v51, %s3035_s16  ;;  %2162 = vmatprep.subr.mxu0 %v1360_v28 }
 0x2aa   : > { %v1326_v18 = vpop.permute.xlu1 %1325 }
 0x2ab   : > { %v1332_v37 = vpop.permute.xlu0 %1331 }
 0x2ac   : > { %v1359_v0 = vsel %vm1355_vm10, %v1332_v37, %v1334_v39  ;;  %1536 = vrot.lane.b32.xlu1 %v4297_v26, %s3035_s16  ;;  %v4873_v39 = vld [vmem:[#allocation31_spill] sm:$0xff]  ;;  %v4874_v37 = vld [vmem:[#allocation33_spill] sm:$0xff] }
 0x2ad   : > { %1544 = vrot.lane.b32.xlu0 %v4288_v63, %s3035_s16  ;;  %2163 = vmatpush2.msra.mxu0 %v1359_v0  ;;  %v4875_v0 = vld [vmem:[#allocation34_spill] sm:$0xff] }
 0x2ae   : > { %v1324_v14 = vpop.permute.xlu1 %1323 }
 0x2af   : > { %v1356_v41 = vsel %vm1355_vm10, %v1324_v14, %v1326_v18  ;;  %v4465_v15 = vpop.permute.xlu0 %1327 }
 0x2b0   : > { %v1357_v51 = vsel %vm1355_vm10, %v1326_v18, %v4465_v15  ;;  %1906 = vperm.xlu1 %2994, %v4872_v30  }
 0x2b1   : > { %2164 = vmatprep.subr.mxu0 %v1357_v51  ;;  %1901 = vperm.xlu0 %2993, %v4873_v39  }
 0x2b2   : > { %v4471_v28 = vpop.permute.xlu1 %1282  ;;  %2165 = vmatpush2.msra.mxu0 %v1356_v41 }
 0x2b3   : > { %v1281_v26 = vpop.permute.xlu0 %1280 }
 0x2b4   : > { %v1297_v63 = vsel %vm1286_vm11, %v1281_v26, %v4471_v28  ;;  %1911 = vperm.xlu1 %2994, %v4874_v37  }
 0x2b5   : > { %2166 = vmatprep.subr.mxu0 %v1297_v63  ;;  %1916 = vperm.xlu0 %2993, %v4875_v0  }
 0x2b6   : > { %v1273_v14 = vpop.permute.xlu1 %1272 }
 0x2b7   : > { %v1279_v18 = vpop.permute.xlu0 %1278 }
 0x2b8   : > { %v1296_v30 = vsel %vm1286_vm11, %v1279_v18, %v1281_v26 }
 0x2b9   : > { %2167 = vmatpush2.msra.mxu0 %v1296_v30 }
 0x2ba   : > { %v1271_v51 = vpop.permute.xlu1 %1270 }
 0x2bb   : > { %v1293_v39 = vsel %vm1286_vm11, %v1271_v51, %v1273_v14  ;;  %v4479_v21 = vpop.permute.xlu0 %1274 }
 0x2bc   : > { %v1294_v41 = vsel %vm1286_vm11, %v1273_v14, %v4479_v21 }
 0x2bd   : > { %2168 = vmatprep.subr.mxu0 %v1294_v41 }
 0x2be   : > { %v1265_v22 = vpop.permute.xlu1 %1264  ;;  %2169 = vmatpush2.msra.mxu0 %v1293_v39 }
 0x2bf   : > { %v940_v37 = vpop.permute.xlu0 %939 }
 0x2c0   : > { %v953_v63 = vsel %vm941_vm12, %v3924_v33, %v940_v37  ;;  %v1742_v33 = vld [vmem:[#allocation2 + $0x478] sm:$0xff] }
 0x2c1   : > { %977 = vst.msk [vmem:[#allocation2 + $0x5f8] sm:$0xff] %vm73_vm0, %v953_v63 }
 0x2c2   : > { %v1263_v0 = vpop.permute.xlu1 %1262 }
 0x2c3   : > { %v1290_v26 = vsel %vm1286_vm11, %v1263_v0, %v1265_v22  ;;  %v4487_v18 = vpop.permute.xlu0 %1266 }
 0x2c4   : > { %v1291_v30 = vsel %vm1286_vm11, %v1265_v22, %v4487_v18 }
 0x2c5   : > { %2170 = vmatprep.subr.mxu0 %v1291_v30 }
 0x2c6   : > { %v1257_v51 = vpop.permute.xlu1 %1256  ;;  %2171 = vmatpush2.msra.mxu0 %v1290_v26 }
 0x2c7   : > { %v932_v14 = vpop.permute.xlu0 %931 }
 0x2c8   : > { %v950_v39 = vsel %vm941_vm12, %v3941_v45, %v932_v14  ;;  %v1790_v41 = vld [vmem:[#allocation2 + $0x5f8] sm:$0xff]  ;;  %v4876_v14 = vld [vmem:[#allocation7_spill] sm:$0xff] }
 0x2c9   : > { %974 = vst.msk [vmem:[#allocation2 + $0x5e0] sm:$0xff] %vm73_vm0, %v950_v39  ;;  %2849 = vmatprep.subr.mxu1 %v1790_v41 }
 0x2ca   : > { %2850 = vmatpush3.msra.mxu1 %v1742_v33  ;;  %v1255_v37 = vpop.permute.xlu1 %1254  ;;  %v4877_v33 = vld [vmem:[#allocation15_spill] sm:$0xff] }
 0x2cb   : > { %v1287_v63 = vsel %vm1286_vm11, %v1255_v37, %v1257_v51  ;;  %v4495_v0 = vpop.permute.xlu0 %1258 }
 0x2cc   : > { %v1288_v22 = vsel %vm1286_vm11, %v1257_v51, %v4495_v0  ;;  %v1739_v51 = vld [vmem:[#allocation2 + $0x460] sm:$0xff] }
 0x2cd   : > { %2172 = vmatprep.subr.mxu0 %v1288_v22  ;;  %v4878_v22 = vld [vmem:[#allocation14_spill] sm:$0xff] }
 0x2ce   : > { %v1492_v26 = vpop.permute.xlu1 %1491  ;;  %2173 = vmatpush2.msra.mxu0 %v1287_v63 }
 0x2cf   : > { %v1505_v45 = vsel %vm1493_vm8, %v4327_v29, %v1492_v26  ;;  %v924_v30 = vpop.permute.xlu0 %923  ;;  %2175 = vmatmul.mubr.f32.vlgmr.msra.gmra.mxu0 %v4876_v14  ;;  %v4879_v26 = vld [vmem:[#allocation22_spill] sm:$0xff] }
 0x2d0   : > { %1529 = vst.msk [vmem:[#allocation2 + $0x8f8] sm:$0xff] %vm73_vm0, %v1505_v45  ;;  %v947_v39 = vsel %vm941_vm12, %v3950_v19, %v924_v30  ;;  %v1787_v41 = vld [vmem:[#allocation2 + $0x5e0] sm:$0xff]  ;;  %2180 = vmatprep.mubr.f32.mxu0 %v4877_v33 }
 0x2d1   : > { %971 = vst.msk [vmem:[#allocation2 + $0x5c8] sm:$0xff] %vm73_vm0, %v947_v39  ;;  %2851 = vmatprep.subr.mxu1 %v1787_v41 }
 0x2d2   : > { %2852 = vmatpush3.msra.mxu1 %v1739_v51  ;;  %v916_v37 = vpop.permute.xlu1 %915  ;;  %v4880_v51 = vld [vmem:[#allocation21_spill] sm:$0xff] }
 0x2d3   : > { %v944_v29 = vsel %vm941_vm12, %v3963_v4, %v916_v37  ;;  %v1216_v63 = vpop.permute.xlu0 %1215  ;;  %2181 = vmatmul.mubr.f32.gmra.mxu0 %v4878_v22 }
 0x2d4   : > { %968 = vst.msk [vmem:[#allocation2 + $0x5b0] sm:$0xff] %vm73_vm0, %v944_v29  ;;  %v1229_v19 = vsel %vm1217_vm14, %v4034_v34, %v1216_v63  ;;  %2186 = vmatprep.mubr.f32.mxu0 %v4879_v26  ;;  %v4881_v34 = vld [vmem:[#allocation29_spill] sm:$0xff]  ;;  %v1736_v29 = vld [vmem:[#allocation2 + $0x448] sm:$0xff] }
 0x2d5   : > { %1253 = vst.msk [vmem:[#allocation2 + $0x778] sm:$0xff] %vm73_vm0, %v1229_v19 }
 0x2d6   : > { %v1208_v45 = vpop.permute.xlu1 %1207 }
 0x2d7   : > { %v1226_v30 = vsel %vm1217_vm14, %v4054_v54, %v1208_v45  ;;  %v1484_v39 = vpop.permute.xlu0 %1483  ;;  %v1886_v41 = vld [vmem:[#allocation2 + $0x8f8] sm:$0xff]  ;;  %2187 = vmatmul.mubr.f32.gmra.mxu0 %v4880_v51 }
 0x2d8   : > { %1250 = vst.msk [vmem:[#allocation2 + $0x760] sm:$0xff] %vm73_vm0, %v1226_v30  ;;  %v1502_v4 = vsel %vm1493_vm8, %v4343_v44, %v1484_v39  ;;  %v1784_v37 = vld [vmem:[#allocation2 + $0x5c8] sm:$0xff]  ;;  %2893 = vmatprep.subr.mxu0 %v1886_v41  ;;  %2192 = vmatprep.mubr.f32.mxu0 %v4881_v34  ;;  %v1733_v39 = vld [vmem:[#allocation2 + $0x430] sm:$0xff] }
 0x2d9   : > { %1526 = vst.msk [vmem:[#allocation2 + $0x8e0] sm:$0xff] %vm73_vm0, %v1502_v4  ;;  %2853 = vmatprep.subr.mxu1 %v1784_v37 }
 0x2da   : > { %2854 = vmatpush3.msra.mxu1 %v1736_v29  ;;  %v1476_v63 = vpop.permute.xlu1 %1475 }
 0x2db   : > { %v1499_v54 = vsel %vm1493_vm8, %v4352_v12, %v1476_v63  ;;  %v871_v19 = vpop.permute.xlu0 %870  ;;  %v1781_v45 = vld [vmem:[#allocation2 + $0x5b0] sm:$0xff]  ;;  %2193 = vmatmul.mubr.f32.gmra.mxu0 %v4882_v61 }
 0x2dc   : > { %1523 = vst.msk [vmem:[#allocation2 + $0x8c8] sm:$0xff] %vm73_vm0, %v1499_v54  ;;  %v884_v44 = vsel %vm872_vm13, %v3972_v60, %v871_v19  ;;  %2855 = vmatprep.subr.mxu1 %v1781_v45  ;;  %v1838_v30 = vld [vmem:[#allocation2 + $0x778] sm:$0xff]  ;;  %2522 = vmatprep.mubr.f32.mxu0 %v4854_v5 }
 0x2dd   : > { %908 = vst.msk [vmem:[#allocation2 + $0x598] sm:$0xff] %vm73_vm0, %v884_v44  ;;  %2894 = vmatpush3.msra.mxu0 %v1838_v30  ;;  %2856 = vmatpush3.msra.mxu1 %v1733_v39 }
 0x2de   : > { %v863_v41 = vpop.permute.xlu1 %862 }
 0x2df   : > { %v881_v12 = vsel %vm872_vm13, %v3985_v59, %v863_v41  ;;  %v1200_v4 = vpop.permute.xlu0 %1199  ;;  %v1835_v37 = vld [vmem:[#allocation2 + $0x760] sm:$0xff] }
 0x2e0   : > { %905 = vst.msk [vmem:[#allocation2 + $0x580] sm:$0xff] %vm73_vm0, %v881_v12  ;;  %v1223_v60 = vsel %vm1217_vm14, %v4074_v40, %v1200_v4  ;;  %v1883_v29 = vld [vmem:[#allocation2 + $0x8e0] sm:$0xff]  ;;  %v1730_v40 = vld [vmem:[#allocation2 + $0x418] sm:$0xff] }
 0x2e1   : > { %1247 = vst.msk [vmem:[#allocation2 + $0x748] sm:$0xff] %vm73_vm0, %v1223_v60  ;;  %2895 = vmatprep.subr.mxu0 %v1883_v29  ;;  %v1727_v4 = vld [vmem:[#allocation2 + $0x400] sm:$0xff] }
 0x2e2   : > { %2896 = vmatpush3.msra.mxu0 %v1835_v37  ;;  %v1192_v63 = vpop.permute.xlu1 %1191 }
 0x2e3   : > { %v1220_v54 = vsel %vm1217_vm14, %v4094_v35, %v1192_v63  ;;  %v1468_v19 = vpop.permute.xlu0 %1467  ;;  %v1880_v45 = vld [vmem:[#allocation2 + $0x8c8] sm:$0xff] }
 0x2e4   : > { %1244 = vst.msk [vmem:[#allocation2 + $0x730] sm:$0xff] %vm73_vm0, %v1220_v54  ;;  %v1496_v59 = vsel %vm1493_vm8, %v4368_v48, %v1468_v19  ;;  %v1778_v44 = vld [vmem:[#allocation2 + $0x598] sm:$0xff]  ;;  %2897 = vmatprep.subr.mxu0 %v1880_v45 }
 0x2e5   : > { %1520 = vst.msk [vmem:[#allocation2 + $0x8b0] sm:$0xff] %vm73_vm0, %v1496_v59  ;;  %2857 = vmatprep.subr.mxu1 %v1778_v44 }
 0x2e6   : > { %2858 = vmatpush3.msra.mxu1 %v1730_v40  ;;  %v1423_v30 = vpop.permute.xlu1 %1422 }
 0x2e7   : > { %v1436_v39 = vsel %vm1424_vm9, %v4378_v11, %v1423_v30  ;;  %v855_v41 = vpop.permute.xlu0 %854  ;;  %v1775_v35 = vld [vmem:[#allocation2 + $0x580] sm:$0xff] }
 0x2e8   : > { %1460 = vst.msk [vmem:[#allocation2 + $0x898] sm:$0xff] %vm73_vm0, %v1436_v39  ;;  %v878_v12 = vsel %vm872_vm13, %v3994_v53, %v855_v41  ;;  %2859 = vmatprep.subr.mxu1 %v1775_v35  ;;  %v1832_v48 = vld [vmem:[#allocation2 + $0x748] sm:$0xff]  ;;  %v1721_v35 = vld [vmem:[#allocation2 + $0x3d0] sm:$0xff] }
 0x2e9   : > { %902 = vst.msk [vmem:[#allocation2 + $0x568] sm:$0xff] %vm73_vm0, %v878_v12  ;;  %2898 = vmatpush3.msra.mxu0 %v1832_v48  ;;  %2860 = vmatpush3.msra.mxu1 %v1727_v4  ;;  %v1766_v12 = vld [vmem:[#allocation2 + $0x538] sm:$0xff] }
 0x2ea   : > { %v847_v37 = vpop.permute.xlu1 %846  ;;  %v1718_v4 = vld [vmem:[#allocation2 + $0x3b8] sm:$0xff] }
 0x2eb   : > { %v875_v60 = vsel %vm872_vm13, %v4007_v3, %v847_v37  ;;  %v1147_v29 = vpop.permute.xlu0 %1146  ;;  %v1829_v11 = vld [vmem:[#allocation2 + $0x730] sm:$0xff] }
 0x2ec   : > { %899 = vst.msk [vmem:[#allocation2 + $0x550] sm:$0xff] %vm73_vm0, %v875_v60  ;;  %v1160_v63 = vsel %vm1148_vm2, %v4114_v62, %v1147_v29  ;;  %v1877_v54 = vld [vmem:[#allocation2 + $0x8b0] sm:$0xff]  ;;  %v1724_v62 = vld [vmem:[#allocation2 + $0x3e8] sm:$0xff]  ;;  %v1763_v60 = vld [vmem:[#allocation2 + $0x520] sm:$0xff] }
 0x2ed   : > { %1184 = vst.msk [vmem:[#allocation2 + $0x718] sm:$0xff] %vm73_vm0, %v1160_v63  ;;  %2899 = vmatprep.subr.mxu0 %v1877_v54  ;;  %v1715_v63 = vld [vmem:[#allocation2 + $0x3a0] sm:$0xff]  ;;  %v1760_v54 = vld [vmem:[#allocation2 + $0x508] sm:$0xff] }
 0x2ee   : > { %2900 = vmatpush3.msra.mxu0 %v1829_v11  ;;  %v1139_v53 = vpop.permute.xlu1 %1138 }
 0x2ef   : > { %v1157_v19 = vsel %vm1148_vm2, %v4134_v1, %v1139_v53  ;;  %v1415_v45 = vpop.permute.xlu0 %1414  ;;  %v1874_v59 = vld [vmem:[#allocation2 + $0x898] sm:$0xff] }
 0x2f0   : > { %1181 = vst.msk [vmem:[#allocation2 + $0x700] sm:$0xff] %vm73_vm0, %v1157_v19  ;;  %v1433_v3 = vsel %vm1424_vm9, %v4397_v32, %v1415_v45  ;;  %v1772_v44 = vld [vmem:[#allocation2 + $0x568] sm:$0xff]  ;;  %2901 = vmatprep.subr.mxu0 %v1874_v59  ;;  %v1757_v59 = vld [vmem:[#allocation2 + $0x4f0] sm:$0xff] }
 0x2f1   : > { %1457 = vst.msk [vmem:[#allocation2 + $0x880] sm:$0xff] %vm73_vm0, %v1433_v3  ;;  %2861 = vmatprep.subr.mxu1 %v1772_v44 }
 0x2f2   : > { %2862 = vmatpush3.msra.mxu1 %v1724_v62  ;;  %v1131_v40 = vpop.permute.xlu1 %1130  ;;  %v1709_v62 = vld [vmem:[#allocation2 + $0x370] sm:$0xff] }
 0x2f3   : > { %v1154_v30 = vsel %vm1148_vm2, %v4154_v57, %v1131_v40  ;;  %v1407_v39 = vpop.permute.xlu0 %1406  ;;  %v1769_v1 = vld [vmem:[#allocation2 + $0x550] sm:$0xff]  ;;  %v1754_v40 = vld [vmem:[#allocation2 + $0x4d8] sm:$0xff] }
 0x2f4   : > { %1178 = vst.msk [vmem:[#allocation2 + $0x6e8] sm:$0xff] %vm73_vm0, %v1154_v30  ;;  %v1430_v41 = vsel %vm1424_vm9, %v4406_v46, %v1407_v39  ;;  %2863 = vmatprep.subr.mxu1 %v1769_v1  ;;  %v1826_v32 = vld [vmem:[#allocation2 + $0x718] sm:$0xff] }
 0x2f5   : > { %1454 = vst.msk [vmem:[#allocation2 + $0x868] sm:$0xff] %vm73_vm0, %v1430_v41  ;;  %2902 = vmatpush3.msra.mxu0 %v1826_v32  ;;  %2864 = vmatpush3.msra.mxu1 %v1721_v35  ;;  %v1751_v41 = vld [vmem:[#allocation2 + $0x4c0] sm:$0xff] }
 0x2f6   : > { %v1123_v48 = vpop.permute.xlu1 %1122  ;;  %2865 = vmatprep.subr.mxu1 %v1766_v12  ;;  %v1703_v12 = vld [vmem:[#allocation2 + $0x340] sm:$0xff] }
 0x2f7   : > { %v1151_v57 = vsel %vm1148_vm2, %v4173_v20, %v1123_v48  ;;  %v1399_v37 = vpop.permute.xlu0 %1398  ;;  %2866 = vmatpush3.msra.mxu1 %v1718_v4  ;;  %v1823_v29 = vld [vmem:[#allocation2 + $0x700] sm:$0xff]  ;;  %v1712_v20 = vld [vmem:[#allocation2 + $0x388] sm:$0xff] }
 0x2f8   : > { %1175 = vst.msk [vmem:[#allocation2 + $0x6d0] sm:$0xff] %vm73_vm0, %v1151_v57  ;;  %v1427_v46 = vsel %vm1424_vm9, %v4421_v7, %v1399_v37  ;;  %2867 = vmatprep.subr.mxu1 %v1763_v60  ;;  %v1871_v11 = vld [vmem:[#allocation2 + $0x880] sm:$0xff]  ;;  %v1748_v48 = vld [vmem:[#allocation2 + $0x4a8] sm:$0xff]  ;;  %v1745_v60 = vld [vmem:[#allocation2 + $0x490] sm:$0xff] }
 0x2f9   : > { %1451 = vst.msk [vmem:[#allocation2 + $0x850] sm:$0xff] %vm73_vm0, %v1427_v46  ;;  %2903 = vmatprep.subr.mxu0 %v1871_v11  ;;  %2868 = vmatpush3.msra.mxu1 %v1715_v63  ;;  %v1697_v11 = vld [vmem:[#allocation2 + $0x310] sm:$0xff] }
 0x2fa   : > { %2904 = vmatpush3.msra.mxu0 %v1823_v29  ;;  %v1078_v53 = vpop.permute.xlu1 %1077  ;;  %2869 = vmatprep.subr.mxu1 %v1760_v54 }
 0x2fb   : > { %v1091_v19 = vsel %vm1079_vm3, %v4182_v13, %v1078_v53  ;;  %v1354_v45 = vpop.permute.xlu0 %1353  ;;  %2870 = vmatpush3.msra.mxu1 %v1712_v20  ;;  %v1820_v3 = vld [vmem:[#allocation2 + $0x6e8] sm:$0xff]  ;;  %v1706_v13 = vld [vmem:[#allocation2 + $0x358] sm:$0xff] }
 0x2fc   : > { %1115 = vst.msk [vmem:[#allocation2 + $0x6b8] sm:$0xff] %vm73_vm0, %v1091_v19  ;;  %v1367_v7 = vsel %vm1355_vm10, %v4429_v27, %v1354_v45  ;;  %2871 = vmatprep.subr.mxu1 %v1757_v59  ;;  %v1868_v44 = vld [vmem:[#allocation2 + $0x868] sm:$0xff] }
 0x2fd   : > { %1391 = vst.msk [vmem:[#allocation2 + $0x838] sm:$0xff] %vm73_vm0, %v1367_v7  ;;  %2905 = vmatprep.subr.mxu0 %v1868_v44  ;;  %2872 = vmatpush3.msra.mxu1 %v1709_v62 }
 0x2fe   : > { %2906 = vmatpush3.msra.mxu0 %v1820_v3  ;;  %v1070_v30 = vpop.permute.xlu1 %1069  ;;  %2873 = vmatprep.subr.mxu1 %v1754_v40 }
 0x2ff   : > { %v1088_v39 = vsel %vm1079_vm3, %v4198_v25, %v1070_v30  ;;  %v1346_v1 = vpop.permute.xlu0 %1345  ;;  %2874 = vmatpush3.msra.mxu1 %v1706_v13  ;;  %v1817_v32 = vld [vmem:[#allocation2 + $0x6d0] sm:$0xff]  ;;  %v1700_v25 = vld [vmem:[#allocation2 + $0x328] sm:$0xff] }
 0x300   : > { %1112 = vst.msk [vmem:[#allocation2 + $0x6a0] sm:$0xff] %vm73_vm0, %v1088_v39  ;;  %v1364_v27 = vsel %vm1355_vm10, %v4443_v8, %v1346_v1  ;;  %2875 = vmatprep.subr.mxu1 %v1751_v41  ;;  %v1865_v35 = vld [vmem:[#allocation2 + $0x850] sm:$0xff] }
 0x301   : > { %1388 = vst.msk [vmem:[#allocation2 + $0x820] sm:$0xff] %vm73_vm0, %v1364_v27  ;;  %2907 = vmatprep.subr.mxu0 %v1865_v35  ;;  %2876 = vmatpush3.msra.mxu1 %v1703_v12 }
 0x302   : > { %2908 = vmatpush3.msra.mxu0 %v1817_v32  ;;  %v1062_v4 = vpop.permute.xlu1 %1061  ;;  %2877 = vmatprep.subr.mxu1 %v1748_v48 }
 0x303   : > { %v1085_v57 = vsel %vm1079_vm3, %v4206_v49, %v1062_v4  ;;  %v1338_v37 = vpop.permute.xlu0 %1337  ;;  %2878 = vmatpush3.msra.mxu1 %v1700_v25  ;;  %v1814_v29 = vld [vmem:[#allocation2 + $0x6b8] sm:$0xff] }
 0x304   : > { %1109 = vst.msk [vmem:[#allocation2 + $0x688] sm:$0xff] %vm73_vm0, %v1085_v57  ;;  %v1361_v8 = vsel %vm1355_vm10, %v4451_v47, %v1338_v37  ;;  %2879 = vmatprep.subr.mxu1 %v1745_v60  ;;  %v1862_v46 = vld [vmem:[#allocation2 + $0x838] sm:$0xff] }
 0x305   : > { %1385 = vst.msk [vmem:[#allocation2 + $0x808] sm:$0xff] %vm73_vm0, %v1361_v8  ;;  %2909 = vmatprep.subr.mxu0 %v1862_v46  ;;  %2880 = vmatpush3.msra.mxu1 %v1697_v11  ;;  %v4883_v11 = vld [vmem:[#allocation23_spill] sm:$0xff] }
 0x306   : > { %2910 = vmatpush3.msra.mxu0 %v1814_v29  ;;  %v1054_v63 = vpop.permute.xlu1 %1053  ;;  %2438 = vmatmul.mubr.f32.vlgmr.msra.gmra.mxu1 %v4855_v2 }
 0x307   : > { %v1082_v49 = vsel %vm1079_vm3, %v4228_v52, %v1054_v63  ;;  %v1330_v54 = vpop.permute.xlu0 %1329  ;;  %v1811_v53 = vld [vmem:[#allocation2 + $0x6a0] sm:$0xff]  ;;  %2442 = vmatprep.mubr.f32.mxu1 %v4852_v10  ;;  %v4884_v63 = vld [vmem:[#allocation30_spill] sm:$0xff] }
 0x308   : > { %1106 = vst.msk [vmem:[#allocation2 + $0x670] sm:$0xff] %vm73_vm0, %v1082_v49  ;;  %v1358_v47 = vsel %vm1355_vm10, %v4465_v15, %v1330_v54  ;;  %v1859_v20 = vld [vmem:[#allocation2 + $0x820] sm:$0xff]  ;;  %v2087_v49 = vpop.f32.mrf.mxu1  ;;  %v1998_v54 = vpop.f32.mrf.mxu0 }
 0x309   : > { %1382 = vst.msk [vmem:[#allocation2 + $0x7f0] sm:$0xff] %vm73_vm0, %v1358_v47  ;;  %2911 = vmatprep.subr.mxu0 %v1859_v20 }
 0x30a   : > { %2912 = vmatpush3.msra.mxu0 %v1811_v53  ;;  %v1009_v19 = vpop.permute.xlu1 %1008  ;;  %2443 = vmatmul.mubr.f32.gmra.mxu1 %v4853_v9  ;;  %v2089_v53 = vpop.f32.mrf.mxu1 }
 0x30b   : > { %v1022_v52 = vsel %vm1010_vm6, %v4247_v42, %v1009_v19  ;;  %v1285_v45 = vpop.permute.xlu0 %1284  ;;  %v1808_v59 = vld [vmem:[#allocation2 + $0x688] sm:$0xff]  ;;  %2447 = vmatprep.mubr.f32.mxu1 %v4850_v17  ;;  %v2000_v47 = vpop.f32.mrf.mxu0 }
 0x30c   : > { %1046 = vst.msk [vmem:[#allocation2 + $0x658] sm:$0xff] %vm73_vm0, %v1022_v52  ;;  %v1298_v15 = vsel %vm1286_vm11, %v4471_v28, %v1285_v45  ;;  %v1856_v3 = vld [vmem:[#allocation2 + $0x808] sm:$0xff]  ;;  %v2093_v20 = vpop.f32.mrf.mxu1 }
 0x30d   : > { %1322 = vst.msk [vmem:[#allocation2 + $0x7d8] sm:$0xff] %vm73_vm0, %v1298_v15  ;;  %2913 = vmatprep.subr.mxu0 %v1856_v3  ;;  %v2004_v19 = vpop.f32.mrf.mxu0 }
 0x30e   : > { %2914 = vmatpush3.msra.mxu0 %v1808_v59  ;;  %v1001_v7 = vpop.permute.xlu1 %1000  ;;  %2448 = vmatmul.mubr.f32.gmra.mxu1 %v4851_v16  ;;  %v4655_v52 = vpop.f32.mrf.mxu1 }
 0x30f   : > { %v1019_v42 = vsel %vm1010_vm6, %v4269_v38, %v1001_v7  ;;  %v1277_v44 = vpop.permute.xlu0 %1276  ;;  %v1805_v62 = vld [vmem:[#allocation2 + $0x670] sm:$0xff]  ;;  %2452 = vmatprep.mubr.f32.mxu1 %v4849_v24  ;;  %v4657_v45 = vpop.f32.mrf.mxu0 }
 0x310   : > { %1043 = vst.msk [vmem:[#allocation2 + $0x640] sm:$0xff] %vm73_vm0, %v1019_v42  ;;  %v1295_v28 = vsel %vm1286_vm11, %v4479_v21, %v1277_v44  ;;  %v1853_v40 = vld [vmem:[#allocation2 + $0x7f0] sm:$0xff]  ;;  %v4659_v59 = vpop.f32.mrf.mxu1 }
 0x311   : > { %1319 = vst.msk [vmem:[#allocation2 + $0x7c0] sm:$0xff] %vm73_vm0, %v1295_v28  ;;  %2915 = vmatprep.subr.mxu0 %v1853_v40  ;;  %v4661_v15 = vpop.f32.mrf.mxu0 }
 0x312   : > { %2916 = vmatpush3.msra.mxu0 %v1805_v62  ;;  %v993_v30 = vpop.permute.xlu1 %992  ;;  %2453 = vmatmul.mubr.f32.gmra.mxu1 %v4865_v58  ;;  %v4663_v3 = vpop.f32.mrf.mxu1 }
 0x313   : > { %v1016_v38 = vsel %vm1010_vm6, %v4299_v56, %v993_v30  ;;  %v1269_v13 = vpop.permute.xlu0 %1268  ;;  %v1802_v39 = vld [vmem:[#allocation2 + $0x658] sm:$0xff]  ;;  %2953 = vmatprep.mubr.msk.f32.mxu1 %vm1919_vm7, %v4866_v43  ;;  %v2012_v7 = vpop.f32.mrf.mxu0 }
 0x314   : > { %1040 = vst.msk [vmem:[#allocation2 + $0x628] sm:$0xff] %vm73_vm0, %v1016_v38  ;;  %v1292_v21 = vsel %vm1286_vm11, %v4487_v18, %v1269_v13  ;;  %v1850_v1 = vld [vmem:[#allocation2 + $0x7d8] sm:$0xff]  ;;  %v4665_v42 = vpop.f32.mrf.mxu1 }
 0x315   : > { %1316 = vst.msk [vmem:[#allocation2 + $0x7a8] sm:$0xff] %vm73_vm0, %v1292_v21  ;;  %2917 = vmatprep.subr.mxu0 %v1850_v1  ;;  %v2016_v62 = vpop.f32.mrf.mxu0 }
 0x316   : > { %2918 = vmatpush3.msra.mxu0 %v1802_v39  ;;  %v985_v41 = vpop.permute.xlu1 %984  ;;  %v4669_v28 = vpop.f32.mrf.mxu1 }
 0x317   : > { %v1013_v32 = vsel %vm1010_vm6, %v4318_v55, %v985_v41  ;;  %v1261_v56 = vpop.permute.xlu0 %1260  ;;  %v1799_v27 = vld [vmem:[#allocation2 + $0x640] sm:$0xff]  ;;  %v4672_v38 = vpop.f32.mrf.mxu0 }
 0x318   : > { %1037 = vst.msk [vmem:[#allocation2 + $0x610] sm:$0xff] %vm73_vm0, %v1013_v32  ;;  %v1289_v35 = vsel %vm1286_vm11, %v4495_v0, %v1261_v56  ;;  %v1847_v12 = vld [vmem:[#allocation2 + $0x7c0] sm:$0xff] }
 0x319   : > { %1313 = vst.msk [vmem:[#allocation2 + $0x790] sm:$0xff] %vm73_vm0, %v1289_v35  ;;  %2919 = vmatprep.subr.mxu0 %v1847_v12 }
 0x31a   : > { %2920 = vmatpush3.msra.mxu0 %v1799_v27  ;;  %v1553_v18 = vpop.permute.xlu1 %1552 }
 0x31b   : > { %v1571_v48 = vsel %vm1562_vm4, %v4235_v6, %v1553_v18  ;;  %v1561_v4 = vpop.permute.xlu0 %1560  ;;  %v1796_v25 = vld [vmem:[#allocation2 + $0x628] sm:$0xff] }
 0x31c   : > { %1595 = vst.msk [vmem:[#allocation2 + $0x940] sm:$0xff] %vm73_vm0, %v1571_v48  ;;  %v1574_v55 = vsel %vm1562_vm4, %v4214_v50, %v1561_v4  ;;  %v1844_v57 = vld [vmem:[#allocation2 + $0x7a8] sm:$0xff] }
 0x31d   : > { %1598 = vst.msk [vmem:[#allocation2 + $0x958] sm:$0xff] %vm73_vm0, %v1574_v55  ;;  %2921 = vmatprep.subr.mxu0 %v1844_v57 }
 0x31e   : > { %2922 = vmatpush3.msra.mxu0 %v1796_v25  ;;  %v1537_v0 = vpop.permute.xlu1 %1536  ;;  %v2265_v13 = vpop.f32.mrf.mxu1 }
 0x31f   : > { %v1565_v37 = vsel %vm1562_vm4, %v4280_v23, %v1537_v0  ;;  %v1545_v60 = vpop.permute.xlu0 %1544  ;;  %v1793_v29 = vld [vmem:[#allocation2 + $0x610] sm:$0xff] }
 0x320   : > { %1589 = vst.msk [vmem:[#allocation2 + $0x910] sm:$0xff] %vm73_vm0, %v1565_v37  ;;  %v1568_v6 = vsel %vm1562_vm4, %v4254_v31, %v1545_v60  ;;  %v1841_v8 = vld [vmem:[#allocation2 + $0x790] sm:$0xff]  ;;  %v2267_v32 = vpop.f32.mrf.mxu1 }
 0x321   : > { %1592 = vst.msk [vmem:[#allocation2 + $0x928] sm:$0xff] %vm73_vm0, %v1568_v6  ;;  %2923 = vmatprep.subr.mxu0 %v1841_v8 }
 0x322   : > { %2924 = vmatpush3.msra.mxu0 %v1793_v29 }
 0x323   : > { %2523 = vmatmul.mubr.f32.vlgmr.msra.gmra.mxu0 %v4876_v14  ;;  %v1895_v23 = vld [vmem:[#allocation2 + $0x940] sm:$0xff]  ;;  %v2271_v25 = vpop.f32.mrf.mxu1 }
 0x324   : > { %v1898_v50 = vld [vmem:[#allocation2 + $0x958] sm:$0xff]  ;;  %2527 = vmatprep.mubr.f32.mxu0 %v4877_v33 }
 0x325   : > { %2945 = vmatprep.subr.mxu1 %v1898_v50  ;;  %v4687_v37 = vpop.f32.mrf.mxu1 }
 0x326   : > { %2946 = vmatpush3.msra.mxu1 %v1898_v50 }
 0x327   : > { %2528 = vmatmul.mubr.f32.gmra.mxu0 %v4878_v22  ;;  %2947 = vmatprep.subr.mxu1 %v1895_v23  ;;  %v1889_v31 = vld [vmem:[#allocation2 + $0x910] sm:$0xff] }
 0x328   : > { %2948 = vmatpush3.msra.mxu1 %v1895_v23  ;;  %v1892_v46 = vld [vmem:[#allocation2 + $0x928] sm:$0xff]  ;;  %2532 = vmatprep.mubr.f32.mxu0 %v4879_v26 }
 0x329   : > { %2949 = vmatprep.subr.mxu1 %v1892_v46 }
 0x32a   : > { %2950 = vmatpush3.msra.mxu1 %v1892_v46 }
 0x32b   : > { %2533 = vmatmul.mubr.f32.gmra.mxu0 %v4880_v51  ;;  %2951 = vmatprep.subr.mxu1 %v1889_v31  ;;  %v1907_v30 = vpop.permute.xlu1 %1906 }
 0x32c   : > { %2952 = vmatpush3.msra.mxu1 %v1889_v31  ;;  %2537 = vmatprep.mubr.f32.mxu0 %v4881_v34  ;;  %v4667_v44 = vpop.permute.xlu0 %1901  ;;  %v2005_v1 = vadd.f32 %v2004_v19, %v1907_v30  ;;  %v2007_v10 = vadd.f32 %v4657_v45, %v1907_v30 }
 0x32d   : > { %2954 = vmatmul.mubr.msk.f32.vlgmr.msra.gmra.mxu1 %vm1919_vm7, %v4867_v36  ;;  %v1999_v40 = vadd.f32 %v1998_v54, %v4667_v44  ;;  %v2001_v39 = vadd.f32 %v2000_v47, %v4667_v44 }
 0x32e   : > { %2956 = vmatprep.mubr.msk.f32.mxu1 %vm1919_vm7, %v4883_v11  ;;  %v2094_v35 = vadd.f32 %v2093_v20, %v2005_v1 }
 0x32f   : > { %2538 = vmatmul.mubr.f32.gmra.mxu0 %v4882_v61  ;;  %v2088_v21 = vadd.f32 %v2087_v49, %v1999_v40  ;;  %v2090_v27 = vadd.f32 %v2089_v53, %v2001_v39  ;;  %v4689_v60 = vpop.f32.mrf.mxu1 }
 0x331   : > { %2957 = vmatmul.mubr.msk.f32.gmra.mxu1 %vm1919_vm7, %v4884_v63  ;;  %v4691_v29 = vpop.f32.mrf.mxu1 }
 0x33b   : > { %v4693_v6 = vpop.f32.mrf.mxu1 }
 0x33d   : > { %v4695_v8 = vpop.f32.mrf.mxu1 }
 0x340   : > { %v2837_v50 = vpop.f32.mrf.mxu1 }
 0x342   : > { %v2838_v23 = vpop.f32.mrf.mxu1 }
 0x344   : > { %v2840_v46 = vpop.f32.mrf.mxu1 }
 0x346   : > { %v2841_v31 = vpop.f32.mrf.mxu1 }
 0x348   : > { %v2843_v11 = vpop.f32.mrf.mxu1 }
 0x34a   : > { %v2844_v63 = vpop.f32.mrf.mxu1 }
 0x34c   : > { %v2846_v49 = vpop.f32.mrf.mxu1 }
 0x34e   : > { %v2847_v54 = vpop.f32.mrf.mxu1 }
 0x38f   : > { %v2176_v41 = vpop.f32.mrf.mxu0 }
 0x390   : > { %v2177_v56 = vadd.f32 %v2176_v41, %v2088_v21 }
 0x391   : > { %v2178_v12 = vpop.f32.mrf.mxu0 }
 0x392   : > { %v2179_v18 = vadd.f32 %v2178_v12, %v2090_v27  ;;  %v4675_v48 = vadd.f32 %v2265_v13, %v2177_v56  ;;  %v2842_v56 = vadd.f32 %v2841_v31, %v2840_v46 }
 0x393   : > { %v2182_v4 = vpop.f32.mrf.mxu0 }
 0x394   : > { %v2183_v55 = vadd.f32 %v2182_v4, %v2094_v35  ;;  %v4677_v57 = vadd.f32 %v2267_v32, %v2179_v18  ;;  %2640 = vrot.lane.b32.xlu1 %v4675_v48, %s3017_s2  ;;  %v1912_v32 = vpop.permute.xlu1 %1911  ;;  %v1917_v4 = vpop.permute.xlu0 %1916 }
 0x395   : > { %v2184_v53 = vpop.f32.mrf.mxu0  ;;  %v2013_v12 = vadd.f32 %v2012_v7, %v1912_v32  ;;  %v2017_v16 = vadd.f32 %v2016_v62, %v1917_v4  ;;  %v2011_v7 = vadd.f32 %v4661_v15, %v1912_v32 }
 0x396   : > { %v4681_v0 = vadd.f32 %v2271_v25, %v2183_v55  ;;  %2642 = vrot.lane.b32.xlu0 %v4677_v57, %s3017_s2  ;;  %v2839_v25 = vadd.f32 %v2838_v23, %v2837_v50  ;;  %v2360_v55 = vadd.f32 %v2842_v56, %v1907_v30  ;;  %v2096_v23 = vadd.f32 %v4655_v52, %v2007_v10 }
 0x397   : > { %v2188_v20 = vpop.f32.mrf.mxu0  ;;  %v2102_v17 = vadd.f32 %v4663_v3, %v2013_v12  ;;  %v2106_v3 = vadd.f32 %v4665_v42, %v2017_v16 }
 0x398   : > { %v2355_v24 = vadd.f32 %v2839_v25, %v4667_v44 }
 0x399   : > { %v2190_v13 = vpop.f32.mrf.mxu0 }
 0x39a   : > { %2646 = vrot.lane.b32.xlu0 %v4681_v0, %s3017_s2  ;;  %v2191_v62 = vadd.f32 %v2190_v13, %v2102_v17 }
 0x39b   : > { %v2194_v21 = vpop.f32.mrf.mxu0 }
 0x39c   : > { %v2280_v17 = vadd.f32 %v4691_v29, %v2191_v62 }
 0x39d   : > { %v4697_v41 = vpop.f32.mrf.mxu0 }
 0x3c6   : > { %v2881_v47 = vpop.f32.mrf.mxu1 }
 0x3c8   : > { %v2882_v19 = vpop.f32.mrf.mxu1 }
 0x3c9   : > { %v2883_v14 = vadd.f32 %v2882_v19, %v2881_v47  ;;  %v2185_v19 = vadd.f32 %v2184_v53, %v2096_v23 }
 0x3ca   : > { %v2884_v40 = vpop.f32.mrf.mxu1 }
 0x3cb   : > { %v2274_v42 = vadd.f32 %v4687_v37, %v2185_v19 }
 0x3cc   : > { %v2885_v39 = vpop.f32.mrf.mxu1 }
 0x3cd   : > { %v2886_v2 = vadd.f32 %v2885_v39, %v2884_v40  ;;  %v2848_v40 = vadd.f32 %v2847_v54, %v2846_v49  ;;  %v2440_v39 = vadd.f32 %v2883_v14, %v2355_v24  ;;  %v2195_v14 = vadd.f32 %v2194_v21, %v2106_v3 }
 0x3ce   : > { %v2887_v1 = vpop.f32.mrf.mxu1 }
 0x3cf   : > { %v2445_v46 = vadd.f32 %v2886_v2, %v2360_v55  ;;  %v2100_v2 = vadd.f32 %v4659_v59, %v2011_v7 }
 0x3d0   : > { %v2888_v27 = vpop.f32.mrf.mxu1 }
 0x3d1   : > { %v2189_v59 = vadd.f32 %v2188_v20, %v2100_v2 }
 0x3d2   : > { %v2890_v5 = vpop.f32.mrf.mxu1 }
 0x3d3   : > { %v2278_v29 = vadd.f32 %v4689_v60, %v2189_v59 }
 0x3d4   : > { %v2891_v33 = vpop.f32.mrf.mxu1 }
 0x3d5   : > { %v2892_v12 = vadd.f32 %v2891_v33, %v2890_v5  ;;  %v2284_v33 = vadd.f32 %v4693_v6, %v2195_v14 }
 0x3e3   : > { %v2925_v35 = vpop.f32.mrf.mxu0 }
 0x3e5   : > { %v2926_v18 = vpop.f32.mrf.mxu0 }
 0x3e6   : > { %v2927_v31 = vadd.f32 %v2926_v18, %v2925_v35  ;;  %v2370_v35 = vadd.f32 %v2848_v40, %v1917_v4 }
 0x3e7   : > { %v2928_v9 = vpop.f32.mrf.mxu0 }
 0x3e8   : > { %v2525_v44 = vadd.f32 %v2927_v31, %v2440_v39 }
 0x3e9   : > { %v2929_v22 = vpop.f32.mrf.mxu0 }
 0x3ea   : > { %v2930_v26 = vadd.f32 %v2929_v22, %v2928_v9  ;;  %v2845_v9 = vadd.f32 %v2844_v63, %v2843_v11  ;;  %v2889_v11 = vadd.f32 %v2888_v27, %v2887_v1  ;;  %v2455_v63 = vadd.f32 %v2892_v12, %v2370_v35 }
 0x3eb   : > { %v2931_v50 = vpop.f32.mrf.mxu0 }
 0x3ec   : > { %v2530_v56 = vadd.f32 %v2930_v26, %v2445_v46  ;;  %v2019_v26 = vadd.f32 %v4672_v38, %v1917_v4  ;;  %v2365_v52 = vadd.f32 %v2845_v9, %v1912_v32 }
 0x3ed   : > { %v2932_v45 = vpop.f32.mrf.mxu0  ;;  %v2955_v30 = vpop.f32.mrf.mxu1 }
 0x3ee   : > { %v4705_v47 = vadd.f32 %v2955_v30, %v2530_v56  ;;  %v2933_v49 = vadd.f32 %v2932_v45, %v2931_v50  ;;  %v2108_v53 = vadd.f32 %v4669_v28, %v2019_v26  ;;  %v2450_v38 = vadd.f32 %v2889_v11, %v2365_v52 }
 0x3ef   : > { %v2934_v22 = vpop.f32.mrf.mxu0  ;;  %v2609_v15 = vpop.f32.mrf.mxu1 }
 0x3f0   : > { %v2610_v10 = vadd.f32 %v2609_v15, %v2525_v44  ;;  %2650 = vrot.lane.b32.xlu0 %v4705_v47, %s3017_s2  ;;  %v2535_v13 = vadd.f32 %v2933_v49, %v2450_v38  ;;  %v2197_v21 = vadd.f32 %v4697_v41, %v2108_v53 }
 0x3f1   : > { %v2935_v24 = vpop.f32.mrf.mxu0  ;;  %v2958_v5 = vpop.f32.mrf.mxu1 }
 0x3f2   : > { %v2936_v16 = vadd.f32 %v2935_v24, %v2934_v22  ;;  %2644 = vrot.lane.b32.xlu1 %v2610_v10, %s3017_s2  ;;  %v2286_v6 = vadd.f32 %v4695_v8, %v2197_v21 }
 0x3f3   : > { %v2619_v20 = vpop.f32.mrf.mxu1 }
 0x3f4   : > { %2654 = vrot.lane.b32.xlu0 %v2280_v17, %s3017_s2  ;;  %v2540_v54 = vadd.f32 %v2936_v16, %v2455_v63  ;;  %v2620_v1 = vadd.f32 %v2619_v20, %v2535_v13 }
 0x3f6   : > { %2648 = vrot.lane.b32.xlu1 %v2274_v42, %s3017_s2  ;;  %v2625_v37 = vadd.f32 %v2958_v5, %v2540_v54 }
 0x3f8   : > { %2658 = vrot.lane.b32.xlu0 %v2284_v33, %s3017_s2 }
 0x3fa   : > { %2652 = vrot.lane.b32.xlu1 %v2278_v29, %s3017_s2 }
 0x3fc   : > { %2662 = vrot.lane.b32.xlu0 %v2625_v37, %s3017_s2 }
 0x3fe   : > { %2656 = vrot.lane.b32.xlu1 %v2620_v1, %s3017_s2 }
 0x402   : > { %2660 = vrot.lane.b32.xlu1 %v2286_v6, %s3017_s2 }
 0x406   : > { %v2641_v28 = vpop.permute.xlu1 %2640 }
 0x408   : > { %v2643_v60 = vpop.permute.xlu0 %2642 }
 0x409   : > { %v2664_v32 = vsel %vm120_vm1, %v2641_v28, %v2643_v60 }
 0x40a   : > { %v2684_v27 = vmax.f32 %v4675_v48, %v2664_v32 }
 0x40c   : > { %2708 = vrot.lane.b32.xlu1 %v2684_v27, %s3021_s29  ;;  %v2647_v18 = vpop.permute.xlu0 %2646 }
 0x462   : > { %v2651_v4 = vpop.permute.xlu0 %2650 }
 0x463   : > { %v2689_v39 = vmax.f32 %v4705_v47, %v2651_v4 }
 0x464   : > { %v2645_v41 = vpop.permute.xlu1 %2644 }
 0x465   : > { %v2665_v25 = vsel %vm120_vm1, %v2643_v60, %v2645_v41  ;;  %v2686_v55 = vmax.f32 %v2610_v10, %v2645_v41 }
 0x466   : > { %v2685_v46 = vmax.f32 %v4677_v57, %v2665_v25  ;;  %v2655_v8 = vpop.permute.xlu0 %2654 }
 0x467   : > { %2712 = vrot.lane.b32.xlu1 %v2686_v55, %s3021_s29 }
 0x468   : > { %2710 = vrot.lane.b32.xlu0 %v2685_v46, %s3021_s29  ;;  %v2649_v31 = vpop.permute.xlu1 %2648 }
 0x469   : > { %v2666_v7 = vsel %vm120_vm1, %v2647_v18, %v2649_v31  ;;  %v2667_v48 = vsel %vm120_vm1, %v2649_v31, %v2651_v4 }
 0x46a   : > { %v2687_v50 = vmax.f32 %v4681_v0, %v2666_v7  ;;  %v2688_v23 = vmax.f32 %v2274_v42, %v2667_v48  ;;  %v2659_v56 = vpop.permute.xlu0 %2658 }
 0x46c   : > { %2716 = vrot.lane.b32.xlu1 %v2688_v23, %s3021_s29  ;;  %2714 = vrot.lane.b32.xlu0 %v2687_v50, %s3021_s29  ;;  %v2653_v40 = vpop.permute.xlu1 %2652 }
 0x46d   : > { %v2668_v57 = vsel %vm120_vm1, %v2653_v40, %v2655_v8 }
 0x46e   : > { %v2690_v45 = vmax.f32 %v2278_v29, %v2668_v57  ;;  %v2663_v44 = vpop.permute.xlu0 %2662 }
 0x46f   : > { %v2695_v19 = vmax.f32 %v2625_v37, %v2663_v44 }
 0x470   : > { %2718 = vrot.lane.b32.xlu0 %v2689_v39, %s3021_s29  ;;  %2720 = vrot.lane.b32.xlu1 %v2690_v45, %s3021_s29  ;;  %v2657_v30 = vpop.permute.xlu1 %2656 }
 0x471   : > { %v2669_v62 = vsel %vm120_vm1, %v2655_v8, %v2657_v30  ;;  %v2692_v0 = vmax.f32 %v2620_v1, %v2657_v30 }
 0x472   : > { %v2691_v3 = vmax.f32 %v2280_v17, %v2669_v62 }
 0x474   : > { %2724 = vrot.lane.b32.xlu1 %v2692_v0, %s3021_s29  ;;  %2722 = vrot.lane.b32.xlu0 %v2691_v3, %s3021_s29  ;;  %v2661_v2 = vpop.permute.xlu1 %2660 }
 0x475   : > { %v2670_v47 = vsel %vm120_vm1, %v2659_v56, %v2661_v2  ;;  %v2671_v9 = vsel %vm120_vm1, %v2661_v2, %v2663_v44 }
 0x476   : > { %v2693_v22 = vmax.f32 %v2284_v33, %v2670_v47  ;;  %v2694_v15 = vmax.f32 %v2286_v6, %v2671_v9 }
 0x478   : > { %2728 = vrot.lane.b32.xlu1 %v2694_v15, %s3021_s29  ;;  %2726 = vrot.lane.b32.xlu0 %v2693_v22, %s3021_s29 }
 0x47c   : > { %2730 = vrot.lane.b32.xlu0 %v2695_v19, %s3021_s29 }
 0x47e   : > { %v2709_v35 = vpop.permute.xlu1 %2708 }
 0x4d9   : > { %v2713_v12 = vpop.permute.xlu1 %2712 }
 0x4da   : > { %v2754_v10 = vmax.f32 %v2686_v55, %v2713_v12  ;;  %v2711_v24 = vpop.permute.xlu0 %2710 }
 0x4db   : > { %v2732_v14 = vsel %vm348_vm5, %v2709_v35, %v2711_v24  ;;  %v2733_v17 = vsel %vm348_vm5, %v2711_v24, %v2713_v12 }
 0x4dc   : > { %2769 = vst.msk [vmem:[%s4754_s25 + $0x10] sm:$0xff] %vm1217_vm14, %v2754_v10  ;;  %v2752_v16 = vmax.f32 %v2684_v27, %v2732_v14  ;;  %v2753_v26 = vmax.f32 %v2685_v46, %v2733_v17 }
 0x4de   : > { %2767 = vst [vmem:[%s4754_s25] sm:$0xff] %v2752_v16  ;;  %2768 = vst [vmem:[%s4754_s25 + $0x8] sm:$0xff] %v2753_v26  ;;  %v2715_v52 = vpop.permute.xlu0 %2714  ;;  %v2717_v59 = vpop.permute.xlu1 %2716 }
 0x4df   : > { %v2734_v42 = vsel %vm348_vm5, %v2715_v52, %v2717_v59 }
 0x4e0   : > { %v2755_v11 = vmax.f32 %v2687_v50, %v2734_v42 }
 0x4e2   : > { %2770 = vst [vmem:[%s4754_s25 + $0x18] sm:$0xff] %v2755_v11  ;;  %v2719_v63 = vpop.permute.xlu0 %2718  ;;  %v2721_v5 = vpop.permute.xlu1 %2720 }
 0x4e3   : > { %v2735_v33 = vsel %vm348_vm5, %v2717_v59, %v2719_v63  ;;  %v2757_v49 = vmax.f32 %v2689_v39, %v2719_v63 }
 0x4e4   : > { %v2756_v54 = vmax.f32 %v2688_v23, %v2735_v33 }
 0x4e5   : > { %2772 = vst.msk [vmem:[%s4754_s25 + $0x28] sm:$0xff] %vm1217_vm14, %v2757_v49 }
 0x4e6   : > { %2771 = vst [vmem:[%s4754_s25 + $0x20] sm:$0xff] %v2756_v54  ;;  %v2723_v29 = vpop.permute.xlu0 %2722  ;;  %v2725_v53 = vpop.permute.xlu1 %2724 }
 0x4e7   : > { %v2736_v38 = vsel %vm348_vm5, %v2721_v5, %v2723_v29  ;;  %v2737_v20 = vsel %vm348_vm5, %v2723_v29, %v2725_v53  ;;  %v2760_v37 = vmax.f32 %v2692_v0, %v2725_v53 }
 0x4e8   : > { %v2758_v13 = vmax.f32 %v2690_v45, %v2736_v38  ;;  %v2759_v21 = vmax.f32 %v2691_v3, %v2737_v20 }
 0x4e9   : > { %2775 = vst.msk [vmem:[%s4754_s25 + $0x40] sm:$0xff] %vm1217_vm14, %v2760_v37 }
 0x4ea   : > { %2773 = vst [vmem:[%s4754_s25 + $0x30] sm:$0xff] %v2758_v13  ;;  %2774 = vst [vmem:[%s4754_s25 + $0x38] sm:$0xff] %v2759_v21  ;;  %v2727_v1 = vpop.permute.xlu0 %2726  ;;  %v2729_v6 = vpop.permute.xlu1 %2728 }
 0x4eb   : > { %v2738_v28 = vsel %vm348_vm5, %v2727_v1, %v2729_v6 }
 0x4ec   : > { %v2761_v60 = vmax.f32 %v2693_v22, %v2738_v28 }
 0x4ee   : > { %2776 = vst [vmem:[%s4754_s25 + $0x48] sm:$0xff] %v2761_v60  ;;  %v2731_v32 = vpop.permute.xlu0 %2730  ;;  %50 = sbr.rel (!%p48_p0) target bundleno = 18 (0x12), region = 41 }
 0x4ef   : > { %v2739_v27 = vsel %vm348_vm5, %v2729_v6, %v2731_v32  ;;  %v2763_v18 = vmax.f32 %v2695_v19, %v2731_v32 }
 0x4f0   : > { %v2762_v4 = vmax.f32 %v2694_v15, %v2739_v27 }
 0x4f1   : > { %2778 = vst.msk [vmem:[%s4754_s25 + $0x58] sm:$0xff] %vm1217_vm14, %v2763_v18 }
 0x4f2   : > { %2777 = vst [vmem:[%s4754_s25 + $0x50] sm:$0xff] %v2762_v4 }

// kernel: tudui_forward.6
= control target key start
LH: loop header
LB: loop body
LE: loop exit
PB: predicated region body
PF: predicated region fallthrough
CT: control target
= control target key end

     0   :  { %s2028_s4 = smov 0   ;;  %s2618_s0 = inlined_call_operand.vmem [shape: f32[2,32,161], index: 0, kind: input, shape index: {}]   ;;  %s2619_s1 = inlined_call_operand.vmem [shape: f32[64,800], index: 1, kind: input, shape index: {}]   ;;  %s2620_s3 = inlined_call_operand.vmem [shape: f32[2,64,96], index: 3, kind: output, shape index: {}]   ;;  %s2621_s2 = inlined_call_operand.vmem [shape: f32[64,1], index: 2, kind: input, shape index: {}]  }
   0x1   :  { %v1711_v0 = vld [vmem:[%s2619_s1] sm:$0xff]  ;;  %v1716_v1 = vld [vmem:[%s2619_s1 + $0x8] sm:$0xff]  ;;  %v1721_v2 = vld [vmem:[%s2619_s1 + $0x10] sm:$0xff] }
   0x2   :  { %2622 = vst [vmem:[#allocation3_spill] sm:$0xff] %v1711_v0  ;;  %2623 = vst [vmem:[#allocation4_spill] sm:$0xff] %v1716_v1  ;;  %v1726_v3 = vld [vmem:[%s2619_s1 + $0x18] sm:$0xff]  ;;  %v1731_v4 = vld [vmem:[%s2619_s1 + $0x20] sm:$0xff] }
   0x3   :  { %2624 = vst [vmem:[#allocation5_spill] sm:$0xff] %v1721_v2  ;;  %2625 = vst [vmem:[#allocation6_spill] sm:$0xff] %v1726_v3  ;;  %v1736_v5 = vld [vmem:[%s2619_s1 + $0x28] sm:$0xff]  ;;  %v1741_v6 = vld [vmem:[%s2619_s1 + $0x30] sm:$0xff] }
   0x4   :  { %2626 = vst [vmem:[#allocation7_spill] sm:$0xff] %v1731_v4  ;;  %2627 = vst [vmem:[#allocation8_spill] sm:$0xff] %v1736_v5  ;;  %v1746_v7 = vld [vmem:[%s2619_s1 + $0x38] sm:$0xff]  ;;  %v1751_v8 = vld [vmem:[%s2619_s1 + $0x40] sm:$0xff] }
   0x5   :  { %2628 = vst [vmem:[#allocation9_spill] sm:$0xff] %v1741_v6  ;;  %2629 = vst [vmem:[#allocation10_spill] sm:$0xff] %v1746_v7  ;;  %v1756_v9 = vld [vmem:[%s2619_s1 + $0x48] sm:$0xff]  ;;  %v1761_v10 = vld [vmem:[%s2619_s1 + $0x50] sm:$0xff] }
   0x6   :  { %2630 = vst [vmem:[#allocation11_spill] sm:$0xff] %v1751_v8  ;;  %2631 = vst [vmem:[#allocation12_spill] sm:$0xff] %v1756_v9  ;;  %v1766_v11 = vld [vmem:[%s2619_s1 + $0x58] sm:$0xff]  ;;  %v1771_v12 = vld [vmem:[%s2619_s1 + $0x60] sm:$0xff] }
   0x7   :  { %2632 = vst [vmem:[#allocation13_spill] sm:$0xff] %v1761_v10  ;;  %2633 = vst [vmem:[#allocation14_spill] sm:$0xff] %v1766_v11  ;;  %v1776_v13 = vld [vmem:[%s2619_s1 + $0x68] sm:$0xff]  ;;  %v1781_v14 = vld [vmem:[%s2619_s1 + $0x70] sm:$0xff] }
   0x8   :  { %2634 = vst [vmem:[#allocation15_spill] sm:$0xff] %v1771_v12  ;;  %2635 = vst [vmem:[#allocation16_spill] sm:$0xff] %v1776_v13  ;;  %v1786_v15 = vld [vmem:[%s2619_s1 + $0x78] sm:$0xff]  ;;  %v1791_v16 = vld [vmem:[%s2619_s1 + $0x80] sm:$0xff] }
   0x9   :  { %2636 = vst [vmem:[#allocation17_spill] sm:$0xff] %v1781_v14  ;;  %2637 = vst [vmem:[#allocation18_spill] sm:$0xff] %v1786_v15  ;;  %v1796_v17 = vld [vmem:[%s2619_s1 + $0x88] sm:$0xff]  ;;  %v1801_v18 = vld [vmem:[%s2619_s1 + $0x90] sm:$0xff] }
   0xa   :  { %2638 = vst [vmem:[#allocation19_spill] sm:$0xff] %v1791_v16  ;;  %2639 = vst [vmem:[#allocation20_spill] sm:$0xff] %v1796_v17  ;;  %v1806_v19 = vld [vmem:[%s2619_s1 + $0x98] sm:$0xff]  ;;  %v1811_v20 = vld [vmem:[%s2619_s1 + $0xa0] sm:$0xff] }
   0xb   :  { %2640 = vst [vmem:[#allocation21_spill] sm:$0xff] %v1801_v18  ;;  %2641 = vst [vmem:[#allocation22_spill] sm:$0xff] %v1806_v19  ;;  %v1816_v21 = vld [vmem:[%s2619_s1 + $0xa8] sm:$0xff]  ;;  %v1821_v22 = vld [vmem:[%s2619_s1 + $0xb0] sm:$0xff] }
   0xc   :  { %2642 = vst [vmem:[#allocation23_spill] sm:$0xff] %v1811_v20  ;;  %2643 = vst [vmem:[#allocation24_spill] sm:$0xff] %v1816_v21  ;;  %v1826_v23 = vld [vmem:[%s2619_s1 + $0xb8] sm:$0xff]  ;;  %v1831_v24 = vld [vmem:[%s2619_s1 + $0xc0] sm:$0xff] }
   0xd   :  { %2644 = vst [vmem:[#allocation25_spill] sm:$0xff] %v1821_v22  ;;  %2645 = vst [vmem:[#allocation26_spill] sm:$0xff] %v1826_v23  ;;  %v1836_v25 = vld [vmem:[%s2619_s1 + $0xc8] sm:$0xff]  ;;  %v1841_v26 = vld [vmem:[%s2619_s1 + $0xd0] sm:$0xff] }
   0xe   :  { %2646 = vst [vmem:[#allocation27_spill] sm:$0xff] %v1831_v24  ;;  %2647 = vst [vmem:[#allocation28_spill] sm:$0xff] %v1836_v25  ;;  %v1846_v27 = vld [vmem:[%s2619_s1 + $0xd8] sm:$0xff]  ;;  %v1851_v28 = vld [vmem:[%s2619_s1 + $0xe0] sm:$0xff] }
   0xf   :  { %2648 = vst [vmem:[#allocation29_spill] sm:$0xff] %v1841_v26  ;;  %2649 = vst [vmem:[#allocation30_spill] sm:$0xff] %v1846_v27  ;;  %v1856_v29 = vld [vmem:[%s2619_s1 + $0xe8] sm:$0xff]  ;;  %v1861_v30 = vld [vmem:[%s2619_s1 + $0xf0] sm:$0xff] }
  0x10   :  { %2650 = vst [vmem:[#allocation31_spill] sm:$0xff] %v1851_v28  ;;  %2651 = vst [vmem:[#allocation32_spill] sm:$0xff] %v1856_v29  ;;  %v1866_v31 = vld [vmem:[%s2619_s1 + $0xf8] sm:$0xff]  ;;  %v1871_v32 = vld [vmem:[%s2619_s1 + $0x100] sm:$0xff] }
  0x11   :  { %2652 = vst [vmem:[#allocation33_spill] sm:$0xff] %v1861_v30  ;;  %2653 = vst [vmem:[#allocation34_spill] sm:$0xff] %v1866_v31  ;;  %v1876_v33 = vld [vmem:[%s2619_s1 + $0x108] sm:$0xff]  ;;  %v1881_v34 = vld [vmem:[%s2619_s1 + $0x110] sm:$0xff] }
  0x12   :  { %2654 = vst [vmem:[#allocation35_spill] sm:$0xff] %v1871_v32  ;;  %2655 = vst [vmem:[#allocation36_spill] sm:$0xff] %v1876_v33  ;;  %v1886_v35 = vld [vmem:[%s2619_s1 + $0x118] sm:$0xff]  ;;  %v1891_v36 = vld [vmem:[%s2619_s1 + $0x120] sm:$0xff] }
  0x13   :  { %2656 = vst [vmem:[#allocation37_spill] sm:$0xff] %v1881_v34  ;;  %2657 = vst [vmem:[#allocation38_spill] sm:$0xff] %v1886_v35  ;;  %v1896_v37 = vld [vmem:[%s2619_s1 + $0x128] sm:$0xff]  ;;  %v1901_v38 = vld [vmem:[%s2619_s1 + $0x130] sm:$0xff] }
  0x14   :  { %2658 = vst [vmem:[#allocation39_spill] sm:$0xff] %v1891_v36  ;;  %2659 = vst [vmem:[#allocation40_spill] sm:$0xff] %v1896_v37  ;;  %v1906_v39 = vld [vmem:[%s2619_s1 + $0x138] sm:$0xff]  ;;  %v1911_v40 = vld [vmem:[%s2619_s1 + $0x140] sm:$0xff] }
  0x15   :  { %2660 = vst [vmem:[#allocation41_spill] sm:$0xff] %v1901_v38  ;;  %2661 = vst [vmem:[#allocation42_spill] sm:$0xff] %v1906_v39  ;;  %v1916_v41 = vld [vmem:[%s2619_s1 + $0x148] sm:$0xff]  ;;  %v1921_v42 = vld [vmem:[%s2619_s1 + $0x150] sm:$0xff] }
  0x16   :  { %2662 = vst [vmem:[#allocation43_spill] sm:$0xff] %v1911_v40  ;;  %2663 = vst [vmem:[#allocation44_spill] sm:$0xff] %v1916_v41  ;;  %v1926_v43 = vld [vmem:[%s2619_s1 + $0x158] sm:$0xff]  ;;  %v1931_v44 = vld [vmem:[%s2619_s1 + $0x160] sm:$0xff] }
  0x17   :  { %2664 = vst [vmem:[#allocation45_spill] sm:$0xff] %v1921_v42  ;;  %2665 = vst [vmem:[#allocation46_spill] sm:$0xff] %v1926_v43  ;;  %v1936_v45 = vld [vmem:[%s2619_s1 + $0x168] sm:$0xff]  ;;  %v1941_v46 = vld [vmem:[%s2619_s1 + $0x170] sm:$0xff] }
  0x18   :  { %2666 = vst [vmem:[#allocation47_spill] sm:$0xff] %v1931_v44  ;;  %2667 = vst [vmem:[#allocation48_spill] sm:$0xff] %v1936_v45  ;;  %v1946_v47 = vld [vmem:[%s2619_s1 + $0x178] sm:$0xff]  ;;  %v1951_v48 = vld [vmem:[%s2619_s1 + $0x180] sm:$0xff] }
  0x19   :  { %2668 = vst [vmem:[#allocation49_spill] sm:$0xff] %v1941_v46  ;;  %2669 = vst [vmem:[#allocation50_spill] sm:$0xff] %v1946_v47  ;;  %v1956_v49 = vld [vmem:[%s2619_s1 + $0x188] sm:$0xff]  ;;  %v1961_v50 = vld [vmem:[%s2619_s1 + $0x190] sm:$0xff] }
  0x1a   :  { %2670 = vst [vmem:[#allocation51_spill] sm:$0xff] %v1951_v48  ;;  %2671 = vst [vmem:[#allocation52_spill] sm:$0xff] %v1956_v49  ;;  %v1966_v51 = vld [vmem:[%s2619_s1 + $0x198] sm:$0xff]  ;;  %v1971_v52 = vld [vmem:[%s2619_s1 + $0x1a0] sm:$0xff] }
  0x1b   :  { %2672 = vst [vmem:[#allocation53_spill] sm:$0xff] %v1961_v50  ;;  %2673 = vst [vmem:[#allocation54_spill] sm:$0xff] %v1966_v51  ;;  %v1976_v53 = vld [vmem:[%s2619_s1 + $0x1a8] sm:$0xff]  ;;  %v1981_v54 = vld [vmem:[%s2619_s1 + $0x1b0] sm:$0xff] }
  0x1c   :  { %2674 = vst [vmem:[#allocation55_spill] sm:$0xff] %v1971_v52  ;;  %2675 = vst [vmem:[#allocation56_spill] sm:$0xff] %v1976_v53  ;;  %v1986_v55 = vld [vmem:[%s2619_s1 + $0x1b8] sm:$0xff]  ;;  %v1991_v56 = vld [vmem:[%s2621_s2] sm:$0xff] }
  0x1d   :  { %2676 = vst [vmem:[#allocation57_spill] sm:$0xff] %v1981_v54  ;;  %2677 = vst [vmem:[#allocation58_spill] sm:$0xff] %v1986_v55  ;;  %v1996_v57 = vld [vmem:[%s2621_s2 + $0x8] sm:$0xff]  ;;  %v2001_v58 = vld [vmem:[%s2621_s2 + $0x10] sm:$0xff] }
  0x1e   :  { %2678 = vst [vmem:[#allocation59_spill] sm:$0xff] %v1991_v56  ;;  %2679 = vst [vmem:[#allocation60_spill] sm:$0xff] %v1996_v57  ;;  %v2006_v59 = vld [vmem:[%s2621_s2 + $0x18] sm:$0xff]  ;;  %v2011_v60 = vld [vmem:[%s2621_s2 + $0x20] sm:$0xff] }
  0x1f   :  { %2680 = vst [vmem:[#allocation61_spill] sm:$0xff] %v2001_v58  ;;  %v2016_v61 = vld [vmem:[%s2621_s2 + $0x28] sm:$0xff]  ;;  %v2021_v62 = vld [vmem:[%s2621_s2 + $0x30] sm:$0xff]  ;;  %v2026_v63 = vld [vmem:[%s2621_s2 + $0x38] sm:$0xff] }
  0x20 LB: > { %v2681_v1 = vld [vmem:[#allocation4_spill] sm:$0xff]  ;;  %v2682_v3 = vld [vmem:[#allocation6_spill] sm:$0xff]  ;;  %s1387_s5 = sshll.u32 %s1661_s4, 6  ;;  %vm95_vm0 = vcmask 891904   ;;  %s1663_s8 = smov 114   ;;  %vm413_vm1 = vcmask 752640   ;;  %s1661_s4 = sphi %s2028_s4, %s83_s4  }
  0x21   : > { %916 = vmatprep.mubr.f32.mxu0 %v2681_v1  ;;  %1021 = vmatprep.mubr.f32.mxu1 %v2682_v3  ;;  %s2041_s2 = scalar_lea.vmem %s2618_s0, %s1387_s5  ;;  %s1664_s9 = smov 125   ;;  %vm297_vm2 = vcmask 842752   ;;  %vm384_vm3 = vcmask 818176   ;;  %vm268_vm4 = vcmask 850944   ;;  %vm355_vm5 = vcmask 826368   ;;  %v2683_v0 = vld [vmem:[#allocation3_spill] sm:$0xff] }
  0x22   : > { %v2044_v55 = vld [vmem:[%s2041_s2 + $0x30] sm:$0xff]  ;;  %v2047_v48 = vld [vmem:[%s2041_s2 + $0x20] sm:$0xff]  ;;  %v2068_v41 = vld [vmem:[%s2041_s2 + $0x38] sm:$0xff]  ;;  %s1665_s10 = smov 92   ;;  %s1666_s11 = smov 103   ;;  %vm326_vm6 = vcmask 834560  }
  0x23   : > { %206 = vrot.lane.b32.xlu0 %v2044_v55, %s1663_s8  ;;  %204 = vrot.lane.b32.xlu1 %v2047_v48, %s1663_s8  ;;  %v2052_v1 = vld [vmem:[%s2041_s2 + $0x10] sm:$0xff]  ;;  %98 = vst.msk [vmem:[#allocation2 + $0x10] sm:$0xff] %vm95_vm0, %v2047_v48  ;;  %99 = vst.msk [vmem:[#allocation2 + $0x18] sm:$0xff] %vm95_vm0, %v2044_v55  ;;  %v2059_v3 = vld [vmem:[%s2041_s2] sm:$0xff]  ;;  %s1667_s12 = smov 115   ;;  %s1668_s13 = smov 126  }
  0x24   : > { %97 = vst.msk [vmem:[#allocation2 + $0x8] sm:$0xff] %vm95_vm0, %v2052_v1  ;;  %96 = vst.msk [vmem:[#allocation2] sm:$0xff] %vm95_vm0, %v2059_v3  ;;  %v2077_v34 = vld [vmem:[%s2041_s2 + $0x28] sm:$0xff]  ;;  %v2086_v27 = vld [vmem:[%s2041_s2 + $0x18] sm:$0xff]  ;;  %s1669_s14 = smov 100   ;;  %s1670_s15 = smov 104  }
  0x25   : > { %v2095_v39 = vld [vmem:[%s2041_s2 + $0x8] sm:$0xff]  ;;  %s1671_s16 = smov 116   ;;  %s1672_s17 = smov 127   ;;  %vm645_vm7 = vcmask 629760   ;;  %vm529_vm8 = vcmask 719872   ;;  %v2684_v8 = vld [vmem:[#allocation11_spill] sm:$0xff] }
  0x26   : > { %s1673_s18 = smov 101   ;;  %s1674_s19 = smov 112   ;;  %v2685_v7 = vld [vmem:[#allocation10_spill] sm:$0xff]  ;;  %v2687_v14 = vld [vmem:[#allocation17_spill] sm:$0xff]  ;;  %v2689_v21 = vld [vmem:[#allocation24_spill] sm:$0xff]  ;;  %vm616_vm9 = vcmask 637952  }
  0x27   : > { %142 = vrot.lane.b32.xlu0 %v2044_v55, %s1664_s9  ;;  %140 = vrot.lane.b32.xlu1 %v2047_v48, %s1664_s9  ;;  %s1675_s20 = smov 124   ;;  %s1676_s21 = smov 102   ;;  %v2686_v15 = vld [vmem:[#allocation18_spill] sm:$0xff]  ;;  %v2688_v22 = vld [vmem:[#allocation25_spill] sm:$0xff]  ;;  %v2690_v29 = vld [vmem:[#allocation32_spill] sm:$0xff]  ;;  %vm500_vm10 = vcmask 728064  }
  0x28   : > { %s1677_s22 = smov 113   ;;  %s1678_s23 = smov 77   ;;  %v2691_v28 = vld [vmem:[#allocation31_spill] sm:$0xff]  ;;  %v2693_v35 = vld [vmem:[#allocation38_spill] sm:$0xff]  ;;  %v2695_v42 = vld [vmem:[#allocation45_spill] sm:$0xff]  ;;  %vm587_vm11 = vcmask 646144  }
  0x29   : > { %s1679_s1 = smov 88   ;;  %s1680_s24 = smov 78   ;;  %v2692_v36 = vld [vmem:[#allocation39_spill] sm:$0xff]  ;;  %v2694_v43 = vld [vmem:[#allocation46_spill] sm:$0xff]  ;;  %v2696_v50 = vld [vmem:[#allocation53_spill] sm:$0xff]  ;;  %vm471_vm12 = vcmask 736256  }
  0x2a   : > { %s1681_s25 = smov 89   ;;  %s1682_s26 = smov 79   ;;  %v2697_v2 = vld [vmem:[#allocation5_spill] sm:$0xff]  ;;  %v2698_v49 = vld [vmem:[#allocation52_spill] sm:$0xff]  ;;  %v2703_v16 = vld [vmem:[#allocation19_spill] sm:$0xff]  ;;  %vm558_vm13 = vcmask 654336  }
  0x2b   : > { %409 = vrot.lane.b32.xlu0 %v2044_v55, %s1665_s10  ;;  %411 = vrot.lane.b32.xlu1 %v2068_v41, %s1665_s10  ;;  %s1683_s27 = smov 90   ;;  %s1684_s28 = smov 80   ;;  %v2699_v10 = vld [vmem:[#allocation13_spill] sm:$0xff]  ;;  %v2700_v9 = vld [vmem:[#allocation12_spill] sm:$0xff]  ;;  %v2704_v24 = vld [vmem:[#allocation27_spill] sm:$0xff]  ;;  %vm442_vm14 = vcmask 744448  }
  0x2c   : > { %s1685_s29 = smov 91   ;;  %s1686_s30 = smov 76   ;;  %v2701_v5 = vld [vmem:[#allocation8_spill] sm:$0xff]  ;;  %v2705_v23 = vld [vmem:[#allocation26_spill] sm:$0xff]  ;;  %v2707_v56 = vld [vmem:[#allocation59_spill] sm:$0xff]  ;;  %vm674_vm15 = vcmask 621568  }
  0x2d   : > { %v2702_v17 = vld [vmem:[#allocation20_spill] sm:$0xff]  ;;  %v2706_v31 = vld [vmem:[#allocation34_spill] sm:$0xff]  ;;  %v2708_v30 = vld [vmem:[#allocation33_spill] sm:$0xff]  ;;  %s1353_s2 = scalar_lea.vmem %s2620_s3, %s1387_s5  ;;  %s83_s4 = sadd.s32 1, %s1661_s4  }
  0x2e   : > { %v2709_v57 = vld [vmem:[#allocation60_spill] sm:$0xff]  ;;  %v2710_v38 = vld [vmem:[#allocation41_spill] sm:$0xff]  ;;  %v2714_v44 = vld [vmem:[#allocation47_spill] sm:$0xff]  ;;  %p80_p0 = scmp.ge.s32.totalorder %s83_s4, 2  }
  0x2f   : > { %293 = vrot.lane.b32.xlu1 %v2044_v55, %s1666_s11  ;;  %202 = vrot.lane.b32.xlu0 %v2052_v1, %s1663_s8  ;;  %v2711_v37 = vld [vmem:[#allocation40_spill] sm:$0xff]  ;;  %v2712_v58 = vld [vmem:[#allocation61_spill] sm:$0xff]  ;;  %v2715_v52 = vld [vmem:[#allocation55_spill] sm:$0xff] }
  0x30   : > { %v2713_v45 = vld [vmem:[#allocation48_spill] sm:$0xff]  ;;  %v2716_v51 = vld [vmem:[#allocation54_spill] sm:$0xff]  ;;  %v2718_v4 = vld [vmem:[#allocation7_spill] sm:$0xff] }
  0x31   : > { %v2717_v47 = vld [vmem:[#allocation50_spill] sm:$0xff]  ;;  %v2719_v46 = vld [vmem:[#allocation49_spill] sm:$0xff]  ;;  %v2720_v12 = vld [vmem:[#allocation15_spill] sm:$0xff] }
  0x32   : > { %v2721_v54 = vld [vmem:[#allocation57_spill] sm:$0xff]  ;;  %v2722_v11 = vld [vmem:[#allocation14_spill] sm:$0xff]  ;;  %v2723_v53 = vld [vmem:[#allocation56_spill] sm:$0xff] }
  0x33   : > { %138 = vrot.lane.b32.xlu1 %v2052_v1, %s1664_s9  ;;  %295 = vrot.lane.b32.xlu0 %v2068_v41, %s1666_s11 }
  0x37   : > { %407 = vrot.lane.b32.xlu1 %v2077_v34, %s1665_s10  ;;  %405 = vrot.lane.b32.xlu0 %v2047_v48, %s1665_s10 }
  0x3b   : > { %289 = vrot.lane.b32.xlu1 %v2047_v48, %s1666_s11  ;;  %200 = vrot.lane.b32.xlu0 %v2059_v3, %s1663_s8 }
  0x3f   : > { %136 = vrot.lane.b32.xlu1 %v2059_v3, %s1664_s9  ;;  %291 = vrot.lane.b32.xlu0 %v2077_v34, %s1666_s11 }
  0x43   : > { %403 = vrot.lane.b32.xlu1 %v2086_v27, %s1665_s10  ;;  %401 = vrot.lane.b32.xlu0 %v2052_v1, %s1665_s10 }
  0x47   : > { %285 = vrot.lane.b32.xlu1 %v2052_v1, %s1666_s11  ;;  %190 = vrot.lane.b32.xlu0 %v2044_v55, %s1667_s12 }
  0x4b   : > { %126 = vrot.lane.b32.xlu1 %v2044_v55, %s1668_s13  ;;  %287 = vrot.lane.b32.xlu0 %v2086_v27, %s1666_s11 }
  0x4f   : > { %399 = vrot.lane.b32.xlu1 %v2095_v39, %s1665_s10  ;;  %397 = vrot.lane.b32.xlu0 %v2059_v3, %s1665_s10 }
  0x53   : > { %281 = vrot.lane.b32.xlu1 %v2059_v3, %s1666_s11  ;;  %188 = vrot.lane.b32.xlu0 %v2047_v48, %s1667_s12 }
  0x57   : > { %124 = vrot.lane.b32.xlu1 %v2047_v48, %s1668_s13  ;;  %283 = vrot.lane.b32.xlu0 %v2095_v39, %s1666_s11 }
  0x5b   : > { %382 = vrot.lane.b32.xlu1 %v2068_v41, %s1669_s14  ;;  %380 = vrot.lane.b32.xlu0 %v2044_v55, %s1669_s14 }
  0x5f   : > { %264 = vrot.lane.b32.xlu1 %v2044_v55, %s1670_s15  ;;  %186 = vrot.lane.b32.xlu0 %v2052_v1, %s1667_s12 }
  0x63   : > { %122 = vrot.lane.b32.xlu1 %v2052_v1, %s1668_s13  ;;  %266 = vrot.lane.b32.xlu0 %v2068_v41, %s1670_s15 }
  0x67   : > { %378 = vrot.lane.b32.xlu1 %v2077_v34, %s1669_s14  ;;  %376 = vrot.lane.b32.xlu0 %v2047_v48, %s1669_s14 }
  0x6b   : > { %260 = vrot.lane.b32.xlu1 %v2047_v48, %s1670_s15  ;;  %184 = vrot.lane.b32.xlu0 %v2059_v3, %s1667_s12 }
  0x6f   : > { %120 = vrot.lane.b32.xlu1 %v2059_v3, %s1668_s13  ;;  %262 = vrot.lane.b32.xlu0 %v2077_v34, %s1670_s15 }
  0x73   : > { %374 = vrot.lane.b32.xlu1 %v2086_v27, %s1669_s14  ;;  %372 = vrot.lane.b32.xlu0 %v2052_v1, %s1669_s14 }
  0x77   : > { %256 = vrot.lane.b32.xlu1 %v2052_v1, %s1670_s15  ;;  %174 = vrot.lane.b32.xlu0 %v2044_v55, %s1671_s16 }
  0x7b   : > { %110 = vrot.lane.b32.xlu1 %v2044_v55, %s1672_s17  ;;  %258 = vrot.lane.b32.xlu0 %v2086_v27, %s1670_s15 }
  0x7f   : > { %370 = vrot.lane.b32.xlu1 %v2095_v39, %s1669_s14  ;;  %368 = vrot.lane.b32.xlu0 %v2059_v3, %s1669_s14 }
  0x83   : > { %252 = vrot.lane.b32.xlu1 %v2059_v3, %s1670_s15  ;;  %172 = vrot.lane.b32.xlu0 %v2047_v48, %s1671_s16 }
  0x87   : > { %108 = vrot.lane.b32.xlu1 %v2047_v48, %s1672_s17  ;;  %254 = vrot.lane.b32.xlu0 %v2095_v39, %s1670_s15 }
  0x8b   : > { %353 = vrot.lane.b32.xlu1 %v2068_v41, %s1673_s18  ;;  %351 = vrot.lane.b32.xlu0 %v2044_v55, %s1673_s18 }
  0x8f   : > { %106 = vrot.lane.b32.xlu1 %v2052_v1, %s1672_s17  ;;  %170 = vrot.lane.b32.xlu0 %v2052_v1, %s1671_s16 }
  0x93   : > { %347 = vrot.lane.b32.xlu1 %v2047_v48, %s1673_s18  ;;  %238 = vrot.lane.b32.xlu0 %v2044_v55, %s1674_s19 }
  0x95   : > { %v207_v20 = vpop.permute.xlu0 %206  ;;  %v205_v40 = vpop.permute.xlu1 %204 }
  0x96   : > { %215 = vst.msk [vmem:[#allocation2 + $0xf8] sm:$0xff] %vm95_vm0, %v207_v20  ;;  %214 = vst.msk [vmem:[#allocation2 + $0xf0] sm:$0xff] %vm95_vm0, %v205_v40 }
  0x97   : > { %168 = vrot.lane.b32.xlu1 %v2059_v3, %s1671_s16  ;;  %349 = vrot.lane.b32.xlu0 %v2077_v34, %s1673_s18 }
  0x99   : > { %v143_v13 = vpop.permute.xlu0 %142  ;;  %v141_v32 = vpop.permute.xlu1 %140 }
  0x9a   : > { %151 = vst.msk [vmem:[#allocation2 + $0x78] sm:$0xff] %vm95_vm0, %v143_v13  ;;  %150 = vst.msk [vmem:[#allocation2 + $0x70] sm:$0xff] %vm95_vm0, %v141_v32 }
  0x9b   : > { %236 = vrot.lane.b32.xlu1 %v2047_v48, %s1674_s19  ;;  %104 = vrot.lane.b32.xlu0 %v2059_v3, %s1672_s17 }
  0x9d   : > { %v410_v20 = vpop.permute.xlu0 %409  ;;  %v412_v40 = vpop.permute.xlu1 %411  ;;  %v718_v33 = vld [vmem:[#allocation2 + $0xf8] sm:$0xff]  ;;  %v717_v18 = vld [vmem:[#allocation2 + $0xf0] sm:$0xff] }
  0x9e   : > { %v417_v25 = vsel %vm413_vm1, %v410_v20, %v412_v40  ;;  %1388 = vmatprep.subr.mxu0 %v718_v33 }
  0x9f   : > { %425 = vst.msk [vmem:[#allocation2 + $0x1f8] sm:$0xff] %vm95_vm0, %v417_v25  ;;  %345 = vrot.lane.b32.xlu1 %v2086_v27, %s1673_s18  ;;  %343 = vrot.lane.b32.xlu0 %v2052_v1, %s1673_s18 }
  0xa1   : > { %v294_v13 = vpop.permute.xlu1 %293  ;;  %v203_v32 = vpop.permute.xlu0 %202  ;;  %v702_v26 = vld [vmem:[#allocation2 + $0x78] sm:$0xff]  ;;  %v701_v33 = vld [vmem:[#allocation2 + $0x70] sm:$0xff] }
  0xa2   : > { %213 = vst.msk [vmem:[#allocation2 + $0xe8] sm:$0xff] %vm95_vm0, %v203_v32  ;;  %1389 = vmatpush3.msra.mxu0 %v702_v26 }
  0xa3   : > { %1390 = vmatprep.subr.mxu0 %v717_v18  ;;  %234 = vrot.lane.b32.xlu1 %v2052_v1, %s1674_s19 }
  0xa4   : > { %158 = vrot.lane.b32.xlu0 %v2044_v55, %s1675_s20  ;;  %1391 = vmatpush3.msra.mxu0 %v701_v33 }
  0xa5   : > { %v139_v25 = vpop.permute.xlu1 %138  ;;  %v296_v20 = vpop.permute.xlu0 %295 }
  0xa6   : > { %149 = vst.msk [vmem:[#allocation2 + $0x68] sm:$0xff] %vm95_vm0, %v139_v25  ;;  %v301_v40 = vsel %vm297_vm2, %v294_v13, %v296_v20  ;;  %v750_v32 = vld [vmem:[#allocation2 + $0x1f8] sm:$0xff] }
  0xa7   : > { %309 = vst.msk [vmem:[#allocation2 + $0x178] sm:$0xff] %vm95_vm0, %v301_v40  ;;  %1444 = vmatprep.subr.mxu1 %v750_v32  ;;  %341 = vrot.lane.b32.xlu1 %v2095_v39, %s1673_s18 }
  0xa8   : > { %339 = vrot.lane.b32.xlu0 %v2059_v3, %s1673_s18 }
  0xa9   : > { %v408_v18 = vpop.permute.xlu1 %407  ;;  %v406_v26 = vpop.permute.xlu0 %405  ;;  %v716_v6 = vld [vmem:[#allocation2 + $0xe8] sm:$0xff] }
  0xaa   : > { %v416_v33 = vsel %vm413_vm1, %v406_v26, %v408_v18  ;;  %1392 = vmatprep.subr.mxu0 %v716_v6 }
  0xab   : > { %424 = vst.msk [vmem:[#allocation2 + $0x1f0] sm:$0xff] %vm95_vm0, %v416_v33  ;;  %232 = vrot.lane.b32.xlu1 %v2059_v3, %s1674_s19 }
  0xac   : > { %156 = vrot.lane.b32.xlu0 %v2047_v48, %s1675_s20 }
  0xad   : > { %v290_v13 = vpop.permute.xlu1 %289  ;;  %v201_v25 = vpop.permute.xlu0 %200  ;;  %v700_v20 = vld [vmem:[#allocation2 + $0x68] sm:$0xff] }
  0xae   : > { %212 = vst.msk [vmem:[#allocation2 + $0xe0] sm:$0xff] %vm95_vm0, %v201_v25  ;;  %1393 = vmatpush3.msra.mxu0 %v700_v20  ;;  %v734_v40 = vld [vmem:[#allocation2 + $0x178] sm:$0xff] }
  0xaf   : > { %1445 = vmatpush3.msra.mxu1 %v734_v40  ;;  %324 = vrot.lane.b32.xlu1 %v2068_v41, %s1676_s21 }
  0xb0   : > { %322 = vrot.lane.b32.xlu0 %v2044_v55, %s1676_s21 }
  0xb1   : > { %v137_v6 = vpop.permute.xlu1 %136  ;;  %v292_v32 = vpop.permute.xlu0 %291 }
  0xb2   : > { %148 = vst.msk [vmem:[#allocation2 + $0x60] sm:$0xff] %vm95_vm0, %v137_v6  ;;  %v300_v18 = vsel %vm297_vm2, %v290_v13, %v292_v32  ;;  %v749_v26 = vld [vmem:[#allocation2 + $0x1f0] sm:$0xff] }
  0xb3   : > { %308 = vst.msk [vmem:[#allocation2 + $0x170] sm:$0xff] %vm95_vm0, %v300_v18  ;;  %1446 = vmatprep.subr.mxu1 %v749_v26  ;;  %222 = vrot.lane.b32.xlu1 %v2044_v55, %s1677_s22 }
  0xb4   : > { %154 = vrot.lane.b32.xlu0 %v2052_v1, %s1675_s20 }
  0xb5   : > { %v404_v33 = vpop.permute.xlu1 %403  ;;  %v402_v25 = vpop.permute.xlu0 %401  ;;  %v715_v20 = vld [vmem:[#allocation2 + $0xe0] sm:$0xff] }
  0xb6   : > { %v415_v40 = vsel %vm413_vm1, %v402_v25, %v404_v33  ;;  %1394 = vmatprep.subr.mxu0 %v715_v20 }
  0xb7   : > { %423 = vst.msk [vmem:[#allocation2 + $0x1e8] sm:$0xff] %vm95_vm0, %v415_v40  ;;  %320 = vrot.lane.b32.xlu1 %v2077_v34, %s1676_s21 }
  0xb8   : > { %318 = vrot.lane.b32.xlu0 %v2047_v48, %s1676_s21 }
  0xb9   : > { %v286_v13 = vpop.permute.xlu1 %285  ;;  %v191_v6 = vpop.permute.xlu0 %190  ;;  %v699_v32 = vld [vmem:[#allocation2 + $0x60] sm:$0xff] }
  0xba   : > { %199 = vst.msk [vmem:[#allocation2 + $0xd8] sm:$0xff] %vm95_vm0, %v191_v6  ;;  %1395 = vmatpush3.msra.mxu0 %v699_v32  ;;  %v733_v18 = vld [vmem:[#allocation2 + $0x170] sm:$0xff] }
  0xbb   : > { %220 = vrot.lane.b32.xlu1 %v2047_v48, %s1677_s22  ;;  %1447 = vmatpush3.msra.mxu1 %v733_v18 }
  0xbc   : > { %152 = vrot.lane.b32.xlu0 %v2059_v3, %s1675_s20 }
  0xbd   : > { %v127_v26 = vpop.permute.xlu1 %126  ;;  %v288_v33 = vpop.permute.xlu0 %287 }
  0xbe   : > { %135 = vst.msk [vmem:[#allocation2 + $0x58] sm:$0xff] %vm95_vm0, %v127_v26  ;;  %v299_v25 = vsel %vm297_vm2, %v286_v13, %v288_v33  ;;  %v748_v20 = vld [vmem:[#allocation2 + $0x1e8] sm:$0xff] }
  0xbf   : > { %307 = vst.msk [vmem:[#allocation2 + $0x168] sm:$0xff] %vm95_vm0, %v299_v25  ;;  %316 = vrot.lane.b32.xlu1 %v2086_v27, %s1676_s21  ;;  %1448 = vmatprep.subr.mxu1 %v748_v20 }
  0xc0   : > { %314 = vrot.lane.b32.xlu0 %v2052_v1, %s1676_s21 }
  0xc1   : > { %v400_v40 = vpop.permute.xlu1 %399  ;;  %v398_v6 = vpop.permute.xlu0 %397  ;;  %v714_v32 = vld [vmem:[#allocation2 + $0xd8] sm:$0xff] }
  0xc2   : > { %v414_v18 = vsel %vm413_vm1, %v398_v6, %v400_v40  ;;  %1396 = vmatprep.subr.mxu0 %v714_v32  ;;  %vm827_vm1 = vcmask 261120  }
  0xc3   : > { %422 = vst.msk [vmem:[#allocation2 + $0x1e0] sm:$0xff] %vm95_vm0, %v414_v18  ;;  %643 = vrot.lane.b32.xlu1 %v2068_v41, %s1678_s23 }
  0xc4   : > { %641 = vrot.lane.b32.xlu0 %v2044_v55, %s1678_s23 }
  0xc5   : > { %v282_v13 = vpop.permute.xlu1 %281  ;;  %v189_v26 = vpop.permute.xlu0 %188  ;;  %v698_v33 = vld [vmem:[#allocation2 + $0x58] sm:$0xff] }
  0xc6   : > { %198 = vst.msk [vmem:[#allocation2 + $0xd0] sm:$0xff] %vm95_vm0, %v189_v26  ;;  %1397 = vmatpush3.msra.mxu0 %v698_v33  ;;  %v732_v25 = vld [vmem:[#allocation2 + $0x168] sm:$0xff] }
  0xc7   : > { %527 = vrot.lane.b32.xlu1 %v2068_v41, %s1679_s1  ;;  %1449 = vmatpush3.msra.mxu1 %v732_v25 }
  0xc8   : > { %525 = vrot.lane.b32.xlu0 %v2044_v55, %s1679_s1 }
  0xc9   : > { %v125_v20 = vpop.permute.xlu1 %124  ;;  %v284_v40 = vpop.permute.xlu0 %283 }
  0xca   : > { %134 = vst.msk [vmem:[#allocation2 + $0x50] sm:$0xff] %vm95_vm0, %v125_v20  ;;  %v298_v6 = vsel %vm297_vm2, %v282_v13, %v284_v40  ;;  %v747_v32 = vld [vmem:[#allocation2 + $0x1e0] sm:$0xff] }
  0xcb   : > { %306 = vst.msk [vmem:[#allocation2 + $0x160] sm:$0xff] %vm95_vm0, %v298_v6  ;;  %310 = vrot.lane.b32.xlu1 %v2059_v3, %s1676_s21  ;;  %1450 = vmatprep.subr.mxu1 %v747_v32 }
  0xcc   : > { %218 = vrot.lane.b32.xlu0 %v2052_v1, %s1677_s22 }
  0xcd   : > { %v383_v18 = vpop.permute.xlu1 %382  ;;  %v381_v26 = vpop.permute.xlu0 %380  ;;  %v713_v33 = vld [vmem:[#allocation2 + $0xd0] sm:$0xff] }
  0xce   : > { %v388_v25 = vsel %vm384_vm3, %v381_v26, %v383_v18  ;;  %1398 = vmatprep.subr.mxu0 %v713_v33 }
  0xcf   : > { %396 = vst.msk [vmem:[#allocation2 + $0x1d8] sm:$0xff] %vm95_vm0, %v388_v25  ;;  %637 = vrot.lane.b32.xlu1 %v2047_v48, %s1678_s23 }
  0xd0   : > { %312 = vrot.lane.b32.xlu0 %v2095_v39, %s1676_s21 }
  0xd1   : > { %v265_v13 = vpop.permute.xlu1 %264  ;;  %v187_v20 = vpop.permute.xlu0 %186  ;;  %v697_v40 = vld [vmem:[#allocation2 + $0x50] sm:$0xff] }
  0xd2   : > { %197 = vst.msk [vmem:[#allocation2 + $0xc8] sm:$0xff] %vm95_vm0, %v187_v20  ;;  %1399 = vmatpush3.msra.mxu0 %v697_v40  ;;  %v731_v6 = vld [vmem:[#allocation2 + $0x160] sm:$0xff] }
  0xd3   : > { %521 = vrot.lane.b32.xlu1 %v2047_v48, %s1679_s1  ;;  %1451 = vmatpush3.msra.mxu1 %v731_v6 }
  0xd4   : > { %639 = vrot.lane.b32.xlu0 %v2077_v34, %s1678_s23 }
  0xd5   : > { %v123_v32 = vpop.permute.xlu1 %122  ;;  %v267_v18 = vpop.permute.xlu0 %266 }
  0xd6   : > { %133 = vst.msk [vmem:[#allocation2 + $0x48] sm:$0xff] %vm95_vm0, %v123_v32  ;;  %v272_v26 = vsel %vm268_vm4, %v265_v13, %v267_v18  ;;  %v746_v33 = vld [vmem:[#allocation2 + $0x1d8] sm:$0xff] }
  0xd7   : > { %280 = vst.msk [vmem:[#allocation2 + $0x158] sm:$0xff] %vm95_vm0, %v272_v26  ;;  %216 = vrot.lane.b32.xlu1 %v2059_v3, %s1677_s22  ;;  %1452 = vmatprep.subr.mxu1 %v746_v33 }
  0xd8   : > { %523 = vrot.lane.b32.xlu0 %v2077_v34, %s1679_s1 }
  0xd9   : > { %v379_v25 = vpop.permute.xlu1 %378  ;;  %v377_v20 = vpop.permute.xlu0 %376  ;;  %v712_v40 = vld [vmem:[#allocation2 + $0xc8] sm:$0xff] }
  0xda   : > { %v387_v6 = vsel %vm384_vm3, %v377_v20, %v379_v25  ;;  %1400 = vmatprep.subr.mxu0 %v712_v40 }
  0xdb   : > { %395 = vst.msk [vmem:[#allocation2 + $0x1d0] sm:$0xff] %vm95_vm0, %v387_v6  ;;  %635 = vrot.lane.b32.xlu1 %v2086_v27, %s1678_s23 }
  0xdc   : > { %633 = vrot.lane.b32.xlu0 %v2052_v1, %s1678_s23 }
  0xdd   : > { %v261_v13 = vpop.permute.xlu1 %260  ;;  %v185_v32 = vpop.permute.xlu0 %184  ;;  %v696_v18 = vld [vmem:[#allocation2 + $0x48] sm:$0xff] }
  0xde   : > { %196 = vst.msk [vmem:[#allocation2 + $0xc0] sm:$0xff] %vm95_vm0, %v185_v32  ;;  %1401 = vmatpush3.msra.mxu0 %v696_v18  ;;  %v730_v26 = vld [vmem:[#allocation2 + $0x158] sm:$0xff] }
  0xdf   : > { %519 = vrot.lane.b32.xlu1 %v2086_v27, %s1679_s1  ;;  %1453 = vmatpush3.msra.mxu1 %v730_v26 }
  0xe0   : > { %517 = vrot.lane.b32.xlu0 %v2052_v1, %s1679_s1 }
  0xe1   : > { %v121_v33 = vpop.permute.xlu1 %120  ;;  %v263_v25 = vpop.permute.xlu0 %262 }
  0xe2   : > { %132 = vst.msk [vmem:[#allocation2 + $0x40] sm:$0xff] %vm95_vm0, %v121_v33  ;;  %v271_v20 = vsel %vm268_vm4, %v261_v13, %v263_v25  ;;  %v745_v40 = vld [vmem:[#allocation2 + $0x1d0] sm:$0xff] }
  0xe3   : > { %279 = vst.msk [vmem:[#allocation2 + $0x150] sm:$0xff] %vm95_vm0, %v271_v20  ;;  %631 = vrot.lane.b32.xlu1 %v2095_v39, %s1678_s23  ;;  %1454 = vmatprep.subr.mxu1 %v745_v40 }
  0xe4   : > { %629 = vrot.lane.b32.xlu0 %v2059_v3, %s1678_s23 }
  0xe5   : > { %v375_v6 = vpop.permute.xlu1 %374  ;;  %v373_v32 = vpop.permute.xlu0 %372  ;;  %v711_v18 = vld [vmem:[#allocation2 + $0xc0] sm:$0xff] }
  0xe6   : > { %v386_v26 = vsel %vm384_vm3, %v373_v32, %v375_v6  ;;  %1402 = vmatprep.subr.mxu0 %v711_v18 }
  0xe7   : > { %394 = vst.msk [vmem:[#allocation2 + $0x1c8] sm:$0xff] %vm95_vm0, %v386_v26  ;;  %515 = vrot.lane.b32.xlu1 %v2095_v39, %s1679_s1 }
  0xe8   : > { %513 = vrot.lane.b32.xlu0 %v2059_v3, %s1679_s1 }
  0xe9   : > { %v257_v13 = vpop.permute.xlu1 %256  ;;  %v175_v33 = vpop.permute.xlu0 %174  ;;  %v695_v25 = vld [vmem:[#allocation2 + $0x40] sm:$0xff] }
  0xea   : > { %183 = vst.msk [vmem:[#allocation2 + $0xb8] sm:$0xff] %vm95_vm0, %v175_v33  ;;  %1403 = vmatpush3.msra.mxu0 %v695_v25  ;;  %v729_v20 = vld [vmem:[#allocation2 + $0x150] sm:$0xff] }
  0xeb   : > { %614 = vrot.lane.b32.xlu1 %v2068_v41, %s1680_s24  ;;  %1455 = vmatpush3.msra.mxu1 %v729_v20 }
  0xec   : > { %612 = vrot.lane.b32.xlu0 %v2044_v55, %s1680_s24 }
  0xed   : > { %v111_v40 = vpop.permute.xlu1 %110  ;;  %v259_v6 = vpop.permute.xlu0 %258 }
  0xee   : > { %119 = vst.msk [vmem:[#allocation2 + $0x38] sm:$0xff] %vm95_vm0, %v111_v40  ;;  %v270_v32 = vsel %vm268_vm4, %v257_v13, %v259_v6  ;;  %v744_v18 = vld [vmem:[#allocation2 + $0x1c8] sm:$0xff] }
  0xef   : > { %278 = vst.msk [vmem:[#allocation2 + $0x148] sm:$0xff] %vm95_vm0, %v270_v32  ;;  %498 = vrot.lane.b32.xlu1 %v2068_v41, %s1681_s25  ;;  %1456 = vmatprep.subr.mxu1 %v744_v18 }
  0xf0   : > { %496 = vrot.lane.b32.xlu0 %v2044_v55, %s1681_s25 }
  0xf1   : > { %v371_v26 = vpop.permute.xlu1 %370  ;;  %v369_v33 = vpop.permute.xlu0 %368  ;;  %v710_v25 = vld [vmem:[#allocation2 + $0xb8] sm:$0xff] }
  0xf2   : > { %v385_v20 = vsel %vm384_vm3, %v369_v33, %v371_v26  ;;  %1404 = vmatprep.subr.mxu0 %v710_v25 }
  0xf3   : > { %393 = vst.msk [vmem:[#allocation2 + $0x1c0] sm:$0xff] %vm95_vm0, %v385_v20  ;;  %610 = vrot.lane.b32.xlu1 %v2077_v34, %s1680_s24 }
  0xf4   : > { %608 = vrot.lane.b32.xlu0 %v2047_v48, %s1680_s24 }
  0xf5   : > { %v253_v13 = vpop.permute.xlu1 %252  ;;  %v173_v40 = vpop.permute.xlu0 %172  ;;  %v694_v6 = vld [vmem:[#allocation2 + $0x38] sm:$0xff] }
  0xf6   : > { %182 = vst.msk [vmem:[#allocation2 + $0xb0] sm:$0xff] %vm95_vm0, %v173_v40  ;;  %1405 = vmatpush3.msra.mxu0 %v694_v6  ;;  %v728_v32 = vld [vmem:[#allocation2 + $0x148] sm:$0xff] }
  0xf7   : > { %494 = vrot.lane.b32.xlu1 %v2077_v34, %s1681_s25  ;;  %1457 = vmatpush3.msra.mxu1 %v728_v32 }
  0xf8   : > { %492 = vrot.lane.b32.xlu0 %v2047_v48, %s1681_s25 }
  0xf9   : > { %v109_v18 = vpop.permute.xlu1 %108  ;;  %v255_v26 = vpop.permute.xlu0 %254 }
  0xfa   : > { %118 = vst.msk [vmem:[#allocation2 + $0x30] sm:$0xff] %vm95_vm0, %v109_v18  ;;  %v269_v33 = vsel %vm268_vm4, %v253_v13, %v255_v26  ;;  %v743_v25 = vld [vmem:[#allocation2 + $0x1c0] sm:$0xff] }
  0xfb   : > { %277 = vst.msk [vmem:[#allocation2 + $0x140] sm:$0xff] %vm95_vm0, %v269_v33  ;;  %606 = vrot.lane.b32.xlu1 %v2086_v27, %s1680_s24  ;;  %1458 = vmatprep.subr.mxu1 %v743_v25 }
  0xfc   : > { %604 = vrot.lane.b32.xlu0 %v2052_v1, %s1680_s24 }
  0xfd   : > { %v354_v20 = vpop.permute.xlu1 %353  ;;  %v352_v40 = vpop.permute.xlu0 %351  ;;  %v709_v6 = vld [vmem:[#allocation2 + $0xb0] sm:$0xff] }
  0xfe   : > { %v359_v32 = vsel %vm355_vm5, %v352_v40, %v354_v20  ;;  %1406 = vmatprep.subr.mxu0 %v709_v6 }
  0xff   : > { %367 = vst.msk [vmem:[#allocation2 + $0x1b8] sm:$0xff] %vm95_vm0, %v359_v32  ;;  %490 = vrot.lane.b32.xlu1 %v2086_v27, %s1681_s25 }
 0x100   : > { %488 = vrot.lane.b32.xlu0 %v2052_v1, %s1681_s25 }
 0x101   : > { %v107_v13 = vpop.permute.xlu1 %106  ;;  %v171_v18 = vpop.permute.xlu0 %170  ;;  %v693_v26 = vld [vmem:[#allocation2 + $0x30] sm:$0xff] }
 0x102   : > { %117 = vst.msk [vmem:[#allocation2 + $0x28] sm:$0xff] %vm95_vm0, %v107_v13  ;;  %181 = vst.msk [vmem:[#allocation2 + $0xa8] sm:$0xff] %vm95_vm0, %v171_v18  ;;  %1407 = vmatpush3.msra.mxu0 %v693_v26  ;;  %v727_v33 = vld [vmem:[#allocation2 + $0x140] sm:$0xff] }
 0x103   : > { %602 = vrot.lane.b32.xlu1 %v2095_v39, %s1680_s24  ;;  %1459 = vmatpush3.msra.mxu1 %v727_v33 }
 0x104   : > { %600 = vrot.lane.b32.xlu0 %v2059_v3, %s1680_s24 }
 0x105   : > { %v348_v25 = vpop.permute.xlu1 %347  ;;  %v239_v20 = vpop.permute.xlu0 %238 }
 0x106   : > { %247 = vst.msk [vmem:[#allocation2 + $0x138] sm:$0xff] %vm95_vm0, %v239_v20  ;;  %v742_v40 = vld [vmem:[#allocation2 + $0x1b8] sm:$0xff] }
 0x107   : > { %486 = vrot.lane.b32.xlu1 %v2095_v39, %s1681_s25  ;;  %1460 = vmatprep.subr.mxu1 %v742_v40 }
 0x108   : > { %484 = vrot.lane.b32.xlu0 %v2059_v3, %s1681_s25 }
 0x109   : > { %v169_v6 = vpop.permute.xlu1 %168  ;;  %v350_v32 = vpop.permute.xlu0 %349  ;;  %v708_v13 = vld [vmem:[#allocation2 + $0xa8] sm:$0xff] }
 0x10a   : > { %v692_v18 = vld [vmem:[#allocation2 + $0x28] sm:$0xff]  ;;  %180 = vst.msk [vmem:[#allocation2 + $0xa0] sm:$0xff] %vm95_vm0, %v169_v6  ;;  %v358_v26 = vsel %vm355_vm5, %v348_v25, %v350_v32  ;;  %1408 = vmatprep.subr.mxu0 %v708_v13 }
 0x10b   : > { %366 = vst.msk [vmem:[#allocation2 + $0x1b0] sm:$0xff] %vm95_vm0, %v358_v26  ;;  %585 = vrot.lane.b32.xlu1 %v2068_v41, %s1682_s26  ;;  %1409 = vmatpush3.msra.mxu0 %v692_v18 }
 0x10c   : > { %583 = vrot.lane.b32.xlu0 %v2044_v55, %s1682_s26 }
 0x10d   : > { %v237_v33 = vpop.permute.xlu1 %236  ;;  %v105_v20 = vpop.permute.xlu0 %104  ;;  %v726_v40 = vld [vmem:[#allocation2 + $0x138] sm:$0xff] }
 0x10e   : > { %246 = vst.msk [vmem:[#allocation2 + $0x130] sm:$0xff] %vm95_vm0, %v237_v33  ;;  %116 = vst.msk [vmem:[#allocation2 + $0x20] sm:$0xff] %vm95_vm0, %v105_v20  ;;  %1461 = vmatpush3.msra.mxu1 %v726_v40 }
 0x10f   : > { %469 = vrot.lane.b32.xlu1 %v2068_v41, %s1683_s27 }
 0x110   : > { %467 = vrot.lane.b32.xlu0 %v2044_v55, %s1683_s27 }
 0x111   : > { %v346_v25 = vpop.permute.xlu1 %345  ;;  %v344_v6 = vpop.permute.xlu0 %343  ;;  %v707_v32 = vld [vmem:[#allocation2 + $0xa0] sm:$0xff] }
 0x112   : > { %v357_v13 = vsel %vm355_vm5, %v344_v6, %v346_v25  ;;  %1410 = vmatprep.subr.mxu0 %v707_v32  ;;  %v741_v18 = vld [vmem:[#allocation2 + $0x1b0] sm:$0xff] }
 0x113   : > { %365 = vst.msk [vmem:[#allocation2 + $0x1a8] sm:$0xff] %vm95_vm0, %v357_v13  ;;  %581 = vrot.lane.b32.xlu1 %v2077_v34, %s1682_s26  ;;  %1462 = vmatprep.subr.mxu1 %v741_v18 }
 0x114   : > { %579 = vrot.lane.b32.xlu0 %v2047_v48, %s1682_s26 }
 0x115   : > { %v235_v26 = vpop.permute.xlu1 %234  ;;  %v691_v33 = vld [vmem:[#allocation2 + $0x20] sm:$0xff]  ;;  %v725_v20 = vld [vmem:[#allocation2 + $0x130] sm:$0xff] }
 0x116   : > { %245 = vst.msk [vmem:[#allocation2 + $0x128] sm:$0xff] %vm95_vm0, %v235_v26  ;;  %v159_v40 = vpop.permute.xlu0 %158  ;;  %1411 = vmatpush3.msra.mxu0 %v691_v33  ;;  %1463 = vmatpush3.msra.mxu1 %v725_v20  ;;  %v690_v33 = vld [vmem:[#allocation2 + $0x18] sm:$0xff] }
 0x117   : > { %167 = vst.msk [vmem:[#allocation2 + $0x98] sm:$0xff] %vm95_vm0, %v159_v40  ;;  %465 = vrot.lane.b32.xlu1 %v2077_v34, %s1683_s27 }
 0x118   : > { %463 = vrot.lane.b32.xlu0 %v2047_v48, %s1683_s27 }
 0x119   : > { %v342_v25 = vpop.permute.xlu1 %341 }
 0x11a   : > { %v340_v6 = vpop.permute.xlu0 %339  ;;  %v740_v32 = vld [vmem:[#allocation2 + $0x1a8] sm:$0xff] }
 0x11b   : > { %v356_v13 = vsel %vm355_vm5, %v340_v6, %v342_v25  ;;  %577 = vrot.lane.b32.xlu1 %v2086_v27, %s1682_s26  ;;  %1464 = vmatprep.subr.mxu1 %v740_v32 }
 0x11c   : > { %364 = vst.msk [vmem:[#allocation2 + $0x1a0] sm:$0xff] %vm95_vm0, %v356_v13  ;;  %575 = vrot.lane.b32.xlu0 %v2052_v1, %s1682_s26 }
 0x11d   : > { %v233_v18 = vpop.permute.xlu1 %232  ;;  %v724_v26 = vld [vmem:[#allocation2 + $0x128] sm:$0xff] }
 0x11e   : > { %244 = vst.msk [vmem:[#allocation2 + $0x120] sm:$0xff] %vm95_vm0, %v233_v18  ;;  %v157_v20 = vpop.permute.xlu0 %156  ;;  %v706_v40 = vld [vmem:[#allocation2 + $0x98] sm:$0xff]  ;;  %1465 = vmatpush3.msra.mxu1 %v724_v26 }
 0x11f   : > { %166 = vst.msk [vmem:[#allocation2 + $0x90] sm:$0xff] %vm95_vm0, %v157_v20  ;;  %1412 = vmatprep.subr.mxu0 %v706_v40  ;;  %461 = vrot.lane.b32.xlu1 %v2086_v27, %s1683_s27  ;;  %v689_v20 = vld [vmem:[#allocation2 + $0x10] sm:$0xff] }
 0x120   : > { %459 = vrot.lane.b32.xlu0 %v2052_v1, %s1683_s27  ;;  %1413 = vmatpush3.msra.mxu0 %v690_v33 }
 0x121   : > { %v325_v25 = vpop.permute.xlu1 %324 }
 0x122   : > { %v323_v6 = vpop.permute.xlu0 %322 }
 0x123   : > { %v330_v32 = vsel %vm326_vm6, %v323_v6, %v325_v25  ;;  %573 = vrot.lane.b32.xlu1 %v2095_v39, %s1682_s26  ;;  %v739_v13 = vld [vmem:[#allocation2 + $0x1a0] sm:$0xff] }
 0x124   : > { %338 = vst.msk [vmem:[#allocation2 + $0x198] sm:$0xff] %vm95_vm0, %v330_v32  ;;  %571 = vrot.lane.b32.xlu0 %v2059_v3, %s1682_s26  ;;  %1466 = vmatprep.subr.mxu1 %v739_v13 }
 0x125   : > { %v223_v18 = vpop.permute.xlu1 %222  ;;  %v723_v26 = vld [vmem:[#allocation2 + $0x120] sm:$0xff] }
 0x126   : > { %231 = vst.msk [vmem:[#allocation2 + $0x118] sm:$0xff] %vm95_vm0, %v223_v18  ;;  %v155_v33 = vpop.permute.xlu0 %154  ;;  %v705_v40 = vld [vmem:[#allocation2 + $0x90] sm:$0xff]  ;;  %1467 = vmatpush3.msra.mxu1 %v723_v26 }
 0x127   : > { %165 = vst.msk [vmem:[#allocation2 + $0x88] sm:$0xff] %vm95_vm0, %v155_v33  ;;  %1414 = vmatprep.subr.mxu0 %v705_v40  ;;  %457 = vrot.lane.b32.xlu1 %v2095_v39, %s1683_s27  ;;  %v688_v33 = vld [vmem:[#allocation2 + $0x8] sm:$0xff] }
 0x128   : > { %455 = vrot.lane.b32.xlu0 %v2059_v3, %s1683_s27  ;;  %1415 = vmatpush3.msra.mxu0 %v689_v20 }
 0x129   : > { %v321_v25 = vpop.permute.xlu1 %320 }
 0x12a   : > { %v319_v6 = vpop.permute.xlu0 %318 }
 0x12b   : > { %v329_v32 = vsel %vm326_vm6, %v319_v6, %v321_v25  ;;  %556 = vrot.lane.b32.xlu1 %v2068_v41, %s1684_s28  ;;  %v738_v13 = vld [vmem:[#allocation2 + $0x198] sm:$0xff] }
 0x12c   : > { %337 = vst.msk [vmem:[#allocation2 + $0x190] sm:$0xff] %vm95_vm0, %v329_v32  ;;  %554 = vrot.lane.b32.xlu0 %v2044_v55, %s1684_s28  ;;  %1468 = vmatprep.subr.mxu1 %v738_v13 }
 0x12d   : > { %v221_v18 = vpop.permute.xlu1 %220  ;;  %v722_v26 = vld [vmem:[#allocation2 + $0x118] sm:$0xff] }
 0x12e   : > { %230 = vst.msk [vmem:[#allocation2 + $0x110] sm:$0xff] %vm95_vm0, %v221_v18  ;;  %v153_v20 = vpop.permute.xlu0 %152  ;;  %v704_v40 = vld [vmem:[#allocation2 + $0x88] sm:$0xff]  ;;  %1469 = vmatpush3.msra.mxu1 %v722_v26 }
 0x12f   : > { %164 = vst.msk [vmem:[#allocation2 + $0x80] sm:$0xff] %vm95_vm0, %v153_v20  ;;  %1416 = vmatprep.subr.mxu0 %v704_v40  ;;  %440 = vrot.lane.b32.xlu1 %v2068_v41, %s1685_s29  ;;  %v687_v20 = vld [vmem:[#allocation2] sm:$0xff] }
 0x130   : > { %438 = vrot.lane.b32.xlu0 %v2044_v55, %s1685_s29  ;;  %1417 = vmatpush3.msra.mxu0 %v688_v33 }
 0x131   : > { %v317_v25 = vpop.permute.xlu1 %316 }
 0x132   : > { %v315_v6 = vpop.permute.xlu0 %314 }
 0x133   : > { %v328_v32 = vsel %vm326_vm6, %v315_v6, %v317_v25  ;;  %552 = vrot.lane.b32.xlu1 %v2077_v34, %s1684_s28  ;;  %v737_v13 = vld [vmem:[#allocation2 + $0x190] sm:$0xff] }
 0x134   : > { %336 = vst.msk [vmem:[#allocation2 + $0x188] sm:$0xff] %vm95_vm0, %v328_v32  ;;  %550 = vrot.lane.b32.xlu0 %v2047_v48, %s1684_s28  ;;  %1470 = vmatprep.subr.mxu1 %v737_v13 }
 0x135   : > { %v644_v18 = vpop.permute.xlu1 %643  ;;  %v721_v26 = vld [vmem:[#allocation2 + $0x110] sm:$0xff] }
 0x136   : > { %v642_v40 = vpop.permute.xlu0 %641  ;;  %v703_v33 = vld [vmem:[#allocation2 + $0x80] sm:$0xff]  ;;  %1471 = vmatpush3.msra.mxu1 %v721_v26 }
 0x137   : > { %v649_v19 = vsel %vm645_vm7, %v642_v40, %v644_v18  ;;  %1418 = vmatprep.subr.mxu0 %v703_v33  ;;  %436 = vrot.lane.b32.xlu1 %v2077_v34, %s1685_s29 }
 0x138   : > { %657 = vst.msk [vmem:[#allocation2 + $0x2f8] sm:$0xff] %vm95_vm0, %v649_v19  ;;  %434 = vrot.lane.b32.xlu0 %v2047_v48, %s1685_s29  ;;  %1419 = vmatpush3.msra.mxu0 %v687_v20 }
 0x139   : > { %v528_v25 = vpop.permute.xlu1 %527  ;;  %917 = vmatmul.mubr.f32.vlgmr.msra.gmra.mxu0 %v2683_v0 }
 0x13a   : > { %v526_v6 = vpop.permute.xlu0 %525  ;;  %921 = vmatprep.mubr.f32.mxu0 %v2684_v8 }
 0x13b   : > { %v533_v32 = vsel %vm529_vm8, %v526_v6, %v528_v25  ;;  %548 = vrot.lane.b32.xlu1 %v2086_v27, %s1684_s28  ;;  %v736_v13 = vld [vmem:[#allocation2 + $0x188] sm:$0xff] }
 0x13c   : > { %541 = vst.msk [vmem:[#allocation2 + $0x278] sm:$0xff] %vm95_vm0, %v533_v32  ;;  %546 = vrot.lane.b32.xlu0 %v2052_v1, %s1684_s28  ;;  %1472 = vmatprep.subr.mxu1 %v736_v13 }
 0x13d   : > { %v311_v19 = vpop.permute.xlu1 %310  ;;  %922 = vmatmul.mubr.f32.gmra.mxu0 %v2685_v7 }
 0x13e   : > { %v219_v18 = vpop.permute.xlu0 %218  ;;  %926 = vmatprep.mubr.f32.mxu0 %v2686_v15 }
 0x13f   : > { %229 = vst.msk [vmem:[#allocation2 + $0x108] sm:$0xff] %vm95_vm0, %v219_v18  ;;  %432 = vrot.lane.b32.xlu1 %v2086_v27, %s1685_s29  ;;  %v782_v26 = vld [vmem:[#allocation2 + $0x2f8] sm:$0xff] }
 0x140   : > { %430 = vrot.lane.b32.xlu0 %v2052_v1, %s1685_s29  ;;  %1500 = vmatprep.subr.mxu0 %v782_v26 }
 0x141   : > { %v638_v20 = vpop.permute.xlu1 %637  ;;  %927 = vmatmul.mubr.f32.gmra.mxu0 %v2687_v14 }
 0x142   : > { %v313_v40 = vpop.permute.xlu0 %312  ;;  %931 = vmatprep.mubr.f32.mxu0 %v2688_v22 }
 0x143   : > { %v327_v33 = vsel %vm326_vm6, %v311_v19, %v313_v40  ;;  %544 = vrot.lane.b32.xlu1 %v2095_v39, %s1684_s28  ;;  %v766_v25 = vld [vmem:[#allocation2 + $0x278] sm:$0xff] }
 0x144   : > { %335 = vst.msk [vmem:[#allocation2 + $0x180] sm:$0xff] %vm95_vm0, %v327_v33  ;;  %542 = vrot.lane.b32.xlu0 %v2059_v3, %s1684_s28  ;;  %1501 = vmatpush3.msra.mxu0 %v766_v25 }
 0x145   : > { %v522_v6 = vpop.permute.xlu1 %521  ;;  %932 = vmatmul.mubr.f32.gmra.mxu0 %v2689_v21 }
 0x146   : > { %v640_v32 = vpop.permute.xlu0 %639  ;;  %v720_v13 = vld [vmem:[#allocation2 + $0x108] sm:$0xff]  ;;  %936 = vmatprep.mubr.f32.mxu0 %v2690_v29 }
 0x147   : > { %v648_v18 = vsel %vm645_vm7, %v638_v20, %v640_v32  ;;  %1473 = vmatpush3.msra.mxu1 %v720_v13  ;;  %428 = vrot.lane.b32.xlu1 %v2095_v39, %s1685_s29 }
 0x148   : > { %656 = vst.msk [vmem:[#allocation2 + $0x2f0] sm:$0xff] %vm95_vm0, %v648_v18  ;;  %426 = vrot.lane.b32.xlu0 %v2059_v3, %s1685_s29 }
 0x149   : > { %v217_v19 = vpop.permute.xlu1 %216  ;;  %937 = vmatmul.mubr.f32.gmra.mxu0 %v2691_v28 }
 0x14a   : > { %228 = vst.msk [vmem:[#allocation2 + $0x100] sm:$0xff] %vm95_vm0, %v217_v19  ;;  %v524_v40 = vpop.permute.xlu0 %523  ;;  %941 = vmatprep.mubr.f32.mxu0 %v2692_v36 }
 0x14b   : > { %v532_v33 = vsel %vm529_vm8, %v522_v6, %v524_v40  ;;  %672 = vrot.lane.b32.xlu1 %v2068_v41, %s1686_s30  ;;  %v735_v20 = vld [vmem:[#allocation2 + $0x180] sm:$0xff] }
 0x14c   : > { %540 = vst.msk [vmem:[#allocation2 + $0x270] sm:$0xff] %vm95_vm0, %v532_v33  ;;  %670 = vrot.lane.b32.xlu0 %v2044_v55, %s1686_s30  ;;  %1474 = vmatprep.subr.mxu1 %v735_v20 }
 0x14d   : > { %v636_v32 = vpop.permute.xlu1 %635  ;;  %942 = vmatmul.mubr.f32.gmra.mxu0 %v2693_v35 }
 0x14e   : > { %v634_v13 = vpop.permute.xlu0 %633  ;;  %946 = vmatprep.mubr.f32.mxu0 %v2694_v43 }
 0x14f   : > { %v647_v18 = vsel %vm645_vm7, %v634_v13, %v636_v32  ;;  %668 = vrot.lane.b32.xlu1 %v2077_v34, %s1686_s30  ;;  %v781_v6 = vld [vmem:[#allocation2 + $0x2f0] sm:$0xff] }
 0x150   : > { %655 = vst.msk [vmem:[#allocation2 + $0x2e8] sm:$0xff] %vm95_vm0, %v647_v18  ;;  %666 = vrot.lane.b32.xlu0 %v2047_v48, %s1686_s30  ;;  %1502 = vmatprep.subr.mxu0 %v781_v6 }
 0x151   : > { %v520_v41 = vpop.permute.xlu1 %519  ;;  %v719_v55 = vld [vmem:[#allocation2 + $0x100] sm:$0xff]  ;;  %947 = vmatmul.mubr.f32.gmra.mxu0 %v2695_v42 }
 0x152   : > { %v518_v19 = vpop.permute.xlu0 %517  ;;  %1475 = vmatpush3.msra.mxu1 %v719_v55  ;;  %951 = vmatprep.mubr.f32.mxu0 %v2696_v50 }
 0x153   : > { %v531_v40 = vsel %vm529_vm8, %v518_v19, %v520_v41  ;;  %664 = vrot.lane.b32.xlu1 %v2086_v27, %s1686_s30  ;;  %1588 = vmatprep.subr.mxu1 %v782_v26  ;;  %v765_v34 = vld [vmem:[#allocation2 + $0x270] sm:$0xff] }
 0x154   : > { %539 = vst.msk [vmem:[#allocation2 + $0x268] sm:$0xff] %vm95_vm0, %v531_v40  ;;  %662 = vrot.lane.b32.xlu0 %v2052_v1, %s1686_s30  ;;  %1503 = vmatpush3.msra.mxu0 %v765_v34  ;;  %v1687_v40 = vmov 0  }
 0x155   : > { %1022 = vmatmul.mubr.f32.vlgmr.msra.gmra.mxu1 %v2697_v2  ;;  %v632_v48 = vpop.permute.xlu1 %631  ;;  %952 = vmatmul.mubr.f32.gmra.mxu0 %v2698_v49 }
 0x156   : > { %1604 = vmatpush3.msra.mxu1 %v766_v25  ;;  %v630_v33 = vpop.permute.xlu0 %629  ;;  %1026 = vmatprep.mubr.f32.mxu1 %v2699_v10 }
 0x157   : > { %1589 = vmatprep.subr.mxu1 %v781_v6  ;;  %v646_v27 = vsel %vm645_vm7, %v630_v33, %v632_v48  ;;  %660 = vrot.lane.b32.xlu1 %v2095_v39, %s1686_s30  ;;  %v780_v26 = vld [vmem:[#allocation2 + $0x2e8] sm:$0xff] }
 0x158   : > { %654 = vst.msk [vmem:[#allocation2 + $0x2e0] sm:$0xff] %vm95_vm0, %v646_v27  ;;  %1605 = vmatpush3.msra.mxu1 %v765_v34  ;;  %658 = vrot.lane.b32.xlu0 %v2059_v3, %s1686_s30 }
 0x159   : > { %1504 = vmatprep.subr.mxu0 %v780_v26  ;;  %1590 = vmatprep.subr.mxu1 %v780_v26  ;;  %v516_v1 = vpop.permute.xlu1 %515 }
 0x15a   : > { %v514_v25 = vpop.permute.xlu0 %513  ;;  %1027 = vmatmul.mubr.f32.gmra.mxu1 %v2700_v9  ;;  %1126 = vmatprep.mubr.f32.mxu0 %v2701_v5 }
 0x15b   : > { %v530_v20 = vsel %vm529_vm8, %v514_v25, %v516_v1  ;;  %v764_v32 = vld [vmem:[#allocation2 + $0x268] sm:$0xff]  ;;  %1031 = vmatprep.mubr.f32.mxu1 %v2702_v17  ;;  %1653 = vset.pattern.permute.xlu0 %v1687_v40 }
 0x15c   : > { %538 = vst.msk [vmem:[#allocation2 + $0x260] sm:$0xff] %vm95_vm0, %v530_v20  ;;  %1505 = vmatpush3.msra.mxu0 %v764_v32  ;;  %1606 = vmatpush3.msra.mxu1 %v764_v32 }
 0x15d   : > { %v615_v39 = vpop.permute.xlu1 %614  ;;  %789 = vperm.xlu0 %1653, %v2707_v56   ;;  %1654 = vset.pattern.permute.xlu1 %v1687_v40 }
 0x15e   : > { %v613_v3 = vpop.permute.xlu0 %612  ;;  %1032 = vmatmul.mubr.f32.gmra.mxu1 %v2703_v16  ;;  %794 = vperm.xlu1 %1654, %v2709_v57  }
 0x15f   : > { %v620_v13 = vsel %vm616_vm9, %v613_v3, %v615_v39  ;;  %v779_v18 = vld [vmem:[#allocation2 + $0x2e0] sm:$0xff]  ;;  %1036 = vmatprep.mubr.f32.mxu1 %v2704_v24 }
 0x160   : > { %628 = vst.msk [vmem:[#allocation2 + $0x2d8] sm:$0xff] %vm95_vm0, %v620_v13  ;;  %1506 = vmatprep.subr.mxu0 %v779_v18  ;;  %1591 = vmatprep.subr.mxu1 %v779_v18 }
 0x161   : > { %v499_v6 = vpop.permute.xlu1 %498  ;;  %804 = vperm.xlu0 %1653, %v2006_v59  }
 0x162   : > { %v497_v41 = vpop.permute.xlu0 %496  ;;  %1037 = vmatmul.mubr.f32.gmra.mxu1 %v2705_v23  ;;  %799 = vperm.xlu1 %1654, %v2712_v58  }
 0x163   : > { %v504_v55 = vsel %vm500_vm10, %v497_v41, %v499_v6  ;;  %v763_v19 = vld [vmem:[#allocation2 + $0x260] sm:$0xff]  ;;  %1041 = vmatprep.mubr.f32.mxu1 %v2706_v31 }
 0x164   : > { %512 = vst.msk [vmem:[#allocation2 + $0x258] sm:$0xff] %vm95_vm0, %v504_v55  ;;  %1507 = vmatpush3.msra.mxu0 %v763_v19  ;;  %1607 = vmatpush3.msra.mxu1 %v763_v19 }
 0x165   : > { %v611_v34 = vpop.permute.xlu1 %610  ;;  %814 = vperm.xlu0 %1653, %v2016_v61  }
 0x166   : > { %v609_v48 = vpop.permute.xlu0 %608  ;;  %1042 = vmatmul.mubr.f32.gmra.mxu1 %v2708_v30  ;;  %809 = vperm.xlu1 %1654, %v2011_v60  }
 0x167   : > { %v619_v33 = vsel %vm616_vm9, %v609_v48, %v611_v34  ;;  %v778_v27 = vld [vmem:[#allocation2 + $0x2d8] sm:$0xff]  ;;  %1046 = vmatprep.mubr.f32.mxu1 %v2710_v38 }
 0x168   : > { %627 = vst.msk [vmem:[#allocation2 + $0x2d0] sm:$0xff] %vm95_vm0, %v619_v33  ;;  %1508 = vmatprep.subr.mxu0 %v778_v27  ;;  %1592 = vmatprep.subr.mxu1 %v778_v27 }
 0x169   : > { %v495_v26 = vpop.permute.xlu1 %494  ;;  %824 = vperm.xlu0 %1653, %v2026_v63  }
 0x16a   : > { %v493_v1 = vpop.permute.xlu0 %492  ;;  %1047 = vmatmul.mubr.f32.gmra.mxu1 %v2711_v37  ;;  %819 = vperm.xlu1 %1654, %v2021_v62  }
 0x16b   : > { %v503_v25 = vsel %vm500_vm10, %v493_v1, %v495_v26  ;;  %v762_v20 = vld [vmem:[#allocation2 + $0x258] sm:$0xff]  ;;  %1051 = vmatprep.mubr.f32.mxu1 %v2713_v45 }
 0x16c   : > { %511 = vst.msk [vmem:[#allocation2 + $0x250] sm:$0xff] %vm95_vm0, %v503_v25  ;;  %1509 = vmatpush3.msra.mxu0 %v762_v20  ;;  %1608 = vmatpush3.msra.mxu1 %v762_v20 }
 0x16d   : > { %v607_v32 = vpop.permute.xlu1 %606 }
 0x16e   : > { %v605_v39 = vpop.permute.xlu0 %604  ;;  %1052 = vmatmul.mubr.f32.gmra.mxu1 %v2714_v44 }
 0x16f   : > { %v618_v3 = vsel %vm616_vm9, %v605_v39, %v607_v32  ;;  %v777_v13 = vld [vmem:[#allocation2 + $0x2d0] sm:$0xff]  ;;  %1056 = vmatprep.mubr.f32.mxu1 %v2715_v52 }
 0x170   : > { %626 = vst.msk [vmem:[#allocation2 + $0x2c8] sm:$0xff] %vm95_vm0, %v618_v3  ;;  %1510 = vmatprep.subr.mxu0 %v777_v13  ;;  %1593 = vmatprep.subr.mxu1 %v777_v13 }
 0x171   : > { %v491_v18 = vpop.permute.xlu1 %490 }
 0x172   : > { %v489_v6 = vpop.permute.xlu0 %488  ;;  %1057 = vmatmul.mubr.f32.gmra.mxu1 %v2716_v51 }
 0x173   : > { %v502_v41 = vsel %vm500_vm10, %v489_v6, %v491_v18  ;;  %v761_v55 = vld [vmem:[#allocation2 + $0x250] sm:$0xff]  ;;  %1156 = vmatprep.mubr.f32.mxu1 %v2717_v47 }
 0x174   : > { %510 = vst.msk [vmem:[#allocation2 + $0x248] sm:$0xff] %vm95_vm0, %v502_v41  ;;  %1511 = vmatpush3.msra.mxu0 %v761_v55  ;;  %1609 = vmatpush3.msra.mxu1 %v761_v55 }
 0x175   : > { %v603_v19 = vpop.permute.xlu1 %602 }
 0x176   : > { %v601_v40 = vpop.permute.xlu0 %600 }
 0x177   : > { %v617_v34 = vsel %vm616_vm9, %v601_v40, %v603_v19  ;;  %v776_v48 = vld [vmem:[#allocation2 + $0x2c8] sm:$0xff] }
 0x178   : > { %625 = vst.msk [vmem:[#allocation2 + $0x2c0] sm:$0xff] %vm95_vm0, %v617_v34  ;;  %1512 = vmatprep.subr.mxu0 %v776_v48  ;;  %1594 = vmatprep.subr.mxu1 %v776_v48 }
 0x179   : > { %v487_v33 = vpop.permute.xlu1 %486 }
 0x17a   : > { %v485_v27 = vpop.permute.xlu0 %484 }
 0x17b   : > { %v501_v26 = vsel %vm500_vm10, %v485_v27, %v487_v33  ;;  %v760_v1 = vld [vmem:[#allocation2 + $0x248] sm:$0xff] }
 0x17c   : > { %509 = vst.msk [vmem:[#allocation2 + $0x240] sm:$0xff] %vm95_vm0, %v501_v26  ;;  %1513 = vmatpush3.msra.mxu0 %v760_v1  ;;  %1610 = vmatpush3.msra.mxu1 %v760_v1 }
 0x17d   : > { %v586_v25 = vpop.permute.xlu1 %585 }
 0x17e   : > { %v584_v20 = vpop.permute.xlu0 %583 }
 0x17f   : > { %v591_v32 = vsel %vm587_vm11, %v584_v20, %v586_v25  ;;  %v775_v39 = vld [vmem:[#allocation2 + $0x2c0] sm:$0xff] }
 0x180   : > { %599 = vst.msk [vmem:[#allocation2 + $0x2b8] sm:$0xff] %vm95_vm0, %v591_v32  ;;  %1514 = vmatprep.subr.mxu0 %v775_v39  ;;  %1595 = vmatprep.subr.mxu1 %v775_v39 }
 0x181   : > { %v470_v3 = vpop.permute.xlu1 %469 }
 0x182   : > { %v468_v13 = vpop.permute.xlu0 %467 }
 0x183   : > { %v475_v18 = vsel %vm471_vm12, %v468_v13, %v470_v3  ;;  %v759_v6 = vld [vmem:[#allocation2 + $0x240] sm:$0xff] }
 0x184   : > { %483 = vst.msk [vmem:[#allocation2 + $0x238] sm:$0xff] %vm95_vm0, %v475_v18  ;;  %1515 = vmatpush3.msra.mxu0 %v759_v6  ;;  %1611 = vmatpush3.msra.mxu1 %v759_v6 }
 0x185   : > { %v582_v41 = vpop.permute.xlu1 %581 }
 0x186   : > { %v580_v55 = vpop.permute.xlu0 %579 }
 0x187   : > { %v590_v19 = vsel %vm587_vm11, %v580_v55, %v582_v41  ;;  %v774_v40 = vld [vmem:[#allocation2 + $0x2b8] sm:$0xff] }
 0x188   : > { %598 = vst.msk [vmem:[#allocation2 + $0x2b0] sm:$0xff] %vm95_vm0, %v590_v19  ;;  %1516 = vmatprep.subr.mxu0 %v774_v40  ;;  %1596 = vmatprep.subr.mxu1 %v774_v40 }
 0x189   : > { %v466_v34 = vpop.permute.xlu1 %465 }
 0x18a   : > { %v464_v48 = vpop.permute.xlu0 %463 }
 0x18b   : > { %v474_v33 = vsel %vm471_vm12, %v464_v48, %v466_v34  ;;  %v758_v27 = vld [vmem:[#allocation2 + $0x238] sm:$0xff] }
 0x18c   : > { %482 = vst.msk [vmem:[#allocation2 + $0x230] sm:$0xff] %vm95_vm0, %v474_v33  ;;  %1517 = vmatpush3.msra.mxu0 %v758_v27  ;;  %1612 = vmatpush3.msra.mxu1 %v758_v27 }
 0x18d   : > { %v578_v26 = vpop.permute.xlu1 %577 }
 0x18e   : > { %v576_v1 = vpop.permute.xlu0 %575 }
 0x18f   : > { %v589_v25 = vsel %vm587_vm11, %v576_v1, %v578_v26  ;;  %v773_v20 = vld [vmem:[#allocation2 + $0x2b0] sm:$0xff] }
 0x190   : > { %597 = vst.msk [vmem:[#allocation2 + $0x2a8] sm:$0xff] %vm95_vm0, %v589_v25  ;;  %1518 = vmatprep.subr.mxu0 %v773_v20  ;;  %1597 = vmatprep.subr.mxu1 %v773_v20 }
 0x191   : > { %v462_v32 = vpop.permute.xlu1 %461 }
 0x192   : > { %v460_v39 = vpop.permute.xlu0 %459 }
 0x193   : > { %v473_v3 = vsel %vm471_vm12, %v460_v39, %v462_v32  ;;  %v757_v13 = vld [vmem:[#allocation2 + $0x230] sm:$0xff] }
 0x194   : > { %481 = vst.msk [vmem:[#allocation2 + $0x228] sm:$0xff] %vm95_vm0, %v473_v3  ;;  %1519 = vmatpush3.msra.mxu0 %v757_v13  ;;  %1613 = vmatpush3.msra.mxu1 %v757_v13 }
 0x195   : > { %v574_v18 = vpop.permute.xlu1 %573 }
 0x196   : > { %v572_v6 = vpop.permute.xlu0 %571 }
 0x197   : > { %v588_v41 = vsel %vm587_vm11, %v572_v6, %v574_v18  ;;  %v772_v55 = vld [vmem:[#allocation2 + $0x2a8] sm:$0xff] }
 0x198   : > { %596 = vst.msk [vmem:[#allocation2 + $0x2a0] sm:$0xff] %vm95_vm0, %v588_v41  ;;  %1520 = vmatprep.subr.mxu0 %v772_v55  ;;  %1598 = vmatprep.subr.mxu1 %v772_v55 }
 0x199   : > { %v458_v19 = vpop.permute.xlu1 %457 }
 0x19a   : > { %v456_v40 = vpop.permute.xlu0 %455 }
 0x19b   : > { %v472_v34 = vsel %vm471_vm12, %v456_v40, %v458_v19  ;;  %v756_v48 = vld [vmem:[#allocation2 + $0x228] sm:$0xff] }
 0x19c   : > { %480 = vst.msk [vmem:[#allocation2 + $0x220] sm:$0xff] %vm95_vm0, %v472_v34  ;;  %1521 = vmatpush3.msra.mxu0 %v756_v48  ;;  %1614 = vmatpush3.msra.mxu1 %v756_v48 }
 0x19d   : > { %v557_v33 = vpop.permute.xlu1 %556 }
 0x19e   : > { %v555_v27 = vpop.permute.xlu0 %554 }
 0x19f   : > { %v562_v26 = vsel %vm558_vm13, %v555_v27, %v557_v33  ;;  %v771_v1 = vld [vmem:[#allocation2 + $0x2a0] sm:$0xff] }
 0x1a0   : > { %570 = vst.msk [vmem:[#allocation2 + $0x298] sm:$0xff] %vm95_vm0, %v562_v26  ;;  %1522 = vmatprep.subr.mxu0 %v771_v1  ;;  %1599 = vmatprep.subr.mxu1 %v771_v1 }
 0x1a1   : > { %v441_v25 = vpop.permute.xlu1 %440 }
 0x1a2   : > { %v439_v20 = vpop.permute.xlu0 %438 }
 0x1a3   : > { %v446_v32 = vsel %vm442_vm14, %v439_v20, %v441_v25  ;;  %v755_v39 = vld [vmem:[#allocation2 + $0x220] sm:$0xff] }
 0x1a4   : > { %454 = vst.msk [vmem:[#allocation2 + $0x218] sm:$0xff] %vm95_vm0, %v446_v32  ;;  %1523 = vmatpush3.msra.mxu0 %v755_v39  ;;  %1615 = vmatpush3.msra.mxu1 %v755_v39 }
 0x1a5   : > { %v553_v3 = vpop.permute.xlu1 %552 }
 0x1a6   : > { %v551_v13 = vpop.permute.xlu0 %550 }
 0x1a7   : > { %v561_v18 = vsel %vm558_vm13, %v551_v13, %v553_v3  ;;  %v770_v6 = vld [vmem:[#allocation2 + $0x298] sm:$0xff] }
 0x1a8   : > { %569 = vst.msk [vmem:[#allocation2 + $0x290] sm:$0xff] %vm95_vm0, %v561_v18  ;;  %1524 = vmatprep.subr.mxu0 %v770_v6  ;;  %1600 = vmatprep.subr.mxu1 %v770_v6 }
 0x1a9   : > { %v437_v41 = vpop.permute.xlu1 %436 }
 0x1aa   : > { %v435_v55 = vpop.permute.xlu0 %434 }
 0x1ab   : > { %v445_v19 = vsel %vm442_vm14, %v435_v55, %v437_v41  ;;  %v754_v40 = vld [vmem:[#allocation2 + $0x218] sm:$0xff] }
 0x1ac   : > { %453 = vst.msk [vmem:[#allocation2 + $0x210] sm:$0xff] %vm95_vm0, %v445_v19  ;;  %1525 = vmatpush3.msra.mxu0 %v754_v40  ;;  %1616 = vmatpush3.msra.mxu1 %v754_v40 }
 0x1ad   : > { %v549_v34 = vpop.permute.xlu1 %548 }
 0x1ae   : > { %v547_v48 = vpop.permute.xlu0 %546 }
 0x1af   : > { %v560_v33 = vsel %vm558_vm13, %v547_v48, %v549_v34  ;;  %v769_v27 = vld [vmem:[#allocation2 + $0x290] sm:$0xff] }
 0x1b0   : > { %568 = vst.msk [vmem:[#allocation2 + $0x288] sm:$0xff] %vm95_vm0, %v560_v33  ;;  %1526 = vmatprep.subr.mxu0 %v769_v27  ;;  %1601 = vmatprep.subr.mxu1 %v769_v27 }
 0x1b1   : > { %v433_v26 = vpop.permute.xlu1 %432 }
 0x1b2   : > { %v431_v1 = vpop.permute.xlu0 %430 }
 0x1b3   : > { %v444_v25 = vsel %vm442_vm14, %v431_v1, %v433_v26  ;;  %v753_v20 = vld [vmem:[#allocation2 + $0x210] sm:$0xff] }
 0x1b4   : > { %452 = vst.msk [vmem:[#allocation2 + $0x208] sm:$0xff] %vm95_vm0, %v444_v25  ;;  %1527 = vmatpush3.msra.mxu0 %v753_v20  ;;  %1617 = vmatpush3.msra.mxu1 %v753_v20 }
 0x1b5   : > { %v545_v32 = vpop.permute.xlu1 %544 }
 0x1b6   : > { %v543_v39 = vpop.permute.xlu0 %542 }
 0x1b7   : > { %v559_v3 = vsel %vm558_vm13, %v543_v39, %v545_v32  ;;  %v768_v13 = vld [vmem:[#allocation2 + $0x288] sm:$0xff] }
 0x1b8   : > { %567 = vst.msk [vmem:[#allocation2 + $0x280] sm:$0xff] %vm95_vm0, %v559_v3  ;;  %1528 = vmatprep.subr.mxu0 %v768_v13  ;;  %1602 = vmatprep.subr.mxu1 %v768_v13 }
 0x1b9   : > { %v429_v18 = vpop.permute.xlu1 %428 }
 0x1ba   : > { %v427_v6 = vpop.permute.xlu0 %426 }
 0x1bb   : > { %v443_v41 = vsel %vm442_vm14, %v427_v6, %v429_v18  ;;  %v752_v55 = vld [vmem:[#allocation2 + $0x208] sm:$0xff]  ;;  %v2724_v18 = vld [vmem:[#allocation22_spill] sm:$0xff] }
 0x1bc   : > { %451 = vst.msk [vmem:[#allocation2 + $0x200] sm:$0xff] %vm95_vm0, %v443_v41  ;;  %1529 = vmatpush3.msra.mxu0 %v752_v55  ;;  %1618 = vmatpush3.msra.mxu1 %v752_v55  ;;  %v2725_v55 = vld [vmem:[#allocation9_spill] sm:$0xff] }
 0x1bd   : > { %v673_v19 = vpop.permute.xlu1 %672 }
 0x1be   : > { %v671_v40 = vpop.permute.xlu0 %670 }
 0x1bf   : > { %v678_v34 = vsel %vm674_vm15, %v671_v40, %v673_v19  ;;  %v767_v48 = vld [vmem:[#allocation2 + $0x280] sm:$0xff]  ;;  %v2726_v19 = vld [vmem:[#allocation21_spill] sm:$0xff] }
 0x1c0   : > { %686 = vst.msk [vmem:[#allocation2 + $0x318] sm:$0xff] %vm95_vm0, %v678_v34  ;;  %1530 = vmatprep.subr.mxu0 %v767_v48  ;;  %1603 = vmatprep.subr.mxu1 %v767_v48  ;;  %v2727_v40 = vld [vmem:[#allocation29_spill] sm:$0xff]  ;;  %v2728_v48 = vld [vmem:[#allocation28_spill] sm:$0xff] }
 0x1c1   : > { %v669_v33 = vpop.permute.xlu1 %668 }
 0x1c2   : > { %v667_v27 = vpop.permute.xlu0 %666 }
 0x1c3   : > { %v677_v26 = vsel %vm674_vm15, %v667_v27, %v669_v33  ;;  %v751_v1 = vld [vmem:[#allocation2 + $0x200] sm:$0xff]  ;;  %v2729_v33 = vld [vmem:[#allocation36_spill] sm:$0xff] }
 0x1c4   : > { %685 = vst.msk [vmem:[#allocation2 + $0x310] sm:$0xff] %vm95_vm0, %v677_v26  ;;  %1531 = vmatpush3.msra.mxu0 %v751_v1  ;;  %1619 = vmatpush3.msra.mxu1 %v751_v1  ;;  %v2730_v26 = vld [vmem:[#allocation35_spill] sm:$0xff]  ;;  %v2731_v1 = vld [vmem:[#allocation16_spill] sm:$0xff] }
 0x1c5   : > { %1127 = vmatmul.mubr.f32.vlgmr.msra.gmra.mxu0 %v2718_v4  ;;  %1157 = vmatmul.mubr.f32.vlgmr.msra.gmra.mxu1 %v2719_v46  ;;  %v665_v25 = vpop.permute.xlu1 %664 }
 0x1c6   : > { %v663_v20 = vpop.permute.xlu0 %662  ;;  %1131 = vmatprep.mubr.f32.mxu0 %v2720_v12  ;;  %1161 = vmatprep.mubr.f32.mxu1 %v2721_v54 }
 0x1c7   : > { %v676_v32 = vsel %vm674_vm15, %v663_v20, %v665_v25  ;;  %v786_v39 = vld [vmem:[#allocation2 + $0x318] sm:$0xff]  ;;  %v2732_v25 = vld [vmem:[#allocation43_spill] sm:$0xff] }
 0x1c8   : > { %684 = vst.msk [vmem:[#allocation2 + $0x308] sm:$0xff] %vm95_vm0, %v676_v32  ;;  %1568 = vmatprep.subr.mxu1 %v786_v39  ;;  %v2733_v20 = vld [vmem:[#allocation23_spill] sm:$0xff]  ;;  %v2734_v32 = vld [vmem:[#allocation42_spill] sm:$0xff] }
 0x1c9   : > { %1132 = vmatmul.mubr.f32.gmra.mxu0 %v2722_v11  ;;  %1162 = vmatmul.mubr.f32.gmra.mxu1 %v2723_v53  ;;  %v661_v3 = vpop.permute.xlu1 %660 }
 0x1ca   : > { %1569 = vmatpush3.msra.mxu1 %v786_v39  ;;  %v659_v13 = vpop.permute.xlu0 %658  ;;  %1136 = vmatprep.mubr.f32.mxu0 %v2724_v18  ;;  %v2735_v39 = vld [vmem:[#allocation30_spill] sm:$0xff]  ;;  %v2738_v18 = vld [vmem:[#allocation51_spill] sm:$0xff] }
 0x1cb   : > { %v675_v6 = vsel %vm674_vm15, %v659_v13, %v661_v3  ;;  %v785_v41 = vld [vmem:[#allocation2 + $0x310] sm:$0xff]  ;;  %1576 = vmatprep.mubr.msk.f32.mxu1 %vm827_vm1, %v2725_v55  ;;  %v2737_v13 = vld [vmem:[#allocation44_spill] sm:$0xff] }
 0x1cc   : > { %683 = vst.msk [vmem:[#allocation2 + $0x300] sm:$0xff] %vm95_vm0, %v675_v6  ;;  %1570 = vmatprep.subr.mxu1 %v785_v41  ;;  %v2736_v3 = vld [vmem:[#allocation37_spill] sm:$0xff]  ;;  %v2739_v6 = vld [vmem:[#allocation58_spill] sm:$0xff]  ;;  %vm1354_vm0 = vcmask 785408  }
 0x1cd   : > { %1137 = vmatmul.mubr.f32.gmra.mxu0 %v2726_v19  ;;  %1571 = vmatpush3.msra.mxu1 %v785_v41 }
 0x1ce   : > { %1141 = vmatprep.mubr.f32.mxu0 %v2727_v40 }
 0x1cf   : > { %v784_v34 = vld [vmem:[#allocation2 + $0x308] sm:$0xff] }
 0x1d0   : > { %1572 = vmatprep.subr.mxu1 %v784_v34 }
 0x1d1   : > { %1142 = vmatmul.mubr.f32.gmra.mxu0 %v2728_v48  ;;  %1573 = vmatpush3.msra.mxu1 %v784_v34 }
 0x1d2   : > { %1146 = vmatprep.mubr.f32.mxu0 %v2729_v33 }
 0x1d3   : > { %v783_v27 = vld [vmem:[#allocation2 + $0x300] sm:$0xff] }
 0x1d4   : > { %1574 = vmatprep.subr.mxu1 %v783_v27 }
 0x1d5   : > { %1147 = vmatmul.mubr.f32.gmra.mxu0 %v2730_v26  ;;  %1575 = vmatpush3.msra.mxu1 %v783_v27 }
 0x1d6   : > { %1577 = vmatmul.mubr.msk.f32.vlgmr.msra.gmra.mxu1 %vm827_vm1, %v2731_v1  ;;  %1151 = vmatprep.mubr.f32.mxu0 %v2732_v25 }
 0x1d7   : > { %1579 = vmatprep.mubr.msk.f32.mxu1 %vm827_vm1, %v2733_v20 }
 0x1d8   : > { %v790_v28 = vpop.permute.xlu0 %789 }
 0x1d9   : > { %1152 = vmatmul.mubr.f32.gmra.mxu0 %v2734_v32  ;;  %v795_v30 = vpop.permute.xlu1 %794 }
 0x1da   : > { %1580 = vmatmul.mubr.msk.f32.gmra.mxu1 %vm827_vm1, %v2735_v39 }
 0x1db   : > { %1582 = vmatprep.mubr.msk.f32.mxu1 %vm827_vm1, %v2736_v3 }
 0x1dc   : > { %v805_v44 = vpop.permute.xlu0 %804 }
 0x1dd   : > { %v800_v51 = vpop.permute.xlu1 %799 }
 0x1de   : > { %1583 = vmatmul.mubr.msk.f32.gmra.mxu1 %vm827_vm1, %v2737_v13 }
 0x1df   : > { %1585 = vmatprep.mubr.msk.f32.mxu1 %vm827_vm1, %v2738_v18 }
 0x1e0   : > { %v815_v56 = vpop.permute.xlu0 %814 }
 0x1e2   : > { %1586 = vmatmul.mubr.msk.f32.gmra.mxu1 %vm827_vm1, %v2739_v6 }
 0x1f9   : > { %v1420_v41 = vpop.f32.mrf.mxu0 }
 0x1fb   : > { %v1421_v19 = vpop.f32.mrf.mxu0 }
 0x1fc   : > { %v1422_v36 = vadd.f32 %v1421_v19, %v1420_v41 }
 0x1fd   : > { %v1423_v34 = vpop.f32.mrf.mxu0 }
 0x1fe   : > { %v919_v50 = vadd.f32 %v1422_v36, %v790_v28 }
 0x1ff   : > { %v1424_v33 = vpop.f32.mrf.mxu0 }
 0x200   : > { %v1425_v29 = vadd.f32 %v1424_v33, %v1423_v34 }
 0x201   : > { %v1426_v26 = vpop.f32.mrf.mxu0 }
 0x202   : > { %v924_v42 = vadd.f32 %v1425_v29, %v795_v30 }
 0x203   : > { %v1427_v25 = vpop.f32.mrf.mxu0 }
 0x204   : > { %v1428_v46 = vadd.f32 %v1427_v25, %v1426_v26 }
 0x205   : > { %v1429_v32 = vpop.f32.mrf.mxu0 }
 0x206   : > { %v929_v41 = vadd.f32 %v1428_v46, %v800_v51 }
 0x207   : > { %v1430_v3 = vpop.f32.mrf.mxu0 }
 0x208   : > { %v1431_v43 = vadd.f32 %v1430_v3, %v1429_v32  ;;  %v810_v32 = vpop.permute.xlu1 %809 }
 0x209   : > { %v1432_v18 = vpop.f32.mrf.mxu0 }
 0x20a   : > { %v934_v33 = vadd.f32 %v1431_v43, %v805_v44 }
 0x20b   : > { %v1433_v6 = vpop.f32.mrf.mxu0 }
 0x20c   : > { %v1434_v19 = vadd.f32 %v1433_v6, %v1432_v18 }
 0x20d   : > { %v1435_v4 = vpop.f32.mrf.mxu0 }
 0x20f   : > { %v1436_v7 = vpop.f32.mrf.mxu0 }
 0x211   : > { %v1438_v9 = vpop.f32.mrf.mxu0 }
 0x213   : > { %v1439_v11 = vpop.f32.mrf.mxu0 }
 0x214   : > { %v1440_v51 = vadd.f32 %v1439_v11, %v1438_v9 }
 0x215   : > { %v1476_v55 = vpop.f32.mrf.mxu1  ;;  %v1441_v14 = vpop.f32.mrf.mxu0 }
 0x217   : > { %v1477_v40 = vpop.f32.mrf.mxu1  ;;  %v1442_v16 = vpop.f32.mrf.mxu0 }
 0x218   : > { %v1478_v49 = vadd.f32 %v1477_v40, %v1476_v55  ;;  %v1443_v28 = vadd.f32 %v1442_v16, %v1441_v14 }
 0x21a   : > { %v1479_v48 = vpop.f32.mrf.mxu1  ;;  %v1024_v30 = vadd.f32 %v1478_v49, %v919_v50  ;;  %v820_v50 = vpop.permute.xlu1 %819 }
 0x21b   : > { %v949_v11 = vadd.f32 %v1440_v51, %v820_v50 }
 0x21c   : > { %v1480_v27 = vpop.f32.mrf.mxu1 }
 0x21d   : > { %v1481_v38 = vadd.f32 %v1480_v27, %v1479_v48  ;;  %v1437_v48 = vadd.f32 %v1436_v7, %v1435_v4 }
 0x21e   : > { %v1482_v1 = vpop.f32.mrf.mxu1 }
 0x21f   : > { %v1029_v54 = vadd.f32 %v1481_v38, %v924_v42  ;;  %v944_v46 = vadd.f32 %v1437_v48, %v815_v56 }
 0x220   : > { %v1483_v20 = vpop.f32.mrf.mxu1 }
 0x221   : > { %v1484_v27 = vadd.f32 %v1483_v20, %v1482_v1 }
 0x222   : > { %v1485_v39 = vpop.f32.mrf.mxu1 }
 0x223   : > { %v1034_v7 = vadd.f32 %v1484_v27, %v929_v41 }
 0x224   : > { %v1486_v13 = vpop.f32.mrf.mxu1 }
 0x225   : > { %v1487_v34 = vadd.f32 %v1486_v13, %v1485_v39 }
 0x226   : > { %v2565_v0 = vpop.f32.mrf.mxu1 }
 0x228   : > { %v2567_v2 = vpop.f32.mrf.mxu1 }
 0x229   : > { %v1490_v49 = vadd.f32 %v2567_v2, %v2565_v0 }
 0x22a   : > { %v1491_v5 = vpop.f32.mrf.mxu1 }
 0x22c   : > { %v1492_v8 = vpop.f32.mrf.mxu1 }
 0x22e   : > { %v2569_v10 = vpop.f32.mrf.mxu1 }
 0x230   : > { %v2571_v12 = vpop.f32.mrf.mxu1 }
 0x232   : > { %v2573_v15 = vpop.f32.mrf.mxu1 }
 0x234   : > { %v1498_v17 = vpop.f32.mrf.mxu1 }
 0x285   : > { %v1532_v21 = vpop.f32.mrf.mxu0  ;;  %v2575_v23 = vpop.f32.mrf.mxu1 }
 0x287   : > { %v1533_v22 = vpop.f32.mrf.mxu0  ;;  %v2577_v35 = vpop.f32.mrf.mxu1 }
 0x288   : > { %v1534_v57 = vadd.f32 %v1533_v22, %v1532_v21  ;;  %v939_v21 = vadd.f32 %v1434_v19, %v810_v32  ;;  %v1493_v22 = vadd.f32 %v1492_v8, %v1491_v5  ;;  %v1552_v39 = vadd.f32 %v2577_v35, %v2575_v23 }
 0x289   : > { %v1535_v24 = vpop.f32.mrf.mxu0  ;;  %v1553_v47 = vpop.f32.mrf.mxu1 }
 0x28a   : > { %v1129_v44 = vadd.f32 %v1534_v57, %v1024_v30  ;;  %v1049_v9 = vadd.f32 %v1493_v22, %v944_v46  ;;  %v1044_v2 = vadd.f32 %v1490_v49, %v939_v21 }
 0x28b   : > { %v1536_v31 = vpop.f32.mrf.mxu0  ;;  %v1554_v29 = vpop.f32.mrf.mxu1 }
 0x28c   : > { %v1537_v52 = vadd.f32 %v1536_v31, %v1535_v24  ;;  %v1039_v24 = vadd.f32 %v1487_v34, %v934_v33  ;;  %v825_v31 = vpop.permute.xlu0 %824  ;;  %v1555_v40 = vadd.f32 %v1554_v29, %v1553_v47 }
 0x28d   : > { %v1538_v37 = vpop.f32.mrf.mxu0  ;;  %v954_v16 = vadd.f32 %v1443_v28, %v825_v31 }
 0x28e   : > { %v1134_v55 = vadd.f32 %v1537_v52, %v1029_v54 }
 0x28f   : > { %v1539_v45 = vpop.f32.mrf.mxu0 }
 0x290   : > { %v1540_v38 = vadd.f32 %v1539_v45, %v1538_v37  ;;  %v1499_v45 = vadd.f32 %v1498_v17, %v2573_v15 }
 0x291   : > { %v1541_v53 = vpop.f32.mrf.mxu0 }
 0x292   : > { %v1139_v8 = vadd.f32 %v1540_v38, %v1034_v7  ;;  %v1059_v17 = vadd.f32 %v1499_v45, %v954_v16 }
 0x293   : > { %v1542_v58 = vpop.f32.mrf.mxu0 }
 0x294   : > { %v1543_v26 = vadd.f32 %v1542_v58, %v1541_v53  ;;  %v1496_v58 = vadd.f32 %v2571_v12, %v2569_v10  ;;  %v1164_v33 = vadd.f32 %v1555_v40, %v1059_v17 }
 0x295   : > { %v1544_v25 = vpop.f32.mrf.mxu0 }
 0x296   : > { %v1578_v36 = vpop.f32.mrf.mxu1  ;;  %v1144_v14 = vadd.f32 %v1543_v26, %v1039_v24  ;;  %v1054_v6 = vadd.f32 %v1496_v58, %v949_v11 }
 0x297   : > { %v1239_v42 = vadd.f32 %v1578_v36, %v1134_v55  ;;  %v1545_v43 = vpop.f32.mrf.mxu0 }
 0x298   : > { %v1233_v4 = vpop.f32.mrf.mxu1  ;;  %v1546_v54 = vadd.f32 %v1545_v43, %v1544_v25  ;;  %v1159_v12 = vadd.f32 %v1552_v39, %v1054_v6 }
 0x299   : > { %v1234_v53 = vadd.f32 %v1233_v4, %v1129_v44  ;;  %v1547_v52 = vpop.f32.mrf.mxu0  ;;  %1282 = vrot.lane.b32.xlu0 %v1239_v42, %s1672_s17 }
 0x29a   : > { %v1581_v37 = vpop.f32.mrf.mxu1  ;;  %v1149_v3 = vadd.f32 %v1546_v54, %v1044_v2 }
 0x29b   : > { %v1249_v57 = vadd.f32 %v1581_v37, %v1144_v14  ;;  %v1548_v5 = vpop.f32.mrf.mxu0  ;;  %1280 = vrot.lane.b32.xlu1 %v1234_v53, %s1672_s17 }
 0x29c   : > { %v1549_v56 = vadd.f32 %v1548_v5, %v1547_v52  ;;  %v1243_v0 = vpop.f32.mrf.mxu1 }
 0x29d   : > { %v1244_v1 = vadd.f32 %v1243_v0, %v1139_v8  ;;  %1286 = vrot.lane.b32.xlu0 %v1249_v57, %s1672_s17 }
 0x29e   : > { %v1154_v20 = vadd.f32 %v1549_v56, %v1049_v9  ;;  %v1584_v15 = vpop.f32.mrf.mxu1 }
 0x29f   : > { %1284 = vrot.lane.b32.xlu1 %v1244_v1, %s1672_s17 }
 0x2a0   : > { %v1259_v13 = vadd.f32 %v1584_v15, %v1154_v20  ;;  %v1253_v18 = vpop.f32.mrf.mxu1 }
 0x2a1   : > { %v1254_v34 = vadd.f32 %v1253_v18, %v1149_v3 }
 0x2a2   : > { %v1587_v41 = vpop.f32.mrf.mxu1  ;;  %1290 = vrot.lane.b32.xlu0 %v1259_v13, %s1672_s17 }
 0x2a3   : > { %v1269_v10 = vadd.f32 %v1587_v41, %v1164_v33  ;;  %1288 = vrot.lane.b32.xlu1 %v1254_v34, %s1672_s17 }
 0x2a4   : > { %v1263_v47 = vpop.f32.mrf.mxu1 }
 0x2a5   : > { %v1264_v19 = vadd.f32 %v1263_v47, %v1159_v12 }
 0x2a6   : > { %1294 = vrot.lane.b32.xlu0 %v1269_v10, %s1672_s17 }
 0x2a7   : > { %1292 = vrot.lane.b32.xlu1 %v1264_v19, %s1672_s17 }
 0x30b   : > { %v1283_v23 = vpop.permute.xlu0 %1282 }
 0x30c   : > { %v1305_v35 = vmax.f32 %v1239_v42, %v1283_v23 }
 0x30d   : > { %v1281_v48 = vpop.permute.xlu1 %1280 }
 0x30e   : > { %v1304_v29 = vmax.f32 %v1234_v53, %v1281_v48  ;;  %1322 = vrot.lane.b32.xlu0 %v1305_v35, %s1671_s16 }
 0x30f   : > { %v1287_v30 = vpop.permute.xlu0 %1286 }
 0x310   : > { %v1307_v27 = vmax.f32 %v1249_v57, %v1287_v30  ;;  %1320 = vrot.lane.b32.xlu1 %v1304_v29, %s1671_s16 }
 0x311   : > { %v1285_v32 = vpop.permute.xlu1 %1284 }
 0x312   : > { %v1306_v26 = vmax.f32 %v1244_v1, %v1285_v32  ;;  %1326 = vrot.lane.b32.xlu0 %v1307_v27, %s1671_s16 }
 0x314   : > { %v1291_v25 = vpop.permute.xlu0 %1290  ;;  %1324 = vrot.lane.b32.xlu1 %v1306_v26, %s1671_s16 }
 0x315   : > { %v1309_v55 = vmax.f32 %v1259_v13, %v1291_v25  ;;  %v1289_v28 = vpop.permute.xlu1 %1288 }
 0x316   : > { %v1308_v36 = vmax.f32 %v1254_v34, %v1289_v28 }
 0x317   : > { %1330 = vrot.lane.b32.xlu0 %v1309_v55, %s1671_s16 }
 0x318   : > { %v1295_v24 = vpop.permute.xlu0 %1294  ;;  %1328 = vrot.lane.b32.xlu1 %v1308_v36, %s1671_s16 }
 0x319   : > { %v1311_v31 = vmax.f32 %v1269_v10, %v1295_v24  ;;  %v1293_v38 = vpop.permute.xlu1 %1292 }
 0x31a   : > { %v1310_v42 = vmax.f32 %v1264_v19, %v1293_v38 }
 0x31b   : > { %1334 = vrot.lane.b32.xlu0 %v1311_v31, %s1671_s16 }
 0x31c   : > { %1332 = vrot.lane.b32.xlu1 %v1310_v42, %s1671_s16 }
 0x380   : > { %v1323_v43 = vpop.permute.xlu0 %1322 }
 0x381   : > { %v1345_v44 = vmax.f32 %v1305_v35, %v1323_v43 }
 0x382   : > { %v1321_v21 = vpop.permute.xlu1 %1320 }
 0x383   : > { %1356 = vst.msk [vmem:[%s1353_s2 + $0x8] sm:$0xff] %vm1354_vm0, %v1345_v44  ;;  %v1344_v22 = vmax.f32 %v1304_v29, %v1321_v21 }
 0x384   : > { %v1327_v46 = vpop.permute.xlu0 %1326 }
 0x385   : > { %1355 = vst.msk [vmem:[%s1353_s2] sm:$0xff] %vm1354_vm0, %v1344_v22  ;;  %v1347_v51 = vmax.f32 %v1307_v27, %v1327_v46 }
 0x386   : > { %v1325_v4 = vpop.permute.xlu1 %1324 }
 0x387   : > { %1358 = vst.msk [vmem:[%s1353_s2 + $0x18] sm:$0xff] %vm1354_vm0, %v1347_v51  ;;  %v1346_v7 = vmax.f32 %v1306_v26, %v1325_v4 }
 0x389   : > { %1357 = vst.msk [vmem:[%s1353_s2 + $0x10] sm:$0xff] %vm1354_vm0, %v1346_v7  ;;  %v1331_v49 = vpop.permute.xlu0 %1330 }
 0x38a   : > { %v1349_v50 = vmax.f32 %v1309_v55, %v1331_v49  ;;  %v1329_v53 = vpop.permute.xlu1 %1328 }
 0x38b   : > { %v1348_v52 = vmax.f32 %v1308_v36, %v1329_v53 }
 0x38c   : > { %1360 = vst.msk [vmem:[%s1353_s2 + $0x28] sm:$0xff] %vm1354_vm0, %v1349_v50 }
 0x38d   : > { %1359 = vst.msk [vmem:[%s1353_s2 + $0x20] sm:$0xff] %vm1354_vm0, %v1348_v52  ;;  %v1335_v14 = vpop.permute.xlu0 %1334  ;;  %82 = sbr.rel (!%p80_p0) target bundleno = 32 (0x20), region = 41 }
 0x38e   : > { %v1351_v16 = vmax.f32 %v1311_v31, %v1335_v14  ;;  %v1333_v37 = vpop.permute.xlu1 %1332 }
 0x38f   : > { %v1350_v45 = vmax.f32 %v1310_v42, %v1333_v37 }
 0x390   : > { %1362 = vst.msk [vmem:[%s1353_s2 + $0x38] sm:$0xff] %vm1354_vm0, %v1351_v16 }
 0x391   : > { %1361 = vst.msk [vmem:[%s1353_s2 + $0x30] sm:$0xff] %vm1354_vm0, %v1350_v45 }

// kernel: tudui_forward.7
= control target key start
LH: loop header
LB: loop body
LE: loop exit
PB: predicated region body
PF: predicated region fallthrough
CT: control target
= control target key end

     0   :  { %v786_v30 = vmov 1983009808   ;;  %v164_v32 = vlaneseq  ;;  %s1249_s0 = inlined_call_operand.vmem [shape: f32[2,1024], index: 0, kind: input, shape index: {}]   ;;  %s1250_s1 = inlined_call_operand.vmem [shape: f32[1024,64], index: 1, kind: input, shape index: {}]   ;;  %s1251_s2 = inlined_call_operand.vmem [shape: f32[1,64], index: 2, kind: input, shape index: {}]   ;;  %s1252_s3 = inlined_call_operand.vmem [shape: f32[64,10], index: 3, kind: input, shape index: {}]   ;;  %s1253_s4 = inlined_call_operand.vmem [shape: f32[1,10], index: 4, kind: input, shape index: {}]   ;;  %s1254_s5 = inlined_call_operand.hbm [shape: f32[2,10], index: 5, kind: output, shape index: {}]  }
   0x1   :  { %v54_v0 = vld [vmem:[%s1250_s1 + $0xf8] sm:$0xff]  ;;  %v53_v4 = vld [vmem:[%s1250_s1 + $0xf0] sm:$0xff]  ;;  %v52_v8 = vld [vmem:[%s1250_s1 + $0xe8] sm:$0xff]  ;;  %v162_v31 = vunpack.c.l.s4 %v786_v30 }
   0x2   :  { %v86_v1 = vld [vmem:[%s1250_s1 + $0x1f8] sm:$0xff]  ;;  %590 = vmatprep.subr.mxu0 %v54_v0  ;;  %v85_v5 = vld [vmem:[%s1250_s1 + $0x1f0] sm:$0xff]  ;;  %v84_v9 = vld [vmem:[%s1250_s1 + $0x1e8] sm:$0xff]  ;;  %v165_v42 = vshrl.u32 %v164_v32, 7 }
   0x3   :  { %v38_v2 = vld [vmem:[%s1250_s1 + $0x78] sm:$0xff]  ;;  %625 = vmatprep.subr.mxu1 %v86_v1  ;;  %v37_v6 = vld [vmem:[%s1250_s1 + $0x70] sm:$0xff]  ;;  %v36_v10 = vld [vmem:[%s1250_s1 + $0x68] sm:$0xff]  ;;  %v163_v41 = vunpack.c.0.s8 %v162_v31 }
   0x4   :  { %v70_v3 = vld [vmem:[%s1250_s1 + $0x178] sm:$0xff]  ;;  %591 = vmatpush3.msra.mxu0 %v38_v2  ;;  %v69_v7 = vld [vmem:[%s1250_s1 + $0x170] sm:$0xff]  ;;  %v68_v11 = vld [vmem:[%s1250_s1 + $0x168] sm:$0xff] }
   0x5   :  { %626 = vmatpush3.msra.mxu1 %v70_v3  ;;  %592 = vmatprep.subr.mxu0 %v53_v4  ;;  %v51_v12 = vld [vmem:[%s1250_s1 + $0xe0] sm:$0xff]  ;;  %v50_v16 = vld [vmem:[%s1250_s1 + $0xd8] sm:$0xff]  ;;  %v49_v20 = vld [vmem:[%s1250_s1 + $0xd0] sm:$0xff]  ;;  %v958_v51 = vsub.s32 %v163_v41, %v165_v42 }
   0x6   :  { %627 = vmatprep.subr.mxu1 %v85_v5  ;;  %593 = vmatpush3.msra.mxu0 %v37_v6  ;;  %v83_v13 = vld [vmem:[%s1250_s1 + $0x1e0] sm:$0xff]  ;;  %v82_v17 = vld [vmem:[%s1250_s1 + $0x1d8] sm:$0xff]  ;;  %v81_v21 = vld [vmem:[%s1250_s1 + $0x1d0] sm:$0xff] }
   0x7   :  { %628 = vmatpush3.msra.mxu1 %v69_v7  ;;  %594 = vmatprep.subr.mxu0 %v52_v8  ;;  %v35_v14 = vld [vmem:[%s1250_s1 + $0x60] sm:$0xff]  ;;  %v34_v18 = vld [vmem:[%s1250_s1 + $0x58] sm:$0xff]  ;;  %v33_v22 = vld [vmem:[%s1250_s1 + $0x50] sm:$0xff] }
   0x8   :  { %629 = vmatprep.subr.mxu1 %v84_v9  ;;  %v67_v15 = vld [vmem:[%s1250_s1 + $0x160] sm:$0xff]  ;;  %595 = vmatpush3.msra.mxu0 %v36_v10  ;;  %v66_v19 = vld [vmem:[%s1250_s1 + $0x158] sm:$0xff]  ;;  %v65_v23 = vld [vmem:[%s1250_s1 + $0x150] sm:$0xff] }
   0x9   :  { %630 = vmatpush3.msra.mxu1 %v68_v11  ;;  %596 = vmatprep.subr.mxu0 %v51_v12  ;;  %v48_v24 = vld [vmem:[%s1250_s1 + $0xc8] sm:$0xff]  ;;  %v47_v28 = vld [vmem:[%s1250_s1 + $0xc0] sm:$0xff]  ;;  %v46_v35 = vld [vmem:[%s1250_s1 + $0xb8] sm:$0xff] }
   0xa   :  { %631 = vmatprep.subr.mxu1 %v83_v13  ;;  %597 = vmatpush3.msra.mxu0 %v35_v14  ;;  %v80_v25 = vld [vmem:[%s1250_s1 + $0x1c8] sm:$0xff]  ;;  %v79_v29 = vld [vmem:[%s1250_s1 + $0x1c0] sm:$0xff]  ;;  %v78_v36 = vld [vmem:[%s1250_s1 + $0x1b8] sm:$0xff] }
   0xb   :  { %632 = vmatpush3.msra.mxu1 %v67_v15  ;;  %598 = vmatprep.subr.mxu0 %v50_v16  ;;  %v32_v26 = vld [vmem:[%s1250_s1 + $0x48] sm:$0xff]  ;;  %v31_v33 = vld [vmem:[%s1250_s1 + $0x40] sm:$0xff]  ;;  %v30_v37 = vld [vmem:[%s1250_s1 + $0x38] sm:$0xff] }
   0xc   :  { %633 = vmatprep.subr.mxu1 %v82_v17  ;;  %599 = vmatpush3.msra.mxu0 %v34_v18  ;;  %v64_v27 = vld [vmem:[%s1250_s1 + $0x148] sm:$0xff]  ;;  %v63_v34 = vld [vmem:[%s1250_s1 + $0x140] sm:$0xff]  ;;  %v62_v38 = vld [vmem:[%s1250_s1 + $0x138] sm:$0xff] }
   0xd   :  { %634 = vmatpush3.msra.mxu1 %v66_v19  ;;  %600 = vmatprep.subr.mxu0 %v49_v20  ;;  %v45_v39 = vld [vmem:[%s1250_s1 + $0xb0] sm:$0xff]  ;;  %v44_v45 = vld [vmem:[%s1250_s1 + $0xa8] sm:$0xff]  ;;  %v43_v49 = vld [vmem:[%s1250_s1 + $0xa0] sm:$0xff] }
   0xe   :  { %635 = vmatprep.subr.mxu1 %v81_v21  ;;  %601 = vmatpush3.msra.mxu0 %v33_v22  ;;  %v77_v40 = vld [vmem:[%s1250_s1 + $0x1b0] sm:$0xff]  ;;  %v76_v46 = vld [vmem:[%s1250_s1 + $0x1a8] sm:$0xff]  ;;  %v75_v50 = vld [vmem:[%s1250_s1 + $0x1a0] sm:$0xff] }
   0xf   :  { %636 = vmatpush3.msra.mxu1 %v65_v23  ;;  %602 = vmatprep.subr.mxu0 %v48_v24  ;;  %v29_v43 = vld [vmem:[%s1250_s1 + $0x30] sm:$0xff]  ;;  %v28_v47 = vld [vmem:[%s1250_s1 + $0x28] sm:$0xff]  ;;  %v27_v52 = vld [vmem:[%s1250_s1 + $0x20] sm:$0xff] }
  0x10   :  { %637 = vmatprep.subr.mxu1 %v80_v25  ;;  %603 = vmatpush3.msra.mxu0 %v32_v26  ;;  %v61_v44 = vld [vmem:[%s1250_s1 + $0x130] sm:$0xff]  ;;  %v60_v48 = vld [vmem:[%s1250_s1 + $0x128] sm:$0xff]  ;;  %v59_v53 = vld [vmem:[%s1250_s1 + $0x120] sm:$0xff] }
  0x11   :  { %638 = vmatpush3.msra.mxu1 %v64_v27  ;;  %604 = vmatprep.subr.mxu0 %v47_v28  ;;  %v21_v54 = vld [vmem:[%s1249_s0] sm:$0xff]  ;;  %v42_v55 = vld [vmem:[%s1250_s1 + $0x98] sm:$0xff]  ;;  %v41_v60 = vld [vmem:[%s1250_s1 + $0x90] sm:$0xff] }
  0x12   :  { %639 = vmatprep.subr.mxu1 %v79_v29  ;;  %605 = vmatpush3.msra.mxu0 %v31_v33  ;;  %v74_v56 = vld [vmem:[%s1250_s1 + $0x198] sm:$0xff]  ;;  %v160_v57 = vcombine.high %v21_v54, %v21_v54  ;;  %v73_v61 = vld [vmem:[%s1250_s1 + $0x190] sm:$0xff]  ;;  %v167_v62 = vrot.slane %v21_v54, %v958_v51  ;;  %v40_v1 = vld [vmem:[%s1250_s1 + $0x88] sm:$0xff] }
  0x13   :  { %640 = vmatpush3.msra.mxu1 %v63_v34  ;;  %606 = vmatprep.subr.mxu0 %v46_v35  ;;  %v26_v58 = vld [vmem:[%s1250_s1 + $0x18] sm:$0xff]  ;;  %v25_v63 = vld [vmem:[%s1250_s1 + $0x10] sm:$0xff]  ;;  %v72_v2 = vld [vmem:[%s1250_s1 + $0x188] sm:$0xff] }
  0x14   :  { %641 = vmatprep.subr.mxu1 %v78_v36  ;;  %607 = vmatpush3.msra.mxu0 %v30_v37  ;;  %v58_v59 = vld [vmem:[%s1250_s1 + $0x118] sm:$0xff]  ;;  %v57_v0 = vld [vmem:[%s1250_s1 + $0x110] sm:$0xff]  ;;  %v174_v3 = vrot.slane %v160_v57, %v958_v51  ;;  %v24_v4 = vld [vmem:[%s1250_s1 + $0x8] sm:$0xff]  ;;  %v175_v8 = vcombine.high %v167_v62, %v167_v62 }
  0x15   :  { %642 = vmatpush3.msra.mxu1 %v62_v38  ;;  %608 = vmatprep.subr.mxu0 %v45_v39  ;;  %v56_v5 = vld [vmem:[%s1250_s1 + $0x108] sm:$0xff]  ;;  %v39_v6 = vld [vmem:[%s1250_s1 + $0x80] sm:$0xff]  ;;  %v118_v12 = vld [vmem:[%s1250_s1 + $0x2f8] sm:$0xff] }
  0x16   :  { %643 = vmatprep.subr.mxu1 %v77_v40  ;;  %609 = vmatpush3.msra.mxu0 %v29_v43  ;;  %v71_v7 = vld [vmem:[%s1250_s1 + $0x180] sm:$0xff]  ;;  %v176_v11 = vcombine.high %v174_v3, %v174_v3  ;;  %v150_v13 = vld [vmem:[%s1250_s1 + $0x3f8] sm:$0xff]  ;;  %v117_v16 = vld [vmem:[%s1250_s1 + $0x2f0] sm:$0xff] }
  0x17   :  { %644 = vmatpush3.msra.mxu1 %v61_v44  ;;  %610 = vmatprep.subr.mxu0 %v44_v45  ;;  %v23_v9 = vld [vmem:[%s1250_s1] sm:$0xff]  ;;  %v102_v14 = vld [vmem:[%s1250_s1 + $0x278] sm:$0xff]  ;;  %v149_v17 = vld [vmem:[%s1250_s1 + $0x3f0] sm:$0xff] }
  0x18   :  { %645 = vmatprep.subr.mxu1 %v76_v46  ;;  %611 = vmatpush3.msra.mxu0 %v28_v47  ;;  %v55_v10 = vld [vmem:[%s1250_s1 + $0x100] sm:$0xff]  ;;  %v134_v15 = vld [vmem:[%s1250_s1 + $0x378] sm:$0xff]  ;;  %v101_v18 = vld [vmem:[%s1250_s1 + $0x270] sm:$0xff] }
  0x19   :  { %646 = vmatpush3.msra.mxu1 %v60_v48  ;;  %612 = vmatprep.subr.mxu0 %v43_v49  ;;  %v133_v19 = vld [vmem:[%s1250_s1 + $0x370] sm:$0xff]  ;;  %v116_v20 = vld [vmem:[%s1250_s1 + $0x2e8] sm:$0xff]  ;;  %v115_v24 = vld [vmem:[%s1250_s1 + $0x2e0] sm:$0xff] }
  0x1a   :  { %647 = vmatprep.subr.mxu1 %v75_v50  ;;  %613 = vmatpush3.msra.mxu0 %v27_v52  ;;  %v148_v21 = vld [vmem:[%s1250_s1 + $0x3e8] sm:$0xff]  ;;  %v147_v25 = vld [vmem:[%s1250_s1 + $0x3e0] sm:$0xff]  ;;  %v114_v28 = vld [vmem:[%s1250_s1 + $0x2d8] sm:$0xff] }
  0x1b   :  { %648 = vmatpush3.msra.mxu1 %v59_v53  ;;  %614 = vmatprep.subr.mxu0 %v42_v55  ;;  %v100_v22 = vld [vmem:[%s1250_s1 + $0x268] sm:$0xff]  ;;  %v99_v26 = vld [vmem:[%s1250_s1 + $0x260] sm:$0xff]  ;;  %v146_v29 = vld [vmem:[%s1250_s1 + $0x3d8] sm:$0xff] }
  0x1c   :  { %649 = vmatprep.subr.mxu1 %v74_v56  ;;  %615 = vmatpush3.msra.mxu0 %v26_v58  ;;  %v132_v23 = vld [vmem:[%s1250_s1 + $0x368] sm:$0xff]  ;;  %v131_v27 = vld [vmem:[%s1250_s1 + $0x360] sm:$0xff]  ;;  %v98_v30 = vld [vmem:[%s1250_s1 + $0x258] sm:$0xff] }
  0x1d   :  { %650 = vmatpush3.msra.mxu1 %v58_v59  ;;  %616 = vmatprep.subr.mxu0 %v41_v60  ;;  %v130_v31 = vld [vmem:[%s1250_s1 + $0x358] sm:$0xff]  ;;  %v113_v32 = vld [vmem:[%s1250_s1 + $0x2d0] sm:$0xff] }
  0x1e   :  { %651 = vmatprep.subr.mxu1 %v73_v61  ;;  %617 = vmatpush3.msra.mxu0 %v25_v63  ;;  %v145_v33 = vld [vmem:[%s1250_s1 + $0x3d0] sm:$0xff] }
  0x1f   :  { %652 = vmatpush3.msra.mxu1 %v57_v0  ;;  %618 = vmatprep.subr.mxu0 %v40_v1  ;;  %v97_v34 = vld [vmem:[%s1250_s1 + $0x250] sm:$0xff] }
  0x20   :  { %653 = vmatprep.subr.mxu1 %v72_v2  ;;  %619 = vmatpush3.msra.mxu0 %v24_v4  ;;  %v129_v35 = vld [vmem:[%s1250_s1 + $0x350] sm:$0xff] }
  0x21   :  { %654 = vmatpush3.msra.mxu1 %v56_v5  ;;  %620 = vmatprep.subr.mxu0 %v39_v6 }
  0x22   :  { %655 = vmatprep.subr.mxu1 %v71_v7  ;;  %621 = vmatpush3.msra.mxu0 %v23_v9 }
  0x23   :  { %266 = vmatprep.mubr.f32.mxu0 %v175_v8  ;;  %656 = vmatpush3.msra.mxu1 %v55_v10 }
  0x24   :  { %267 = vmatmul.mubr.f32.vlgmr.msra.gmra.mxu0 %v167_v62  ;;  %336 = vmatprep.mubr.f32.mxu1 %v176_v11 }
  0x25   :  { %660 = vmatprep.subr.mxu0 %v118_v12  ;;  %695 = vmatprep.subr.mxu1 %v150_v13 }
  0x26   :  { %337 = vmatmul.mubr.f32.vlgmr.msra.gmra.mxu1 %v174_v3  ;;  %661 = vmatpush3.msra.mxu0 %v102_v14 }
  0x27   :  { %696 = vmatpush3.msra.mxu1 %v134_v15  ;;  %662 = vmatprep.subr.mxu0 %v117_v16 }
  0x28   :  { %697 = vmatprep.subr.mxu1 %v149_v17  ;;  %663 = vmatpush3.msra.mxu0 %v101_v18 }
  0x29   :  { %698 = vmatpush3.msra.mxu1 %v133_v19  ;;  %664 = vmatprep.subr.mxu0 %v116_v20 }
  0x2a   :  { %699 = vmatprep.subr.mxu1 %v148_v21  ;;  %665 = vmatpush3.msra.mxu0 %v100_v22 }
  0x2b   :  { %700 = vmatpush3.msra.mxu1 %v132_v23  ;;  %666 = vmatprep.subr.mxu0 %v115_v24 }
  0x2c   :  { %701 = vmatprep.subr.mxu1 %v147_v25  ;;  %667 = vmatpush3.msra.mxu0 %v99_v26 }
  0x2d   :  { %702 = vmatpush3.msra.mxu1 %v131_v27  ;;  %668 = vmatprep.subr.mxu0 %v114_v28 }
  0x2e   :  { %703 = vmatprep.subr.mxu1 %v146_v29 }
  0x2f   :  { %10 = vsyncpa [#allocation3], 0  ;;  %669 = vmatpush3.msra.mxu0 %v98_v30  ;;  %704 = vmatpush3.msra.mxu1 %v130_v31  ;;  %v112_v36 = vld [vmem:[%s1250_s1 + $0x2c8] sm:$0xff]  ;;  %v111_v40 = vld [vmem:[%s1250_s1 + $0x2c0] sm:$0xff]  ;;  %v787_v19 = vmov 0.0   ;;  %vm788_vm0 = vmmov 0  }
  0x30   :  { %v144_v37 = vld [vmem:[%s1250_s1 + $0x3c8] sm:$0xff]  ;;  %670 = vmatprep.subr.mxu0 %v113_v32  ;;  %705 = vmatprep.subr.mxu1 %v145_v33  ;;  %v143_v41 = vld [vmem:[%s1250_s1 + $0x3c0] sm:$0xff]  ;;  %v110_v44 = vld [vmem:[%s1250_s1 + $0x2b8] sm:$0xff]  ;;  %vm497_vm1 = vcmask 523264   ;;  %s789_s18 = smov [#allocation2]   ;;  %vm571_vm2 = vcmask 74752  }
  0x31   :  { %v96_v38 = vld [vmem:[%s1250_s1 + $0x248] sm:$0xff]  ;;  %671 = vmatpush3.msra.mxu0 %v97_v34  ;;  %706 = vmatpush3.msra.mxu1 %v129_v35  ;;  %v95_v42 = vld [vmem:[%s1250_s1 + $0x240] sm:$0xff]  ;;  %v142_v45 = vld [vmem:[%s1250_s1 + $0x3b8] sm:$0xff] }
  0x32   :  { %v128_v39 = vld [vmem:[%s1250_s1 + $0x348] sm:$0xff]  ;;  %672 = vmatprep.subr.mxu0 %v112_v36  ;;  %707 = vmatprep.subr.mxu1 %v144_v37  ;;  %v127_v43 = vld [vmem:[%s1250_s1 + $0x340] sm:$0xff]  ;;  %v94_v46 = vld [vmem:[%s1250_s1 + $0x238] sm:$0xff] }
  0x33   :  { %673 = vmatpush3.msra.mxu0 %v96_v38  ;;  %708 = vmatpush3.msra.mxu1 %v128_v39  ;;  %v126_v47 = vld [vmem:[%s1250_s1 + $0x338] sm:$0xff]  ;;  %v109_v48 = vld [vmem:[%s1250_s1 + $0x2b0] sm:$0xff]  ;;  %v108_v53 = vld [vmem:[%s1250_s1 + $0x2a8] sm:$0xff] }
  0x34   :  { %674 = vmatprep.subr.mxu0 %v111_v40  ;;  %709 = vmatprep.subr.mxu1 %v143_v41  ;;  %v141_v49 = vld [vmem:[%s1250_s1 + $0x3b0] sm:$0xff]  ;;  %v140_v54 = vld [vmem:[%s1250_s1 + $0x3a8] sm:$0xff]  ;;  %v107_v58 = vld [vmem:[%s1250_s1 + $0x2a0] sm:$0xff] }
  0x35   :  { %675 = vmatpush3.msra.mxu0 %v95_v42  ;;  %710 = vmatpush3.msra.mxu1 %v127_v43  ;;  %v93_v50 = vld [vmem:[%s1250_s1 + $0x230] sm:$0xff]  ;;  %v22_v55 = vld [vmem:[%s1249_s0 + $0x8] sm:$0xff]  ;;  %v139_v59 = vld [vmem:[%s1250_s1 + $0x3a0] sm:$0xff] }
  0x36   :  { %676 = vmatprep.subr.mxu0 %v110_v44  ;;  %711 = vmatprep.subr.mxu1 %v142_v45  ;;  %v125_v52 = vld [vmem:[%s1250_s1 + $0x330] sm:$0xff]  ;;  %v92_v56 = vld [vmem:[%s1250_s1 + $0x228] sm:$0xff]  ;;  %v91_v60 = vld [vmem:[%s1250_s1 + $0x220] sm:$0xff]  ;;  %v177_v62 = vcombine.high %v22_v55, %v22_v55  ;;  %v184_v5 = vrot.slane %v22_v55, %v958_v51 }
  0x37   :  { %677 = vmatpush3.msra.mxu0 %v94_v46  ;;  %712 = vmatpush3.msra.mxu1 %v126_v47  ;;  %v124_v57 = vld [vmem:[%s1250_s1 + $0x328] sm:$0xff]  ;;  %v123_v61 = vld [vmem:[%s1250_s1 + $0x320] sm:$0xff]  ;;  %v106_v63 = vld [vmem:[%s1250_s1 + $0x298] sm:$0xff] }
  0x38   :  { %678 = vmatprep.subr.mxu0 %v109_v48  ;;  %713 = vmatprep.subr.mxu1 %v141_v49  ;;  %v138_v0 = vld [vmem:[%s1250_s1 + $0x398] sm:$0xff]  ;;  %v105_v3 = vld [vmem:[%s1250_s1 + $0x290] sm:$0xff]  ;;  %v191_v8 = vrot.slane %v177_v62, %v958_v51  ;;  %v104_v9 = vld [vmem:[%s1250_s1 + $0x288] sm:$0xff]  ;;  %v192_v14 = vcombine.high %v184_v5, %v184_v5 }
  0x39   :  { %679 = vmatpush3.msra.mxu0 %v93_v50  ;;  %714 = vmatpush3.msra.mxu1 %v125_v52  ;;  %v90_v1 = vld [vmem:[%s1250_s1 + $0x218] sm:$0xff]  ;;  %v137_v4 = vld [vmem:[%s1250_s1 + $0x390] sm:$0xff]  ;;  %v136_v10 = vld [vmem:[%s1250_s1 + $0x388] sm:$0xff] }
  0x3a   :  { %680 = vmatprep.subr.mxu0 %v108_v53  ;;  %715 = vmatprep.subr.mxu1 %v140_v54  ;;  %v122_v2 = vld [vmem:[%s1250_s1 + $0x318] sm:$0xff]  ;;  %v89_v6 = vld [vmem:[%s1250_s1 + $0x210] sm:$0xff]  ;;  %v88_v11 = vld [vmem:[%s1250_s1 + $0x208] sm:$0xff]  ;;  %v193_v16 = vcombine.high %v191_v8, %v191_v8 }
  0x3b   :  { %681 = vmatpush3.msra.mxu0 %v92_v56  ;;  %716 = vmatpush3.msra.mxu1 %v124_v57  ;;  %v121_v7 = vld [vmem:[%s1250_s1 + $0x310] sm:$0xff]  ;;  %v120_v51 = vld [vmem:[%s1250_s1 + $0x308] sm:$0xff]  ;;  %v103_v12 = vld [vmem:[%s1250_s1 + $0x280] sm:$0xff] }
  0x3c   :  { %682 = vmatprep.subr.mxu0 %v107_v58  ;;  %717 = vmatprep.subr.mxu1 %v139_v59  ;;  %v135_v13 = vld [vmem:[%s1250_s1 + $0x380] sm:$0xff]  ;;  %v489_v18 = vld [vmem:[%s1252_s3 + $0x38] sm:$0xff]  ;;  %v488_v20 = vld [vmem:[%s1252_s3 + $0x30] sm:$0xff] }
  0x3d   :  { %683 = vmatpush3.msra.mxu0 %v91_v60  ;;  %718 = vmatpush3.msra.mxu1 %v123_v61  ;;  %v87_v15 = vld [vmem:[%s1250_s1 + $0x200] sm:$0xff]  ;;  %v487_v21 = vld [vmem:[%s1252_s3 + $0x28] sm:$0xff]  ;;  %v485_v23 = vld [vmem:[%s1252_s3 + $0x18] sm:$0xff] }
  0x3e   :  { %684 = vmatprep.subr.mxu0 %v106_v63  ;;  %719 = vmatprep.subr.mxu1 %v138_v0  ;;  %v119_v17 = vld [vmem:[%s1250_s1 + $0x300] sm:$0xff]  ;;  %v484_v24 = vld [vmem:[%s1252_s3 + $0x10] sm:$0xff]  ;;  %v483_v25 = vld [vmem:[%s1252_s3 + $0x8] sm:$0xff] }
  0x3f   :  { %685 = vmatpush3.msra.mxu0 %v90_v1  ;;  %720 = vmatpush3.msra.mxu1 %v122_v2  ;;  %v486_v22 = vld [vmem:[%s1252_s3 + $0x20] sm:$0xff] }
  0x40   :  { %686 = vmatprep.subr.mxu0 %v105_v3  ;;  %721 = vmatprep.subr.mxu1 %v137_v4  ;;  %v482_v26 = vld [vmem:[%s1252_s3] sm:$0xff] }
  0x41   :  { %687 = vmatpush3.msra.mxu0 %v89_v6  ;;  %722 = vmatpush3.msra.mxu1 %v121_v7  ;;  %v587_v31 = vld [vmem:[%s1251_s2] ss:$0 sm:$0xff]  ;;  %s579_s2 = sshll.u32 %s789_s18, 4  ;;  %s580_s2 = int_to_ptr.vmem [resolvable:$true] %s579_s2 }
  0x42   :  { %688 = vmatprep.subr.mxu0 %v104_v9  ;;  %723 = vmatprep.subr.mxu1 %v136_v10  ;;  %v588_v44 = vld [vmem:[%s1253_s4] ss:$0 sm:$0xff]  ;;  %s764_s19 = scalar_lea.vmem %s580_s2, 32  ;;  %p769_p1 = scmp.lt.s32.totalorder %s580_s2, %s580_s2 }
  0x43   :  { %689 = vmatpush3.msra.mxu0 %v88_v11  ;;  %724 = vmatpush3.msra.mxu1 %v120_v51  ;;  %p765_p0 = scmp.ne.s32.totalorder %s580_s2, %s764_s19  ;;  %p770_p2 = scmp.lt.s32.totalorder %s764_s19, %s764_s19 }
  0x44   :  { %690 = vmatprep.subr.mxu0 %v103_v12  ;;  %725 = vmatprep.subr.mxu1 %v135_v13 }
  0x45   :  { %691 = vmatpush3.msra.mxu0 %v87_v15  ;;  %406 = vmatprep.mubr.f32.mxu0 %v192_v14  ;;  %p771_p3 = por %p770_p2, %p769_p1 }
  0x46   :  { %726 = vmatpush3.msra.mxu1 %v119_v17  ;;  %476 = vmatprep.mubr.f32.mxu1 %v193_v16 }
  0x47   :  { %407 = vmatmul.mubr.f32.vlgmr.msra.gmra.mxu0 %v184_v5  ;;  %477 = vmatmul.mubr.f32.vlgmr.msra.gmra.mxu1 %v191_v8  ;;  %p772_p4 = pnand %p771_p3, %p765_p0 }
  0x48   :  { %739 = vmatprep.subr.mxu0 %v787_v19  ;;  %755 = vmatprep.mubr.msk.f32.mxu0 %vm788_vm0, %v787_v19 }
  0x49   :  { %740 = vmatpush3.msra.mxu0 %v489_v18 }
  0x4a   :  { %741 = vmatprep.subr.mxu0 %v787_v19 }
  0x4b   :  { %742 = vmatpush3.msra.mxu0 %v488_v20 }
  0x4c   :  { %743 = vmatprep.subr.mxu0 %v787_v19 }
  0x4d   :  { %744 = vmatpush3.msra.mxu0 %v487_v21 }
  0x4e   :  { %745 = vmatprep.subr.mxu0 %v787_v19 }
  0x4f   :  { %746 = vmatpush3.msra.mxu0 %v486_v22 }
  0x50   :  { %747 = vmatprep.subr.mxu0 %v787_v19 }
  0x51   :  { %748 = vmatpush3.msra.mxu0 %v485_v23 }
  0x52   :  { %749 = vmatprep.subr.mxu0 %v787_v19 }
  0x53   :  { %750 = vmatpush3.msra.mxu0 %v484_v24 }
  0x54   :  { %751 = vmatprep.subr.mxu0 %v787_v19 }
  0x55   :  { %752 = vmatpush3.msra.mxu0 %v483_v25 }
  0x56   :  { %753 = vmatprep.subr.mxu0 %v787_v19 }
  0x57   :  { %754 = vmatpush3.msra.mxu0 %v482_v26 }
  0xe4   :  { %v622_v27 = vpop.f32.mrf.mxu0 }
  0xe6   :  { %v657_v28 = vpop.f32.mrf.mxu1  ;;  %v623_v29 = vpop.f32.mrf.mxu0 }
  0xe7   :  { %v624_v30 = vadd.f32 %v623_v29, %v622_v27 }
  0xe8   :  { %v658_v32 = vpop.f32.mrf.mxu1 }
  0xe9   :  { %v269_v33 = vadd.f32 %v624_v30, %v587_v31  ;;  %v659_v34 = vadd.f32 %v658_v32, %v657_v28 }
  0xeb   :  { %v339_v39 = vadd.f32 %v659_v34, %v269_v33 }
 0x107   :  { %v692_v35 = vpop.f32.mrf.mxu0  ;;  %v727_v36 = vpop.f32.mrf.mxu1 }
 0x109   :  { %v693_v37 = vpop.f32.mrf.mxu0  ;;  %v728_v38 = vpop.f32.mrf.mxu1 }
 0x10a   :  { %v694_v40 = vadd.f32 %v693_v37, %v692_v35  ;;  %v729_v42 = vadd.f32 %v728_v38, %v727_v36 }
 0x10c   :  { %v409_v41 = vadd.f32 %v694_v40, %v339_v39 }
 0x10e   :  { %v479_v43 = vadd.f32 %v729_v42, %v409_v41 }
 0x110   :  { %756 = vmatmul.mubr.msk.f32.vlgmr.msra.gmra.mxu0 %vm497_vm1, %v479_v43 }
 0x1d0   :  { %v567_v45 = vpop.f32.mrf.mxu0 }
 0x1d1   :  { %v568_v46 = vadd.f32 %v588_v44, %v567_v45 }
 0x1d2   :  { %v757_v47 = vpop.f32.mrf.mxu0 }
 0x1d3   :  { %572 = vst.msk [vmem:[#allocation2] sm:$0x3] %vm571_vm2, %v568_v46 }
 0x1d4   :  { %775 = shalt.err (!%p772_p4)
}
 0x1d5   :  { %582 = dma.vmem_to_hbm [thread:$0]  %s580_s2, 32, %s1254_s5, [#allocation3]  }
 0x1d6   :  { %784 = dma.done.wait [#allocation3], 32  }
 0x1d7   :  { %785 = vsyncadd [#allocation3], 4294967264 }
 0x1d8   :  { %586 = vsyncpa [#allocation3], 1 }

</bundles_post_ra>
